<compile_context>
chip_gen: v5e
topology: v5e:2x2
jax: 0.10.0
libtpu: 0.0.40
codegen_flags: <defaults>
</compile_context>

<pallas_src>
import functools
import math

import jax
import jax.numpy as jnp
from jax.experimental import pallas as pl
from jax.experimental.pallas import tpu as pltpu


# ------------------------------ tiling helpers ------------------------------ #

_LANE = 128          # lane width: channel / K / N padding quantum
_SUBLANE_BF16 = 16   # bf16 sublane packing: M alignment

_TM_TARGET = 128
_TN_TARGET = 256
_TK_TARGET = 512


def _round_up(x, m):
    return ((x + m - 1) // m) * m


def _tile(dim, target, align):
    """Return (padded_dim, tile): padded_dim % tile == 0, tile % align == 0,
    tile <= max(target, align), minimizing padded_dim (largest tile on ties)."""
    pad = _round_up(dim, align)
    if pad <= target:
        return pad, pad                      # single full-extent block
    best_pad, best_tile = None, None
    t = max(align, (target // align) * align)
    while t >= align:
        p = _round_up(dim, t)
        if best_pad is None or p < best_pad:
            best_pad, best_tile = p, t
        if p == pad:                         # no over-padding beyond alignment
            return p, t
        t -= align
    return best_pad, best_tile


# ------------------------------ Pallas kernel ------------------------------- #

def _gemm_bn_kernel(a_ref, b_ref, scale_ref, shift_ref, *rest, relu, has_res):
    """acc += A_tile @ B_tile over the K grid axis; on the last K step apply
    out = maybe_relu(acc * scale + shift [+ residual]) and store in bf16."""
    if has_res:
        res_ref, o_ref, acc_ref = rest
    else:
        o_ref, acc_ref = rest

    k = pl.program_id(2)

    @pl.when(k == 0)
    def _():
        acc_ref[...] = jnp.zeros_like(acc_ref)

    acc_ref[...] += jnp.dot(a_ref[...], b_ref[...],
                            preferred_element_type=jnp.float32)

    @pl.when(k == pl.num_programs(2) - 1)
    def _():
        acc = acc_ref[...] * scale_ref[...] + shift_ref[...]
        if has_res:
            acc = acc + res_ref[...].astype(jnp.float32)
        if relu:
            acc = jnp.maximum(acc, 0.0)
        o_ref[...] = acc.astype(o_ref.dtype)


def fused_gemm_bn(a, w, scale, shift, residual=None, relu=True):
    """Tiled conv-as-GEMM + inference BN + (residual) + (ReLU) on the MXU.

    a:        (M, Ka)      bf16 patch matrix (Ka <= K_pad)
    w:        (K_pad, N_pad) bf16, pre-packed (K_pad/N_pad multiples of 128)
    scale/shift: (1, N_pad) f32 (zero in padded columns)
    residual: (M, N_pad)   bf16 or None
    returns   (M, N_pad)   bf16
    """
    M, Ka = a.shape
    K_pad, N_pad = w.shape
    assert Ka <= K_pad and K_pad % _LANE == 0 and N_pad % _LANE == 0

    M_pad, tm = _tile(M, _TM_TARGET, _SUBLANE_BF16)
    _, tn = _tile(N_pad, _TN_TARGET, _LANE)
    _, tk = _tile(K_pad, _TK_TARGET, _LANE)
    gm, gn = M_pad // tm, N_pad // tn

    # v7x megacore: give the "parallel" axes >= 2 blocks when the grid degenerates.
    if gm * gn == 1 and tm % (2 * _SUBLANE_BF16) == 0:
        tm //= 2
        gm = M_pad // tm
    gk = K_pad // tk

    if (M_pad, K_pad) != (M, Ka):
        a = jnp.pad(a, ((0, M_pad - M), (0, K_pad - Ka)))
    a = a.astype(jnp.bfloat16)

    has_res = residual is not None
    args = [a, w, scale, shift]
    in_specs = [
        pl.BlockSpec((tm, tk), lambda i, j, k: (i, k)),
        pl.BlockSpec((tk, tn), lambda i, j, k: (k, j)),
        pl.BlockSpec((1, tn), lambda i, j, k: (0, j)),
        pl.BlockSpec((1, tn), lambda i, j, k: (0, j)),
    ]
    if has_res:
        res = residual.astype(jnp.bfloat16)
        if M_pad != M:
            res = jnp.pad(res, ((0, M_pad - M), (0, 0)))
        args.append(res)
        in_specs.append(pl.BlockSpec((tm, tn), lambda i, j, k: (i, j)))

    bytes_accessed = (M_pad * K_pad * 2 + K_pad * N_pad * 2 + 2 * N_pad * 4
                      + M_pad * N_pad * 2 * (2 if has_res else 1))

    out = pl.pallas_call(
        functools.partial(_gemm_bn_kernel, relu=relu, has_res=has_res),
        grid=(gm, gn, gk),
        in_specs=in_specs,
        out_specs=pl.BlockSpec((tm, tn), lambda i, j, k: (i, j)),
        out_shape=jax.ShapeDtypeStruct((M_pad, N_pad), jnp.bfloat16),
        scratch_shapes=[pltpu.VMEM((tm, tn), jnp.float32)],
        compiler_params=pltpu.CompilerParams(
            dimension_semantics=("parallel", "parallel", "arbitrary")),
        cost_estimate=pl.CostEstimate(
            flops=2 * M_pad * N_pad * K_pad,
            transcendentals=0,
            bytes_accessed=bytes_accessed),
    )(*args)

    return out[:M] if M_pad != M else out


# ------------------------------- glue (JAX) --------------------------------- #

def _im2col(x, kh, kw, stride, padding):
    """x: NHWC bf16 -> (N*Ho*Wo, kh*kw*C) bf16 patch matrix (tap-major, channel-minor).
    kh/kw/stride/padding MUST be static Python ints."""
    N, H, W, C = x.shape
    Ho = (H + 2 * padding - kh) // stride + 1
    Wo = (W + 2 * padding - kw) // stride + 1
    if padding:
        x = jnp.pad(x, ((0, 0), (padding, padding), (padding, padding), (0, 0)))
    if kh == 1 and kw == 1:
        patches = x[:, ::stride, ::stride, :][:, :Ho, :Wo, :]
    else:
        cols = []
        for i in range(kh):
            for j in range(kw):
                cols.append(x[:, i:i + (Ho - 1) * stride + 1:stride,
                                 j:j + (Wo - 1) * stride + 1:stride, :])
        patches = jnp.concatenate(cols, axis=-1)          # (N, Ho, Wo, kh*kw*C)
    return patches.reshape(N * Ho * Wo, kh * kw * C), Ho, Wo


def conv_bn(x, pc, kh, kw, stride, padding, relu, residual=None):
    """x: NHWC bf16 (channels lane-padded), pc: pre-packed conv {w, scale, shift}.
    residual: NHWC bf16 with the output's spatial dims and padded channels."""
    N, H, W, C = x.shape
    a, Ho, Wo = _im2col(x, kh, kw, stride, padding)
    n_pad = pc["w"].shape[1]
    res = residual.reshape(N * Ho * Wo, n_pad) if residual is not None else None
    out = fused_gemm_bn(a, pc["w"], pc["scale"], pc["shift"], residual=res, relu=relu)
    return out.reshape(N, Ho, Wo, n_pad)


def maxpool_3x3_s2_p1(x):
    # Trivial 9-tap VPU max tree; XLA fuses this for free.
    N, H, W, C = x.shape
    xp = jnp.pad(x, ((0, 0), (1, 1), (1, 1), (0, 0)), constant_values=-jnp.inf)
    Ho = (H + 2 - 3) // 2 + 1
    Wo = (W + 2 - 3) // 2 + 1
    out = None
    for i in range(3):
        for j in range(3):
            tap = xp[:, i:i + (Ho - 1) * 2 + 1:2, j:j + (Wo - 1) * 2 + 1:2, :]
            out = tap if out is None else jnp.maximum(out, tap)
    return out


# ----------------------------- model definition ----------------------------- #

def _init_conv(key, cout, cin, kh, kw):
    # kaiming_normal_(mode='fan_out', nonlinearity='relu')
    std = math.sqrt(2.0 / (cout * kh * kw))
    return jax.random.normal(key, (cout, cin, kh, kw), jnp.float32) * std


def _init_bn(c):
    # weight=1, bias=0, default running stats (mean=0, var=1)
    return dict(gamma=jnp.ones((c,), jnp.float32),
                beta=jnp.zeros((c,), jnp.float32),
                mean=jnp.zeros((c,), jnp.float32),
                var=jnp.ones((c,), jnp.float32))


def build_adv_resnet_params(key, layers=(1, 1, 1, 1)):
    """Raw (torch-layout) AdvResNet BasicBlock parameters, deterministic init."""
    keys = iter(jax.random.split(key, 64))
    params = {"conv1": _init_conv(next(keys), 64, 3, 7, 7),
              "bn1": _init_bn(64),
              "layers": []}
    inplanes = 64
    for planes, nblocks, stride in zip((64, 128, 256, 512), layers, (1, 2, 2, 2)):
        blocks = []
        for b in range(nblocks):
            s = stride if b == 0 else 1
            blk = {"conv1": _init_conv(next(keys), planes, inplanes, 3, 3),
                   "bn1": _init_bn(planes),
                   "conv2": _init_conv(next(keys), planes, planes, 3, 3),
                   "bn2": _init_bn(planes)}
            if s != 1 or inplanes != planes:
                blk["downsample_conv"] = _init_conv(next(keys), planes, inplanes, 1, 1)
                blk["downsample_bn"] = _init_bn(planes)
            inplanes = planes
            blocks.append(blk)
        params["layers"].append(blocks)
    return params


def _pack_conv(w, bn, cin_carried):
    """torch conv weight (Cout,Cin,kh,kw) + BN stats -> GEMM-ready pack:
    w: (K_pad, N_pad) bf16 (Cin rows padded to the carried lane-padded channel
    count with zeros, Cout cols padded to a multiple of 128), scale/shift (1,N_pad) f32."""
    cout, cin, kh, kw = w.shape
    cout_pad = _round_up(cout, _LANE)
    wt = jnp.transpose(w, (2, 3, 1, 0))                                   # (kh,kw,cin,cout)
    wt = jnp.pad(wt, ((0, 0), (0, 0), (0, cin_carried - cin), (0, cout_pad - cout)))
    b = wt.reshape(kh * kw * cin_carried, cout_pad)
    k_pad = _round_up(b.shape[0], _LANE)
    if k_pad != b.shape[0]:
        b = jnp.pad(b, ((0, k_pad - b.shape[0]), (0, 0)))
    scale = bn["gamma"] / jnp.sqrt(bn["var"] + 1e-5)
    shift = bn["beta"] - bn["mean"] * scale
    scale = jnp.pad(scale, (0, cout_pad - cout)).reshape(1, cout_pad)
    shift = jnp.pad(shift, (0, cout_pad - cout)).reshape(1, cout_pad)
    return {"w": b.astype(jnp.bfloat16),
            "scale": scale.astype(jnp.float32),
            "shift": shift.astype(jnp.float32)}


def pack_adv_resnet_params(raw):
    """One-time pack: all transposes / pads / casts / BN folding happen here, not per forward."""
    packed = {"conv1": _pack_conv(raw["conv1"], raw["bn1"], cin_carried=3),
              "layers": []}
    carried = _round_up(64, _LANE)            # channels carried after conv1 / maxpool
    for li, layer in enumerate(raw["layers"]):
        planes = 64 * (2 ** li)
        planes_pad = _round_up(planes, _LANE)
        blocks = []
        for blk in layer:
            pb = {"conv1": _pack_conv(blk["conv1"], blk["bn1"], cin_carried=carried),
                  "conv2": _pack_conv(blk["conv2"], blk["bn2"], cin_carried=planes_pad)}
            if "downsample_conv" in blk:
                pb["downsample"] = _pack_conv(blk["downsample_conv"], blk["downsample_bn"],
                                              cin_carried=carried)
            blocks.append(pb)
            carried = planes_pad
        packed["layers"].append(blocks)
    return packed


def basic_block(x, p, stride):
    out = conv_bn(x, p["conv1"], 3, 3, stride, 1, relu=True)
    if "downsample" in p:
        identity = conv_bn(x, p["downsample"], 1, 1, stride, 0, relu=False)
    else:
        identity = x
    # relu(bn2(conv2(out)) + identity), all fused in the GEMM epilogue
    return conv_bn(out, p["conv2"], 3, 3, 1, 1, relu=True, residual=identity)


def adv_resnet_forward(packed, x_nchw, labels, cur_fc_layer=None):
    """Eval-mode AdvResNet.forward(x, labels, cur_fc_layer): NoOpAttacker, clean BN."""
    del cur_fc_layer  # unused in the eval / clean path
    x = jnp.transpose(x_nchw, (0, 2, 3, 1)).astype(jnp.bfloat16)   # NCHW f32 -> NHWC bf16
    x = conv_bn(x, packed["conv1"], 7, 7, 2, 3, relu=True)
    x = maxpool_3x3_s2_p1(x)
    fmaps = []
    for li, layer in enumerate(packed["layers"]):
        planes = 64 * (2 ** li)
        for bi, blk in enumerate(layer):
            stride = (1 if li == 0 else 2) if bi == 0 else 1       # static Python ints
            x = basic_block(x, blk, stride)
        fmaps.append(x[..., :planes])       # drop lane padding only at export time
    # AdaptiveAvgPool2d((1,1)) + flatten == mean over spatial dims
    features = jnp.mean(fmaps[-1].astype(jnp.float32), axis=(1, 2))
    fmaps_nchw = [jnp.transpose(f, (0, 3, 1, 2)).astype(jnp.float32) for f in fmaps]
    return {"fmaps": fmaps_nchw, "features": features}, labels


# ---------------------------------- main ------------------------------------ #

if __name__ == "__main__":
    key = jax.random.PRNGKey(0)
    k_param, k_x = jax.random.split(key)

    raw_params = build_adv_resnet_params(k_param, layers=(1, 1, 1, 1))
    packed_params = pack_adv_resnet_params(raw_params)   # one-time weight/BN pack

    # small shapes: batch=2, 3-channel 32x32 images
    x = jax.random.normal(k_x, (2, 3, 32, 32), jnp.float32)
    labels = jnp.array([1, 7], jnp.int32)

    fwd = jax.jit(adv_resnet_forward)
    out, targets = fwd(packed_params, x, labels)

    jax.block_until_ready(out["features"])
    for f in out["fmaps"]:
        jax.block_until_ready(f)
    jax.block_until_ready(targets)

    assert out["features"].shape == (2, 512)
    assert [f.shape for f in out["fmaps"]] == [
        (2, 64, 8, 8), (2, 128, 4, 4), (2, 256, 2, 2), (2, 512, 1, 1)]
    print("KERNEL_OK")
</pallas_src>

<mosaic_0001>
module attributes {stable_mosaic.version = 11 : i64} {
  func.func @_gemm_bn_kernel(%arg0: i32, %arg1: i32, %arg2: i32, %arg3: memref<128x256xbf16, #tpu.memory_space<vmem>>, %arg4: memref<256x128xbf16, #tpu.memory_space<vmem>>, %arg5: memref<1x128xf32, #tpu.memory_space<vmem>>, %arg6: memref<1x128xf32, #tpu.memory_space<vmem>>, %arg7: memref<128x128xbf16, #tpu.memory_space<vmem>>, %arg8: memref<128x128xf32, #tpu.memory_space<vmem>>) attributes {dimension_semantics = [#tpu.dimension_semantics<parallel>, #tpu.dimension_semantics<parallel>, #tpu.dimension_semantics<arbitrary>], iteration_bounds = array<i64: 4, 1, 1>, scalar_prefetch = 0 : i64, scratch_operands = 1 : i64, tpu.core_type = #tpu.core_type<tc>, window_params = [{transform_indices = @transform_0, window_bounds = array<i64: 128, 256>}, {transform_indices = @transform_1, window_bounds = array<i64: 256, 128>}, {transform_indices = @transform_2, window_bounds = array<i64: 1, 128>}, {transform_indices = @transform_3, window_bounds = array<i64: 1, 128>}, {transform_indices = @transform_4, window_bounds = array<i64: 128, 128>}]} {
    %c0_i32 = arith.constant 0 : i32
    %0 = arith.cmpi eq, %arg2, %c0_i32 : i32
    %1 = arith.extui %0 : i1 to i32
    %c0_i32_0 = arith.constant 0 : i32
    %2 = arith.cmpi ne, %1, %c0_i32_0 : i32
    scf.if %2 {
      %cst_10 = arith.constant 0.000000e+00 : f32
      %12 = vector.broadcast %cst_10 : f32 to vector<128x128xf32>
      %c0_11 = arith.constant 0 : index
      %c0_12 = arith.constant 0 : index
      %13 = vector.load %arg8[%c0_11, %c0_12] : memref<128x128xf32, #tpu.memory_space<vmem>>, vector<128x128xf32>
      tpu.vector_store %arg8[%c0_11, %c0_12], %12 {strides = array<i32>} : memref<128x128xf32, #tpu.memory_space<vmem>>, vector<128x128xf32>,
    } else {
    }
    %c0 = arith.constant 0 : index
    %c0_1 = arith.constant 0 : index
    %3 = vector.load %arg8[%c0, %c0_1] : memref<128x128xf32, #tpu.memory_space<vmem>>, vector<128x128xf32>
    %c0_2 = arith.constant 0 : index
    %c0_3 = arith.constant 0 : index
    %4 = vector.load %arg3[%c0_2, %c0_3] : memref<128x256xbf16, #tpu.memory_space<vmem>>, vector<128x256xbf16>
    %c0_4 = arith.constant 0 : index
    %c0_5 = arith.constant 0 : index
    %5 = vector.load %arg4[%c0_4, %c0_5] : memref<256x128xbf16, #tpu.memory_space<vmem>>, vector<256x128xbf16>
    %cst = arith.constant dense<0.000000e+00> : vector<128x128xf32>
    %6 = tpu.matmul %4, %5, %cst {dimension_numbers = #tpu.dot_dimension_numbers<[1], [0], [0], [1], [0, 0, 1, 1], [], []>} : vector<128x256xbf16>, vector<256x128xbf16>, vector<128x128xf32> -> vector<128x128xf32>
    %7 = arith.addf %3, %6 : vector<128x128xf32>
    %c0_6 = arith.constant 0 : index
    %c0_7 = arith.constant 0 : index
    %8 = vector.load %arg8[%c0_6, %c0_7] : memref<128x128xf32, #tpu.memory_space<vmem>>, vector<128x128xf32>
    tpu.vector_store %arg8[%c0_6, %c0_7], %7 {strides = array<i32>} : memref<128x128xf32, #tpu.memory_space<vmem>>, vector<128x128xf32>,
    %c0_i32_8 = arith.constant 0 : i32
    %9 = arith.cmpi eq, %arg2, %c0_i32_8 : i32
    %10 = arith.extui %9 : i1 to i32
    %c0_i32_9 = arith.constant 0 : i32
    %11 = arith.cmpi ne, %10, %c0_i32_9 : i32
    scf.if %11 {
      %c0_10 = arith.constant 0 : index
      %c0_11 = arith.constant 0 : index
      %12 = vector.load %arg8[%c0_10, %c0_11] : memref<128x128xf32, #tpu.memory_space<vmem>>, vector<128x128xf32>
      %c0_12 = arith.constant 0 : index
      %c0_13 = arith.constant 0 : index
      %13 = vector.load %arg5[%c0_12, %c0_13] : memref<1x128xf32, #tpu.memory_space<vmem>>, vector<1x128xf32>
      %14 = vector.broadcast %13 : vector<1x128xf32> to vector<128x128xf32>
      %15 = arith.mulf %12, %14 : vector<128x128xf32>
      %c0_14 = arith.constant 0 : index
      %c0_15 = arith.constant 0 : index
      %16 = vector.load %arg6[%c0_14, %c0_15] : memref<1x128xf32, #tpu.memory_space<vmem>>, vector<1x128xf32>
      %17 = vector.broadcast %16 : vector<1x128xf32> to vector<128x128xf32>
      %18 = arith.addf %15, %17 : vector<128x128xf32>
      %cst_16 = arith.constant 0.000000e+00 : f32
      %19 = vector.broadcast %cst_16 : f32 to vector<128x128xf32>
      %20 = arith.maximumf %18, %19 : vector<128x128xf32>
      %21 = arith.truncf %20 : vector<128x128xf32> to vector<128x128xbf16>
      %c0_17 = arith.constant 0 : index
      %c0_18 = arith.constant 0 : index
      %22 = vector.load %arg7[%c0_17, %c0_18] : memref<128x128xbf16, #tpu.memory_space<vmem>>, vector<128x128xbf16>
      tpu.vector_store %arg7[%c0_17, %c0_18], %21 {strides = array<i32>} : memref<128x128xbf16, #tpu.memory_space<vmem>>, vector<128x128xbf16>,
    } else {
    }
    return
  }
  func.func @transform_0(%arg0: i32, %arg1: i32, %arg2: i32) -> (i32, i32) {
    %c0_i32 = arith.constant 0 : i32
    return %arg0, %arg2 : i32, i32
  }
  func.func @transform_1(%arg0: i32, %arg1: i32, %arg2: i32) -> (i32, i32) {
    %c0_i32 = arith.constant 0 : i32
    return %arg2, %arg1 : i32, i32
  }
  func.func @transform_2(%arg0: i32, %arg1: i32, %arg2: i32) -> (i32, i32) {
    %c0_i32 = arith.constant 0 : i32
    %c0_i32_0 = arith.constant 0 : i32
    return %c0_i32, %arg1 : i32, i32
  }
  func.func @transform_3(%arg0: i32, %arg1: i32, %arg2: i32) -> (i32, i32) {
    %c0_i32 = arith.constant 0 : i32
    %c0_i32_0 = arith.constant 0 : i32
    return %c0_i32, %arg1 : i32, i32
  }
  func.func @transform_4(%arg0: i32, %arg1: i32, %arg2: i32) -> (i32, i32) {
    %c0_i32 = arith.constant 0 : i32
    return %arg0, %arg1 : i32, i32
  }
}

module attributes {stable_mosaic.version = 11 : i64} {
  func.func @_gemm_bn_kernel(%arg0: i32, %arg1: i32, %arg2: i32, %arg3: memref<64x384xbf16, #tpu.memory_space<vmem>>, %arg4: memref<384x128xbf16, #tpu.memory_space<vmem>>, %arg5: memref<1x128xf32, #tpu.memory_space<vmem>>, %arg6: memref<1x128xf32, #tpu.memory_space<vmem>>, %arg7: memref<64x128xbf16, #tpu.memory_space<vmem>>, %arg8: memref<64x128xf32, #tpu.memory_space<vmem>>) attributes {dimension_semantics = [#tpu.dimension_semantics<parallel>, #tpu.dimension_semantics<parallel>, #tpu.dimension_semantics<arbitrary>], iteration_bounds = array<i64: 2, 1, 3>, scalar_prefetch = 0 : i64, scratch_operands = 1 : i64, tpu.core_type = #tpu.core_type<tc>, window_params = [{transform_indices = @transform_0, window_bounds = array<i64: 64, 384>}, {transform_indices = @transform_1, window_bounds = array<i64: 384, 128>}, {transform_indices = @transform_2, window_bounds = array<i64: 1, 128>}, {transform_indices = @transform_3, window_bounds = array<i64: 1, 128>}, {transform_indices = @transform_4, window_bounds = array<i64: 64, 128>}]} {
    %c0_i32 = arith.constant 0 : i32
    %0 = arith.cmpi eq, %arg2, %c0_i32 : i32
    %1 = arith.extui %0 : i1 to i32
    %c0_i32_0 = arith.constant 0 : i32
    %2 = arith.cmpi ne, %1, %c0_i32_0 : i32
    scf.if %2 {
      %cst_9 = arith.constant 0.000000e+00 : f32
      %12 = vector.broadcast %cst_9 : f32 to vector<64x128xf32>
      %c0_10 = arith.constant 0 : index
      %c0_11 = arith.constant 0 : index
      %13 = vector.load %arg8[%c0_10, %c0_11] : memref<64x128xf32, #tpu.memory_space<vmem>>, vector<64x128xf32>
      tpu.vector_store %arg8[%c0_10, %c0_11], %12 {strides = array<i32>} : memref<64x128xf32, #tpu.memory_space<vmem>>, vector<64x128xf32>,
    } else {
    }
    %c0 = arith.constant 0 : index
    %c0_1 = arith.constant 0 : index
    %3 = vector.load %arg8[%c0, %c0_1] : memref<64x128xf32, #tpu.memory_space<vmem>>, vector<64x128xf32>
    %c0_2 = arith.constant 0 : index
    %c0_3 = arith.constant 0 : index
    %4 = vector.load %arg3[%c0_2, %c0_3] : memref<64x384xbf16, #tpu.memory_space<vmem>>, vector<64x384xbf16>
    %c0_4 = arith.constant 0 : index
    %c0_5 = arith.constant 0 : index
    %5 = vector.load %arg4[%c0_4, %c0_5] : memref<384x128xbf16, #tpu.memory_space<vmem>>, vector<384x128xbf16>
    %cst = arith.constant dense<0.000000e+00> : vector<64x128xf32>
    %6 = tpu.matmul %4, %5, %cst {dimension_numbers = #tpu.dot_dimension_numbers<[1], [0], [0], [1], [0, 0, 1, 1], [], []>} : vector<64x384xbf16>, vector<384x128xbf16>, vector<64x128xf32> -> vector<64x128xf32>
    %7 = arith.addf %3, %6 : vector<64x128xf32>
    %c0_6 = arith.constant 0 : index
    %c0_7 = arith.constant 0 : index
    %8 = vector.load %arg8[%c0_6, %c0_7] : memref<64x128xf32, #tpu.memory_space<vmem>>, vector<64x128xf32>
    tpu.vector_store %arg8[%c0_6, %c0_7], %7 {strides = array<i32>} : memref<64x128xf32, #tpu.memory_space<vmem>>, vector<64x128xf32>,
    %c2_i32 = arith.constant 2 : i32
    %9 = arith.cmpi eq, %arg2, %c2_i32 : i32
    %10 = arith.extui %9 : i1 to i32
    %c0_i32_8 = arith.constant 0 : i32
    %11 = arith.cmpi ne, %10, %c0_i32_8 : i32
    scf.if %11 {
      %c0_9 = arith.constant 0 : index
      %c0_10 = arith.constant 0 : index
      %12 = vector.load %arg8[%c0_9, %c0_10] : memref<64x128xf32, #tpu.memory_space<vmem>>, vector<64x128xf32>
      %c0_11 = arith.constant 0 : index
      %c0_12 = arith.constant 0 : index
      %13 = vector.load %arg5[%c0_11, %c0_12] : memref<1x128xf32, #tpu.memory_space<vmem>>, vector<1x128xf32>
      %14 = vector.broadcast %13 : vector<1x128xf32> to vector<64x128xf32>
      %15 = arith.mulf %12, %14 : vector<64x128xf32>
      %c0_13 = arith.constant 0 : index
      %c0_14 = arith.constant 0 : index
      %16 = vector.load %arg6[%c0_13, %c0_14] : memref<1x128xf32, #tpu.memory_space<vmem>>, vector<1x128xf32>
      %17 = vector.broadcast %16 : vector<1x128xf32> to vector<64x128xf32>
      %18 = arith.addf %15, %17 : vector<64x128xf32>
      %cst_15 = arith.constant 0.000000e+00 : f32
      %19 = vector.broadcast %cst_15 : f32 to vector<64x128xf32>
      %20 = arith.maximumf %18, %19 : vector<64x128xf32>
      %21 = arith.truncf %20 : vector<64x128xf32> to vector<64x128xbf16>
      %c0_16 = arith.constant 0 : index
      %c0_17 = arith.constant 0 : index
      %22 = vector.load %arg7[%c0_16, %c0_17] : memref<64x128xbf16, #tpu.memory_space<vmem>>, vector<64x128xbf16>
      tpu.vector_store %arg7[%c0_16, %c0_17], %21 {strides = array<i32>} : memref<64x128xbf16, #tpu.memory_space<vmem>>, vector<64x128xbf16>,
    } else {
    }
    return
  }
  func.func @transform_0(%arg0: i32, %arg1: i32, %arg2: i32) -> (i32, i32) {
    %c0_i32 = arith.constant 0 : i32
    return %arg0, %arg2 : i32, i32
  }
  func.func @transform_1(%arg0: i32, %arg1: i32, %arg2: i32) -> (i32, i32) {
    %c0_i32 = arith.constant 0 : i32
    return %arg2, %arg1 : i32, i32
  }
  func.func @transform_2(%arg0: i32, %arg1: i32, %arg2: i32) -> (i32, i32) {
    %c0_i32 = arith.constant 0 : i32
    %c0_i32_0 = arith.constant 0 : i32
    return %c0_i32, %arg1 : i32, i32
  }
  func.func @transform_3(%arg0: i32, %arg1: i32, %arg2: i32) -> (i32, i32) {
    %c0_i32 = arith.constant 0 : i32
    %c0_i32_0 = arith.constant 0 : i32
    return %c0_i32, %arg1 : i32, i32
  }
  func.func @transform_4(%arg0: i32, %arg1: i32, %arg2: i32) -> (i32, i32) {
    %c0_i32 = arith.constant 0 : i32
    return %arg0, %arg1 : i32, i32
  }
}

module attributes {stable_mosaic.version = 11 : i64} {
  func.func @_gemm_bn_kernel(%arg0: i32, %arg1: i32, %arg2: i32, %arg3: memref<64x384xbf16, #tpu.memory_space<vmem>>, %arg4: memref<384x128xbf16, #tpu.memory_space<vmem>>, %arg5: memref<1x128xf32, #tpu.memory_space<vmem>>, %arg6: memref<1x128xf32, #tpu.memory_space<vmem>>, %arg7: memref<64x128xbf16, #tpu.memory_space<vmem>>, %arg8: memref<64x128xbf16, #tpu.memory_space<vmem>>, %arg9: memref<64x128xf32, #tpu.memory_space<vmem>>) attributes {dimension_semantics = [#tpu.dimension_semantics<parallel>, #tpu.dimension_semantics<parallel>, #tpu.dimension_semantics<arbitrary>], iteration_bounds = array<i64: 2, 1, 3>, scalar_prefetch = 0 : i64, scratch_operands = 1 : i64, tpu.core_type = #tpu.core_type<tc>, window_params = [{transform_indices = @transform_0, window_bounds = array<i64: 64, 384>}, {transform_indices = @transform_1, window_bounds = array<i64: 384, 128>}, {transform_indices = @transform_2, window_bounds = array<i64: 1, 128>}, {transform_indices = @transform_3, window_bounds = array<i64: 1, 128>}, {transform_indices = @transform_4, window_bounds = array<i64: 64, 128>}, {transform_indices = @transform_5, window_bounds = array<i64: 64, 128>}]} {
    %c0_i32 = arith.constant 0 : i32
    %0 = arith.cmpi eq, %arg2, %c0_i32 : i32
    %1 = arith.extui %0 : i1 to i32
    %c0_i32_0 = arith.constant 0 : i32
    %2 = arith.cmpi ne, %1, %c0_i32_0 : i32
    scf.if %2 {
      %cst_9 = arith.constant 0.000000e+00 : f32
      %12 = vector.broadcast %cst_9 : f32 to vector<64x128xf32>
      %c0_10 = arith.constant 0 : index
      %c0_11 = arith.constant 0 : index
      %13 = vector.load %arg9[%c0_10, %c0_11] : memref<64x128xf32, #tpu.memory_space<vmem>>, vector<64x128xf32>
      tpu.vector_store %arg9[%c0_10, %c0_11], %12 {strides = array<i32>} : memref<64x128xf32, #tpu.memory_space<vmem>>, vector<64x128xf32>,
    } else {
    }
    %c0 = arith.constant 0 : index
    %c0_1 = arith.constant 0 : index
    %3 = vector.load %arg9[%c0, %c0_1] : memref<64x128xf32, #tpu.memory_space<vmem>>, vector<64x128xf32>
    %c0_2 = arith.constant 0 : index
    %c0_3 = arith.constant 0 : index
    %4 = vector.load %arg3[%c0_2, %c0_3] : memref<64x384xbf16, #tpu.memory_space<vmem>>, vector<64x384xbf16>
    %c0_4 = arith.constant 0 : index
    %c0_5 = arith.constant 0 : index
    %5 = vector.load %arg4[%c0_4, %c0_5] : memref<384x128xbf16, #tpu.memory_space<vmem>>, vector<384x128xbf16>
    %cst = arith.constant dense<0.000000e+00> : vector<64x128xf32>
    %6 = tpu.matmul %4, %5, %cst {dimension_numbers = #tpu.dot_dimension_numbers<[1], [0], [0], [1], [0, 0, 1, 1], [], []>} : vector<64x384xbf16>, vector<384x128xbf16>, vector<64x128xf32> -> vector<64x128xf32>
    %7 = arith.addf %3, %6 : vector<64x128xf32>
    %c0_6 = arith.constant 0 : index
    %c0_7 = arith.constant 0 : index
    %8 = vector.load %arg9[%c0_6, %c0_7] : memref<64x128xf32, #tpu.memory_space<vmem>>, vector<64x128xf32>
    tpu.vector_store %arg9[%c0_6, %c0_7], %7 {strides = array<i32>} : memref<64x128xf32, #tpu.memory_space<vmem>>, vector<64x128xf32>,
    %c2_i32 = arith.constant 2 : i32
    %9 = arith.cmpi eq, %arg2, %c2_i32 : i32
    %10 = arith.extui %9 : i1 to i32
    %c0_i32_8 = arith.constant 0 : i32
    %11 = arith.cmpi ne, %10, %c0_i32_8 : i32
    scf.if %11 {
      %c0_9 = arith.constant 0 : index
      %c0_10 = arith.constant 0 : index
      %12 = vector.load %arg9[%c0_9, %c0_10] : memref<64x128xf32, #tpu.memory_space<vmem>>, vector<64x128xf32>
      %c0_11 = arith.constant 0 : index
      %c0_12 = arith.constant 0 : index
      %13 = vector.load %arg5[%c0_11, %c0_12] : memref<1x128xf32, #tpu.memory_space<vmem>>, vector<1x128xf32>
      %14 = vector.broadcast %13 : vector<1x128xf32> to vector<64x128xf32>
      %15 = arith.mulf %12, %14 : vector<64x128xf32>
      %c0_13 = arith.constant 0 : index
      %c0_14 = arith.constant 0 : index
      %16 = vector.load %arg6[%c0_13, %c0_14] : memref<1x128xf32, #tpu.memory_space<vmem>>, vector<1x128xf32>
      %17 = vector.broadcast %16 : vector<1x128xf32> to vector<64x128xf32>
      %18 = arith.addf %15, %17 : vector<64x128xf32>
      %c0_15 = arith.constant 0 : index
      %c0_16 = arith.constant 0 : index
      %19 = vector.load %arg7[%c0_15, %c0_16] : memref<64x128xbf16, #tpu.memory_space<vmem>>, vector<64x128xbf16>
      %20 = arith.extf %19 : vector<64x128xbf16> to vector<64x128xf32>
      %21 = arith.addf %18, %20 : vector<64x128xf32>
      %cst_17 = arith.constant 0.000000e+00 : f32
      %22 = vector.broadcast %cst_17 : f32 to vector<64x128xf32>
      %23 = arith.maximumf %21, %22 : vector<64x128xf32>
      %24 = arith.truncf %23 : vector<64x128xf32> to vector<64x128xbf16>
      %c0_18 = arith.constant 0 : index
      %c0_19 = arith.constant 0 : index
      %25 = vector.load %arg8[%c0_18, %c0_19] : memref<64x128xbf16, #tpu.memory_space<vmem>>, vector<64x128xbf16>
      tpu.vector_store %arg8[%c0_18, %c0_19], %24 {strides = array<i32>} : memref<64x128xbf16, #tpu.memory_space<vmem>>, vector<64x128xbf16>,
    } else {
    }
    return
  }
  func.func @transform_0(%arg0: i32, %arg1: i32, %arg2: i32) -> (i32, i32) {
    %c0_i32 = arith.constant 0 : i32
    return %arg0, %arg2 : i32, i32
  }
  func.func @transform_1(%arg0: i32, %arg1: i32, %arg2: i32) -> (i32, i32) {
    %c0_i32 = arith.constant 0 : i32
    return %arg2, %arg1 : i32, i32
  }
  func.func @transform_2(%arg0: i32, %arg1: i32, %arg2: i32) -> (i32, i32) {
    %c0_i32 = arith.constant 0 : i32
    %c0_i32_0 = arith.constant 0 : i32
    return %c0_i32, %arg1 : i32, i32
  }
  func.func @transform_3(%arg0: i32, %arg1: i32, %arg2: i32) -> (i32, i32) {
    %c0_i32 = arith.constant 0 : i32
    %c0_i32_0 = arith.constant 0 : i32
    return %c0_i32, %arg1 : i32, i32
  }
  func.func @transform_4(%arg0: i32, %arg1: i32, %arg2: i32) -> (i32, i32) {
    %c0_i32 = arith.constant 0 : i32
    return %arg0, %arg1 : i32, i32
  }
  func.func @transform_5(%arg0: i32, %arg1: i32, %arg2: i32) -> (i32, i32) {
    %c0_i32 = arith.constant 0 : i32
    return %arg0, %arg1 : i32, i32
  }
}

module attributes {stable_mosaic.version = 11 : i64} {
  func.func @_gemm_bn_kernel(%arg0: i32, %arg1: i32, %arg2: i32, %arg3: memref<16x384xbf16, #tpu.memory_space<vmem>>, %arg4: memref<384x128xbf16, #tpu.memory_space<vmem>>, %arg5: memref<1x128xf32, #tpu.memory_space<vmem>>, %arg6: memref<1x128xf32, #tpu.memory_space<vmem>>, %arg7: memref<16x128xbf16, #tpu.memory_space<vmem>>, %arg8: memref<16x128xf32, #tpu.memory_space<vmem>>) attributes {dimension_semantics = [#tpu.dimension_semantics<parallel>, #tpu.dimension_semantics<parallel>, #tpu.dimension_semantics<arbitrary>], iteration_bounds = array<i64: 2, 1, 3>, scalar_prefetch = 0 : i64, scratch_operands = 1 : i64, tpu.core_type = #tpu.core_type<tc>, window_params = [{transform_indices = @transform_0, window_bounds = array<i64: 16, 384>}, {transform_indices = @transform_1, window_bounds = array<i64: 384, 128>}, {transform_indices = @transform_2, window_bounds = array<i64: 1, 128>}, {transform_indices = @transform_3, window_bounds = array<i64: 1, 128>}, {transform_indices = @transform_4, window_bounds = array<i64: 16, 128>}]} {
    %c0_i32 = arith.constant 0 : i32
    %0 = arith.cmpi eq, %arg2, %c0_i32 : i32
    %1 = arith.extui %0 : i1 to i32
    %c0_i32_0 = arith.constant 0 : i32
    %2 = arith.cmpi ne, %1, %c0_i32_0 : i32
    scf.if %2 {
      %cst_9 = arith.constant 0.000000e+00 : f32
      %12 = vector.broadcast %cst_9 : f32 to vector<16x128xf32>
      %c0_10 = arith.constant 0 : index
      %c0_11 = arith.constant 0 : index
      %13 = vector.load %arg8[%c0_10, %c0_11] : memref<16x128xf32, #tpu.memory_space<vmem>>, vector<16x128xf32>
      tpu.vector_store %arg8[%c0_10, %c0_11], %12 {strides = array<i32>} : memref<16x128xf32, #tpu.memory_space<vmem>>, vector<16x128xf32>,
    } else {
    }
    %c0 = arith.constant 0 : index
    %c0_1 = arith.constant 0 : index
    %3 = vector.load %arg8[%c0, %c0_1] : memref<16x128xf32, #tpu.memory_space<vmem>>, vector<16x128xf32>
    %c0_2 = arith.constant 0 : index
    %c0_3 = arith.constant 0 : index
    %4 = vector.load %arg3[%c0_2, %c0_3] : memref<16x384xbf16, #tpu.memory_space<vmem>>, vector<16x384xbf16>
    %c0_4 = arith.constant 0 : index
    %c0_5 = arith.constant 0 : index
    %5 = vector.load %arg4[%c0_4, %c0_5] : memref<384x128xbf16, #tpu.memory_space<vmem>>, vector<384x128xbf16>
    %cst = arith.constant dense<0.000000e+00> : vector<16x128xf32>
    %6 = tpu.matmul %4, %5, %cst {dimension_numbers = #tpu.dot_dimension_numbers<[1], [0], [0], [1], [0, 0, 1, 1], [], []>} : vector<16x384xbf16>, vector<384x128xbf16>, vector<16x128xf32> -> vector<16x128xf32>
    %7 = arith.addf %3, %6 : vector<16x128xf32>
    %c0_6 = arith.constant 0 : index
    %c0_7 = arith.constant 0 : index
    %8 = vector.load %arg8[%c0_6, %c0_7] : memref<16x128xf32, #tpu.memory_space<vmem>>, vector<16x128xf32>
    tpu.vector_store %arg8[%c0_6, %c0_7], %7 {strides = array<i32>} : memref<16x128xf32, #tpu.memory_space<vmem>>, vector<16x128xf32>,
    %c2_i32 = arith.constant 2 : i32
    %9 = arith.cmpi eq, %arg2, %c2_i32 : i32
    %10 = arith.extui %9 : i1 to i32
    %c0_i32_8 = arith.constant 0 : i32
    %11 = arith.cmpi ne, %10, %c0_i32_8 : i32
    scf.if %11 {
      %c0_9 = arith.constant 0 : index
      %c0_10 = arith.constant 0 : index
      %12 = vector.load %arg8[%c0_9, %c0_10] : memref<16x128xf32, #tpu.memory_space<vmem>>, vector<16x128xf32>
      %c0_11 = arith.constant 0 : index
      %c0_12 = arith.constant 0 : index
      %13 = vector.load %arg5[%c0_11, %c0_12] : memref<1x128xf32, #tpu.memory_space<vmem>>, vector<1x128xf32>
      %14 = vector.broadcast %13 : vector<1x128xf32> to vector<16x128xf32>
      %15 = arith.mulf %12, %14 : vector<16x128xf32>
      %c0_13 = arith.constant 0 : index
      %c0_14 = arith.constant 0 : index
      %16 = vector.load %arg6[%c0_13, %c0_14] : memref<1x128xf32, #tpu.memory_space<vmem>>, vector<1x128xf32>
      %17 = vector.broadcast %16 : vector<1x128xf32> to vector<16x128xf32>
      %18 = arith.addf %15, %17 : vector<16x128xf32>
      %cst_15 = arith.constant 0.000000e+00 : f32
      %19 = vector.broadcast %cst_15 : f32 to vector<16x128xf32>
      %20 = arith.maximumf %18, %19 : vector<16x128xf32>
      %21 = arith.truncf %20 : vector<16x128xf32> to vector<16x128xbf16>
      %c0_16 = arith.constant 0 : index
      %c0_17 = arith.constant 0 : index
      %22 = vector.load %arg7[%c0_16, %c0_17] : memref<16x128xbf16, #tpu.memory_space<vmem>>, vector<16x128xbf16>
      tpu.vector_store %arg7[%c0_16, %c0_17], %21 {strides = array<i32>} : memref<16x128xbf16, #tpu.memory_space<vmem>>, vector<16x128xbf16>,
    } else {
    }
    return
  }
  func.func @transform_0(%arg0: i32, %arg1: i32, %arg2: i32) -> (i32, i32) {
    %c0_i32 = arith.constant 0 : i32
    return %arg0, %arg2 : i32, i32
  }
  func.func @transform_1(%arg0: i32, %arg1: i32, %arg2: i32) -> (i32, i32) {
    %c0_i32 = arith.constant 0 : i32
    return %arg2, %arg1 : i32, i32
  }
  func.func @transform_2(%arg0: i32, %arg1: i32, %arg2: i32) -> (i32, i32) {
    %c0_i32 = arith.constant 0 : i32
    %c0_i32_0 = arith.constant 0 : i32
    return %c0_i32, %arg1 : i32, i32
  }
  func.func @transform_3(%arg0: i32, %arg1: i32, %arg2: i32) -> (i32, i32) {
    %c0_i32 = arith.constant 0 : i32
    %c0_i32_0 = arith.constant 0 : i32
    return %c0_i32, %arg1 : i32, i32
  }
  func.func @transform_4(%arg0: i32, %arg1: i32, %arg2: i32) -> (i32, i32) {
    %c0_i32 = arith.constant 0 : i32
    return %arg0, %arg1 : i32, i32
  }
}

module attributes {stable_mosaic.version = 11 : i64} {
  func.func @_gemm_bn_kernel(%arg0: i32, %arg1: i32, %arg2: i32, %arg3: memref<16x128xbf16, #tpu.memory_space<vmem>>, %arg4: memref<128x128xbf16, #tpu.memory_space<vmem>>, %arg5: memref<1x128xf32, #tpu.memory_space<vmem>>, %arg6: memref<1x128xf32, #tpu.memory_space<vmem>>, %arg7: memref<16x128xbf16, #tpu.memory_space<vmem>>, %arg8: memref<16x128xf32, #tpu.memory_space<vmem>>) attributes {dimension_semantics = [#tpu.dimension_semantics<parallel>, #tpu.dimension_semantics<parallel>, #tpu.dimension_semantics<arbitrary>], iteration_bounds = array<i64: 2, 1, 1>, scalar_prefetch = 0 : i64, scratch_operands = 1 : i64, tpu.core_type = #tpu.core_type<tc>, window_params = [{transform_indices = @transform_0, window_bounds = array<i64: 16, 128>}, {transform_indices = @transform_1, window_bounds = array<i64: 128, 128>}, {transform_indices = @transform_2, window_bounds = array<i64: 1, 128>}, {transform_indices = @transform_3, window_bounds = array<i64: 1, 128>}, {transform_indices = @transform_4, window_bounds = array<i64: 16, 128>}]} {
    %c0_i32 = arith.constant 0 : i32
    %0 = arith.cmpi eq, %arg2, %c0_i32 : i32
    %1 = arith.extui %0 : i1 to i32
    %c0_i32_0 = arith.constant 0 : i32
    %2 = arith.cmpi ne, %1, %c0_i32_0 : i32
    scf.if %2 {
      %cst_10 = arith.constant 0.000000e+00 : f32
      %12 = vector.broadcast %cst_10 : f32 to vector<16x128xf32>
      %c0_11 = arith.constant 0 : index
      %c0_12 = arith.constant 0 : index
      %13 = vector.load %arg8[%c0_11, %c0_12] : memref<16x128xf32, #tpu.memory_space<vmem>>, vector<16x128xf32>
      tpu.vector_store %arg8[%c0_11, %c0_12], %12 {strides = array<i32>} : memref<16x128xf32, #tpu.memory_space<vmem>>, vector<16x128xf32>,
    } else {
    }
    %c0 = arith.constant 0 : index
    %c0_1 = arith.constant 0 : index
    %3 = vector.load %arg8[%c0, %c0_1] : memref<16x128xf32, #tpu.memory_space<vmem>>, vector<16x128xf32>
    %c0_2 = arith.constant 0 : index
    %c0_3 = arith.constant 0 : index
    %4 = vector.load %arg3[%c0_2, %c0_3] : memref<16x128xbf16, #tpu.memory_space<vmem>>, vector<16x128xbf16>
    %c0_4 = arith.constant 0 : index
    %c0_5 = arith.constant 0 : index
    %5 = vector.load %arg4[%c0_4, %c0_5] : memref<128x128xbf16, #tpu.memory_space<vmem>>, vector<128x128xbf16>
    %cst = arith.constant dense<0.000000e+00> : vector<16x128xf32>
    %6 = tpu.matmul %4, %5, %cst {dimension_numbers = #tpu.dot_dimension_numbers<[1], [0], [0], [1], [0, 0, 1, 1], [], []>} : vector<16x128xbf16>, vector<128x128xbf16>, vector<16x128xf32> -> vector<16x128xf32>
    %7 = arith.addf %3, %6 : vector<16x128xf32>
    %c0_6 = arith.constant 0 : index
    %c0_7 = arith.constant 0 : index
    %8 = vector.load %arg8[%c0_6, %c0_7] : memref<16x128xf32, #tpu.memory_space<vmem>>, vector<16x128xf32>
    tpu.vector_store %arg8[%c0_6, %c0_7], %7 {strides = array<i32>} : memref<16x128xf32, #tpu.memory_space<vmem>>, vector<16x128xf32>,
    %c0_i32_8 = arith.constant 0 : i32
    %9 = arith.cmpi eq, %arg2, %c0_i32_8 : i32
    %10 = arith.extui %9 : i1 to i32
    %c0_i32_9 = arith.constant 0 : i32
    %11 = arith.cmpi ne, %10, %c0_i32_9 : i32
    scf.if %11 {
      %c0_10 = arith.constant 0 : index
      %c0_11 = arith.constant 0 : index
      %12 = vector.load %arg8[%c0_10, %c0_11] : memref<16x128xf32, #tpu.memory_space<vmem>>, vector<16x128xf32>
      %c0_12 = arith.constant 0 : index
      %c0_13 = arith.constant 0 : index
      %13 = vector.load %arg5[%c0_12, %c0_13] : memref<1x128xf32, #tpu.memory_space<vmem>>, vector<1x128xf32>
      %14 = vector.broadcast %13 : vector<1x128xf32> to vector<16x128xf32>
      %15 = arith.mulf %12, %14 : vector<16x128xf32>
      %c0_14 = arith.constant 0 : index
      %c0_15 = arith.constant 0 : index
      %16 = vector.load %arg6[%c0_14, %c0_15] : memref<1x128xf32, #tpu.memory_space<vmem>>, vector<1x128xf32>
      %17 = vector.broadcast %16 : vector<1x128xf32> to vector<16x128xf32>
      %18 = arith.addf %15, %17 : vector<16x128xf32>
      %19 = arith.truncf %18 : vector<16x128xf32> to vector<16x128xbf16>
      %c0_16 = arith.constant 0 : index
      %c0_17 = arith.constant 0 : index
      %20 = vector.load %arg7[%c0_16, %c0_17] : memref<16x128xbf16, #tpu.memory_space<vmem>>, vector<16x128xbf16>
      tpu.vector_store %arg7[%c0_16, %c0_17], %19 {strides = array<i32>} : memref<16x128xbf16, #tpu.memory_space<vmem>>, vector<16x128xbf16>,
    } else {
    }
    return
  }
  func.func @transform_0(%arg0: i32, %arg1: i32, %arg2: i32) -> (i32, i32) {
    %c0_i32 = arith.constant 0 : i32
    return %arg0, %arg2 : i32, i32
  }
  func.func @transform_1(%arg0: i32, %arg1: i32, %arg2: i32) -> (i32, i32) {
    %c0_i32 = arith.constant 0 : i32
    return %arg2, %arg1 : i32, i32
  }
  func.func @transform_2(%arg0: i32, %arg1: i32, %arg2: i32) -> (i32, i32) {
    %c0_i32 = arith.constant 0 : i32
    %c0_i32_0 = arith.constant 0 : i32
    return %c0_i32, %arg1 : i32, i32
  }
  func.func @transform_3(%arg0: i32, %arg1: i32, %arg2: i32) -> (i32, i32) {
    %c0_i32 = arith.constant 0 : i32
    %c0_i32_0 = arith.constant 0 : i32
    return %c0_i32, %arg1 : i32, i32
  }
  func.func @transform_4(%arg0: i32, %arg1: i32, %arg2: i32) -> (i32, i32) {
    %c0_i32 = arith.constant 0 : i32
    return %arg0, %arg1 : i32, i32
  }
}

module attributes {stable_mosaic.version = 11 : i64} {
  func.func @_gemm_bn_kernel(%arg0: i32, %arg1: i32, %arg2: i32, %arg3: memref<16x384xbf16, #tpu.memory_space<vmem>>, %arg4: memref<384x128xbf16, #tpu.memory_space<vmem>>, %arg5: memref<1x128xf32, #tpu.memory_space<vmem>>, %arg6: memref<1x128xf32, #tpu.memory_space<vmem>>, %arg7: memref<16x128xbf16, #tpu.memory_space<vmem>>, %arg8: memref<16x128xbf16, #tpu.memory_space<vmem>>, %arg9: memref<16x128xf32, #tpu.memory_space<vmem>>) attributes {dimension_semantics = [#tpu.dimension_semantics<parallel>, #tpu.dimension_semantics<parallel>, #tpu.dimension_semantics<arbitrary>], iteration_bounds = array<i64: 2, 1, 3>, scalar_prefetch = 0 : i64, scratch_operands = 1 : i64, tpu.core_type = #tpu.core_type<tc>, window_params = [{transform_indices = @transform_0, window_bounds = array<i64: 16, 384>}, {transform_indices = @transform_1, window_bounds = array<i64: 384, 128>}, {transform_indices = @transform_2, window_bounds = array<i64: 1, 128>}, {transform_indices = @transform_3, window_bounds = array<i64: 1, 128>}, {transform_indices = @transform_4, window_bounds = array<i64: 16, 128>}, {transform_indices = @transform_5, window_bounds = array<i64: 16, 128>}]} {
    %c0_i32 = arith.constant 0 : i32
    %0 = arith.cmpi eq, %arg2, %c0_i32 : i32
    %1 = arith.extui %0 : i1 to i32
    %c0_i32_0 = arith.constant 0 : i32
    %2 = arith.cmpi ne, %1, %c0_i32_0 : i32
    scf.if %2 {
      %cst_9 = arith.constant 0.000000e+00 : f32
      %12 = vector.broadcast %cst_9 : f32 to vector<16x128xf32>
      %c0_10 = arith.constant 0 : index
      %c0_11 = arith.constant 0 : index
      %13 = vector.load %arg9[%c0_10, %c0_11] : memref<16x128xf32, #tpu.memory_space<vmem>>, vector<16x128xf32>
      tpu.vector_store %arg9[%c0_10, %c0_11], %12 {strides = array<i32>} : memref<16x128xf32, #tpu.memory_space<vmem>>, vector<16x128xf32>,
    } else {
    }
    %c0 = arith.constant 0 : index
    %c0_1 = arith.constant 0 : index
    %3 = vector.load %arg9[%c0, %c0_1] : memref<16x128xf32, #tpu.memory_space<vmem>>, vector<16x128xf32>
    %c0_2 = arith.constant 0 : index
    %c0_3 = arith.constant 0 : index
    %4 = vector.load %arg3[%c0_2, %c0_3] : memref<16x384xbf16, #tpu.memory_space<vmem>>, vector<16x384xbf16>
    %c0_4 = arith.constant 0 : index
    %c0_5 = arith.constant 0 : index
    %5 = vector.load %arg4[%c0_4, %c0_5] : memref<384x128xbf16, #tpu.memory_space<vmem>>, vector<384x128xbf16>
    %cst = arith.constant dense<0.000000e+00> : vector<16x128xf32>
    %6 = tpu.matmul %4, %5, %cst {dimension_numbers = #tpu.dot_dimension_numbers<[1], [0], [0], [1], [0, 0, 1, 1], [], []>} : vector<16x384xbf16>, vector<384x128xbf16>, vector<16x128xf32> -> vector<16x128xf32>
    %7 = arith.addf %3, %6 : vector<16x128xf32>
    %c0_6 = arith.constant 0 : index
    %c0_7 = arith.constant 0 : index
    %8 = vector.load %arg9[%c0_6, %c0_7] : memref<16x128xf32, #tpu.memory_space<vmem>>, vector<16x128xf32>
    tpu.vector_store %arg9[%c0_6, %c0_7], %7 {strides = array<i32>} : memref<16x128xf32, #tpu.memory_space<vmem>>, vector<16x128xf32>,
    %c2_i32 = arith.constant 2 : i32
    %9 = arith.cmpi eq, %arg2, %c2_i32 : i32
    %10 = arith.extui %9 : i1 to i32
    %c0_i32_8 = arith.constant 0 : i32
    %11 = arith.cmpi ne, %10, %c0_i32_8 : i32
    scf.if %11 {
      %c0_9 = arith.constant 0 : index
      %c0_10 = arith.constant 0 : index
      %12 = vector.load %arg9[%c0_9, %c0_10] : memref<16x128xf32, #tpu.memory_space<vmem>>, vector<16x128xf32>
      %c0_11 = arith.constant 0 : index
      %c0_12 = arith.constant 0 : index
      %13 = vector.load %arg5[%c0_11, %c0_12] : memref<1x128xf32, #tpu.memory_space<vmem>>, vector<1x128xf32>
      %14 = vector.broadcast %13 : vector<1x128xf32> to vector<16x128xf32>
      %15 = arith.mulf %12, %14 : vector<16x128xf32>
      %c0_13 = arith.constant 0 : index
      %c0_14 = arith.constant 0 : index
      %16 = vector.load %arg6[%c0_13, %c0_14] : memref<1x128xf32, #tpu.memory_space<vmem>>, vector<1x128xf32>
      %17 = vector.broadcast %16 : vector<1x128xf32> to vector<16x128xf32>
      %18 = arith.addf %15, %17 : vector<16x128xf32>
      %c0_15 = arith.constant 0 : index
      %c0_16 = arith.constant 0 : index
      %19 = vector.load %arg7[%c0_15, %c0_16] : memref<16x128xbf16, #tpu.memory_space<vmem>>, vector<16x128xbf16>
      %20 = arith.extf %19 : vector<16x128xbf16> to vector<16x128xf32>
      %21 = arith.addf %18, %20 : vector<16x128xf32>
      %cst_17 = arith.constant 0.000000e+00 : f32
      %22 = vector.broadcast %cst_17 : f32 to vector<16x128xf32>
      %23 = arith.maximumf %21, %22 : vector<16x128xf32>
      %24 = arith.truncf %23 : vector<16x128xf32> to vector<16x128xbf16>
      %c0_18 = arith.constant 0 : index
      %c0_19 = arith.constant 0 : index
      %25 = vector.load %arg8[%c0_18, %c0_19] : memref<16x128xbf16, #tpu.memory_space<vmem>>, vector<16x128xbf16>
      tpu.vector_store %arg8[%c0_18, %c0_19], %24 {strides = array<i32>} : memref<16x128xbf16, #tpu.memory_space<vmem>>, vector<16x128xbf16>,
    } else {
    }
    return
  }
  func.func @transform_0(%arg0: i32, %arg1: i32, %arg2: i32) -> (i32, i32) {
    %c0_i32 = arith.constant 0 : i32
    return %arg0, %arg2 : i32, i32
  }
  func.func @transform_1(%arg0: i32, %arg1: i32, %arg2: i32) -> (i32, i32) {
    %c0_i32 = arith.constant 0 : i32
    return %arg2, %arg1 : i32, i32
  }
  func.func @transform_2(%arg0: i32, %arg1: i32, %arg2: i32) -> (i32, i32) {
    %c0_i32 = arith.constant 0 : i32
    %c0_i32_0 = arith.constant 0 : i32
    return %c0_i32, %arg1 : i32, i32
  }
  func.func @transform_3(%arg0: i32, %arg1: i32, %arg2: i32) -> (i32, i32) {
    %c0_i32 = arith.constant 0 : i32
    %c0_i32_0 = arith.constant 0 : i32
    return %c0_i32, %arg1 : i32, i32
  }
  func.func @transform_4(%arg0: i32, %arg1: i32, %arg2: i32) -> (i32, i32) {
    %c0_i32 = arith.constant 0 : i32
    return %arg0, %arg1 : i32, i32
  }
  func.func @transform_5(%arg0: i32, %arg1: i32, %arg2: i32) -> (i32, i32) {
    %c0_i32 = arith.constant 0 : i32
    return %arg0, %arg1 : i32, i32
  }
}

module attributes {stable_mosaic.version = 11 : i64} {
  func.func @_gemm_bn_kernel(%arg0: i32, %arg1: i32, %arg2: i32, %arg3: memref<16x384xbf16, #tpu.memory_space<vmem>>, %arg4: memref<384x256xbf16, #tpu.memory_space<vmem>>, %arg5: memref<1x256xf32, #tpu.memory_space<vmem>>, %arg6: memref<1x256xf32, #tpu.memory_space<vmem>>, %arg7: memref<16x256xbf16, #tpu.memory_space<vmem>>, %arg8: memref<16x256xf32, #tpu.memory_space<vmem>>) attributes {dimension_semantics = [#tpu.dimension_semantics<parallel>, #tpu.dimension_semantics<parallel>, #tpu.dimension_semantics<arbitrary>], iteration_bounds = array<i64: 1, 1, 3>, scalar_prefetch = 0 : i64, scratch_operands = 1 : i64, tpu.core_type = #tpu.core_type<tc>, window_params = [{transform_indices = @transform_0, window_bounds = array<i64: 16, 384>}, {transform_indices = @transform_1, window_bounds = array<i64: 384, 256>}, {transform_indices = @transform_2, window_bounds = array<i64: 1, 256>}, {transform_indices = @transform_3, window_bounds = array<i64: 1, 256>}, {transform_indices = @transform_4, window_bounds = array<i64: 16, 256>}]} {
    %c0_i32 = arith.constant 0 : i32
    %0 = arith.cmpi eq, %arg2, %c0_i32 : i32
    %1 = arith.extui %0 : i1 to i32
    %c0_i32_0 = arith.constant 0 : i32
    %2 = arith.cmpi ne, %1, %c0_i32_0 : i32
    scf.if %2 {
      %cst_9 = arith.constant 0.000000e+00 : f32
      %12 = vector.broadcast %cst_9 : f32 to vector<16x256xf32>
      %c0_10 = arith.constant 0 : index
      %c0_11 = arith.constant 0 : index
      %13 = vector.load %arg8[%c0_10, %c0_11] : memref<16x256xf32, #tpu.memory_space<vmem>>, vector<16x256xf32>
      tpu.vector_store %arg8[%c0_10, %c0_11], %12 {strides = array<i32>} : memref<16x256xf32, #tpu.memory_space<vmem>>, vector<16x256xf32>,
    } else {
    }
    %c0 = arith.constant 0 : index
    %c0_1 = arith.constant 0 : index
    %3 = vector.load %arg8[%c0, %c0_1] : memref<16x256xf32, #tpu.memory_space<vmem>>, vector<16x256xf32>
    %c0_2 = arith.constant 0 : index
    %c0_3 = arith.constant 0 : index
    %4 = vector.load %arg3[%c0_2, %c0_3] : memref<16x384xbf16, #tpu.memory_space<vmem>>, vector<16x384xbf16>
    %c0_4 = arith.constant 0 : index
    %c0_5 = arith.constant 0 : index
    %5 = vector.load %arg4[%c0_4, %c0_5] : memref<384x256xbf16, #tpu.memory_space<vmem>>, vector<384x256xbf16>
    %cst = arith.constant dense<0.000000e+00> : vector<16x256xf32>
    %6 = tpu.matmul %4, %5, %cst {dimension_numbers = #tpu.dot_dimension_numbers<[1], [0], [0], [1], [0, 0, 1, 1], [], []>} : vector<16x384xbf16>, vector<384x256xbf16>, vector<16x256xf32> -> vector<16x256xf32>
    %7 = arith.addf %3, %6 : vector<16x256xf32>
    %c0_6 = arith.constant 0 : index
    %c0_7 = arith.constant 0 : index
    %8 = vector.load %arg8[%c0_6, %c0_7] : memref<16x256xf32, #tpu.memory_space<vmem>>, vector<16x256xf32>
    tpu.vector_store %arg8[%c0_6, %c0_7], %7 {strides = array<i32>} : memref<16x256xf32, #tpu.memory_space<vmem>>, vector<16x256xf32>,
    %c2_i32 = arith.constant 2 : i32
    %9 = arith.cmpi eq, %arg2, %c2_i32 : i32
    %10 = arith.extui %9 : i1 to i32
    %c0_i32_8 = arith.constant 0 : i32
    %11 = arith.cmpi ne, %10, %c0_i32_8 : i32
    scf.if %11 {
      %c0_9 = arith.constant 0 : index
      %c0_10 = arith.constant 0 : index
      %12 = vector.load %arg8[%c0_9, %c0_10] : memref<16x256xf32, #tpu.memory_space<vmem>>, vector<16x256xf32>
      %c0_11 = arith.constant 0 : index
      %c0_12 = arith.constant 0 : index
      %13 = vector.load %arg5[%c0_11, %c0_12] : memref<1x256xf32, #tpu.memory_space<vmem>>, vector<1x256xf32>
      %14 = vector.broadcast %13 : vector<1x256xf32> to vector<16x256xf32>
      %15 = arith.mulf %12, %14 : vector<16x256xf32>
      %c0_13 = arith.constant 0 : index
      %c0_14 = arith.constant 0 : index
      %16 = vector.load %arg6[%c0_13, %c0_14] : memref<1x256xf32, #tpu.memory_space<vmem>>, vector<1x256xf32>
      %17 = vector.broadcast %16 : vector<1x256xf32> to vector<16x256xf32>
      %18 = arith.addf %15, %17 : vector<16x256xf32>
      %cst_15 = arith.constant 0.000000e+00 : f32
      %19 = vector.broadcast %cst_15 : f32 to vector<16x256xf32>
      %20 = arith.maximumf %18, %19 : vector<16x256xf32>
      %21 = arith.truncf %20 : vector<16x256xf32> to vector<16x256xbf16>
      %c0_16 = arith.constant 0 : index
      %c0_17 = arith.constant 0 : index
      %22 = vector.load %arg7[%c0_16, %c0_17] : memref<16x256xbf16, #tpu.memory_space<vmem>>, vector<16x256xbf16>
      tpu.vector_store %arg7[%c0_16, %c0_17], %21 {strides = array<i32>} : memref<16x256xbf16, #tpu.memory_space<vmem>>, vector<16x256xbf16>,
    } else {
    }
    return
  }
  func.func @transform_0(%arg0: i32, %arg1: i32, %arg2: i32) -> (i32, i32) {
    %c0_i32 = arith.constant 0 : i32
    return %arg0, %arg2 : i32, i32
  }
  func.func @transform_1(%arg0: i32, %arg1: i32, %arg2: i32) -> (i32, i32) {
    %c0_i32 = arith.constant 0 : i32
    return %arg2, %arg1 : i32, i32
  }
  func.func @transform_2(%arg0: i32, %arg1: i32, %arg2: i32) -> (i32, i32) {
    %c0_i32 = arith.constant 0 : i32
    %c0_i32_0 = arith.constant 0 : i32
    return %c0_i32, %arg1 : i32, i32
  }
  func.func @transform_3(%arg0: i32, %arg1: i32, %arg2: i32) -> (i32, i32) {
    %c0_i32 = arith.constant 0 : i32
    %c0_i32_0 = arith.constant 0 : i32
    return %c0_i32, %arg1 : i32, i32
  }
  func.func @transform_4(%arg0: i32, %arg1: i32, %arg2: i32) -> (i32, i32) {
    %c0_i32 = arith.constant 0 : i32
    return %arg0, %arg1 : i32, i32
  }
}

module attributes {stable_mosaic.version = 11 : i64} {
  func.func @_gemm_bn_kernel(%arg0: i32, %arg1: i32, %arg2: i32, %arg3: memref<16x128xbf16, #tpu.memory_space<vmem>>, %arg4: memref<128x256xbf16, #tpu.memory_space<vmem>>, %arg5: memref<1x256xf32, #tpu.memory_space<vmem>>, %arg6: memref<1x256xf32, #tpu.memory_space<vmem>>, %arg7: memref<16x256xbf16, #tpu.memory_space<vmem>>, %arg8: memref<16x256xf32, #tpu.memory_space<vmem>>) attributes {dimension_semantics = [#tpu.dimension_semantics<parallel>, #tpu.dimension_semantics<parallel>, #tpu.dimension_semantics<arbitrary>], iteration_bounds = array<i64: 1, 1, 1>, scalar_prefetch = 0 : i64, scratch_operands = 1 : i64, tpu.core_type = #tpu.core_type<tc>, window_params = [{transform_indices = @transform_0, window_bounds = array<i64: 16, 128>}, {transform_indices = @transform_1, window_bounds = array<i64: 128, 256>}, {transform_indices = @transform_2, window_bounds = array<i64: 1, 256>}, {transform_indices = @transform_3, window_bounds = array<i64: 1, 256>}, {transform_indices = @transform_4, window_bounds = array<i64: 16, 256>}]} {
    %c0_i32 = arith.constant 0 : i32
    %0 = arith.cmpi eq, %arg2, %c0_i32 : i32
    %1 = arith.extui %0 : i1 to i32
    %c0_i32_0 = arith.constant 0 : i32
    %2 = arith.cmpi ne, %1, %c0_i32_0 : i32
    scf.if %2 {
      %cst_10 = arith.constant 0.000000e+00 : f32
      %12 = vector.broadcast %cst_10 : f32 to vector<16x256xf32>
      %c0_11 = arith.constant 0 : index
      %c0_12 = arith.constant 0 : index
      %13 = vector.load %arg8[%c0_11, %c0_12] : memref<16x256xf32, #tpu.memory_space<vmem>>, vector<16x256xf32>
      tpu.vector_store %arg8[%c0_11, %c0_12], %12 {strides = array<i32>} : memref<16x256xf32, #tpu.memory_space<vmem>>, vector<16x256xf32>,
    } else {
    }
    %c0 = arith.constant 0 : index
    %c0_1 = arith.constant 0 : index
    %3 = vector.load %arg8[%c0, %c0_1] : memref<16x256xf32, #tpu.memory_space<vmem>>, vector<16x256xf32>
    %c0_2 = arith.constant 0 : index
    %c0_3 = arith.constant 0 : index
    %4 = vector.load %arg3[%c0_2, %c0_3] : memref<16x128xbf16, #tpu.memory_space<vmem>>, vector<16x128xbf16>
    %c0_4 = arith.constant 0 : index
    %c0_5 = arith.constant 0 : index
    %5 = vector.load %arg4[%c0_4, %c0_5] : memref<128x256xbf16, #tpu.memory_space<vmem>>, vector<128x256xbf16>
    %cst = arith.constant dense<0.000000e+00> : vector<16x256xf32>
    %6 = tpu.matmul %4, %5, %cst {dimension_numbers = #tpu.dot_dimension_numbers<[1], [0], [0], [1], [0, 0, 1, 1], [], []>} : vector<16x128xbf16>, vector<128x256xbf16>, vector<16x256xf32> -> vector<16x256xf32>
    %7 = arith.addf %3, %6 : vector<16x256xf32>
    %c0_6 = arith.constant 0 : index
    %c0_7 = arith.constant 0 : index
    %8 = vector.load %arg8[%c0_6, %c0_7] : memref<16x256xf32, #tpu.memory_space<vmem>>, vector<16x256xf32>
    tpu.vector_store %arg8[%c0_6, %c0_7], %7 {strides = array<i32>} : memref<16x256xf32, #tpu.memory_space<vmem>>, vector<16x256xf32>,
    %c0_i32_8 = arith.constant 0 : i32
    %9 = arith.cmpi eq, %arg2, %c0_i32_8 : i32
    %10 = arith.extui %9 : i1 to i32
    %c0_i32_9 = arith.constant 0 : i32
    %11 = arith.cmpi ne, %10, %c0_i32_9 : i32
    scf.if %11 {
      %c0_10 = arith.constant 0 : index
      %c0_11 = arith.constant 0 : index
      %12 = vector.load %arg8[%c0_10, %c0_11] : memref<16x256xf32, #tpu.memory_space<vmem>>, vector<16x256xf32>
      %c0_12 = arith.constant 0 : index
      %c0_13 = arith.constant 0 : index
      %13 = vector.load %arg5[%c0_12, %c0_13] : memref<1x256xf32, #tpu.memory_space<vmem>>, vector<1x256xf32>
      %14 = vector.broadcast %13 : vector<1x256xf32> to vector<16x256xf32>
      %15 = arith.mulf %12, %14 : vector<16x256xf32>
      %c0_14 = arith.constant 0 : index
      %c0_15 = arith.constant 0 : index
      %16 = vector.load %arg6[%c0_14, %c0_15] : memref<1x256xf32, #tpu.memory_space<vmem>>, vector<1x256xf32>
      %17 = vector.broadcast %16 : vector<1x256xf32> to vector<16x256xf32>
      %18 = arith.addf %15, %17 : vector<16x256xf32>
      %19 = arith.truncf %18 : vector<16x256xf32> to vector<16x256xbf16>
      %c0_16 = arith.constant 0 : index
      %c0_17 = arith.constant 0 : index
      %20 = vector.load %arg7[%c0_16, %c0_17] : memref<16x256xbf16, #tpu.memory_space<vmem>>, vector<16x256xbf16>
      tpu.vector_store %arg7[%c0_16, %c0_17], %19 {strides = array<i32>} : memref<16x256xbf16, #tpu.memory_space<vmem>>, vector<16x256xbf16>,
    } else {
    }
    return
  }
  func.func @transform_0(%arg0: i32, %arg1: i32, %arg2: i32) -> (i32, i32) {
    %c0_i32 = arith.constant 0 : i32
    return %arg0, %arg2 : i32, i32
  }
  func.func @transform_1(%arg0: i32, %arg1: i32, %arg2: i32) -> (i32, i32) {
    %c0_i32 = arith.constant 0 : i32
    return %arg2, %arg1 : i32, i32
  }
  func.func @transform_2(%arg0: i32, %arg1: i32, %arg2: i32) -> (i32, i32) {
    %c0_i32 = arith.constant 0 : i32
    %c0_i32_0 = arith.constant 0 : i32
    return %c0_i32, %arg1 : i32, i32
  }
  func.func @transform_3(%arg0: i32, %arg1: i32, %arg2: i32) -> (i32, i32) {
    %c0_i32 = arith.constant 0 : i32
    %c0_i32_0 = arith.constant 0 : i32
    return %c0_i32, %arg1 : i32, i32
  }
  func.func @transform_4(%arg0: i32, %arg1: i32, %arg2: i32) -> (i32, i32) {
    %c0_i32 = arith.constant 0 : i32
    return %arg0, %arg1 : i32, i32
  }
}

module attributes {stable_mosaic.version = 11 : i64} {
  func.func @_gemm_bn_kernel(%arg0: i32, %arg1: i32, %arg2: i32, %arg3: memref<16x384xbf16, #tpu.memory_space<vmem>>, %arg4: memref<384x256xbf16, #tpu.memory_space<vmem>>, %arg5: memref<1x256xf32, #tpu.memory_space<vmem>>, %arg6: memref<1x256xf32, #tpu.memory_space<vmem>>, %arg7: memref<16x256xbf16, #tpu.memory_space<vmem>>, %arg8: memref<16x256xbf16, #tpu.memory_space<vmem>>, %arg9: memref<16x256xf32, #tpu.memory_space<vmem>>) attributes {dimension_semantics = [#tpu.dimension_semantics<parallel>, #tpu.dimension_semantics<parallel>, #tpu.dimension_semantics<arbitrary>], iteration_bounds = array<i64: 1, 1, 6>, scalar_prefetch = 0 : i64, scratch_operands = 1 : i64, tpu.core_type = #tpu.core_type<tc>, window_params = [{transform_indices = @transform_0, window_bounds = array<i64: 16, 384>}, {transform_indices = @transform_1, window_bounds = array<i64: 384, 256>}, {transform_indices = @transform_2, window_bounds = array<i64: 1, 256>}, {transform_indices = @transform_3, window_bounds = array<i64: 1, 256>}, {transform_indices = @transform_4, window_bounds = array<i64: 16, 256>}, {transform_indices = @transform_5, window_bounds = array<i64: 16, 256>}]} {
    %c0_i32 = arith.constant 0 : i32
    %0 = arith.cmpi eq, %arg2, %c0_i32 : i32
    %1 = arith.extui %0 : i1 to i32
    %c0_i32_0 = arith.constant 0 : i32
    %2 = arith.cmpi ne, %1, %c0_i32_0 : i32
    scf.if %2 {
      %cst_9 = arith.constant 0.000000e+00 : f32
      %12 = vector.broadcast %cst_9 : f32 to vector<16x256xf32>
      %c0_10 = arith.constant 0 : index
      %c0_11 = arith.constant 0 : index
      %13 = vector.load %arg9[%c0_10, %c0_11] : memref<16x256xf32, #tpu.memory_space<vmem>>, vector<16x256xf32>
      tpu.vector_store %arg9[%c0_10, %c0_11], %12 {strides = array<i32>} : memref<16x256xf32, #tpu.memory_space<vmem>>, vector<16x256xf32>,
    } else {
    }
    %c0 = arith.constant 0 : index
    %c0_1 = arith.constant 0 : index
    %3 = vector.load %arg9[%c0, %c0_1] : memref<16x256xf32, #tpu.memory_space<vmem>>, vector<16x256xf32>
    %c0_2 = arith.constant 0 : index
    %c0_3 = arith.constant 0 : index
    %4 = vector.load %arg3[%c0_2, %c0_3] : memref<16x384xbf16, #tpu.memory_space<vmem>>, vector<16x384xbf16>
    %c0_4 = arith.constant 0 : index
    %c0_5 = arith.constant 0 : index
    %5 = vector.load %arg4[%c0_4, %c0_5] : memref<384x256xbf16, #tpu.memory_space<vmem>>, vector<384x256xbf16>
    %cst = arith.constant dense<0.000000e+00> : vector<16x256xf32>
    %6 = tpu.matmul %4, %5, %cst {dimension_numbers = #tpu.dot_dimension_numbers<[1], [0], [0], [1], [0, 0, 1, 1], [], []>} : vector<16x384xbf16>, vector<384x256xbf16>, vector<16x256xf32> -> vector<16x256xf32>
    %7 = arith.addf %3, %6 : vector<16x256xf32>
    %c0_6 = arith.constant 0 : index
    %c0_7 = arith.constant 0 : index
    %8 = vector.load %arg9[%c0_6, %c0_7] : memref<16x256xf32, #tpu.memory_space<vmem>>, vector<16x256xf32>
    tpu.vector_store %arg9[%c0_6, %c0_7], %7 {strides = array<i32>} : memref<16x256xf32, #tpu.memory_space<vmem>>, vector<16x256xf32>,
    %c5_i32 = arith.constant 5 : i32
    %9 = arith.cmpi eq, %arg2, %c5_i32 : i32
    %10 = arith.extui %9 : i1 to i32
    %c0_i32_8 = arith.constant 0 : i32
    %11 = arith.cmpi ne, %10, %c0_i32_8 : i32
    scf.if %11 {
      %c0_9 = arith.constant 0 : index
      %c0_10 = arith.constant 0 : index
      %12 = vector.load %arg9[%c0_9, %c0_10] : memref<16x256xf32, #tpu.memory_space<vmem>>, vector<16x256xf32>
      %c0_11 = arith.constant 0 : index
      %c0_12 = arith.constant 0 : index
      %13 = vector.load %arg5[%c0_11, %c0_12] : memref<1x256xf32, #tpu.memory_space<vmem>>, vector<1x256xf32>
      %14 = vector.broadcast %13 : vector<1x256xf32> to vector<16x256xf32>
      %15 = arith.mulf %12, %14 : vector<16x256xf32>
      %c0_13 = arith.constant 0 : index
      %c0_14 = arith.constant 0 : index
      %16 = vector.load %arg6[%c0_13, %c0_14] : memref<1x256xf32, #tpu.memory_space<vmem>>, vector<1x256xf32>
      %17 = vector.broadcast %16 : vector<1x256xf32> to vector<16x256xf32>
      %18 = arith.addf %15, %17 : vector<16x256xf32>
      %c0_15 = arith.constant 0 : index
      %c0_16 = arith.constant 0 : index
      %19 = vector.load %arg7[%c0_15, %c0_16] : memref<16x256xbf16, #tpu.memory_space<vmem>>, vector<16x256xbf16>
      %20 = arith.extf %19 : vector<16x256xbf16> to vector<16x256xf32>
      %21 = arith.addf %18, %20 : vector<16x256xf32>
      %cst_17 = arith.constant 0.000000e+00 : f32
      %22 = vector.broadcast %cst_17 : f32 to vector<16x256xf32>
      %23 = arith.maximumf %21, %22 : vector<16x256xf32>
      %24 = arith.truncf %23 : vector<16x256xf32> to vector<16x256xbf16>
      %c0_18 = arith.constant 0 : index
      %c0_19 = arith.constant 0 : index
      %25 = vector.load %arg8[%c0_18, %c0_19] : memref<16x256xbf16, #tpu.memory_space<vmem>>, vector<16x256xbf16>
      tpu.vector_store %arg8[%c0_18, %c0_19], %24 {strides = array<i32>} : memref<16x256xbf16, #tpu.memory_space<vmem>>, vector<16x256xbf16>,
    } else {
    }
    return
  }
  func.func @transform_0(%arg0: i32, %arg1: i32, %arg2: i32) -> (i32, i32) {
    %c0_i32 = arith.constant 0 : i32
    return %arg0, %arg2 : i32, i32
  }
  func.func @transform_1(%arg0: i32, %arg1: i32, %arg2: i32) -> (i32, i32) {
    %c0_i32 = arith.constant 0 : i32
    return %arg2, %arg1 : i32, i32
  }
  func.func @transform_2(%arg0: i32, %arg1: i32, %arg2: i32) -> (i32, i32) {
    %c0_i32 = arith.constant 0 : i32
    %c0_i32_0 = arith.constant 0 : i32
    return %c0_i32, %arg1 : i32, i32
  }
  func.func @transform_3(%arg0: i32, %arg1: i32, %arg2: i32) -> (i32, i32) {
    %c0_i32 = arith.constant 0 : i32
    %c0_i32_0 = arith.constant 0 : i32
    return %c0_i32, %arg1 : i32, i32
  }
  func.func @transform_4(%arg0: i32, %arg1: i32, %arg2: i32) -> (i32, i32) {
    %c0_i32 = arith.constant 0 : i32
    return %arg0, %arg1 : i32, i32
  }
  func.func @transform_5(%arg0: i32, %arg1: i32, %arg2: i32) -> (i32, i32) {
    %c0_i32 = arith.constant 0 : i32
    return %arg0, %arg1 : i32, i32
  }
}

module attributes {stable_mosaic.version = 11 : i64} {
  func.func @_gemm_bn_kernel(%arg0: i32, %arg1: i32, %arg2: i32, %arg3: memref<16x384xbf16, #tpu.memory_space<vmem>>, %arg4: memref<384x256xbf16, #tpu.memory_space<vmem>>, %arg5: memref<1x256xf32, #tpu.memory_space<vmem>>, %arg6: memref<1x256xf32, #tpu.memory_space<vmem>>, %arg7: memref<16x256xbf16, #tpu.memory_space<vmem>>, %arg8: memref<16x256xf32, #tpu.memory_space<vmem>>) attributes {dimension_semantics = [#tpu.dimension_semantics<parallel>, #tpu.dimension_semantics<parallel>, #tpu.dimension_semantics<arbitrary>], iteration_bounds = array<i64: 1, 2, 6>, scalar_prefetch = 0 : i64, scratch_operands = 1 : i64, tpu.core_type = #tpu.core_type<tc>, window_params = [{transform_indices = @transform_0, window_bounds = array<i64: 16, 384>}, {transform_indices = @transform_1, window_bounds = array<i64: 384, 256>}, {transform_indices = @transform_2, window_bounds = array<i64: 1, 256>}, {transform_indices = @transform_3, window_bounds = array<i64: 1, 256>}, {transform_indices = @transform_4, window_bounds = array<i64: 16, 256>}]} {
    %c0_i32 = arith.constant 0 : i32
    %0 = arith.cmpi eq, %arg2, %c0_i32 : i32
    %1 = arith.extui %0 : i1 to i32
    %c0_i32_0 = arith.constant 0 : i32
    %2 = arith.cmpi ne, %1, %c0_i32_0 : i32
    scf.if %2 {
      %cst_9 = arith.constant 0.000000e+00 : f32
      %12 = vector.broadcast %cst_9 : f32 to vector<16x256xf32>
      %c0_10 = arith.constant 0 : index
      %c0_11 = arith.constant 0 : index
      %13 = vector.load %arg8[%c0_10, %c0_11] : memref<16x256xf32, #tpu.memory_space<vmem>>, vector<16x256xf32>
      tpu.vector_store %arg8[%c0_10, %c0_11], %12 {strides = array<i32>} : memref<16x256xf32, #tpu.memory_space<vmem>>, vector<16x256xf32>,
    } else {
    }
    %c0 = arith.constant 0 : index
    %c0_1 = arith.constant 0 : index
    %3 = vector.load %arg8[%c0, %c0_1] : memref<16x256xf32, #tpu.memory_space<vmem>>, vector<16x256xf32>
    %c0_2 = arith.constant 0 : index
    %c0_3 = arith.constant 0 : index
    %4 = vector.load %arg3[%c0_2, %c0_3] : memref<16x384xbf16, #tpu.memory_space<vmem>>, vector<16x384xbf16>
    %c0_4 = arith.constant 0 : index
    %c0_5 = arith.constant 0 : index
    %5 = vector.load %arg4[%c0_4, %c0_5] : memref<384x256xbf16, #tpu.memory_space<vmem>>, vector<384x256xbf16>
    %cst = arith.constant dense<0.000000e+00> : vector<16x256xf32>
    %6 = tpu.matmul %4, %5, %cst {dimension_numbers = #tpu.dot_dimension_numbers<[1], [0], [0], [1], [0, 0, 1, 1], [], []>} : vector<16x384xbf16>, vector<384x256xbf16>, vector<16x256xf32> -> vector<16x256xf32>
    %7 = arith.addf %3, %6 : vector<16x256xf32>
    %c0_6 = arith.constant 0 : index
    %c0_7 = arith.constant 0 : index
    %8 = vector.load %arg8[%c0_6, %c0_7] : memref<16x256xf32, #tpu.memory_space<vmem>>, vector<16x256xf32>
    tpu.vector_store %arg8[%c0_6, %c0_7], %7 {strides = array<i32>} : memref<16x256xf32, #tpu.memory_space<vmem>>, vector<16x256xf32>,
    %c5_i32 = arith.constant 5 : i32
    %9 = arith.cmpi eq, %arg2, %c5_i32 : i32
    %10 = arith.extui %9 : i1 to i32
    %c0_i32_8 = arith.constant 0 : i32
    %11 = arith.cmpi ne, %10, %c0_i32_8 : i32
    scf.if %11 {
      %c0_9 = arith.constant 0 : index
      %c0_10 = arith.constant 0 : index
      %12 = vector.load %arg8[%c0_9, %c0_10] : memref<16x256xf32, #tpu.memory_space<vmem>>, vector<16x256xf32>
      %c0_11 = arith.constant 0 : index
      %c0_12 = arith.constant 0 : index
      %13 = vector.load %arg5[%c0_11, %c0_12] : memref<1x256xf32, #tpu.memory_space<vmem>>, vector<1x256xf32>
      %14 = vector.broadcast %13 : vector<1x256xf32> to vector<16x256xf32>
      %15 = arith.mulf %12, %14 : vector<16x256xf32>
      %c0_13 = arith.constant 0 : index
      %c0_14 = arith.constant 0 : index
      %16 = vector.load %arg6[%c0_13, %c0_14] : memref<1x256xf32, #tpu.memory_space<vmem>>, vector<1x256xf32>
      %17 = vector.broadcast %16 : vector<1x256xf32> to vector<16x256xf32>
      %18 = arith.addf %15, %17 : vector<16x256xf32>
      %cst_15 = arith.constant 0.000000e+00 : f32
      %19 = vector.broadcast %cst_15 : f32 to vector<16x256xf32>
      %20 = arith.maximumf %18, %19 : vector<16x256xf32>
      %21 = arith.truncf %20 : vector<16x256xf32> to vector<16x256xbf16>
      %c0_16 = arith.constant 0 : index
      %c0_17 = arith.constant 0 : index
      %22 = vector.load %arg7[%c0_16, %c0_17] : memref<16x256xbf16, #tpu.memory_space<vmem>>, vector<16x256xbf16>
      tpu.vector_store %arg7[%c0_16, %c0_17], %21 {strides = array<i32>} : memref<16x256xbf16, #tpu.memory_space<vmem>>, vector<16x256xbf16>,
    } else {
    }
    return
  }
  func.func @transform_0(%arg0: i32, %arg1: i32, %arg2: i32) -> (i32, i32) {
    %c0_i32 = arith.constant 0 : i32
    return %arg0, %arg2 : i32, i32
  }
  func.func @transform_1(%arg0: i32, %arg1: i32, %arg2: i32) -> (i32, i32) {
    %c0_i32 = arith.constant 0 : i32
    return %arg2, %arg1 : i32, i32
  }
  func.func @transform_2(%arg0: i32, %arg1: i32, %arg2: i32) -> (i32, i32) {
    %c0_i32 = arith.constant 0 : i32
    %c0_i32_0 = arith.constant 0 : i32
    return %c0_i32, %arg1 : i32, i32
  }
  func.func @transform_3(%arg0: i32, %arg1: i32, %arg2: i32) -> (i32, i32) {
    %c0_i32 = arith.constant 0 : i32
    %c0_i32_0 = arith.constant 0 : i32
    return %c0_i32, %arg1 : i32, i32
  }
  func.func @transform_4(%arg0: i32, %arg1: i32, %arg2: i32) -> (i32, i32) {
    %c0_i32 = arith.constant 0 : i32
    return %arg0, %arg1 : i32, i32
  }
}

module attributes {stable_mosaic.version = 11 : i64} {
  func.func @_gemm_bn_kernel(%arg0: i32, %arg1: i32, %arg2: i32, %arg3: memref<16x256xbf16, #tpu.memory_space<vmem>>, %arg4: memref<256x256xbf16, #tpu.memory_space<vmem>>, %arg5: memref<1x256xf32, #tpu.memory_space<vmem>>, %arg6: memref<1x256xf32, #tpu.memory_space<vmem>>, %arg7: memref<16x256xbf16, #tpu.memory_space<vmem>>, %arg8: memref<16x256xf32, #tpu.memory_space<vmem>>) attributes {dimension_semantics = [#tpu.dimension_semantics<parallel>, #tpu.dimension_semantics<parallel>, #tpu.dimension_semantics<arbitrary>], iteration_bounds = array<i64: 1, 2, 1>, scalar_prefetch = 0 : i64, scratch_operands = 1 : i64, tpu.core_type = #tpu.core_type<tc>, window_params = [{transform_indices = @transform_0, window_bounds = array<i64: 16, 256>}, {transform_indices = @transform_1, window_bounds = array<i64: 256, 256>}, {transform_indices = @transform_2, window_bounds = array<i64: 1, 256>}, {transform_indices = @transform_3, window_bounds = array<i64: 1, 256>}, {transform_indices = @transform_4, window_bounds = array<i64: 16, 256>}]} {
    %c0_i32 = arith.constant 0 : i32
    %0 = arith.cmpi eq, %arg2, %c0_i32 : i32
    %1 = arith.extui %0 : i1 to i32
    %c0_i32_0 = arith.constant 0 : i32
    %2 = arith.cmpi ne, %1, %c0_i32_0 : i32
    scf.if %2 {
      %cst_10 = arith.constant 0.000000e+00 : f32
      %12 = vector.broadcast %cst_10 : f32 to vector<16x256xf32>
      %c0_11 = arith.constant 0 : index
      %c0_12 = arith.constant 0 : index
      %13 = vector.load %arg8[%c0_11, %c0_12] : memref<16x256xf32, #tpu.memory_space<vmem>>, vector<16x256xf32>
      tpu.vector_store %arg8[%c0_11, %c0_12], %12 {strides = array<i32>} : memref<16x256xf32, #tpu.memory_space<vmem>>, vector<16x256xf32>,
    } else {
    }
    %c0 = arith.constant 0 : index
    %c0_1 = arith.constant 0 : index
    %3 = vector.load %arg8[%c0, %c0_1] : memref<16x256xf32, #tpu.memory_space<vmem>>, vector<16x256xf32>
    %c0_2 = arith.constant 0 : index
    %c0_3 = arith.constant 0 : index
    %4 = vector.load %arg3[%c0_2, %c0_3] : memref<16x256xbf16, #tpu.memory_space<vmem>>, vector<16x256xbf16>
    %c0_4 = arith.constant 0 : index
    %c0_5 = arith.constant 0 : index
    %5 = vector.load %arg4[%c0_4, %c0_5] : memref<256x256xbf16, #tpu.memory_space<vmem>>, vector<256x256xbf16>
    %cst = arith.constant dense<0.000000e+00> : vector<16x256xf32>
    %6 = tpu.matmul %4, %5, %cst {dimension_numbers = #tpu.dot_dimension_numbers<[1], [0], [0], [1], [0, 0, 1, 1], [], []>} : vector<16x256xbf16>, vector<256x256xbf16>, vector<16x256xf32> -> vector<16x256xf32>
    %7 = arith.addf %3, %6 : vector<16x256xf32>
    %c0_6 = arith.constant 0 : index
    %c0_7 = arith.constant 0 : index
    %8 = vector.load %arg8[%c0_6, %c0_7] : memref<16x256xf32, #tpu.memory_space<vmem>>, vector<16x256xf32>
    tpu.vector_store %arg8[%c0_6, %c0_7], %7 {strides = array<i32>} : memref<16x256xf32, #tpu.memory_space<vmem>>, vector<16x256xf32>,
    %c0_i32_8 = arith.constant 0 : i32
    %9 = arith.cmpi eq, %arg2, %c0_i32_8 : i32
    %10 = arith.extui %9 : i1 to i32
    %c0_i32_9 = arith.constant 0 : i32
    %11 = arith.cmpi ne, %10, %c0_i32_9 : i32
    scf.if %11 {
      %c0_10 = arith.constant 0 : index
      %c0_11 = arith.constant 0 : index
      %12 = vector.load %arg8[%c0_10, %c0_11] : memref<16x256xf32, #tpu.memory_space<vmem>>, vector<16x256xf32>
      %c0_12 = arith.constant 0 : index
      %c0_13 = arith.constant 0 : index
      %13 = vector.load %arg5[%c0_12, %c0_13] : memref<1x256xf32, #tpu.memory_space<vmem>>, vector<1x256xf32>
      %14 = vector.broadcast %13 : vector<1x256xf32> to vector<16x256xf32>
      %15 = arith.mulf %12, %14 : vector<16x256xf32>
      %c0_14 = arith.constant 0 : index
      %c0_15 = arith.constant 0 : index
      %16 = vector.load %arg6[%c0_14, %c0_15] : memref<1x256xf32, #tpu.memory_space<vmem>>, vector<1x256xf32>
      %17 = vector.broadcast %16 : vector<1x256xf32> to vector<16x256xf32>
      %18 = arith.addf %15, %17 : vector<16x256xf32>
      %19 = arith.truncf %18 : vector<16x256xf32> to vector<16x256xbf16>
      %c0_16 = arith.constant 0 : index
      %c0_17 = arith.constant 0 : index
      %20 = vector.load %arg7[%c0_16, %c0_17] : memref<16x256xbf16, #tpu.memory_space<vmem>>, vector<16x256xbf16>
      tpu.vector_store %arg7[%c0_16, %c0_17], %19 {strides = array<i32>} : memref<16x256xbf16, #tpu.memory_space<vmem>>, vector<16x256xbf16>,
    } else {
    }
    return
  }
  func.func @transform_0(%arg0: i32, %arg1: i32, %arg2: i32) -> (i32, i32) {
    %c0_i32 = arith.constant 0 : i32
    return %arg0, %arg2 : i32, i32
  }
  func.func @transform_1(%arg0: i32, %arg1: i32, %arg2: i32) -> (i32, i32) {
    %c0_i32 = arith.constant 0 : i32
    return %arg2, %arg1 : i32, i32
  }
  func.func @transform_2(%arg0: i32, %arg1: i32, %arg2: i32) -> (i32, i32) {
    %c0_i32 = arith.constant 0 : i32
    %c0_i32_0 = arith.constant 0 : i32
    return %c0_i32, %arg1 : i32, i32
  }
  func.func @transform_3(%arg0: i32, %arg1: i32, %arg2: i32) -> (i32, i32) {
    %c0_i32 = arith.constant 0 : i32
    %c0_i32_0 = arith.constant 0 : i32
    return %c0_i32, %arg1 : i32, i32
  }
  func.func @transform_4(%arg0: i32, %arg1: i32, %arg2: i32) -> (i32, i32) {
    %c0_i32 = arith.constant 0 : i32
    return %arg0, %arg1 : i32, i32
  }
}

module attributes {stable_mosaic.version = 11 : i64} {
  func.func @_gemm_bn_kernel(%arg0: i32, %arg1: i32, %arg2: i32, %arg3: memref<16x512xbf16, #tpu.memory_space<vmem>>, %arg4: memref<512x256xbf16, #tpu.memory_space<vmem>>, %arg5: memref<1x256xf32, #tpu.memory_space<vmem>>, %arg6: memref<1x256xf32, #tpu.memory_space<vmem>>, %arg7: memref<16x256xbf16, #tpu.memory_space<vmem>>, %arg8: memref<16x256xbf16, #tpu.memory_space<vmem>>, %arg9: memref<16x256xf32, #tpu.memory_space<vmem>>) attributes {dimension_semantics = [#tpu.dimension_semantics<parallel>, #tpu.dimension_semantics<parallel>, #tpu.dimension_semantics<arbitrary>], iteration_bounds = array<i64: 1, 2, 9>, scalar_prefetch = 0 : i64, scratch_operands = 1 : i64, tpu.core_type = #tpu.core_type<tc>, window_params = [{transform_indices = @transform_0, window_bounds = array<i64: 16, 512>}, {transform_indices = @transform_1, window_bounds = array<i64: 512, 256>}, {transform_indices = @transform_2, window_bounds = array<i64: 1, 256>}, {transform_indices = @transform_3, window_bounds = array<i64: 1, 256>}, {transform_indices = @transform_4, window_bounds = array<i64: 16, 256>}, {transform_indices = @transform_5, window_bounds = array<i64: 16, 256>}]} {
    %c0_i32 = arith.constant 0 : i32
    %0 = arith.cmpi eq, %arg2, %c0_i32 : i32
    %1 = arith.extui %0 : i1 to i32
    %c0_i32_0 = arith.constant 0 : i32
    %2 = arith.cmpi ne, %1, %c0_i32_0 : i32
    scf.if %2 {
      %cst_9 = arith.constant 0.000000e+00 : f32
      %12 = vector.broadcast %cst_9 : f32 to vector<16x256xf32>
      %c0_10 = arith.constant 0 : index
      %c0_11 = arith.constant 0 : index
      %13 = vector.load %arg9[%c0_10, %c0_11] : memref<16x256xf32, #tpu.memory_space<vmem>>, vector<16x256xf32>
      tpu.vector_store %arg9[%c0_10, %c0_11], %12 {strides = array<i32>} : memref<16x256xf32, #tpu.memory_space<vmem>>, vector<16x256xf32>,
    } else {
    }
    %c0 = arith.constant 0 : index
    %c0_1 = arith.constant 0 : index
    %3 = vector.load %arg9[%c0, %c0_1] : memref<16x256xf32, #tpu.memory_space<vmem>>, vector<16x256xf32>
    %c0_2 = arith.constant 0 : index
    %c0_3 = arith.constant 0 : index
    %4 = vector.load %arg3[%c0_2, %c0_3] : memref<16x512xbf16, #tpu.memory_space<vmem>>, vector<16x512xbf16>
    %c0_4 = arith.constant 0 : index
    %c0_5 = arith.constant 0 : index
    %5 = vector.load %arg4[%c0_4, %c0_5] : memref<512x256xbf16, #tpu.memory_space<vmem>>, vector<512x256xbf16>
    %cst = arith.constant dense<0.000000e+00> : vector<16x256xf32>
    %6 = tpu.matmul %4, %5, %cst {dimension_numbers = #tpu.dot_dimension_numbers<[1], [0], [0], [1], [0, 0, 1, 1], [], []>} : vector<16x512xbf16>, vector<512x256xbf16>, vector<16x256xf32> -> vector<16x256xf32>
    %7 = arith.addf %3, %6 : vector<16x256xf32>
    %c0_6 = arith.constant 0 : index
    %c0_7 = arith.constant 0 : index
    %8 = vector.load %arg9[%c0_6, %c0_7] : memref<16x256xf32, #tpu.memory_space<vmem>>, vector<16x256xf32>
    tpu.vector_store %arg9[%c0_6, %c0_7], %7 {strides = array<i32>} : memref<16x256xf32, #tpu.memory_space<vmem>>, vector<16x256xf32>,
    %c8_i32 = arith.constant 8 : i32
    %9 = arith.cmpi eq, %arg2, %c8_i32 : i32
    %10 = arith.extui %9 : i1 to i32
    %c0_i32_8 = arith.constant 0 : i32
    %11 = arith.cmpi ne, %10, %c0_i32_8 : i32
    scf.if %11 {
      %c0_9 = arith.constant 0 : index
      %c0_10 = arith.constant 0 : index
      %12 = vector.load %arg9[%c0_9, %c0_10] : memref<16x256xf32, #tpu.memory_space<vmem>>, vector<16x256xf32>
      %c0_11 = arith.constant 0 : index
      %c0_12 = arith.constant 0 : index
      %13 = vector.load %arg5[%c0_11, %c0_12] : memref<1x256xf32, #tpu.memory_space<vmem>>, vector<1x256xf32>
      %14 = vector.broadcast %13 : vector<1x256xf32> to vector<16x256xf32>
      %15 = arith.mulf %12, %14 : vector<16x256xf32>
      %c0_13 = arith.constant 0 : index
      %c0_14 = arith.constant 0 : index
      %16 = vector.load %arg6[%c0_13, %c0_14] : memref<1x256xf32, #tpu.memory_space<vmem>>, vector<1x256xf32>
      %17 = vector.broadcast %16 : vector<1x256xf32> to vector<16x256xf32>
      %18 = arith.addf %15, %17 : vector<16x256xf32>
      %c0_15 = arith.constant 0 : index
      %c0_16 = arith.constant 0 : index
      %19 = vector.load %arg7[%c0_15, %c0_16] : memref<16x256xbf16, #tpu.memory_space<vmem>>, vector<16x256xbf16>
      %20 = arith.extf %19 : vector<16x256xbf16> to vector<16x256xf32>
      %21 = arith.addf %18, %20 : vector<16x256xf32>
      %cst_17 = arith.constant 0.000000e+00 : f32
      %22 = vector.broadcast %cst_17 : f32 to vector<16x256xf32>
      %23 = arith.maximumf %21, %22 : vector<16x256xf32>
      %24 = arith.truncf %23 : vector<16x256xf32> to vector<16x256xbf16>
      %c0_18 = arith.constant 0 : index
      %c0_19 = arith.constant 0 : index
      %25 = vector.load %arg8[%c0_18, %c0_19] : memref<16x256xbf16, #tpu.memory_space<vmem>>, vector<16x256xbf16>
      tpu.vector_store %arg8[%c0_18, %c0_19], %24 {strides = array<i32>} : memref<16x256xbf16, #tpu.memory_space<vmem>>, vector<16x256xbf16>,
    } else {
    }
    return
  }
  func.func @transform_0(%arg0: i32, %arg1: i32, %arg2: i32) -> (i32, i32) {
    %c0_i32 = arith.constant 0 : i32
    return %arg0, %arg2 : i32, i32
  }
  func.func @transform_1(%arg0: i32, %arg1: i32, %arg2: i32) -> (i32, i32) {
    %c0_i32 = arith.constant 0 : i32
    return %arg2, %arg1 : i32, i32
  }
  func.func @transform_2(%arg0: i32, %arg1: i32, %arg2: i32) -> (i32, i32) {
    %c0_i32 = arith.constant 0 : i32
    %c0_i32_0 = arith.constant 0 : i32
    return %c0_i32, %arg1 : i32, i32
  }
  func.func @transform_3(%arg0: i32, %arg1: i32, %arg2: i32) -> (i32, i32) {
    %c0_i32 = arith.constant 0 : i32
    %c0_i32_0 = arith.constant 0 : i32
    return %c0_i32, %arg1 : i32, i32
  }
  func.func @transform_4(%arg0: i32, %arg1: i32, %arg2: i32) -> (i32, i32) {
    %c0_i32 = arith.constant 0 : i32
    return %arg0, %arg1 : i32, i32
  }
  func.func @transform_5(%arg0: i32, %arg1: i32, %arg2: i32) -> (i32, i32) {
    %c0_i32 = arith.constant 0 : i32
    return %arg0, %arg1 : i32, i32
  }
}

</mosaic_0001>

<bundles_post_ra>
// kernel: adv_resnet_forward.12
= control target key start
LH: loop header
LB: loop body
LE: loop exit
PB: predicated region body
PF: predicated region fallthrough
CT: control target
= control target key end

     0   :  { %s1245_s15 = smov 0   ;;  %s1247_s16 = smov 0   ;;  %s1419_s0 = inlined_call_operand.vmem [shape: bf16[512,256], index: 0, kind: input, shape index: {}]   ;;  %s1420_s1 = inlined_call_operand.vmem [shape: bf16[256,128], index: 1, kind: input, shape index: {}]   ;;  %s1421_s2 = inlined_call_operand.vmem [shape: f32[1,128], index: 2, kind: input, shape index: {}]   ;;  %s1422_s3 = inlined_call_operand.vmem [shape: f32[1,128], index: 3, kind: input, shape index: {}]   ;;  %s1423_s4 = inlined_call_operand.vmem [shape: bf16[512,128], index: 4, kind: output, shape index: {}]  }
   0x1   :  { %s1249_s17 = smov 0  }
   0x2 LB: > { %s33_s18 = sadd.s32 1, %s1214_s16  ;;  %p938_p0 = scmp.ge.s32.totalorder %s1218_s17, 1  ;;  %s1218_s17 = sphi %s1249_s17, %s14_s17   ;;  %s1214_s16 = sphi %s1247_s16, %s1425_s16   ;;  %s1210_s15 = sphi %s1245_s15, %s1424_s15  }
   0x3   : > { %p35_p1 = scmp.ge.s32.totalorder %s33_s18, 4  ;;  %p224_p2 = scmp.lt.s32.totalorder %s1218_s17, 5 }
   0x5   : > { %s1427_s18 = smov (%p35_p1, %s33_s18), 0  ;;  %p225_p3 = pnand %p938_p0, %p224_p2 }
   0x6   : > { %s939_s5 = sshll.u32 (!%p225_p3), %s1210_s15, 4 }
   0x7   : > { %228 = sbr.rel (%p225_p3) target bundleno = 244 (0xf4), region = 36  ;;  %p274_p4 = scmp.lt.s32.totalorder (!%p225_p3), %s939_s5, 63 }
   0xc   : > { %v1098_v0 = vld [vmem:[%s1420_s1 + $0x38] sm:$0xff]  ;;  %v1097_v2 = vld [vmem:[%s1420_s1 + $0x30] sm:$0xff]  ;;  %v1096_v4 = vld [vmem:[%s1420_s1 + $0x28] sm:$0xff]  ;;  %s1429_s5 = smov (!%p274_p4, %s939_s5), 63 }
   0xd   : > { %v1106_v1 = vld [vmem:[%s1420_s1 + $0x78] sm:$0xff]  ;;  %568 = vmatpush.bf16.msra.mxu0 %v1098_v0  ;;  %1154 = vmatpush.bf16.msra.mxu2 %v1098_v0  ;;  %v1105_v3 = vld [vmem:[%s1420_s1 + $0x70] sm:$0xff]  ;;  %v1104_v5 = vld [vmem:[%s1420_s1 + $0x68] sm:$0xff]  ;;  %s1074_s21 = sshll.u32 %s1429_s5, 3  ;;  %s943_s12 = sshll.u32 %s1429_s5, 2 }
   0xe   : > { %617 = vmatpush.bf16.msra.mxu1 %v1106_v1  ;;  %1162 = vmatpush.bf16.msra.mxu3 %v1106_v1  ;;  %v1095_v6 = vld [vmem:[%s1420_s1 + $0x20] sm:$0xff]  ;;  %v1094_v8 = vld [vmem:[%s1420_s1 + $0x18] sm:$0xff]  ;;  %v1093_v10 = vld [vmem:[%s1420_s1 + $0x10] sm:$0xff]  ;;  %s1311_s26 = scalar_lea.vmem %s1419_s0, %s1074_s21  ;;  %s1373_s15 = scalar_lea.vmem %s1423_s4, %s943_s12 }
   0xf   : > { %v1103_v7 = vld [vmem:[%s1420_s1 + $0x60] sm:$0xff]  ;;  %v1102_v9 = vld [vmem:[%s1420_s1 + $0x58] sm:$0xff]  ;;  %v1101_v11 = vld [vmem:[%s1420_s1 + $0x50] sm:$0xff] }
  0x10   : > { %v1092_v12 = vld [vmem:[%s1420_s1 + $0x8] sm:$0xff]  ;;  %v1091_v14 = vld [vmem:[%s1420_s1] sm:$0xff]  ;;  %v954_v28 = vld [vmem:[%s1311_s26 + $0x10] sm:$0xf] }
  0x11   : > { %569 = vmatpush.bf16.msra.mxu0 %v1097_v2  ;;  %1155 = vmatpush.bf16.msra.mxu2 %v1097_v2  ;;  %v1100_v13 = vld [vmem:[%s1420_s1 + $0x48] sm:$0xff]  ;;  %v1099_v15 = vld [vmem:[%s1420_s1 + $0x40] sm:$0xff]  ;;  %v1078_v29 = vld [vmem:[%s1311_s26 + $0x14] sm:$0xf0] }
  0x12   : > { %618 = vmatpush.bf16.msra.mxu1 %v1105_v3  ;;  %1163 = vmatpush.bf16.msra.mxu3 %v1105_v3  ;;  %v946_v16 = vld [vmem:[%s1311_s26] sm:$0xf]  ;;  %v1076_v17 = vld [vmem:[%s1311_s26 + $0x4] sm:$0xf0]  ;;  %v1075_v20 = vld [vmem:[%s1311_s26 + $0x4] sm:$0xf]  ;;  %v955_v36 = vor.u32 %v1078_v29, %v954_v28 }
  0x13   : > { %v978_v18 = vld [vmem:[%s1311_s26 + $0x40] sm:$0xf]  ;;  %v1084_v19 = vld [vmem:[%s1311_s26 + $0x44] sm:$0xf0]  ;;  %v948_v21 = vld [vmem:[%s1311_s26 + $0x8] sm:$0xf0]  ;;  %v947_v24 = vor.u32 %v1076_v17, %v946_v16 }
  0x14   : > { %v1083_v22 = vld [vmem:[%s1311_s26 + $0x44] sm:$0xf]  ;;  %v980_v23 = vld [vmem:[%s1311_s26 + $0x48] sm:$0xf0]  ;;  %v979_v25 = vor.u32 %v1084_v19, %v978_v18  ;;  %v951_v26 = vor.u32 %v1075_v20, %v948_v21  ;;  %v986_v30 = vld [vmem:[%s1311_s26 + $0x50] sm:$0xf] }
  0x15   : > { %570 = vmatpush.bf16.msra.mxu0 %v1096_v4  ;;  %1156 = vmatpush.bf16.msra.mxu2 %v1096_v4  ;;  %v983_v27 = vor.u32 %v1083_v22, %v980_v23  ;;  %v1086_v31 = vld [vmem:[%s1311_s26 + $0x54] sm:$0xf0]  ;;  %v1077_v32 = vld [vmem:[%s1311_s26 + $0x14] sm:$0xf]  ;;  %v956_v33 = vld [vmem:[%s1311_s26 + $0x18] sm:$0xf0] }
  0x16   : > { %619 = vmatpush.bf16.msra.mxu1 %v1104_v5  ;;  %1164 = vmatpush.bf16.msra.mxu3 %v1104_v5  ;;  %v1085_v34 = vld [vmem:[%s1311_s26 + $0x54] sm:$0xf]  ;;  %v988_v35 = vld [vmem:[%s1311_s26 + $0x58] sm:$0xf0]  ;;  %v987_v37 = vor.u32 %v1086_v31, %v986_v30  ;;  %v959_v38 = vor.u32 %v1077_v32, %v956_v33  ;;  %v962_v40 = vld [vmem:[%s1311_s26 + $0x20] sm:$0xf] }
  0x17   : > { %v991_v39 = vor.u32 %v1085_v34, %v988_v35  ;;  %v1080_v41 = vld [vmem:[%s1311_s26 + $0x24] sm:$0xf0]  ;;  %v994_v42 = vld [vmem:[%s1311_s26 + $0x60] sm:$0xf]  ;;  %v1079_v44 = vld [vmem:[%s1311_s26 + $0x24] sm:$0xf] }
  0x18   : > { %v1088_v43 = vld [vmem:[%s1311_s26 + $0x64] sm:$0xf0]  ;;  %v964_v45 = vld [vmem:[%s1311_s26 + $0x28] sm:$0xf0]  ;;  %v1087_v46 = vld [vmem:[%s1311_s26 + $0x64] sm:$0xf]  ;;  %v963_v48 = vor.u32 %v1080_v41, %v962_v40 }
  0x19   : > { %571 = vmatpush.bf16.msra.mxu0 %v1095_v6  ;;  %1157 = vmatpush.bf16.msra.mxu2 %v1095_v6  ;;  %v996_v47 = vld [vmem:[%s1311_s26 + $0x68] sm:$0xf0]  ;;  %v995_v49 = vor.u32 %v1088_v43, %v994_v42  ;;  %v967_v50 = vor.u32 %v1079_v44, %v964_v45  ;;  %v970_v52 = vld [vmem:[%s1311_s26 + $0x30] sm:$0xf]  ;;  %v1082_v53 = vld [vmem:[%s1311_s26 + $0x34] sm:$0xf0] }
  0x1a   : > { %620 = vmatpush.bf16.msra.mxu1 %v1103_v7  ;;  %1165 = vmatpush.bf16.msra.mxu3 %v1103_v7  ;;  %v999_v51 = vor.u32 %v1087_v46, %v996_v47  ;;  %v1002_v54 = vld [vmem:[%s1311_s26 + $0x70] sm:$0xf]  ;;  %v1090_v55 = vld [vmem:[%s1311_s26 + $0x74] sm:$0xf0]  ;;  %v1081_v56 = vld [vmem:[%s1311_s26 + $0x34] sm:$0xf]  ;;  %v971_v60 = vor.u32 %v1082_v53, %v970_v52 }
  0x1b   : > { %v972_v57 = vld [vmem:[%s1311_s26 + $0x38] sm:$0xf0]  ;;  %v1089_v58 = vld [vmem:[%s1311_s26 + $0x74] sm:$0xf]  ;;  %v1003_v61 = vor.u32 %v1090_v55, %v1002_v54  ;;  %v1357_v3 = vld [vmem:[%s1421_s2] ss:$0 sm:$0xff] }
  0x1c   : > { %v1004_v59 = vld [vmem:[%s1311_s26 + $0x78] sm:$0xf0]  ;;  %v975_v62 = vor.u32 %v1081_v56, %v972_v57  ;;  %v1363_v7 = vld [vmem:[%s1422_s3] ss:$0 sm:$0xff] }
  0x1d   : > { %572 = vmatpush.bf16.msra.mxu0 %v1094_v8  ;;  %1158 = vmatpush.bf16.msra.mxu2 %v1094_v8  ;;  %v1007_v63 = vor.u32 %v1089_v58, %v1004_v59 }
  0x1e   : > { %621 = vmatpush.bf16.msra.mxu1 %v1102_v9  ;;  %1166 = vmatpush.bf16.msra.mxu3 %v1102_v9 }
  0x21   : > { %573 = vmatpush.bf16.msra.mxu0 %v1093_v10  ;;  %1159 = vmatpush.bf16.msra.mxu2 %v1093_v10 }
  0x22   : > { %622 = vmatpush.bf16.msra.mxu1 %v1101_v11  ;;  %1167 = vmatpush.bf16.msra.mxu3 %v1101_v11 }
  0x25   : > { %574 = vmatpush.bf16.msra.mxu0 %v1092_v12  ;;  %1160 = vmatpush.bf16.msra.mxu2 %v1092_v12 }
  0x26   : > { %623 = vmatpush.bf16.msra.mxu1 %v1100_v13  ;;  %1168 = vmatpush.bf16.msra.mxu3 %v1100_v13 }
  0x29   : > { %575 = vmatpush.bf16.msra.mxu0 %v1091_v14  ;;  %1161 = vmatpush.bf16.msra.mxu2 %v1091_v14 }
  0x2a   : > { %624 = vmatpush.bf16.msra.mxu1 %v1099_v15  ;;  %1169 = vmatpush.bf16.msra.mxu3 %v1099_v15 }
  0x2c   : > { %576 = vmatmul.bf16.vlgmr.msra.gmra.mxu0 %v947_v24  ;;  %596 = vmatmul.bf16.vlgmr.msra.gmra.mxu2 %v979_v25 }
  0x2d   : > { %625 = vmatmul.bf16.vlgmr.msra.gmra.mxu1 %v951_v26  ;;  %645 = vmatmul.bf16.vlgmr.msra.gmra.mxu3 %v983_v27 }
  0x3c   : > { %581 = vmatmul.bf16.gmra.mxu0 %v955_v36  ;;  %601 = vmatmul.bf16.gmra.mxu2 %v987_v37 }
  0x3d   : > { %630 = vmatmul.bf16.gmra.mxu1 %v959_v38  ;;  %650 = vmatmul.bf16.gmra.mxu3 %v991_v39 }
  0x4c   : > { %586 = vmatmul.bf16.gmra.mxu0 %v963_v48  ;;  %606 = vmatmul.bf16.gmra.mxu2 %v995_v49 }
  0x4d   : > { %635 = vmatmul.bf16.gmra.mxu1 %v967_v50  ;;  %655 = vmatmul.bf16.gmra.mxu3 %v999_v51 }
  0x5c   : > { %591 = vmatmul.bf16.gmra.mxu0 %v971_v60  ;;  %611 = vmatmul.bf16.gmra.mxu2 %v1003_v61 }
  0x5d   : > { %640 = vmatmul.bf16.gmra.mxu1 %v975_v62  ;;  %660 = vmatmul.bf16.gmra.mxu3 %v1007_v63 }
  0xa9   : > { %v577_v0 = vpop.f32.mrf.mxu0 }
  0xaa   : > { %v626_v1 = vpop.f32.mrf.mxu1 }
  0xab   : > { %v627_v2 = vadd.f32 %v626_v1, %v577_v0 }
  0xad   : > { %v721_v6 = vmul.f32 %v1357_v3, %v627_v2 }
  0xaf   : > { %v597_v4 = vpop.f32.mrf.mxu2  ;;  %v741_v12 = vadd.f32 %v1363_v7, %v721_v6 }
  0xb0   : > { %v646_v5 = vpop.f32.mrf.mxu3 }
  0xb1   : > { %v579_v8 = vpop.f32.mrf.mxu0  ;;  %v647_v10 = vadd.f32 %v646_v5, %v597_v4  ;;  %v757_v18 = vmax.f32 %v741_v12, 0.0 }
  0xb2   : > { %v628_v9 = vpop.f32.mrf.mxu1 }
  0xb3   : > { %v629_v11 = vadd.f32 %v628_v9, %v579_v8  ;;  %v729_v14 = vmul.f32 %v1357_v3, %v647_v10 }
  0xb5   : > { %v722_v13 = vmul.f32 %v1357_v3, %v629_v11  ;;  %v749_v23 = vadd.f32 %v1363_v7, %v729_v14 }
  0xb7   : > { %v742_v15 = vadd.f32 %v1363_v7, %v722_v13  ;;  %v599_v16 = vpop.f32.mrf.mxu2  ;;  %v765_v28 = vmax.f32 %v749_v23, 0.0 }
  0xb8   : > { %v648_v17 = vpop.f32.mrf.mxu3 }
  0xb9   : > { %v758_v19 = vmax.f32 %v742_v15, 0.0  ;;  %v649_v20 = vadd.f32 %v648_v17, %v599_v16  ;;  %v582_v21 = vpop.f32.mrf.mxu0 }
  0xba   : > { %v631_v22 = vpop.f32.mrf.mxu1 }
  0xbb   : > { %v1110_v24 = vpack.c.bf16 %v758_v19, %v757_v18  ;;  %v730_v25 = vmul.f32 %v1357_v3, %v649_v20  ;;  %v632_v27 = vadd.f32 %v631_v22, %v582_v21 }
  0xbd   : > { %1111 = vst [vmem:[%s1373_s15] sm:$0xff] %v1110_v24   ;;  %v750_v26 = vadd.f32 %v1363_v7, %v730_v25  ;;  %v723_v33 = vmul.f32 %v1357_v3, %v632_v27 }
  0xbf   : > { %v766_v29 = vmax.f32 %v750_v26, 0.0  ;;  %v602_v30 = vpop.f32.mrf.mxu2  ;;  %v743_v38 = vadd.f32 %v1363_v7, %v723_v33 }
  0xc0   : > { %v651_v31 = vpop.f32.mrf.mxu3 }
  0xc1   : > { %v1130_v32 = vpack.c.bf16 %v766_v29, %v765_v28  ;;  %v584_v34 = vpop.f32.mrf.mxu0  ;;  %v652_v36 = vadd.f32 %v651_v31, %v602_v30  ;;  %v759_v44 = vmax.f32 %v743_v38, 0.0 }
  0xc2   : > { %v633_v35 = vpop.f32.mrf.mxu1 }
  0xc3   : > { %1150 = vst [vmem:[%s1373_s15 + $0x20] sm:$0xff] %v1130_v32   ;;  %v634_v37 = vadd.f32 %v633_v35, %v584_v34  ;;  %v731_v40 = vmul.f32 %v1357_v3, %v652_v36 }
  0xc5   : > { %v724_v39 = vmul.f32 %v1357_v3, %v634_v37  ;;  %v751_v49 = vadd.f32 %v1363_v7, %v731_v40 }
  0xc7   : > { %v744_v41 = vadd.f32 %v1363_v7, %v724_v39  ;;  %v604_v42 = vpop.f32.mrf.mxu2  ;;  %v767_v54 = vmax.f32 %v751_v49, 0.0 }
  0xc8   : > { %v653_v43 = vpop.f32.mrf.mxu3 }
  0xc9   : > { %v760_v45 = vmax.f32 %v744_v41, 0.0  ;;  %v654_v46 = vadd.f32 %v653_v43, %v604_v42  ;;  %v587_v47 = vpop.f32.mrf.mxu0 }
  0xca   : > { %v636_v48 = vpop.f32.mrf.mxu1 }
  0xcb   : > { %v1115_v50 = vpack.c.bf16 %v760_v45, %v759_v44  ;;  %v732_v51 = vmul.f32 %v1357_v3, %v654_v46  ;;  %v637_v53 = vadd.f32 %v636_v48, %v587_v47 }
  0xcd   : > { %1147 = vst [vmem:[%s1373_s15 + $0x8] sm:$0xff] %v1115_v50   ;;  %v752_v52 = vadd.f32 %v1363_v7, %v732_v51  ;;  %v725_v59 = vmul.f32 %v1357_v3, %v637_v53 }
  0xcf   : > { %v768_v55 = vmax.f32 %v752_v52, 0.0  ;;  %v607_v56 = vpop.f32.mrf.mxu2  ;;  %v745_v0 = vadd.f32 %v1363_v7, %v725_v59 }
  0xd0   : > { %v656_v57 = vpop.f32.mrf.mxu3 }
  0xd1   : > { %v1135_v58 = vpack.c.bf16 %v768_v55, %v767_v54  ;;  %v589_v60 = vpop.f32.mrf.mxu0  ;;  %v657_v62 = vadd.f32 %v656_v57, %v607_v56  ;;  %v761_v8 = vmax.f32 %v745_v0, 0.0 }
  0xd2   : > { %v638_v61 = vpop.f32.mrf.mxu1 }
  0xd3   : > { %1151 = vst [vmem:[%s1373_s15 + $0x28] sm:$0xff] %v1135_v58   ;;  %v639_v63 = vadd.f32 %v638_v61, %v589_v60  ;;  %v733_v2 = vmul.f32 %v1357_v3, %v657_v62 }
  0xd5   : > { %v726_v1 = vmul.f32 %v1357_v3, %v639_v63  ;;  %v753_v13 = vadd.f32 %v1363_v7, %v733_v2 }
  0xd7   : > { %v746_v4 = vadd.f32 %v1363_v7, %v726_v1  ;;  %v609_v5 = vpop.f32.mrf.mxu2  ;;  %v769_v18 = vmax.f32 %v753_v13, 0.0 }
  0xd8   : > { %v658_v6 = vpop.f32.mrf.mxu3 }
  0xd9   : > { %v762_v9 = vmax.f32 %v746_v4, 0.0  ;;  %v659_v10 = vadd.f32 %v658_v6, %v609_v5  ;;  %v592_v11 = vpop.f32.mrf.mxu0 }
  0xda   : > { %v641_v12 = vpop.f32.mrf.mxu1 }
  0xdb   : > { %v1120_v14 = vpack.c.bf16 %v762_v9, %v761_v8  ;;  %v734_v15 = vmul.f32 %v1357_v3, %v659_v10  ;;  %v642_v17 = vadd.f32 %v641_v12, %v592_v11 }
  0xdd   : > { %1148 = vst [vmem:[%s1373_s15 + $0x10] sm:$0xff] %v1120_v14   ;;  %v754_v16 = vadd.f32 %v1363_v7, %v734_v15  ;;  %v727_v23 = vmul.f32 %v1357_v3, %v642_v17 }
  0xdf   : > { %v770_v19 = vmax.f32 %v754_v16, 0.0  ;;  %v612_v20 = vpop.f32.mrf.mxu2  ;;  %v747_v28 = vadd.f32 %v1363_v7, %v727_v23 }
  0xe0   : > { %v661_v21 = vpop.f32.mrf.mxu3 }
  0xe1   : > { %v1140_v22 = vpack.c.bf16 %v770_v19, %v769_v18  ;;  %v594_v24 = vpop.f32.mrf.mxu0  ;;  %v662_v26 = vadd.f32 %v661_v21, %v612_v20  ;;  %v763_v34 = vmax.f32 %v747_v28, 0.0 }
  0xe2   : > { %v643_v25 = vpop.f32.mrf.mxu1 }
  0xe3   : > { %1152 = vst [vmem:[%s1373_s15 + $0x30] sm:$0xff] %v1140_v22   ;;  %v644_v27 = vadd.f32 %v643_v25, %v594_v24  ;;  %v735_v30 = vmul.f32 %v1357_v3, %v662_v26 }
  0xe5   : > { %v728_v29 = vmul.f32 %v1357_v3, %v644_v27  ;;  %v755_v37 = vadd.f32 %v1363_v7, %v735_v30 }
  0xe7   : > { %v748_v31 = vadd.f32 %v1363_v7, %v728_v29  ;;  %v614_v32 = vpop.f32.mrf.mxu2  ;;  %v771_v41 = vmax.f32 %v755_v37, 0.0 }
  0xe8   : > { %v663_v33 = vpop.f32.mrf.mxu3 }
  0xe9   : > { %v764_v35 = vmax.f32 %v748_v31, 0.0  ;;  %v664_v36 = vadd.f32 %v663_v33, %v614_v32 }
  0xeb   : > { %v1125_v38 = vpack.c.bf16 %v764_v35, %v763_v34  ;;  %v736_v39 = vmul.f32 %v1357_v3, %v664_v36 }
  0xed   : > { %1149 = vst [vmem:[%s1373_s15 + $0x18] sm:$0xff] %v1125_v38   ;;  %v756_v40 = vadd.f32 %v1363_v7, %v736_v39 }
  0xef   : > { %v772_v42 = vmax.f32 %v756_v40, 0.0 }
  0xf1   : > { %v1145_v43 = vpack.c.bf16 %v772_v42, %v771_v41 }
  0xf3   : > { %1153 = vst [vmem:[%s1373_s15 + $0x38] sm:$0xff] %v1145_v43  }
  0xf4 PF: > { %s14_s17 = sadd.s32 1, %s1218_s17   ;;  %s1424_s15 = smov %s1214_s16 }
  0xf5   : > { %p11_p5 = scmp.ge.s32.totalorder %s14_s17, 6   ;;  %s1425_s16 = smov %s1427_s18 }
  0xf7   :  { %13 = sbr.rel (!%p11_p5) target bundleno = 2 (0x2), region = 83 }

// kernel: adv_resnet_forward.13
= control target key start
LH: loop header
LB: loop body
LE: loop exit
PB: predicated region body
PF: predicated region fallthrough
CT: control target
= control target key end

     0   :  { %s1330_s15 = smov 0   ;;  %s1332_s16 = smov 0   ;;  %s1506_s0 = inlined_call_operand.vmem [shape: bf16[128,1152], index: 0, kind: input, shape index: {}]   ;;  %s1507_s1 = inlined_call_operand.vmem [shape: bf16[1152,128], index: 1, kind: input, shape index: {}]   ;;  %s1508_s2 = inlined_call_operand.vmem [shape: f32[1,128], index: 2, kind: input, shape index: {}]   ;;  %s1509_s3 = inlined_call_operand.vmem [shape: f32[1,128], index: 3, kind: input, shape index: {}]   ;;  %s1510_s4 = inlined_call_operand.vmem [shape: bf16[128,128], index: 4, kind: output, shape index: {}]  }
   0x1   :  { %s1334_s17 = smov 0   ;;  %s1336_s18 = smov 0  }
   0x2   :  { %s1338_s19 = smov 0   ;;  %s1340_s20 = smov 0  }
   0x3   :  { %s1342_s21 = smov 0  }
   0x4 LB: > { %s26_s22 = sadd.s32 1, %s1294_s19  ;;  %s33_s23 = sadd.s32 1, %s1298_s20  ;;  %s1302_s21 = sphi %s1342_s21, %s14_s21   ;;  %s1298_s20 = sphi %s1340_s20, %s1516_s20   ;;  %s1294_s19 = sphi %s1338_s19, %s1515_s19   ;;  %s1290_s18 = sphi %s1336_s18, %s1514_s18   ;;  %s1286_s17 = sphi %s1334_s17, %s1513_s17   ;;  %s1282_s16 = sphi %s1332_s16, %s1512_s16   ;;  %s1278_s15 = sphi %s1330_s15, %s1511_s15  }
   0x5   : > { %p27_p0 = scmp.ge.s32.totalorder %s26_s22, 3  ;;  %p49_p1 = scmp.ne.s32.totalorder %s1282_s16, %s1278_s15 }
   0x6   : > { %p50_p2 = scmp.eq.s32.totalorder %s1302_s21, 0  ;;  %s42_s27 = sadd.s32 1, %s1282_s16 }
   0x7   : > { %s1518_s22 = smov (%p27_p0, %s26_s22), 0  ;;  %s1520_s23 = smov (!%p27_p0, %s33_s23), %s1298_s20 }
   0x8   : > { %p51_p3 = por %p50_p2, %p49_p1  ;;  %p35_p4 = scmp.ge.s32.totalorder %s1520_s23, 2 }
   0x9   : > { %s38_s24 = ssub.s32 %s1294_s19, %s1518_s22  ;;  %p947_p6 = scmp.ge.s32.totalorder %s1302_s21, 6 }
   0xa   : > { %s1522_s23 = smov (%p35_p4, %s1520_s23), 0 }
   0xb   : > { %s37_s25 = ssub.s32 %s1298_s20, %s1522_s23  ;;  %195 = sbr.rel (%p947_p6) target bundleno = 41 (0x29), region = 24 }
   0xc   : > { %s39_s26 = sor.u32 %s38_s24, %s37_s25 }
   0xd   : > { %p40_p5 = scmp.eq.s32.totalorder %s39_s26, 0 }
   0xf   : > { %s1381_s28 = scalar_select %p40_p5, %s1282_s16, %s42_s27  }
  0x10   : > { %198 = sbr.rel (!%p51_p3) target bundleno = 41 (0x29), region = 28  ;;  %s200_s29 = sand.u32 (%p51_p3), 1, %s1282_s16  }
  0x11   : > { %s204_s30 = smul.u32 (%p51_p3), 3, %s1294_s19 }
  0x12   : > { %s1186_s5 = smul.u32 (%p51_p3), 96, %s200_s29 }
  0x13   : > { %s1187_s6 = smul.u32 (%p51_p3), 72, %s1298_s20 }
  0x14   : > { %s202_s12 = scalar_lea.vmem (%p51_p3), [#allocation3], %s1186_s5 }
  0x15   : > { %s206_s7 = sadd.s32 %s1187_s6, %s204_s30 }
  0x16   : > { %s950_s8 = sshll.u32 %s206_s7, 2 }
  0x17   : > { %s1390_s11 = scalar_lea.vmem %s1506_s0, %s950_s8 }
  0x18   : > { %v223_v0 = vld [vmem:[%s1390_s11] sm:$0xff]  ;;  %v227_v2 = vld [vmem:[%s1390_s11 + $0x48] sm:$0xff]  ;;  %v231_v4 = vld [vmem:[%s1390_s11 + $0x90] sm:$0xff] }
  0x19   : > { %v225_v1 = vld [vmem:[%s1390_s11 + $0x24] sm:$0xff]  ;;  %224 = vst [vmem:[%s202_s12] sm:$0xff] %v223_v0  ;;  %v229_v3 = vld [vmem:[%s1390_s11 + $0x6c] sm:$0xff]  ;;  %v233_v5 = vld [vmem:[%s1390_s11 + $0xb4] sm:$0xff] }
  0x1a   : > { %226 = vst [vmem:[%s202_s12 + $0xc] sm:$0xff] %v225_v1  ;;  %v235_v6 = vld [vmem:[%s1390_s11 + $0xd8] sm:$0xff]  ;;  %v951_v8 = vld [vmem:[%s1390_s11 + $0x8] sm:$0xf]  ;;  %v953_v9 = vld [vmem:[%s1390_s11 + $0x2c] sm:$0xf] }
  0x1b   : > { %228 = vst [vmem:[%s202_s12 + $0x18] sm:$0xff] %v227_v2  ;;  %v237_v7 = vld [vmem:[%s1390_s11 + $0xfc] sm:$0xff]  ;;  %v955_v10 = vld [vmem:[%s1390_s11 + $0x50] sm:$0xf]  ;;  %v957_v11 = vld [vmem:[%s1390_s11 + $0x74] sm:$0xf] }
  0x1c   : > { %230 = vst [vmem:[%s202_s12 + $0x24] sm:$0xff] %v229_v3  ;;  %v959_v12 = vld [vmem:[%s1390_s11 + $0x98] sm:$0xf]  ;;  %v961_v13 = vld [vmem:[%s1390_s11 + $0xbc] sm:$0xf] }
  0x1d   : > { %232 = vst [vmem:[%s202_s12 + $0x30] sm:$0xff] %v231_v4  ;;  %v963_v14 = vld [vmem:[%s1390_s11 + $0xe0] sm:$0xf]  ;;  %v965_v15 = vld [vmem:[%s1390_s11 + $0x104] sm:$0xf] }
  0x1e   : > { %234 = vst [vmem:[%s202_s12 + $0x3c] sm:$0xff] %v233_v5 }
  0x1f   : > { %236 = vst [vmem:[%s202_s12 + $0x48] sm:$0xff] %v235_v6 }
  0x20   : > { %238 = vst [vmem:[%s202_s12 + $0x54] sm:$0xff] %v237_v7 }
  0x21   : > { %952 = vst [vmem:[%s202_s12 + $0x8] sm:$0xf] %v951_v8 }
  0x22   : > { %954 = vst [vmem:[%s202_s12 + $0x14] sm:$0xf] %v953_v9 }
  0x23   : > { %956 = vst [vmem:[%s202_s12 + $0x20] sm:$0xf] %v955_v10 }
  0x24   : > { %958 = vst [vmem:[%s202_s12 + $0x2c] sm:$0xf] %v957_v11 }
  0x25   : > { %960 = vst [vmem:[%s202_s12 + $0x38] sm:$0xf] %v959_v12 }
  0x26   : > { %962 = vst [vmem:[%s202_s12 + $0x44] sm:$0xf] %v961_v13 }
  0x27   : > { %964 = vst [vmem:[%s202_s12 + $0x50] sm:$0xf] %v963_v14 }
  0x28   : > { %966 = vst [vmem:[%s202_s12 + $0x5c] sm:$0xf] %v965_v15 }
  0x29 PF: > { %p967_p7 = scmp.ge.s32.totalorder %s1302_s21, 1  ;;  %p279_p8 = scmp.lt.s32.totalorder %s1302_s21, 7 }
  0x2b   : > { %p280_p9 = pnand %p967_p7, %p279_p8 }
  0x2c   : > { %s286_s13 = sand.u32 (!%p280_p9), 1, %s1278_s15   ;;  %s330_s14 = smul.u32 (!%p280_p9), 48, %s1286_s17 }
  0x2d   : > { %283 = sbr.rel (%p280_p9) target bundleno = 310 (0x136), region = 58  ;;  %s969_s25 = sshll.u32 (!%p280_p9), %s1290_s18, 3 }
  0x2e   : > { %s1188_s24 = smul.u32 (!%p280_p9), 96, %s286_s13  ;;  %p331_p10 = scmp.lt.s32.totalorder (!%p280_p9), %s330_s14, 143 }
  0x2f   : > { %p346_p11 = scmp.lt.s32.totalorder (!%p280_p9), %s969_s25, 15  ;;  %p971_p12 = scmp.ne.s32.totalorder (!%p280_p9), %s1286_s17, 0 }
  0x30   : > { %s1423_s15 = scalar_lea.vmem (!%p280_p9), [#allocation3], %s1188_s24 }
  0x32   : > { %s1524_s14 = smov (!%p331_p10, %s330_s14), 143  ;;  %s1526_s25 = smov (!%p346_p11, %s969_s25), 15 }
  0x33   : > { %s968_s26 = sshll.u32 %s1524_s14, 2  ;;  %s970_s5 = sshll.u32 %s1526_s25, 2 }
  0x34   : > { %s1416_s30 = scalar_lea.vmem %s1507_s1, %s968_s26  ;;  %s1421_s8 = scalar_lea.vmem %s1510_s4, %s970_s5 }
  0x35   : > { %357 = sbr.rel (%p971_p12) target bundleno = 67 (0x43), region = 66 }
  0x3a   : > { %v1304_v16 = vmov 0.0  }
  0x3b   : > { %358 = vst [vmem:[#allocation2 + $0x30] sm:$0xff] %v1304_v16 }
  0x3c   : > { %359 = vst [vmem:[#allocation2] sm:$0xff] %v1304_v16 }
  0x3d   : > { %360 = vst [vmem:[#allocation2 + $0x18] sm:$0xff] %v1304_v16 }
  0x3e   : > { %361 = vst [vmem:[#allocation2 + $0x10] sm:$0xff] %v1304_v16 }
  0x3f   : > { %362 = vst [vmem:[#allocation2 + $0x8] sm:$0xff] %v1304_v16 }
  0x40   : > { %363 = vst [vmem:[#allocation2 + $0x20] sm:$0xff] %v1304_v16 }
  0x41   : > { %364 = vst [vmem:[#allocation2 + $0x28] sm:$0xff] %v1304_v16 }
  0x42   : > { %365 = vst [vmem:[#allocation2 + $0x38] sm:$0xff] %v1304_v16 }
  0x43 PF: > { %v1138_v17 = vld [vmem:[%s1416_s30 + $0x38] sm:$0xff]  ;;  %v1137_v20 = vld [vmem:[%s1416_s30 + $0x30] sm:$0xff]  ;;  %v1136_v23 = vld [vmem:[%s1416_s30 + $0x28] sm:$0xff]  ;;  %p1116_p13 = scmp.ne.s32.totalorder %s1286_s17, 2 }
  0x44   : > { %v1146_v18 = vld [vmem:[%s1416_s30 + $0x78] sm:$0xff]  ;;  %646 = vmatpush.bf16.msra.mxu0 %v1138_v17  ;;  %v1145_v21 = vld [vmem:[%s1416_s30 + $0x70] sm:$0xff]  ;;  %1178 = vmatpush.bf16.msra.mxu3 %v1138_v17  ;;  %v1144_v24 = vld [vmem:[%s1416_s30 + $0x68] sm:$0xff] }
  0x45   : > { %v1154_v19 = vld [vmem:[%s1416_s30 + $0xb8] sm:$0xff]  ;;  %675 = vmatpush.bf16.msra.mxu1 %v1146_v18  ;;  %v1153_v22 = vld [vmem:[%s1416_s30 + $0xb0] sm:$0xff]  ;;  %v1152_v25 = vld [vmem:[%s1416_s30 + $0xa8] sm:$0xff] }
  0x46   : > { %704 = vmatpush.bf16.msra.mxu2 %v1154_v19  ;;  %v1135_v26 = vld [vmem:[%s1416_s30 + $0x20] sm:$0xff]  ;;  %v1134_v29 = vld [vmem:[%s1416_s30 + $0x18] sm:$0xff]  ;;  %v1133_v32 = vld [vmem:[%s1416_s30 + $0x10] sm:$0xff] }
  0x47   : > { %v1143_v27 = vld [vmem:[%s1416_s30 + $0x60] sm:$0xff]  ;;  %v1142_v30 = vld [vmem:[%s1416_s30 + $0x58] sm:$0xff]  ;;  %v1141_v33 = vld [vmem:[%s1416_s30 + $0x50] sm:$0xff] }
  0x48   : > { %647 = vmatpush.bf16.msra.mxu0 %v1137_v20  ;;  %1179 = vmatpush.bf16.msra.mxu3 %v1137_v20  ;;  %v1151_v28 = vld [vmem:[%s1416_s30 + $0xa0] sm:$0xff]  ;;  %v1150_v31 = vld [vmem:[%s1416_s30 + $0x98] sm:$0xff]  ;;  %v1149_v34 = vld [vmem:[%s1416_s30 + $0x90] sm:$0xff] }
  0x49   : > { %676 = vmatpush.bf16.msra.mxu1 %v1145_v21  ;;  %v1132_v35 = vld [vmem:[%s1416_s30 + $0x8] sm:$0xff]  ;;  %v1131_v38 = vld [vmem:[%s1416_s30] sm:$0xff]  ;;  %v976_v44 = vld [vmem:[%s1423_s15 + $0xc] sm:$0xf0] }
  0x4a   : > { %705 = vmatpush.bf16.msra.mxu2 %v1153_v22  ;;  %v1140_v36 = vld [vmem:[%s1416_s30 + $0x48] sm:$0xff]  ;;  %v1139_v39 = vld [vmem:[%s1416_s30 + $0x40] sm:$0xff]  ;;  %v1121_v46 = vld [vmem:[%s1423_s15 + $0x10] sm:$0xf0] }
  0x4b   : > { %v1148_v37 = vld [vmem:[%s1416_s30 + $0x88] sm:$0xff]  ;;  %v1147_v40 = vld [vmem:[%s1416_s30 + $0x80] sm:$0xff]  ;;  %v986_v47 = vld [vmem:[%s1423_s15 + $0x18] sm:$0xf] }
  0x4c   : > { %648 = vmatpush.bf16.msra.mxu0 %v1136_v23  ;;  %1180 = vmatpush.bf16.msra.mxu3 %v1136_v23  ;;  %v974_v41 = vld [vmem:[%s1423_s15] sm:$0xf]  ;;  %v1120_v42 = vld [vmem:[%s1423_s15 + $0x8] sm:$0xf0]  ;;  %v1119_v43 = vld [vmem:[%s1423_s15 + $0x4] sm:$0xf] }
  0x4d   : > { %677 = vmatpush.bf16.msra.mxu1 %v1144_v24  ;;  %v982_v45 = vld [vmem:[%s1423_s15 + $0x8] sm:$0xf]  ;;  %v1123_v48 = vld [vmem:[%s1423_s15 + $0x20] sm:$0xf0]  ;;  %v975_v49 = vor.u32 %v1120_v42, %v974_v41  ;;  %v979_v50 = vor.u32 %v1119_v43, %v976_v44  ;;  %v1122_v53 = vld [vmem:[%s1423_s15 + $0x1c] sm:$0xf] }
  0x4e   : > { %706 = vmatpush.bf16.msra.mxu2 %v1152_v25  ;;  %v983_v51 = vor.u32 %v1121_v46, %v982_v45  ;;  %v987_v52 = vor.u32 %v1123_v48, %v986_v47  ;;  %v988_v54 = vld [vmem:[%s1423_s15 + $0x24] sm:$0xf0]  ;;  %v994_v55 = vld [vmem:[%s1423_s15 + $0x20] sm:$0xf]  ;;  %v1124_v56 = vld [vmem:[%s1423_s15 + $0x28] sm:$0xf0] }
  0x4f   : > { %v998_v57 = vld [vmem:[%s1423_s15 + $0x30] sm:$0xf]  ;;  %v1126_v58 = vld [vmem:[%s1423_s15 + $0x38] sm:$0xf0]  ;;  %v991_v59 = vor.u32 %v1122_v53, %v988_v54  ;;  %v995_v60 = vor.u32 %v1124_v56, %v994_v55  ;;  %v1125_v62 = vld [vmem:[%s1423_s15 + $0x34] sm:$0xf] }
  0x50   : > { %649 = vmatpush.bf16.msra.mxu0 %v1135_v26  ;;  %1181 = vmatpush.bf16.msra.mxu3 %v1135_v26  ;;  %v999_v61 = vor.u32 %v1126_v58, %v998_v57  ;;  %v1000_v63 = vld [vmem:[%s1423_s15 + $0x3c] sm:$0xf0]  ;;  %v1006_v0 = vld [vmem:[%s1423_s15 + $0x38] sm:$0xf]  ;;  %v1127_v1 = vld [vmem:[%s1423_s15 + $0x40] sm:$0xf0] }
  0x51   : > { %678 = vmatpush.bf16.msra.mxu1 %v1143_v27  ;;  %v1010_v2 = vld [vmem:[%s1423_s15 + $0x48] sm:$0xf]  ;;  %v1129_v3 = vld [vmem:[%s1423_s15 + $0x50] sm:$0xf0]  ;;  %v1003_v4 = vor.u32 %v1125_v62, %v1000_v63  ;;  %v1007_v5 = vor.u32 %v1127_v1, %v1006_v0  ;;  %v1128_v7 = vld [vmem:[%s1423_s15 + $0x4c] sm:$0xf] }
  0x52   : > { %707 = vmatpush.bf16.msra.mxu2 %v1151_v28  ;;  %v1011_v6 = vor.u32 %v1129_v3, %v1010_v2  ;;  %v1012_v8 = vld [vmem:[%s1423_s15 + $0x54] sm:$0xf0]  ;;  %v1018_v9 = vld [vmem:[%s1423_s15 + $0x50] sm:$0xf]  ;;  %v1130_v10 = vld [vmem:[%s1423_s15 + $0x58] sm:$0xf0] }
  0x53   : > { %v1015_v11 = vor.u32 %v1128_v7, %v1012_v8  ;;  %v1019_v12 = vor.u32 %v1130_v10, %v1018_v9  ;;  %v366_v16 = vld [vmem:[#allocation2 + $0x30] sm:$0xff]  ;;  %v367_v24 = vld [vmem:[#allocation2] sm:$0xff]  ;;  %v370_v44 = vld [vmem:[#allocation2 + $0x8] sm:$0xff] }
  0x54   : > { %650 = vmatpush.bf16.msra.mxu0 %v1134_v29  ;;  %1182 = vmatpush.bf16.msra.mxu3 %v1134_v29  ;;  %v372_v58 = vld [vmem:[#allocation2 + $0x28] sm:$0xff]  ;;  %v373_v1 = vld [vmem:[#allocation2 + $0x38] sm:$0xff] }
  0x55   : > { %679 = vmatpush.bf16.msra.mxu1 %v1142_v30 }
  0x56   : > { %708 = vmatpush.bf16.msra.mxu2 %v1150_v31  ;;  %v368_v31 = vld [vmem:[#allocation2 + $0x18] sm:$0xff] }
  0x58   : > { %651 = vmatpush.bf16.msra.mxu0 %v1133_v32  ;;  %1183 = vmatpush.bf16.msra.mxu3 %v1133_v32 }
  0x59   : > { %680 = vmatpush.bf16.msra.mxu1 %v1141_v33 }
  0x5a   : > { %709 = vmatpush.bf16.msra.mxu2 %v1149_v34 }
  0x5c   : > { %652 = vmatpush.bf16.msra.mxu0 %v1132_v35  ;;  %1184 = vmatpush.bf16.msra.mxu3 %v1132_v35 }
  0x5d   : > { %681 = vmatpush.bf16.msra.mxu1 %v1140_v36 }
  0x5e   : > { %710 = vmatpush.bf16.msra.mxu2 %v1148_v37 }
  0x60   : > { %653 = vmatpush.bf16.msra.mxu0 %v1131_v38  ;;  %1185 = vmatpush.bf16.msra.mxu3 %v1131_v38  ;;  %v369_v38 = vld [vmem:[#allocation2 + $0x10] sm:$0xff] }
  0x61   : > { %682 = vmatpush.bf16.msra.mxu1 %v1139_v39 }
  0x62   : > { %711 = vmatpush.bf16.msra.mxu2 %v1147_v40 }
  0x63   : > { %654 = vmatmul.bf16.vlgmr.msra.gmra.mxu0 %v975_v49  ;;  %659 = vmatmul.bf16.vlgmr.msra.gmra.mxu3 %v987_v52 }
  0x64   : > { %683 = vmatmul.bf16.vlgmr.msra.gmra.mxu1 %v979_v50 }
  0x65   : > { %712 = vmatmul.bf16.vlgmr.msra.gmra.mxu2 %v983_v51  ;;  %v371_v51 = vld [vmem:[#allocation2 + $0x20] sm:$0xff] }
  0x73   : > { %664 = vmatmul.bf16.gmra.mxu3 %v999_v61 }
  0x74   : > { %688 = vmatmul.bf16.gmra.mxu1 %v991_v59 }
  0x75   : > { %717 = vmatmul.bf16.gmra.mxu2 %v995_v60 }
  0x83   : > { %669 = vmatmul.bf16.gmra.mxu3 %v1011_v6 }
  0x84   : > { %693 = vmatmul.bf16.gmra.mxu1 %v1003_v4 }
  0x85   : > { %722 = vmatmul.bf16.gmra.mxu2 %v1007_v5 }
  0x94   : > { %698 = vmatmul.bf16.gmra.mxu1 %v1015_v11 }
  0x95   : > { %727 = vmatmul.bf16.gmra.mxu2 %v1019_v12 }
  0xe0   : > { %v655_v14 = vpop.f32.mrf.mxu0 }
  0xe1   : > { %v684_v13 = vpop.f32.mrf.mxu1 }
  0xe2   : > { %v685_v15 = vadd.f32 %v684_v13, %v655_v14 }
  0xe6   : > { %v660_v22 = vpop.f32.mrf.mxu3 }
  0xe8   : > { %v713_v17 = vpop.f32.mrf.mxu2  ;;  %v657_v21 = vpop.f32.mrf.mxu0 }
  0xe9   : > { %v714_v18 = vadd.f32 %v713_v17, %v685_v15  ;;  %v686_v19 = vpop.f32.mrf.mxu1 }
  0xea   : > { %v687_v23 = vadd.f32 %v686_v19, %v657_v21 }
  0xeb   : > { %v733_v20 = vadd.f32 %v714_v18, %v366_v16 }
  0xed   : > { %741 = vst [vmem:[#allocation2 + $0x30] sm:$0xff] %v733_v20 }
  0xee   : > { %v662_v30 = vpop.f32.mrf.mxu3 }
  0xf0   : > { %v715_v25 = vpop.f32.mrf.mxu2 }
  0xf1   : > { %v716_v26 = vadd.f32 %v715_v25, %v687_v23  ;;  %v689_v27 = vpop.f32.mrf.mxu1 }
  0xf2   : > { %v690_v29 = vadd.f32 %v689_v27, %v660_v22 }
  0xf3   : > { %v734_v28 = vadd.f32 %v716_v26, %v367_v24 }
  0xf5   : > { %742 = vst [vmem:[#allocation2] sm:$0xff] %v734_v28 }
  0xf6   : > { %v665_v37 = vpop.f32.mrf.mxu3 }
  0xf8   : > { %v718_v32 = vpop.f32.mrf.mxu2 }
  0xf9   : > { %v719_v33 = vadd.f32 %v718_v32, %v690_v29  ;;  %v691_v34 = vpop.f32.mrf.mxu1 }
  0xfa   : > { %v692_v36 = vadd.f32 %v691_v34, %v662_v30 }
  0xfb   : > { %v735_v35 = vadd.f32 %v719_v33, %v368_v31 }
  0xfd   : > { %743 = vst [vmem:[#allocation2 + $0x18] sm:$0xff] %v735_v35 }
  0xfe   : > { %v667_v48 = vpop.f32.mrf.mxu3 }
 0x100   : > { %v720_v39 = vpop.f32.mrf.mxu2 }
 0x101   : > { %v721_v40 = vadd.f32 %v720_v39, %v692_v36  ;;  %v694_v41 = vpop.f32.mrf.mxu1 }
 0x102   : > { %v695_v43 = vadd.f32 %v694_v41, %v665_v37 }
 0x103   : > { %v736_v42 = vadd.f32 %v721_v40, %v369_v38 }
 0x105   : > { %744 = vst [vmem:[#allocation2 + $0x10] sm:$0xff] %v736_v42 }
 0x106   : > { %v670_v56 = vpop.f32.mrf.mxu3 }
 0x108   : > { %v723_v45 = vpop.f32.mrf.mxu2 }
 0x109   : > { %v724_v46 = vadd.f32 %v723_v45, %v695_v43  ;;  %v696_v47 = vpop.f32.mrf.mxu1 }
 0x10a   : > { %v697_v50 = vadd.f32 %v696_v47, %v667_v48 }
 0x10b   : > { %v737_v49 = vadd.f32 %v724_v46, %v370_v44 }
 0x10d   : > { %745 = vst [vmem:[#allocation2 + $0x8] sm:$0xff] %v737_v49 }
 0x10e   : > { %v672_v63 = vpop.f32.mrf.mxu3 }
 0x110   : > { %v725_v52 = vpop.f32.mrf.mxu2 }
 0x111   : > { %v726_v53 = vadd.f32 %v725_v52, %v697_v50  ;;  %v699_v54 = vpop.f32.mrf.mxu1 }
 0x112   : > { %v700_v57 = vadd.f32 %v699_v54, %v670_v56 }
 0x113   : > { %v738_v55 = vadd.f32 %v726_v53, %v371_v51 }
 0x115   : > { %746 = vst [vmem:[#allocation2 + $0x20] sm:$0xff] %v738_v55 }
 0x118   : > { %v728_v59 = vpop.f32.mrf.mxu2 }
 0x119   : > { %v729_v60 = vadd.f32 %v728_v59, %v700_v57  ;;  %v701_v62 = vpop.f32.mrf.mxu1 }
 0x11a   : > { %v702_v0 = vadd.f32 %v701_v62, %v672_v63 }
 0x11b   : > { %v739_v61 = vadd.f32 %v729_v60, %v372_v58 }
 0x11d   : > { %747 = vst [vmem:[#allocation2 + $0x28] sm:$0xff] %v739_v61 }
 0x120   : > { %v730_v2 = vpop.f32.mrf.mxu2 }
 0x121   : > { %v731_v3 = vadd.f32 %v730_v2, %v702_v0  ;;  %752 = sbr.rel (%p1116_p13) target bundleno = 310 (0x136), region = 70 }
 0x123   : > { %v740_v4 = vadd.f32 %v731_v3, %v373_v1 }
 0x125   : > { %748 = vst [vmem:[#allocation2 + $0x38] sm:$0xff] %v740_v4 }
 0x126   : > { %v753_v5 = vld [vmem:[#allocation2 + $0x30] sm:$0xff]  ;;  %v754_v6 = vld [vmem:[#allocation2] sm:$0xff]  ;;  %v755_v9 = vld [vmem:[#allocation2 + $0x18] sm:$0xff] }
 0x127   : > { %v1246_v7 = vld [vmem:[%s1508_s2] ss:$0 sm:$0xff]  ;;  %v756_v10 = vld [vmem:[#allocation2 + $0x10] sm:$0xff]  ;;  %v757_v11 = vld [vmem:[#allocation2 + $0x8] sm:$0xff] }
 0x128   : > { %v1247_v8 = vld [vmem:[%s1509_s3] ss:$0 sm:$0xff]  ;;  %v765_v12 = vmul.f32 %v1246_v7, %v753_v5  ;;  %v766_v13 = vmul.f32 %v1246_v7, %v754_v6  ;;  %v767_v14 = vmul.f32 %v1246_v7, %v755_v9  ;;  %v768_v15 = vmul.f32 %v1246_v7, %v756_v10  ;;  %v759_v17 = vld [vmem:[#allocation2 + $0x28] sm:$0xff] }
 0x129   : > { %v758_v16 = vld [vmem:[#allocation2 + $0x20] sm:$0xff]  ;;  %v769_v19 = vmul.f32 %v1246_v7, %v757_v11  ;;  %v771_v21 = vmul.f32 %v1246_v7, %v759_v17 }
 0x12a   : > { %v770_v20 = vmul.f32 %v1246_v7, %v758_v16  ;;  %v777_v23 = vadd.f32 %v1247_v8, %v765_v12  ;;  %v778_v24 = vadd.f32 %v1247_v8, %v766_v13  ;;  %v779_v25 = vadd.f32 %v1247_v8, %v767_v14 }
 0x12b   : > { %v780_v26 = vadd.f32 %v1247_v8, %v768_v15  ;;  %v781_v27 = vadd.f32 %v1247_v8, %v769_v19  ;;  %v783_v29 = vadd.f32 %v1247_v8, %v771_v21 }
 0x12c   : > { %v760_v18 = vld [vmem:[#allocation2 + $0x38] sm:$0xff]  ;;  %v782_v28 = vadd.f32 %v1247_v8, %v770_v20  ;;  %v785_v31 = vmax.f32 %v777_v23, 0.0  ;;  %v786_v32 = vmax.f32 %v778_v24, 0.0  ;;  %v787_v33 = vmax.f32 %v779_v25, 0.0 }
 0x12d   : > { %v772_v22 = vmul.f32 %v1246_v7, %v760_v18  ;;  %v788_v34 = vmax.f32 %v780_v26, 0.0  ;;  %v789_v35 = vmax.f32 %v781_v27, 0.0  ;;  %v791_v37 = vmax.f32 %v783_v29, 0.0 }
 0x12e   : > { %v790_v36 = vmax.f32 %v782_v28, 0.0  ;;  %v1158_v39 = vpack.c.bf16 %v786_v32, %v785_v31 }
 0x12f   : > { %v784_v30 = vadd.f32 %v1247_v8, %v772_v22  ;;  %v1163_v40 = vpack.c.bf16 %v788_v34, %v787_v33 }
 0x130   : > { %v1168_v41 = vpack.c.bf16 %v790_v36, %v789_v35  ;;  %1159 = vst [vmem:[%s1421_s8] sm:$0xff] %v1158_v39  }
 0x131   : > { %v792_v38 = vmax.f32 %v784_v30, 0.0  ;;  %1175 = vst [vmem:[%s1421_s8 + $0x8] sm:$0xff] %v1163_v40  }
 0x132   : > { %1176 = vst [vmem:[%s1421_s8 + $0x10] sm:$0xff] %v1168_v41  }
 0x133   : > { %v1173_v42 = vpack.c.bf16 %v792_v38, %v791_v37 }
 0x135   : > { %1177 = vst [vmem:[%s1421_s8 + $0x18] sm:$0xff] %v1173_v42  }
 0x136 PF: > { %s14_s21 = sadd.s32 1, %s1302_s21   ;;  %s1511_s15 = smov %s1282_s16 }
 0x137   : > { %p11_p0 = scmp.ge.s32.totalorder %s14_s21, 8   ;;  %s1512_s16 = smov %s1381_s28 }
 0x138   : > { %s1513_s17 = smov %s1294_s19  ;;  %s1514_s18 = smov %s1298_s20 }
 0x139   : > { %s1515_s19 = smov %s1518_s22  ;;  %s1516_s20 = smov %s1522_s23 }
 0x13a   :  { %13 = sbr.rel (!%p11_p0) target bundleno = 4 (0x4), region = 120 }

// kernel: adv_resnet_forward.14
= control target key start
LH: loop header
LB: loop body
LE: loop exit
PB: predicated region body
PF: predicated region fallthrough
CT: control target
= control target key end

     0   :  { %s1455_s18 = smov 0   ;;  %s1457_s19 = smov 0   ;;  %s1640_s0 = inlined_call_operand.vmem [shape: bf16[128,1152], index: 0, kind: input, shape index: {}]   ;;  %s1641_s1 = inlined_call_operand.vmem [shape: bf16[1152,128], index: 1, kind: input, shape index: {}]   ;;  %s1642_s2 = inlined_call_operand.vmem [shape: f32[1,128], index: 2, kind: input, shape index: {}]   ;;  %s1643_s3 = inlined_call_operand.vmem [shape: f32[1,128], index: 3, kind: input, shape index: {}]   ;;  %s1644_s4 = inlined_call_operand.vmem [shape: bf16[128,128], index: 4, kind: input, shape index: {}]   ;;  %s1645_s5 = inlined_call_operand.vmem [shape: bf16[128,128], index: 5, kind: output, shape index: {}]  }
   0x1   :  { %s1459_s20 = smov 0   ;;  %s1461_s21 = smov 0  }
   0x2   :  { %s1463_s22 = smov 0   ;;  %s1465_s23 = smov 0  }
   0x3   :  { %s1467_s24 = smov 0  }
   0x4 LB: > { %s27_s25 = sadd.s32 1, %s1414_s22  ;;  %s34_s26 = sadd.s32 1, %s1418_s23  ;;  %s1422_s24 = sphi %s1467_s24, %s15_s24   ;;  %s1418_s23 = sphi %s1465_s23, %s1651_s23   ;;  %s1414_s22 = sphi %s1463_s22, %s1650_s22   ;;  %s1410_s21 = sphi %s1461_s21, %s1649_s21   ;;  %s1406_s20 = sphi %s1459_s20, %s1648_s20   ;;  %s1402_s19 = sphi %s1457_s19, %s1647_s19   ;;  %s1398_s18 = sphi %s1455_s18, %s1646_s18  }
   0x5   : > { %p28_p0 = scmp.ge.s32.totalorder %s27_s25, 3  ;;  %p50_p1 = scmp.ne.s32.totalorder %s1402_s19, %s1398_s18 }
   0x6   : > { %p51_p2 = scmp.eq.s32.totalorder %s1422_s24, 0  ;;  %s43_s30 = sadd.s32 1, %s1402_s19 }
   0x7   : > { %s1653_s25 = smov (%p28_p0, %s27_s25), 0  ;;  %s1655_s26 = smov (!%p28_p0, %s34_s26), %s1418_s23 }
   0x8   : > { %p52_p3 = por %p51_p2, %p50_p1  ;;  %p36_p4 = scmp.ge.s32.totalorder %s1655_s26, 2 }
   0x9   : > { %s39_s27 = ssub.s32 %s1414_s22, %s1653_s25  ;;  %p1046_p6 = scmp.ge.s32.totalorder %s1422_s24, 6 }
   0xa   : > { %s1657_s26 = smov (%p36_p4, %s1655_s26), 0 }
   0xb   : > { %s38_s28 = ssub.s32 %s1418_s23, %s1657_s26  ;;  %224 = sbr.rel (%p1046_p6) target bundleno = 41 (0x29), region = 24 }
   0xc   : > { %s40_s29 = sor.u32 %s39_s27, %s38_s28 }
   0xd   : > { %p41_p5 = scmp.eq.s32.totalorder %s40_s29, 0 }
   0xf   : > { %s1506_s6 = scalar_select %p41_p5, %s1402_s19, %s43_s30  }
  0x10   : > { %227 = sbr.rel (!%p52_p3) target bundleno = 41 (0x29), region = 28  ;;  %s229_s7 = sand.u32 (%p52_p3), 1, %s1402_s19  }
  0x11   : > { %s233_s8 = smul.u32 (%p52_p3), 3, %s1414_s22 }
  0x12   : > { %s1306_s9 = smul.u32 (%p52_p3), 96, %s229_s7 }
  0x13   : > { %s1307_s10 = smul.u32 (%p52_p3), 72, %s1418_s23 }
  0x14   : > { %s231_s16 = scalar_lea.vmem (%p52_p3), [#allocation3], %s1306_s9 }
  0x15   : > { %s235_s11 = sadd.s32 %s1307_s10, %s233_s8 }
  0x16   : > { %s1049_s12 = sshll.u32 %s235_s11, 2 }
  0x17   : > { %s1515_s15 = scalar_lea.vmem %s1640_s0, %s1049_s12 }
  0x18   : > { %v252_v0 = vld [vmem:[%s1515_s15] sm:$0xff]  ;;  %v256_v2 = vld [vmem:[%s1515_s15 + $0x48] sm:$0xff]  ;;  %v260_v4 = vld [vmem:[%s1515_s15 + $0x90] sm:$0xff] }
  0x19   : > { %v254_v1 = vld [vmem:[%s1515_s15 + $0x24] sm:$0xff]  ;;  %253 = vst [vmem:[%s231_s16] sm:$0xff] %v252_v0  ;;  %v258_v3 = vld [vmem:[%s1515_s15 + $0x6c] sm:$0xff]  ;;  %v262_v5 = vld [vmem:[%s1515_s15 + $0xb4] sm:$0xff] }
  0x1a   : > { %255 = vst [vmem:[%s231_s16 + $0xc] sm:$0xff] %v254_v1  ;;  %v264_v6 = vld [vmem:[%s1515_s15 + $0xd8] sm:$0xff]  ;;  %v1050_v8 = vld [vmem:[%s1515_s15 + $0x8] sm:$0xf]  ;;  %v1052_v9 = vld [vmem:[%s1515_s15 + $0x2c] sm:$0xf] }
  0x1b   : > { %257 = vst [vmem:[%s231_s16 + $0x18] sm:$0xff] %v256_v2  ;;  %v266_v7 = vld [vmem:[%s1515_s15 + $0xfc] sm:$0xff]  ;;  %v1054_v10 = vld [vmem:[%s1515_s15 + $0x50] sm:$0xf]  ;;  %v1056_v11 = vld [vmem:[%s1515_s15 + $0x74] sm:$0xf] }
  0x1c   : > { %259 = vst [vmem:[%s231_s16 + $0x24] sm:$0xff] %v258_v3  ;;  %v1058_v12 = vld [vmem:[%s1515_s15 + $0x98] sm:$0xf]  ;;  %v1060_v13 = vld [vmem:[%s1515_s15 + $0xbc] sm:$0xf] }
  0x1d   : > { %261 = vst [vmem:[%s231_s16 + $0x30] sm:$0xff] %v260_v4  ;;  %v1062_v14 = vld [vmem:[%s1515_s15 + $0xe0] sm:$0xf]  ;;  %v1064_v15 = vld [vmem:[%s1515_s15 + $0x104] sm:$0xf] }
  0x1e   : > { %263 = vst [vmem:[%s231_s16 + $0x3c] sm:$0xff] %v262_v5 }
  0x1f   : > { %265 = vst [vmem:[%s231_s16 + $0x48] sm:$0xff] %v264_v6 }
  0x20   : > { %267 = vst [vmem:[%s231_s16 + $0x54] sm:$0xff] %v266_v7 }
  0x21   : > { %1051 = vst [vmem:[%s231_s16 + $0x8] sm:$0xf] %v1050_v8 }
  0x22   : > { %1053 = vst [vmem:[%s231_s16 + $0x14] sm:$0xf] %v1052_v9 }
  0x23   : > { %1055 = vst [vmem:[%s231_s16 + $0x20] sm:$0xf] %v1054_v10 }
  0x24   : > { %1057 = vst [vmem:[%s231_s16 + $0x2c] sm:$0xf] %v1056_v11 }
  0x25   : > { %1059 = vst [vmem:[%s231_s16 + $0x38] sm:$0xf] %v1058_v12 }
  0x26   : > { %1061 = vst [vmem:[%s231_s16 + $0x44] sm:$0xf] %v1060_v13 }
  0x27   : > { %1063 = vst [vmem:[%s231_s16 + $0x50] sm:$0xf] %v1062_v14 }
  0x28   : > { %1065 = vst [vmem:[%s231_s16 + $0x5c] sm:$0xf] %v1064_v15 }
  0x29 PF: > { %p1066_p7 = scmp.ge.s32.totalorder %s1422_s24, 1  ;;  %p320_p8 = scmp.lt.s32.totalorder %s1422_s24, 7 }
  0x2b   : > { %p321_p9 = pnand %p1066_p7, %p320_p8 }
  0x2c   : > { %s327_s17 = sand.u32 (!%p321_p9), 1, %s1398_s18   ;;  %s381_s27 = smul.u32 (!%p321_p9), 48, %s1406_s20 }
  0x2d   : > { %324 = sbr.rel (%p321_p9) target bundleno = 313 (0x139), region = 62  ;;  %s1068_s29 = sshll.u32 (!%p321_p9), %s1410_s21, 3 }
  0x2e   : > { %s1308_s28 = smul.u32 (!%p321_p9), 96, %s327_s17  ;;  %p382_p10 = scmp.lt.s32.totalorder (!%p321_p9), %s381_s27, 143 }
  0x2f   : > { %p397_p11 = scmp.lt.s32.totalorder (!%p321_p9), %s1068_s29, 15  ;;  %p1072_p12 = scmp.ne.s32.totalorder (!%p321_p9), %s1406_s20, 0 }
  0x30   : > { %s1553_s15 = scalar_lea.vmem (!%p321_p9), [#allocation3], %s1308_s28 }
  0x32   : > { %s1659_s27 = smov (!%p382_p10, %s381_s27), 143  ;;  %s1661_s29 = smov (!%p397_p11, %s1068_s29), 15 }
  0x33   : > { %s1067_s30 = sshll.u32 %s1659_s27, 2  ;;  %s1069_s10 = sshll.u32 %s1661_s29, 2 }
  0x34   : > { %s1541_s9 = scalar_lea.vmem %s1641_s1, %s1067_s30  ;;  %s1546_s13 = scalar_lea.vmem %s1644_s4, %s1069_s10 }
  0x35   : > { %s1551_s21 = scalar_lea.vmem %s1645_s5, %s1069_s10  ;;  %417 = sbr.rel (%p1072_p12) target bundleno = 67 (0x43), region = 70 }
  0x3a   : > { %v1424_v16 = vmov 0.0  }
  0x3b   : > { %418 = vst [vmem:[#allocation2 + $0x30] sm:$0xff] %v1424_v16 }
  0x3c   : > { %419 = vst [vmem:[#allocation2] sm:$0xff] %v1424_v16 }
  0x3d   : > { %420 = vst [vmem:[#allocation2 + $0x18] sm:$0xff] %v1424_v16 }
  0x3e   : > { %421 = vst [vmem:[#allocation2 + $0x10] sm:$0xff] %v1424_v16 }
  0x3f   : > { %422 = vst [vmem:[#allocation2 + $0x8] sm:$0xff] %v1424_v16 }
  0x40   : > { %423 = vst [vmem:[#allocation2 + $0x20] sm:$0xff] %v1424_v16 }
  0x41   : > { %424 = vst [vmem:[#allocation2 + $0x28] sm:$0xff] %v1424_v16 }
  0x42   : > { %425 = vst [vmem:[#allocation2 + $0x38] sm:$0xff] %v1424_v16 }
  0x43 PF: > { %v1239_v17 = vld [vmem:[%s1541_s9 + $0x38] sm:$0xff]  ;;  %v1238_v20 = vld [vmem:[%s1541_s9 + $0x30] sm:$0xff]  ;;  %v1237_v23 = vld [vmem:[%s1541_s9 + $0x28] sm:$0xff]  ;;  %p1217_p13 = scmp.ne.s32.totalorder %s1406_s20, 2 }
  0x44   : > { %v1247_v18 = vld [vmem:[%s1541_s9 + $0x78] sm:$0xff]  ;;  %706 = vmatpush.bf16.msra.mxu0 %v1239_v17  ;;  %v1246_v21 = vld [vmem:[%s1541_s9 + $0x70] sm:$0xff]  ;;  %1298 = vmatpush.bf16.msra.mxu3 %v1239_v17  ;;  %v1245_v24 = vld [vmem:[%s1541_s9 + $0x68] sm:$0xff] }
  0x45   : > { %v1255_v19 = vld [vmem:[%s1541_s9 + $0xb8] sm:$0xff]  ;;  %735 = vmatpush.bf16.msra.mxu1 %v1247_v18  ;;  %v1254_v22 = vld [vmem:[%s1541_s9 + $0xb0] sm:$0xff]  ;;  %v1253_v25 = vld [vmem:[%s1541_s9 + $0xa8] sm:$0xff] }
  0x46   : > { %764 = vmatpush.bf16.msra.mxu2 %v1255_v19  ;;  %v1236_v26 = vld [vmem:[%s1541_s9 + $0x20] sm:$0xff]  ;;  %v1235_v29 = vld [vmem:[%s1541_s9 + $0x18] sm:$0xff]  ;;  %v1234_v32 = vld [vmem:[%s1541_s9 + $0x10] sm:$0xff] }
  0x47   : > { %v1244_v27 = vld [vmem:[%s1541_s9 + $0x60] sm:$0xff]  ;;  %v1243_v30 = vld [vmem:[%s1541_s9 + $0x58] sm:$0xff]  ;;  %v1242_v33 = vld [vmem:[%s1541_s9 + $0x50] sm:$0xff] }
  0x48   : > { %707 = vmatpush.bf16.msra.mxu0 %v1238_v20  ;;  %1299 = vmatpush.bf16.msra.mxu3 %v1238_v20  ;;  %v1252_v28 = vld [vmem:[%s1541_s9 + $0xa0] sm:$0xff]  ;;  %v1251_v31 = vld [vmem:[%s1541_s9 + $0x98] sm:$0xff]  ;;  %v1250_v34 = vld [vmem:[%s1541_s9 + $0x90] sm:$0xff] }
  0x49   : > { %736 = vmatpush.bf16.msra.mxu1 %v1246_v21  ;;  %v1233_v35 = vld [vmem:[%s1541_s9 + $0x8] sm:$0xff]  ;;  %v1232_v38 = vld [vmem:[%s1541_s9] sm:$0xff]  ;;  %v1077_v44 = vld [vmem:[%s1553_s15 + $0xc] sm:$0xf0] }
  0x4a   : > { %765 = vmatpush.bf16.msra.mxu2 %v1254_v22  ;;  %v1241_v36 = vld [vmem:[%s1541_s9 + $0x48] sm:$0xff]  ;;  %v1240_v39 = vld [vmem:[%s1541_s9 + $0x40] sm:$0xff]  ;;  %v1222_v46 = vld [vmem:[%s1553_s15 + $0x10] sm:$0xf0] }
  0x4b   : > { %v1249_v37 = vld [vmem:[%s1541_s9 + $0x88] sm:$0xff]  ;;  %v1248_v40 = vld [vmem:[%s1541_s9 + $0x80] sm:$0xff]  ;;  %v1087_v47 = vld [vmem:[%s1553_s15 + $0x18] sm:$0xf] }
  0x4c   : > { %708 = vmatpush.bf16.msra.mxu0 %v1237_v23  ;;  %1300 = vmatpush.bf16.msra.mxu3 %v1237_v23  ;;  %v1075_v41 = vld [vmem:[%s1553_s15] sm:$0xf]  ;;  %v1221_v42 = vld [vmem:[%s1553_s15 + $0x8] sm:$0xf0]  ;;  %v1220_v43 = vld [vmem:[%s1553_s15 + $0x4] sm:$0xf] }
  0x4d   : > { %737 = vmatpush.bf16.msra.mxu1 %v1245_v24  ;;  %v1083_v45 = vld [vmem:[%s1553_s15 + $0x8] sm:$0xf]  ;;  %v1224_v48 = vld [vmem:[%s1553_s15 + $0x20] sm:$0xf0]  ;;  %v1076_v49 = vor.u32 %v1221_v42, %v1075_v41  ;;  %v1080_v50 = vor.u32 %v1220_v43, %v1077_v44  ;;  %v1223_v53 = vld [vmem:[%s1553_s15 + $0x1c] sm:$0xf] }
  0x4e   : > { %766 = vmatpush.bf16.msra.mxu2 %v1253_v25  ;;  %v1084_v51 = vor.u32 %v1222_v46, %v1083_v45  ;;  %v1088_v52 = vor.u32 %v1224_v48, %v1087_v47  ;;  %v1089_v54 = vld [vmem:[%s1553_s15 + $0x24] sm:$0xf0]  ;;  %v1095_v55 = vld [vmem:[%s1553_s15 + $0x20] sm:$0xf]  ;;  %v1225_v56 = vld [vmem:[%s1553_s15 + $0x28] sm:$0xf0] }
  0x4f   : > { %v1099_v57 = vld [vmem:[%s1553_s15 + $0x30] sm:$0xf]  ;;  %v1227_v58 = vld [vmem:[%s1553_s15 + $0x38] sm:$0xf0]  ;;  %v1092_v59 = vor.u32 %v1223_v53, %v1089_v54  ;;  %v1096_v60 = vor.u32 %v1225_v56, %v1095_v55  ;;  %v1226_v62 = vld [vmem:[%s1553_s15 + $0x34] sm:$0xf] }
  0x50   : > { %709 = vmatpush.bf16.msra.mxu0 %v1236_v26  ;;  %1301 = vmatpush.bf16.msra.mxu3 %v1236_v26  ;;  %v1100_v61 = vor.u32 %v1227_v58, %v1099_v57  ;;  %v1101_v63 = vld [vmem:[%s1553_s15 + $0x3c] sm:$0xf0]  ;;  %v1107_v0 = vld [vmem:[%s1553_s15 + $0x38] sm:$0xf]  ;;  %v1228_v1 = vld [vmem:[%s1553_s15 + $0x40] sm:$0xf0] }
  0x51   : > { %738 = vmatpush.bf16.msra.mxu1 %v1244_v27  ;;  %v1111_v2 = vld [vmem:[%s1553_s15 + $0x48] sm:$0xf]  ;;  %v1230_v3 = vld [vmem:[%s1553_s15 + $0x50] sm:$0xf0]  ;;  %v1104_v4 = vor.u32 %v1226_v62, %v1101_v63  ;;  %v1108_v5 = vor.u32 %v1228_v1, %v1107_v0  ;;  %v1229_v7 = vld [vmem:[%s1553_s15 + $0x4c] sm:$0xf] }
  0x52   : > { %767 = vmatpush.bf16.msra.mxu2 %v1252_v28  ;;  %v1112_v6 = vor.u32 %v1230_v3, %v1111_v2  ;;  %v1113_v8 = vld [vmem:[%s1553_s15 + $0x54] sm:$0xf0]  ;;  %v1119_v9 = vld [vmem:[%s1553_s15 + $0x50] sm:$0xf]  ;;  %v1231_v10 = vld [vmem:[%s1553_s15 + $0x58] sm:$0xf0] }
  0x53   : > { %v1116_v11 = vor.u32 %v1229_v7, %v1113_v8  ;;  %v1120_v12 = vor.u32 %v1231_v10, %v1119_v9  ;;  %v426_v16 = vld [vmem:[#allocation2 + $0x30] sm:$0xff]  ;;  %v427_v24 = vld [vmem:[#allocation2] sm:$0xff]  ;;  %v430_v44 = vld [vmem:[#allocation2 + $0x8] sm:$0xff] }
  0x54   : > { %710 = vmatpush.bf16.msra.mxu0 %v1235_v29  ;;  %1302 = vmatpush.bf16.msra.mxu3 %v1235_v29  ;;  %v432_v58 = vld [vmem:[#allocation2 + $0x28] sm:$0xff]  ;;  %v433_v1 = vld [vmem:[#allocation2 + $0x38] sm:$0xff] }
  0x55   : > { %739 = vmatpush.bf16.msra.mxu1 %v1243_v30 }
  0x56   : > { %768 = vmatpush.bf16.msra.mxu2 %v1251_v31  ;;  %v428_v31 = vld [vmem:[#allocation2 + $0x18] sm:$0xff] }
  0x58   : > { %711 = vmatpush.bf16.msra.mxu0 %v1234_v32  ;;  %1303 = vmatpush.bf16.msra.mxu3 %v1234_v32 }
  0x59   : > { %740 = vmatpush.bf16.msra.mxu1 %v1242_v33 }
  0x5a   : > { %769 = vmatpush.bf16.msra.mxu2 %v1250_v34 }
  0x5c   : > { %712 = vmatpush.bf16.msra.mxu0 %v1233_v35  ;;  %1304 = vmatpush.bf16.msra.mxu3 %v1233_v35 }
  0x5d   : > { %741 = vmatpush.bf16.msra.mxu1 %v1241_v36 }
  0x5e   : > { %770 = vmatpush.bf16.msra.mxu2 %v1249_v37 }
  0x60   : > { %713 = vmatpush.bf16.msra.mxu0 %v1232_v38  ;;  %1305 = vmatpush.bf16.msra.mxu3 %v1232_v38  ;;  %v429_v38 = vld [vmem:[#allocation2 + $0x10] sm:$0xff] }
  0x61   : > { %742 = vmatpush.bf16.msra.mxu1 %v1240_v39 }
  0x62   : > { %771 = vmatpush.bf16.msra.mxu2 %v1248_v40 }
  0x63   : > { %714 = vmatmul.bf16.vlgmr.msra.gmra.mxu0 %v1076_v49  ;;  %719 = vmatmul.bf16.vlgmr.msra.gmra.mxu3 %v1088_v52 }
  0x64   : > { %743 = vmatmul.bf16.vlgmr.msra.gmra.mxu1 %v1080_v50 }
  0x65   : > { %772 = vmatmul.bf16.vlgmr.msra.gmra.mxu2 %v1084_v51  ;;  %v431_v51 = vld [vmem:[#allocation2 + $0x20] sm:$0xff] }
  0x73   : > { %724 = vmatmul.bf16.gmra.mxu3 %v1100_v61 }
  0x74   : > { %748 = vmatmul.bf16.gmra.mxu1 %v1092_v59 }
  0x75   : > { %777 = vmatmul.bf16.gmra.mxu2 %v1096_v60 }
  0x83   : > { %729 = vmatmul.bf16.gmra.mxu3 %v1112_v6 }
  0x84   : > { %753 = vmatmul.bf16.gmra.mxu1 %v1104_v4 }
  0x85   : > { %782 = vmatmul.bf16.gmra.mxu2 %v1108_v5 }
  0x94   : > { %758 = vmatmul.bf16.gmra.mxu1 %v1116_v11 }
  0x95   : > { %787 = vmatmul.bf16.gmra.mxu2 %v1120_v12 }
  0xe0   : > { %v715_v14 = vpop.f32.mrf.mxu0 }
  0xe1   : > { %v744_v13 = vpop.f32.mrf.mxu1 }
  0xe2   : > { %v745_v15 = vadd.f32 %v744_v13, %v715_v14 }
  0xe6   : > { %v720_v22 = vpop.f32.mrf.mxu3 }
  0xe8   : > { %v773_v17 = vpop.f32.mrf.mxu2  ;;  %v717_v21 = vpop.f32.mrf.mxu0 }
  0xe9   : > { %v774_v18 = vadd.f32 %v773_v17, %v745_v15  ;;  %v746_v19 = vpop.f32.mrf.mxu1 }
  0xea   : > { %v747_v23 = vadd.f32 %v746_v19, %v717_v21 }
  0xeb   : > { %v793_v20 = vadd.f32 %v774_v18, %v426_v16 }
  0xed   : > { %801 = vst [vmem:[#allocation2 + $0x30] sm:$0xff] %v793_v20 }
  0xee   : > { %v722_v30 = vpop.f32.mrf.mxu3 }
  0xf0   : > { %v775_v25 = vpop.f32.mrf.mxu2 }
  0xf1   : > { %v776_v26 = vadd.f32 %v775_v25, %v747_v23  ;;  %v749_v27 = vpop.f32.mrf.mxu1 }
  0xf2   : > { %v750_v29 = vadd.f32 %v749_v27, %v720_v22 }
  0xf3   : > { %v794_v28 = vadd.f32 %v776_v26, %v427_v24 }
  0xf5   : > { %802 = vst [vmem:[#allocation2] sm:$0xff] %v794_v28 }
  0xf6   : > { %v725_v37 = vpop.f32.mrf.mxu3 }
  0xf8   : > { %v778_v32 = vpop.f32.mrf.mxu2 }
  0xf9   : > { %v779_v33 = vadd.f32 %v778_v32, %v750_v29  ;;  %v751_v34 = vpop.f32.mrf.mxu1 }
  0xfa   : > { %v752_v36 = vadd.f32 %v751_v34, %v722_v30 }
  0xfb   : > { %v795_v35 = vadd.f32 %v779_v33, %v428_v31 }
  0xfd   : > { %803 = vst [vmem:[#allocation2 + $0x18] sm:$0xff] %v795_v35 }
  0xfe   : > { %v727_v48 = vpop.f32.mrf.mxu3 }
 0x100   : > { %v780_v39 = vpop.f32.mrf.mxu2 }
 0x101   : > { %v781_v40 = vadd.f32 %v780_v39, %v752_v36  ;;  %v754_v41 = vpop.f32.mrf.mxu1 }
 0x102   : > { %v755_v43 = vadd.f32 %v754_v41, %v725_v37 }
 0x103   : > { %v796_v42 = vadd.f32 %v781_v40, %v429_v38 }
 0x105   : > { %804 = vst [vmem:[#allocation2 + $0x10] sm:$0xff] %v796_v42 }
 0x106   : > { %v730_v56 = vpop.f32.mrf.mxu3 }
 0x108   : > { %v783_v45 = vpop.f32.mrf.mxu2 }
 0x109   : > { %v784_v46 = vadd.f32 %v783_v45, %v755_v43  ;;  %v756_v47 = vpop.f32.mrf.mxu1 }
 0x10a   : > { %v757_v50 = vadd.f32 %v756_v47, %v727_v48 }
 0x10b   : > { %v797_v49 = vadd.f32 %v784_v46, %v430_v44 }
 0x10d   : > { %805 = vst [vmem:[#allocation2 + $0x8] sm:$0xff] %v797_v49 }
 0x10e   : > { %v732_v63 = vpop.f32.mrf.mxu3 }
 0x110   : > { %v785_v52 = vpop.f32.mrf.mxu2 }
 0x111   : > { %v786_v53 = vadd.f32 %v785_v52, %v757_v50  ;;  %v759_v54 = vpop.f32.mrf.mxu1 }
 0x112   : > { %v760_v57 = vadd.f32 %v759_v54, %v730_v56 }
 0x113   : > { %v798_v55 = vadd.f32 %v786_v53, %v431_v51 }
 0x115   : > { %806 = vst [vmem:[#allocation2 + $0x20] sm:$0xff] %v798_v55 }
 0x118   : > { %v788_v59 = vpop.f32.mrf.mxu2 }
 0x119   : > { %v789_v60 = vadd.f32 %v788_v59, %v760_v57  ;;  %v761_v62 = vpop.f32.mrf.mxu1 }
 0x11a   : > { %v762_v0 = vadd.f32 %v761_v62, %v732_v63 }
 0x11b   : > { %v799_v61 = vadd.f32 %v789_v60, %v432_v58 }
 0x11d   : > { %807 = vst [vmem:[#allocation2 + $0x28] sm:$0xff] %v799_v61 }
 0x120   : > { %v790_v2 = vpop.f32.mrf.mxu2 }
 0x121   : > { %v791_v3 = vadd.f32 %v790_v2, %v762_v0  ;;  %812 = sbr.rel (%p1217_p13) target bundleno = 313 (0x139), region = 74 }
 0x123   : > { %v800_v4 = vadd.f32 %v791_v3, %v433_v1 }
 0x125   : > { %808 = vst [vmem:[#allocation2 + $0x38] sm:$0xff] %v800_v4 }
 0x126   : > { %v813_v5 = vld [vmem:[#allocation2 + $0x30] sm:$0xff]  ;;  %v814_v6 = vld [vmem:[#allocation2] sm:$0xff]  ;;  %v815_v10 = vld [vmem:[#allocation2 + $0x18] sm:$0xff] }
 0x127   : > { %v1366_v7 = vld [vmem:[%s1642_s2] ss:$0 sm:$0xff]  ;;  %v816_v11 = vld [vmem:[#allocation2 + $0x10] sm:$0xff]  ;;  %v1292_v16 = vld [vmem:[%s1546_s13 + $0x8] sm:$0xff]  }
 0x128   : > { %v1367_v8 = vld [vmem:[%s1643_s3] ss:$0 sm:$0xff]  ;;  %v825_v12 = vmul.f32 %v1366_v7, %v813_v5  ;;  %v826_v13 = vmul.f32 %v1366_v7, %v814_v6  ;;  %v817_v17 = vld [vmem:[#allocation2 + $0x8] sm:$0xff]  ;;  %v827_v19 = vmul.f32 %v1366_v7, %v815_v10  ;;  %v828_v20 = vmul.f32 %v1366_v7, %v816_v11  ;;  %v1293_v23 = vld [vmem:[%s1546_s13 + $0x10] sm:$0xff]  }
 0x129   : > { %v1257_v9 = vld [vmem:[%s1546_s13] sm:$0xff]   ;;  %v1262_v21 = vunpack.c.l.bf16 %v1292_v16  ;;  %v1263_v22 = vunpack.c.h.bf16 %v1292_v16  ;;  %v829_v26 = vmul.f32 %v1366_v7, %v817_v17  ;;  %v819_v28 = vld [vmem:[#allocation2 + $0x28] sm:$0xff]  ;;  %v1266_v32 = vunpack.c.l.bf16 %v1293_v23  ;;  %v1294_v42 = vld [vmem:[%s1546_s13 + $0x18] sm:$0xff]  }
 0x12a   : > { %v1258_v14 = vunpack.c.l.bf16 %v1257_v9  ;;  %v1259_v15 = vunpack.c.h.bf16 %v1257_v9  ;;  %v818_v18 = vld [vmem:[#allocation2 + $0x20] sm:$0xff]  ;;  %v837_v24 = vadd.f32 %v1367_v8, %v825_v12  ;;  %v838_v25 = vadd.f32 %v1367_v8, %v826_v13 }
 0x12b   : > { %v830_v27 = vmul.f32 %v1366_v7, %v818_v18  ;;  %v839_v30 = vadd.f32 %v1367_v8, %v827_v19  ;;  %v840_v31 = vadd.f32 %v1367_v8, %v828_v20  ;;  %v1267_v33 = vunpack.c.h.bf16 %v1293_v23 }
 0x12c   : > { %v820_v29 = vld [vmem:[#allocation2 + $0x38] sm:$0xff]  ;;  %v861_v34 = vadd.f32 %v1258_v14, %v837_v24  ;;  %v862_v35 = vadd.f32 %v1259_v15, %v838_v25  ;;  %v841_v36 = vadd.f32 %v1367_v8, %v829_v26  ;;  %v831_v40 = vmul.f32 %v1366_v7, %v819_v28 }
 0x12d   : > { %v842_v37 = vadd.f32 %v1367_v8, %v830_v27  ;;  %v863_v38 = vadd.f32 %v1262_v21, %v839_v30  ;;  %v864_v39 = vadd.f32 %v1263_v22, %v840_v31  ;;  %v832_v41 = vmul.f32 %v1366_v7, %v820_v29 }
 0x12e   : > { %v869_v43 = vmax.f32 %v861_v34, 0.0  ;;  %v870_v44 = vmax.f32 %v862_v35, 0.0  ;;  %v865_v45 = vadd.f32 %v1266_v32, %v841_v36  ;;  %v843_v49 = vadd.f32 %v1367_v8, %v831_v40 }
 0x12f   : > { %v866_v46 = vadd.f32 %v1267_v33, %v842_v37  ;;  %v871_v47 = vmax.f32 %v863_v38, 0.0  ;;  %v872_v48 = vmax.f32 %v864_v39, 0.0  ;;  %v844_v50 = vadd.f32 %v1367_v8, %v832_v41 }
 0x130   : > { %v1275_v51 = vpack.c.bf16 %v870_v44, %v869_v43  ;;  %v873_v52 = vmax.f32 %v865_v45, 0.0  ;;  %v1270_v54 = vunpack.c.l.bf16 %v1294_v42  ;;  %v1271_v56 = vunpack.c.h.bf16 %v1294_v42 }
 0x131   : > { %v874_v53 = vmax.f32 %v866_v46, 0.0  ;;  %v1280_v55 = vpack.c.bf16 %v872_v48, %v871_v47 }
 0x132   : > { %1276 = vst [vmem:[%s1551_s21] sm:$0xff] %v1275_v51   ;;  %v867_v58 = vadd.f32 %v1270_v54, %v843_v49  ;;  %v868_v59 = vadd.f32 %v1271_v56, %v844_v50 }
 0x133   : > { %v1285_v57 = vpack.c.bf16 %v874_v53, %v873_v52  ;;  %1295 = vst [vmem:[%s1551_s21 + $0x8] sm:$0xff] %v1280_v55  }
 0x134   : > { %v875_v60 = vmax.f32 %v867_v58, 0.0  ;;  %v876_v61 = vmax.f32 %v868_v59, 0.0 }
 0x135   : > { %1296 = vst [vmem:[%s1551_s21 + $0x10] sm:$0xff] %v1285_v57  }
 0x136   : > { %v1290_v62 = vpack.c.bf16 %v876_v61, %v875_v60 }
 0x138   : > { %1297 = vst [vmem:[%s1551_s21 + $0x18] sm:$0xff] %v1290_v62  }
 0x139 PF: > { %s15_s24 = sadd.s32 1, %s1422_s24   ;;  %s1646_s18 = smov %s1402_s19 }
 0x13a   : > { %p12_p0 = scmp.ge.s32.totalorder %s15_s24, 8   ;;  %s1647_s19 = smov %s1506_s6 }
 0x13b   : > { %s1648_s20 = smov %s1414_s22  ;;  %s1649_s21 = smov %s1418_s23 }
 0x13c   : > { %s1650_s22 = smov %s1653_s25  ;;  %s1651_s23 = smov %s1657_s26 }
 0x13d   :  { %14 = sbr.rel (!%p12_p0) target bundleno = 4 (0x4), region = 127 }

// kernel: adv_resnet_forward.15
= control target key start
LH: loop header
LB: loop body
LE: loop exit
PB: predicated region body
PF: predicated region fallthrough
CT: control target
= control target key end

     0   :  { %s1058_s15 = smov 0   ;;  %s1060_s16 = smov 0   ;;  %s1195_s0 = inlined_call_operand.vmem [shape: bf16[32,1152], index: 0, kind: input, shape index: {}]   ;;  %s1196_s1 = inlined_call_operand.vmem [shape: bf16[1152,128], index: 1, kind: input, shape index: {}]   ;;  %s1197_s2 = inlined_call_operand.vmem [shape: f32[1,128], index: 2, kind: input, shape index: {}]   ;;  %s1198_s3 = inlined_call_operand.vmem [shape: f32[1,128], index: 3, kind: input, shape index: {}]   ;;  %s1199_s4 = inlined_call_operand.vmem [shape: bf16[32,128], index: 4, kind: output, shape index: {}]  }
   0x1   :  { %s1062_s17 = smov 0   ;;  %s1064_s18 = smov 0  }
   0x2   :  { %s1066_s19 = smov 0   ;;  %s1068_s20 = smov 0  }
   0x3   :  { %s1070_s21 = smov 0  }
   0x4 LB: > { %s26_s22 = sadd.s32 1, %s1022_s19  ;;  %s33_s23 = sadd.s32 1, %s1026_s20  ;;  %s1030_s21 = sphi %s1070_s21, %s14_s21   ;;  %s1026_s20 = sphi %s1068_s20, %s1205_s20   ;;  %s1022_s19 = sphi %s1066_s19, %s1204_s19   ;;  %s1018_s18 = sphi %s1064_s18, %s1203_s18   ;;  %s1014_s17 = sphi %s1062_s17, %s1202_s17   ;;  %s1010_s16 = sphi %s1060_s16, %s1201_s16   ;;  %s1006_s15 = sphi %s1058_s15, %s1200_s15  }
   0x5   : > { %p27_p0 = scmp.ge.s32.totalorder %s26_s22, 3  ;;  %p49_p1 = scmp.ne.s32.totalorder %s1010_s16, %s1006_s15 }
   0x6   : > { %p50_p2 = scmp.eq.s32.totalorder %s1030_s21, 0  ;;  %s42_s27 = sadd.s32 1, %s1010_s16 }
   0x7   : > { %s1207_s22 = smov (%p27_p0, %s26_s22), 0  ;;  %s1209_s23 = smov (!%p27_p0, %s33_s23), %s1026_s20 }
   0x8   : > { %p51_p3 = por %p50_p2, %p49_p1  ;;  %p35_p4 = scmp.ge.s32.totalorder %s1209_s23, 2 }
   0x9   : > { %s38_s24 = ssub.s32 %s1022_s19, %s1207_s22  ;;  %p758_p6 = scmp.ge.s32.totalorder %s1030_s21, 6 }
   0xa   : > { %s1211_s23 = smov (%p35_p4, %s1209_s23), 0 }
   0xb   : > { %s37_s25 = ssub.s32 %s1026_s20, %s1211_s23  ;;  %195 = sbr.rel (%p758_p6) target bundleno = 29 (0x1d), region = 24 }
   0xc   : > { %s39_s26 = sor.u32 %s38_s24, %s37_s25 }
   0xd   : > { %p40_p5 = scmp.eq.s32.totalorder %s39_s26, 0 }
   0xf   : > { %s1109_s28 = scalar_select %p40_p5, %s1010_s16, %s42_s27  }
  0x10   : > { %198 = sbr.rel (!%p51_p3) target bundleno = 29 (0x1d), region = 28  ;;  %s200_s29 = sand.u32 (%p51_p3), 1, %s1010_s16  }
  0x11   : > { %s204_s30 = smul.u32 (%p51_p3), 3, %s1022_s19 }
  0x12   : > { %s914_s5 = smul.u32 (%p51_p3), 24, %s200_s29 }
  0x13   : > { %s915_s6 = smul.u32 (%p51_p3), 18, %s1026_s20 }
  0x14   : > { %s202_s12 = scalar_lea.vmem (%p51_p3), [#allocation3], %s914_s5 }
  0x15   : > { %s206_s7 = sadd.s32 %s915_s6, %s204_s30 }
  0x16   : > { %s761_s8 = sshll.u32 %s206_s7, 2 }
  0x17   : > { %s208_s11 = scalar_lea.vmem %s1195_s0, %s761_s8 }
  0x18   : > { %v223_v0 = vld [vmem:[%s208_s11] sm:$0xff]  ;;  %v762_v2 = vld [vmem:[%s208_s11 + $0x8] sm:$0xf]  ;;  %v764_v3 = vld [vmem:[%s208_s11 + $0x2c] sm:$0xf] }
  0x19   : > { %v225_v1 = vld [vmem:[%s208_s11 + $0x24] sm:$0xff]  ;;  %224 = vst [vmem:[%s202_s12] sm:$0xff] %v223_v0 }
  0x1a   : > { %226 = vst [vmem:[%s202_s12 + $0xc] sm:$0xff] %v225_v1 }
  0x1b   : > { %763 = vst [vmem:[%s202_s12 + $0x8] sm:$0xf] %v762_v2 }
  0x1c   : > { %765 = vst [vmem:[%s202_s12 + $0x14] sm:$0xf] %v764_v3 }
  0x1d PF: > { %p766_p7 = scmp.ge.s32.totalorder %s1030_s21, 1  ;;  %p255_p8 = scmp.lt.s32.totalorder %s1030_s21, 7 }
  0x1f   : > { %p256_p9 = pnand %p766_p7, %p255_p8 }
  0x20   : > { %s262_s13 = sand.u32 (!%p256_p9), 1, %s1006_s15   ;;  %s306_s14 = smul.u32 (!%p256_p9), 48, %s1014_s17 }
  0x21   : > { %259 = sbr.rel (%p256_p9) target bundleno = 244 (0xf4), region = 58  ;;  %s768_s25 = sshll.u32 (!%p256_p9), %s1018_s18, 1 }
  0x22   : > { %s916_s24 = smul.u32 (!%p256_p9), 24, %s262_s13  ;;  %p307_p10 = scmp.lt.s32.totalorder (!%p256_p9), %s306_s14, 143 }
  0x23   : > { %p322_p11 = scmp.lt.s32.totalorder (!%p256_p9), %s768_s25, 3  ;;  %p770_p12 = scmp.ne.s32.totalorder (!%p256_p9), %s1014_s17, 0 }
  0x24   : > { %s1133_s15 = scalar_lea.vmem (!%p256_p9), [#allocation3], %s916_s24 }
  0x26   : > { %s1213_s14 = smov (!%p307_p10, %s306_s14), 143  ;;  %s1215_s25 = smov (!%p322_p11, %s768_s25), 3 }
  0x27   : > { %s767_s26 = sshll.u32 %s1213_s14, 2  ;;  %s769_s5 = sshll.u32 %s1215_s25, 2 }
  0x28   : > { %s1126_s30 = scalar_lea.vmem %s1196_s1, %s767_s26  ;;  %s1131_s8 = scalar_lea.vmem %s1199_s4, %s769_s5 }
  0x29   : > { %333 = sbr.rel (%p770_p12) target bundleno = 49 (0x31), region = 66 }
  0x2e   : > { %v1032_v4 = vmov 0.0  }
  0x2f   : > { %334 = vst [vmem:[#allocation2] sm:$0xff] %v1032_v4 }
  0x30   : > { %335 = vst [vmem:[#allocation2 + $0x8] sm:$0xff] %v1032_v4 }
  0x31 PF: > { %v892_v5 = vld [vmem:[%s1126_s30 + $0x38] sm:$0xff]  ;;  %v891_v8 = vld [vmem:[%s1126_s30 + $0x30] sm:$0xff]  ;;  %v890_v11 = vld [vmem:[%s1126_s30 + $0x28] sm:$0xff]  ;;  %p879_p13 = scmp.ne.s32.totalorder %s1014_s17, 2 }
  0x32   : > { %v900_v6 = vld [vmem:[%s1126_s30 + $0x78] sm:$0xff]  ;;  %550 = vmatpush.bf16.msra.mxu0 %v892_v5  ;;  %v899_v9 = vld [vmem:[%s1126_s30 + $0x70] sm:$0xff]  ;;  %v898_v12 = vld [vmem:[%s1126_s30 + $0x68] sm:$0xff] }
  0x33   : > { %v908_v7 = vld [vmem:[%s1126_s30 + $0xb8] sm:$0xff]  ;;  %564 = vmatpush.bf16.msra.mxu1 %v900_v6  ;;  %v907_v10 = vld [vmem:[%s1126_s30 + $0xb0] sm:$0xff]  ;;  %v906_v13 = vld [vmem:[%s1126_s30 + $0xa8] sm:$0xff] }
  0x34   : > { %578 = vmatpush.bf16.msra.mxu2 %v908_v7  ;;  %v889_v14 = vld [vmem:[%s1126_s30 + $0x20] sm:$0xff]  ;;  %v888_v17 = vld [vmem:[%s1126_s30 + $0x18] sm:$0xff]  ;;  %v887_v20 = vld [vmem:[%s1126_s30 + $0x10] sm:$0xff] }
  0x35   : > { %v897_v15 = vld [vmem:[%s1126_s30 + $0x60] sm:$0xff]  ;;  %v896_v18 = vld [vmem:[%s1126_s30 + $0x58] sm:$0xff]  ;;  %v895_v21 = vld [vmem:[%s1126_s30 + $0x50] sm:$0xff] }
  0x36   : > { %551 = vmatpush.bf16.msra.mxu0 %v891_v8  ;;  %v905_v16 = vld [vmem:[%s1126_s30 + $0xa0] sm:$0xff]  ;;  %v904_v19 = vld [vmem:[%s1126_s30 + $0x98] sm:$0xff]  ;;  %v903_v22 = vld [vmem:[%s1126_s30 + $0x90] sm:$0xff] }
  0x37   : > { %565 = vmatpush.bf16.msra.mxu1 %v899_v9  ;;  %v886_v23 = vld [vmem:[%s1126_s30 + $0x8] sm:$0xff]  ;;  %v885_v26 = vld [vmem:[%s1126_s30] sm:$0xff]  ;;  %v883_v29 = vld [vmem:[%s1133_s15 + $0x8] sm:$0xf0] }
  0x38   : > { %579 = vmatpush.bf16.msra.mxu2 %v907_v10  ;;  %v894_v24 = vld [vmem:[%s1126_s30 + $0x48] sm:$0xff]  ;;  %v893_v27 = vld [vmem:[%s1126_s30 + $0x40] sm:$0xff]  ;;  %v781_v33 = vld [vmem:[%s1133_s15 + $0x8] sm:$0xf] }
  0x39   : > { %v902_v25 = vld [vmem:[%s1126_s30 + $0x88] sm:$0xff]  ;;  %v775_v31 = vld [vmem:[%s1133_s15 + $0xc] sm:$0xf0]  ;;  %v884_v34 = vld [vmem:[%s1133_s15 + $0x10] sm:$0xf0] }
  0x3a   : > { %552 = vmatpush.bf16.msra.mxu0 %v890_v11  ;;  %v773_v28 = vld [vmem:[%s1133_s15] sm:$0xf]  ;;  %v882_v30 = vld [vmem:[%s1133_s15 + $0x4] sm:$0xf]  ;;  %v901_v32 = vld [vmem:[%s1126_s30 + $0x80] sm:$0xff]  ;;  %v782_v37 = vor.u32 %v884_v34, %v781_v33 }
  0x3b   : > { %566 = vmatpush.bf16.msra.mxu1 %v898_v12  ;;  %v774_v35 = vor.u32 %v883_v29, %v773_v28  ;;  %v778_v36 = vor.u32 %v882_v30, %v775_v31  ;;  %v336_v41 = vld [vmem:[#allocation2] sm:$0xff]  ;;  %v337_v48 = vld [vmem:[#allocation2 + $0x8] sm:$0xff] }
  0x3c   : > { %580 = vmatpush.bf16.msra.mxu2 %v906_v13 }
  0x3e   : > { %553 = vmatpush.bf16.msra.mxu0 %v889_v14 }
  0x3f   : > { %567 = vmatpush.bf16.msra.mxu1 %v897_v15 }
  0x40   : > { %581 = vmatpush.bf16.msra.mxu2 %v905_v16 }
  0x42   : > { %554 = vmatpush.bf16.msra.mxu0 %v888_v17 }
  0x43   : > { %568 = vmatpush.bf16.msra.mxu1 %v896_v18 }
  0x44   : > { %582 = vmatpush.bf16.msra.mxu2 %v904_v19 }
  0x46   : > { %555 = vmatpush.bf16.msra.mxu0 %v887_v20 }
  0x47   : > { %569 = vmatpush.bf16.msra.mxu1 %v895_v21 }
  0x48   : > { %583 = vmatpush.bf16.msra.mxu2 %v903_v22 }
  0x4a   : > { %556 = vmatpush.bf16.msra.mxu0 %v886_v23 }
  0x4b   : > { %570 = vmatpush.bf16.msra.mxu1 %v894_v24 }
  0x4c   : > { %584 = vmatpush.bf16.msra.mxu2 %v902_v25 }
  0x4e   : > { %557 = vmatpush.bf16.msra.mxu0 %v885_v26 }
  0x4f   : > { %571 = vmatpush.bf16.msra.mxu1 %v893_v27 }
  0x50   : > { %585 = vmatpush.bf16.msra.mxu2 %v901_v32 }
  0x51   : > { %558 = vmatmul.bf16.vlgmr.msra.gmra.mxu0 %v774_v35 }
  0x52   : > { %572 = vmatmul.bf16.vlgmr.msra.gmra.mxu1 %v778_v36 }
  0x53   : > { %586 = vmatmul.bf16.vlgmr.msra.gmra.mxu2 %v782_v37 }
  0xce   : > { %v559_v38 = vpop.f32.mrf.mxu0 }
  0xcf   : > { %v573_v39 = vpop.f32.mrf.mxu1 }
  0xd0   : > { %v574_v40 = vadd.f32 %v573_v39, %v559_v38 }
  0xd6   : > { %v587_v42 = vpop.f32.mrf.mxu2  ;;  %v561_v45 = vpop.f32.mrf.mxu0 }
  0xd7   : > { %v588_v43 = vadd.f32 %v587_v42, %v574_v40  ;;  %v575_v46 = vpop.f32.mrf.mxu1 }
  0xd8   : > { %v576_v47 = vadd.f32 %v575_v46, %v561_v45 }
  0xd9   : > { %v592_v44 = vadd.f32 %v588_v43, %v336_v41 }
  0xdb   : > { %594 = vst [vmem:[#allocation2] sm:$0xff] %v592_v44 }
  0xde   : > { %v589_v49 = vpop.f32.mrf.mxu2 }
  0xdf   : > { %v590_v50 = vadd.f32 %v589_v49, %v576_v47  ;;  %599 = sbr.rel (%p879_p13) target bundleno = 244 (0xf4), region = 70 }
  0xe1   : > { %v593_v51 = vadd.f32 %v590_v50, %v337_v48 }
  0xe3   : > { %595 = vst [vmem:[#allocation2 + $0x8] sm:$0xff] %v593_v51 }
  0xe4   : > { %v600_v52 = vld [vmem:[#allocation2] sm:$0xff] }
  0xe5   : > { %v974_v54 = vld [vmem:[%s1197_s2] ss:$0 sm:$0xff] }
  0xe6   : > { %v975_v55 = vld [vmem:[%s1198_s3] ss:$0 sm:$0xff]  ;;  %v606_v56 = vmul.f32 %v974_v54, %v600_v52 }
  0xe8   : > { %v612_v58 = vadd.f32 %v975_v55, %v606_v56 }
  0xea   : > { %v601_v53 = vld [vmem:[#allocation2 + $0x8] sm:$0xff]  ;;  %v614_v60 = vmax.f32 %v612_v58, 0.0 }
  0xeb   : > { %v607_v57 = vmul.f32 %v974_v54, %v601_v53 }
  0xed   : > { %v613_v59 = vadd.f32 %v975_v55, %v607_v57 }
  0xef   : > { %v615_v61 = vmax.f32 %v613_v59, 0.0 }
  0xf1   : > { %v912_v62 = vpack.c.bf16 %v615_v61, %v614_v60 }
  0xf3   : > { %913 = vst [vmem:[%s1131_s8] sm:$0xff] %v912_v62  }
  0xf4 PF: > { %s14_s21 = sadd.s32 1, %s1030_s21   ;;  %s1200_s15 = smov %s1010_s16 }
  0xf5   : > { %p11_p0 = scmp.ge.s32.totalorder %s14_s21, 8   ;;  %s1201_s16 = smov %s1109_s28 }
  0xf6   : > { %s1202_s17 = smov %s1022_s19  ;;  %s1203_s18 = smov %s1026_s20 }
  0xf7   : > { %s1204_s19 = smov %s1207_s22  ;;  %s1205_s20 = smov %s1211_s23 }
  0xf8   :  { %13 = sbr.rel (!%p11_p0) target bundleno = 4 (0x4), region = 120 }

// kernel: adv_resnet_forward.16
= control target key start
LH: loop header
LB: loop body
LE: loop exit
PB: predicated region body
PF: predicated region fallthrough
CT: control target
= control target key end

     0   :  { %s681_s15 = smov 0   ;;  %s683_s16 = smov 0   ;;  %s744_s0 = inlined_call_operand.vmem [shape: bf16[32,128], index: 0, kind: input, shape index: {}]   ;;  %s745_s1 = inlined_call_operand.vmem [shape: bf16[128,128], index: 1, kind: input, shape index: {}]   ;;  %s746_s2 = inlined_call_operand.vmem [shape: f32[1,128], index: 2, kind: input, shape index: {}]   ;;  %s747_s3 = inlined_call_operand.vmem [shape: f32[1,128], index: 3, kind: input, shape index: {}]   ;;  %s748_s4 = inlined_call_operand.vmem [shape: bf16[32,128], index: 4, kind: output, shape index: {}]  }
   0x1   :  { %s685_s17 = smov 0  }
   0x2 LB: > { %s33_s18 = sadd.s32 1, %s650_s16  ;;  %p549_p0 = scmp.ge.s32.totalorder %s654_s17, 1  ;;  %s654_s17 = sphi %s685_s17, %s14_s17   ;;  %s650_s16 = sphi %s683_s16, %s750_s16   ;;  %s646_s15 = sphi %s681_s15, %s749_s15  }
   0x3   : > { %p35_p1 = scmp.ge.s32.totalorder %s33_s18, 2  ;;  %p221_p2 = scmp.lt.s32.totalorder %s654_s17, 3 }
   0x5   : > { %s752_s18 = smov (%p35_p1, %s33_s18), 0  ;;  %p222_p3 = pnand %p549_p0, %p221_p2 }
   0x6   : > { %s550_s27 = sshll.u32 (!%p222_p3), %s646_s15, 1 }
   0x7   : > { %225 = sbr.rel (%p222_p3) target bundleno = 185 (0xb9), region = 36  ;;  %p268_p4 = scmp.lt.s32.totalorder (!%p222_p3), %s550_s27, 3 }
   0xc   : > { %v600_v0 = vld [vmem:[%s745_s1 + $0x38] sm:$0xff]  ;;  %v599_v1 = vld [vmem:[%s745_s1 + $0x30] sm:$0xff]  ;;  %v598_v2 = vld [vmem:[%s745_s1 + $0x28] sm:$0xff]  ;;  %s754_s27 = smov (!%p268_p4, %s550_s27), 3 }
   0xd   : > { %380 = vmatpush.bf16.msra.mxu0 %v600_v0  ;;  %v597_v3 = vld [vmem:[%s745_s1 + $0x20] sm:$0xff]  ;;  %v596_v4 = vld [vmem:[%s745_s1 + $0x18] sm:$0xff]  ;;  %v595_v5 = vld [vmem:[%s745_s1 + $0x10] sm:$0xff]  ;;  %s551_s8 = sshll.u32 %s754_s27, 2 }
   0xe   : > { %v594_v6 = vld [vmem:[%s745_s1 + $0x8] sm:$0xff]  ;;  %v593_v7 = vld [vmem:[%s745_s1] sm:$0xff]  ;;  %s274_s13 = scalar_lea.vmem %s744_s0, %s551_s8  ;;  %s298_s23 = scalar_lea.vmem %s748_s4, %s551_s8 }
   0xf   : > { %v592_v8 = vld [vmem:[%s274_s13] sm:$0xff] }
  0x10   : > { %v630_v10 = vld [vmem:[%s746_s2] ss:$0 sm:$0xff] }
  0x11   : > { %381 = vmatpush.bf16.msra.mxu0 %v599_v1  ;;  %v631_v12 = vld [vmem:[%s747_s3] ss:$0 sm:$0xff] }
  0x15   : > { %382 = vmatpush.bf16.msra.mxu0 %v598_v2 }
  0x19   : > { %383 = vmatpush.bf16.msra.mxu0 %v597_v3 }
  0x1d   : > { %384 = vmatpush.bf16.msra.mxu0 %v596_v4 }
  0x21   : > { %385 = vmatpush.bf16.msra.mxu0 %v595_v5 }
  0x25   : > { %386 = vmatpush.bf16.msra.mxu0 %v594_v6 }
  0x29   : > { %387 = vmatpush.bf16.msra.mxu0 %v593_v7 }
  0x2c   : > { %388 = vmatmul.bf16.vlgmr.msra.gmra.mxu0 %v592_v8 }
  0xa9   : > { %v389_v9 = vpop.f32.mrf.mxu0 }
  0xaa   : > { %v407_v11 = vmul.f32 %v630_v10, %v389_v9 }
  0xac   : > { %v413_v15 = vadd.f32 %v631_v12, %v407_v11 }
  0xb1   : > { %v391_v13 = vpop.f32.mrf.mxu0 }
  0xb2   : > { %v408_v14 = vmul.f32 %v630_v10, %v391_v13 }
  0xb4   : > { %v414_v16 = vadd.f32 %v631_v12, %v408_v14 }
  0xb6   : > { %v604_v17 = vpack.c.bf16 %v414_v16, %v413_v15 }
  0xb8   : > { %605 = vst [vmem:[%s298_s23] sm:$0xff] %v604_v17  }
  0xb9 PF: > { %s14_s17 = sadd.s32 1, %s654_s17   ;;  %s749_s15 = smov %s650_s16 }
  0xba   : > { %p11_p5 = scmp.ge.s32.totalorder %s14_s17, 4   ;;  %s750_s16 = smov %s752_s18 }
  0xbc   :  { %13 = sbr.rel (!%p11_p5) target bundleno = 2 (0x2), region = 83 }

// kernel: adv_resnet_forward.17
= control target key start
LH: loop header
LB: loop body
LE: loop exit
PB: predicated region body
PF: predicated region fallthrough
CT: control target
= control target key end

     0   :  { %s1150_s18 = smov 0   ;;  %s1152_s19 = smov 0   ;;  %s1293_s0 = inlined_call_operand.vmem [shape: bf16[32,1152], index: 0, kind: input, shape index: {}]   ;;  %s1294_s1 = inlined_call_operand.vmem [shape: bf16[1152,128], index: 1, kind: input, shape index: {}]   ;;  %s1295_s2 = inlined_call_operand.vmem [shape: f32[1,128], index: 2, kind: input, shape index: {}]   ;;  %s1296_s3 = inlined_call_operand.vmem [shape: f32[1,128], index: 3, kind: input, shape index: {}]   ;;  %s1297_s4 = inlined_call_operand.vmem [shape: bf16[32,128], index: 4, kind: input, shape index: {}]   ;;  %s1298_s5 = inlined_call_operand.vmem [shape: bf16[32,128], index: 5, kind: output, shape index: {}]  }
   0x1   :  { %s1154_s20 = smov 0   ;;  %s1156_s21 = smov 0  }
   0x2   :  { %s1158_s22 = smov 0   ;;  %s1160_s23 = smov 0  }
   0x3   :  { %s1162_s24 = smov 0  }
   0x4 LB: > { %s27_s25 = sadd.s32 1, %s1109_s22  ;;  %s34_s26 = sadd.s32 1, %s1113_s23  ;;  %s1117_s24 = sphi %s1162_s24, %s15_s24   ;;  %s1113_s23 = sphi %s1160_s23, %s1304_s23   ;;  %s1109_s22 = sphi %s1158_s22, %s1303_s22   ;;  %s1105_s21 = sphi %s1156_s21, %s1302_s21   ;;  %s1101_s20 = sphi %s1154_s20, %s1301_s20   ;;  %s1097_s19 = sphi %s1152_s19, %s1300_s19   ;;  %s1093_s18 = sphi %s1150_s18, %s1299_s18  }
   0x5   : > { %p28_p0 = scmp.ge.s32.totalorder %s27_s25, 3  ;;  %p50_p1 = scmp.ne.s32.totalorder %s1097_s19, %s1093_s18 }
   0x6   : > { %p51_p2 = scmp.eq.s32.totalorder %s1117_s24, 0  ;;  %s43_s30 = sadd.s32 1, %s1097_s19 }
   0x7   : > { %s1306_s25 = smov (%p28_p0, %s27_s25), 0  ;;  %s1308_s26 = smov (!%p28_p0, %s34_s26), %s1113_s23 }
   0x8   : > { %p52_p3 = por %p51_p2, %p50_p1  ;;  %p36_p4 = scmp.ge.s32.totalorder %s1308_s26, 2 }
   0x9   : > { %s39_s27 = ssub.s32 %s1109_s22, %s1306_s25  ;;  %p839_p6 = scmp.ge.s32.totalorder %s1117_s24, 6 }
   0xa   : > { %s1310_s26 = smov (%p36_p4, %s1308_s26), 0 }
   0xb   : > { %s38_s28 = ssub.s32 %s1113_s23, %s1310_s26  ;;  %224 = sbr.rel (%p839_p6) target bundleno = 29 (0x1d), region = 24 }
   0xc   : > { %s40_s29 = sor.u32 %s39_s27, %s38_s28 }
   0xd   : > { %p41_p5 = scmp.eq.s32.totalorder %s40_s29, 0 }
   0xf   : > { %s1201_s6 = scalar_select %p41_p5, %s1097_s19, %s43_s30  }
  0x10   : > { %227 = sbr.rel (!%p52_p3) target bundleno = 29 (0x1d), region = 28  ;;  %s229_s7 = sand.u32 (%p52_p3), 1, %s1097_s19  }
  0x11   : > { %s233_s8 = smul.u32 (%p52_p3), 3, %s1109_s22 }
  0x12   : > { %s1001_s9 = smul.u32 (%p52_p3), 24, %s229_s7 }
  0x13   : > { %s1002_s10 = smul.u32 (%p52_p3), 18, %s1113_s23 }
  0x14   : > { %s231_s16 = scalar_lea.vmem (%p52_p3), [#allocation3], %s1001_s9 }
  0x15   : > { %s235_s11 = sadd.s32 %s1002_s10, %s233_s8 }
  0x16   : > { %s842_s12 = sshll.u32 %s235_s11, 2 }
  0x17   : > { %s237_s15 = scalar_lea.vmem %s1293_s0, %s842_s12 }
  0x18   : > { %v252_v0 = vld [vmem:[%s237_s15] sm:$0xff]  ;;  %v843_v2 = vld [vmem:[%s237_s15 + $0x8] sm:$0xf]  ;;  %v845_v3 = vld [vmem:[%s237_s15 + $0x2c] sm:$0xf] }
  0x19   : > { %v254_v1 = vld [vmem:[%s237_s15 + $0x24] sm:$0xff]  ;;  %253 = vst [vmem:[%s231_s16] sm:$0xff] %v252_v0 }
  0x1a   : > { %255 = vst [vmem:[%s231_s16 + $0xc] sm:$0xff] %v254_v1 }
  0x1b   : > { %844 = vst [vmem:[%s231_s16 + $0x8] sm:$0xf] %v843_v2 }
  0x1c   : > { %846 = vst [vmem:[%s231_s16 + $0x14] sm:$0xf] %v845_v3 }
  0x1d PF: > { %p847_p7 = scmp.ge.s32.totalorder %s1117_s24, 1  ;;  %p296_p8 = scmp.lt.s32.totalorder %s1117_s24, 7 }
  0x1f   : > { %p297_p9 = pnand %p847_p7, %p296_p8 }
  0x20   : > { %s303_s17 = sand.u32 (!%p297_p9), 1, %s1093_s18   ;;  %s357_s27 = smul.u32 (!%p297_p9), 48, %s1101_s20 }
  0x21   : > { %300 = sbr.rel (%p297_p9) target bundleno = 246 (0xf6), region = 62  ;;  %s849_s29 = sshll.u32 (!%p297_p9), %s1105_s21, 1 }
  0x22   : > { %s1003_s28 = smul.u32 (!%p297_p9), 24, %s303_s17  ;;  %p358_p10 = scmp.lt.s32.totalorder (!%p297_p9), %s357_s27, 143 }
  0x23   : > { %p373_p11 = scmp.lt.s32.totalorder (!%p297_p9), %s849_s29, 3  ;;  %p853_p12 = scmp.ne.s32.totalorder (!%p297_p9), %s1101_s20, 0 }
  0x24   : > { %s1230_s15 = scalar_lea.vmem (!%p297_p9), [#allocation3], %s1003_s28 }
  0x26   : > { %s1312_s27 = smov (!%p358_p10, %s357_s27), 143  ;;  %s1314_s29 = smov (!%p373_p11, %s849_s29), 3 }
  0x27   : > { %s848_s30 = sshll.u32 %s1312_s27, 2  ;;  %s850_s10 = sshll.u32 %s1314_s29, 2 }
  0x28   : > { %s1218_s9 = scalar_lea.vmem %s1294_s1, %s848_s30  ;;  %s1223_s13 = scalar_lea.vmem %s1297_s4, %s850_s10 }
  0x29   : > { %s1228_s21 = scalar_lea.vmem %s1298_s5, %s850_s10  ;;  %393 = sbr.rel (%p853_p12) target bundleno = 49 (0x31), region = 70 }
  0x2e   : > { %v1119_v4 = vmov 0.0  }
  0x2f   : > { %394 = vst [vmem:[#allocation2] sm:$0xff] %v1119_v4 }
  0x30   : > { %395 = vst [vmem:[#allocation2 + $0x8] sm:$0xff] %v1119_v4 }
  0x31 PF: > { %v975_v5 = vld [vmem:[%s1218_s9 + $0x38] sm:$0xff]  ;;  %v974_v8 = vld [vmem:[%s1218_s9 + $0x30] sm:$0xff]  ;;  %v973_v11 = vld [vmem:[%s1218_s9 + $0x28] sm:$0xff]  ;;  %p962_p13 = scmp.ne.s32.totalorder %s1101_s20, 2 }
  0x32   : > { %v983_v6 = vld [vmem:[%s1218_s9 + $0x78] sm:$0xff]  ;;  %610 = vmatpush.bf16.msra.mxu0 %v975_v5  ;;  %v982_v9 = vld [vmem:[%s1218_s9 + $0x70] sm:$0xff]  ;;  %v981_v12 = vld [vmem:[%s1218_s9 + $0x68] sm:$0xff] }
  0x33   : > { %v991_v7 = vld [vmem:[%s1218_s9 + $0xb8] sm:$0xff]  ;;  %624 = vmatpush.bf16.msra.mxu1 %v983_v6  ;;  %v990_v10 = vld [vmem:[%s1218_s9 + $0xb0] sm:$0xff]  ;;  %v989_v13 = vld [vmem:[%s1218_s9 + $0xa8] sm:$0xff] }
  0x34   : > { %638 = vmatpush.bf16.msra.mxu2 %v991_v7  ;;  %v972_v14 = vld [vmem:[%s1218_s9 + $0x20] sm:$0xff]  ;;  %v971_v17 = vld [vmem:[%s1218_s9 + $0x18] sm:$0xff]  ;;  %v970_v20 = vld [vmem:[%s1218_s9 + $0x10] sm:$0xff] }
  0x35   : > { %v980_v15 = vld [vmem:[%s1218_s9 + $0x60] sm:$0xff]  ;;  %v979_v18 = vld [vmem:[%s1218_s9 + $0x58] sm:$0xff]  ;;  %v978_v21 = vld [vmem:[%s1218_s9 + $0x50] sm:$0xff] }
  0x36   : > { %611 = vmatpush.bf16.msra.mxu0 %v974_v8  ;;  %v988_v16 = vld [vmem:[%s1218_s9 + $0xa0] sm:$0xff]  ;;  %v987_v19 = vld [vmem:[%s1218_s9 + $0x98] sm:$0xff]  ;;  %v986_v22 = vld [vmem:[%s1218_s9 + $0x90] sm:$0xff] }
  0x37   : > { %625 = vmatpush.bf16.msra.mxu1 %v982_v9  ;;  %v969_v23 = vld [vmem:[%s1218_s9 + $0x8] sm:$0xff]  ;;  %v968_v26 = vld [vmem:[%s1218_s9] sm:$0xff]  ;;  %v966_v29 = vld [vmem:[%s1230_s15 + $0x8] sm:$0xf0] }
  0x38   : > { %639 = vmatpush.bf16.msra.mxu2 %v990_v10  ;;  %v977_v24 = vld [vmem:[%s1218_s9 + $0x48] sm:$0xff]  ;;  %v976_v27 = vld [vmem:[%s1218_s9 + $0x40] sm:$0xff]  ;;  %v864_v33 = vld [vmem:[%s1230_s15 + $0x8] sm:$0xf] }
  0x39   : > { %v985_v25 = vld [vmem:[%s1218_s9 + $0x88] sm:$0xff]  ;;  %v858_v31 = vld [vmem:[%s1230_s15 + $0xc] sm:$0xf0]  ;;  %v967_v34 = vld [vmem:[%s1230_s15 + $0x10] sm:$0xf0] }
  0x3a   : > { %612 = vmatpush.bf16.msra.mxu0 %v973_v11  ;;  %v856_v28 = vld [vmem:[%s1230_s15] sm:$0xf]  ;;  %v965_v30 = vld [vmem:[%s1230_s15 + $0x4] sm:$0xf]  ;;  %v984_v32 = vld [vmem:[%s1218_s9 + $0x80] sm:$0xff]  ;;  %v865_v37 = vor.u32 %v967_v34, %v864_v33 }
  0x3b   : > { %626 = vmatpush.bf16.msra.mxu1 %v981_v12  ;;  %v857_v35 = vor.u32 %v966_v29, %v856_v28  ;;  %v861_v36 = vor.u32 %v965_v30, %v858_v31  ;;  %v396_v41 = vld [vmem:[#allocation2] sm:$0xff]  ;;  %v397_v48 = vld [vmem:[#allocation2 + $0x8] sm:$0xff] }
  0x3c   : > { %640 = vmatpush.bf16.msra.mxu2 %v989_v13 }
  0x3e   : > { %613 = vmatpush.bf16.msra.mxu0 %v972_v14 }
  0x3f   : > { %627 = vmatpush.bf16.msra.mxu1 %v980_v15 }
  0x40   : > { %641 = vmatpush.bf16.msra.mxu2 %v988_v16 }
  0x42   : > { %614 = vmatpush.bf16.msra.mxu0 %v971_v17 }
  0x43   : > { %628 = vmatpush.bf16.msra.mxu1 %v979_v18 }
  0x44   : > { %642 = vmatpush.bf16.msra.mxu2 %v987_v19 }
  0x46   : > { %615 = vmatpush.bf16.msra.mxu0 %v970_v20 }
  0x47   : > { %629 = vmatpush.bf16.msra.mxu1 %v978_v21 }
  0x48   : > { %643 = vmatpush.bf16.msra.mxu2 %v986_v22 }
  0x4a   : > { %616 = vmatpush.bf16.msra.mxu0 %v969_v23 }
  0x4b   : > { %630 = vmatpush.bf16.msra.mxu1 %v977_v24 }
  0x4c   : > { %644 = vmatpush.bf16.msra.mxu2 %v985_v25 }
  0x4e   : > { %617 = vmatpush.bf16.msra.mxu0 %v968_v26 }
  0x4f   : > { %631 = vmatpush.bf16.msra.mxu1 %v976_v27 }
  0x50   : > { %645 = vmatpush.bf16.msra.mxu2 %v984_v32 }
  0x51   : > { %618 = vmatmul.bf16.vlgmr.msra.gmra.mxu0 %v857_v35 }
  0x52   : > { %632 = vmatmul.bf16.vlgmr.msra.gmra.mxu1 %v861_v36 }
  0x53   : > { %646 = vmatmul.bf16.vlgmr.msra.gmra.mxu2 %v865_v37 }
  0xce   : > { %v619_v38 = vpop.f32.mrf.mxu0 }
  0xcf   : > { %v633_v39 = vpop.f32.mrf.mxu1 }
  0xd0   : > { %v634_v40 = vadd.f32 %v633_v39, %v619_v38 }
  0xd6   : > { %v647_v42 = vpop.f32.mrf.mxu2  ;;  %v621_v45 = vpop.f32.mrf.mxu0 }
  0xd7   : > { %v648_v43 = vadd.f32 %v647_v42, %v634_v40  ;;  %v635_v46 = vpop.f32.mrf.mxu1 }
  0xd8   : > { %v636_v47 = vadd.f32 %v635_v46, %v621_v45 }
  0xd9   : > { %v652_v44 = vadd.f32 %v648_v43, %v396_v41 }
  0xdb   : > { %654 = vst [vmem:[#allocation2] sm:$0xff] %v652_v44 }
  0xde   : > { %v649_v49 = vpop.f32.mrf.mxu2 }
  0xdf   : > { %v650_v50 = vadd.f32 %v649_v49, %v636_v47  ;;  %659 = sbr.rel (%p962_p13) target bundleno = 246 (0xf6), region = 74 }
  0xe1   : > { %v653_v51 = vadd.f32 %v650_v50, %v397_v48 }
  0xe3   : > { %655 = vst [vmem:[#allocation2 + $0x8] sm:$0xff] %v653_v51 }
  0xe4   : > { %v660_v52 = vld [vmem:[#allocation2] sm:$0xff] }
  0xe5   : > { %v1061_v54 = vld [vmem:[%s1295_s2] ss:$0 sm:$0xff] }
  0xe6   : > { %v1062_v55 = vld [vmem:[%s1296_s3] ss:$0 sm:$0xff]  ;;  %v666_v57 = vmul.f32 %v1061_v54, %v660_v52 }
  0xe7   : > { %v993_v56 = vld [vmem:[%s1223_s13] sm:$0xff]  }
  0xe8   : > { %v994_v59 = vunpack.c.l.bf16 %v993_v56  ;;  %v995_v60 = vunpack.c.h.bf16 %v993_v56  ;;  %v672_v61 = vadd.f32 %v1062_v55, %v666_v57 }
  0xea   : > { %v661_v53 = vld [vmem:[#allocation2 + $0x8] sm:$0xff]  ;;  %v678_v63 = vadd.f32 %v994_v59, %v672_v61 }
  0xeb   : > { %v667_v58 = vmul.f32 %v1061_v54, %v661_v53 }
  0xec   : > { %v680_v1 = vmax.f32 %v678_v63, 0.0 }
  0xed   : > { %v673_v62 = vadd.f32 %v1062_v55, %v667_v58 }
  0xef   : > { %v679_v0 = vadd.f32 %v995_v60, %v673_v62 }
  0xf1   : > { %v681_v2 = vmax.f32 %v679_v0, 0.0 }
  0xf3   : > { %v999_v3 = vpack.c.bf16 %v681_v2, %v680_v1 }
  0xf5   : > { %1000 = vst [vmem:[%s1228_s21] sm:$0xff] %v999_v3  }
  0xf6 PF: > { %s15_s24 = sadd.s32 1, %s1117_s24   ;;  %s1299_s18 = smov %s1097_s19 }
  0xf7   : > { %p12_p0 = scmp.ge.s32.totalorder %s15_s24, 8   ;;  %s1300_s19 = smov %s1201_s6 }
  0xf8   : > { %s1301_s20 = smov %s1109_s22  ;;  %s1302_s21 = smov %s1113_s23 }
  0xf9   : > { %s1303_s22 = smov %s1306_s25  ;;  %s1304_s23 = smov %s1310_s26 }
  0xfa   :  { %14 = sbr.rel (!%p12_p0) target bundleno = 4 (0x4), region = 127 }

// kernel: adv_resnet_forward.19
= control target key start
LH: loop header
LB: loop body
LE: loop exit
PB: predicated region body
PF: predicated region fallthrough
CT: control target
= control target key end

     0   :  { %s425_s1 = inlined_call_operand.vmem [shape: bf16[128,256], index: 1, kind: input, shape index: {}]   ;;  %s426_s0 = inlined_call_operand.vmem [shape: bf16[16,128], index: 0, kind: input, shape index: {}]   ;;  %s427_s2 = inlined_call_operand.vmem [shape: f32[1,256], index: 2, kind: input, shape index: {}]   ;;  %s428_s3 = inlined_call_operand.vmem [shape: f32[1,256], index: 3, kind: input, shape index: {}]   ;;  %s429_s4 = inlined_call_operand.vmem [shape: bf16[16,256], index: 4, kind: output, shape index: {}]  }
   0x1   :  { %v266_v0 = vld [vmem:[%s425_s1 + $0x70] sm:$0xf]  ;;  %v288_v1 = vld [vmem:[%s425_s1 + $0x74] sm:$0xf0]  ;;  %v287_v2 = vld [vmem:[%s425_s1 + $0x74] sm:$0xf] }
   0x2   :  { %v267_v3 = vor.u32 %v288_v1, %v266_v0  ;;  %v268_v4 = vld [vmem:[%s425_s1 + $0x78] sm:$0xf0]  ;;  %v258_v5 = vld [vmem:[%s425_s1 + $0x60] sm:$0xf]  ;;  %v286_v6 = vld [vmem:[%s425_s1 + $0x64] sm:$0xf0] }
   0x3   :  { %v271_v7 = vor.u32 %v287_v2, %v268_v4  ;;  %v285_v8 = vld [vmem:[%s425_s1 + $0x64] sm:$0xf]  ;;  %v260_v9 = vld [vmem:[%s425_s1 + $0x68] sm:$0xf0]  ;;  %v259_v10 = vor.u32 %v286_v6, %v258_v5  ;;  %v250_v12 = vld [vmem:[%s425_s1 + $0x50] sm:$0xf] }
   0x4   :  { %133 = vmatpush.bf16.msra.mxu0 %v267_v3  ;;  %v263_v11 = vor.u32 %v285_v8, %v260_v9  ;;  %v284_v13 = vld [vmem:[%s425_s1 + $0x54] sm:$0xf0]  ;;  %v283_v14 = vld [vmem:[%s425_s1 + $0x54] sm:$0xf]  ;;  %v252_v15 = vld [vmem:[%s425_s1 + $0x58] sm:$0xf0] }
   0x5   :  { %147 = vmatpush.bf16.msra.mxu1 %v271_v7  ;;  %v251_v16 = vor.u32 %v284_v13, %v250_v12  ;;  %v255_v17 = vor.u32 %v283_v14, %v252_v15  ;;  %v242_v18 = vld [vmem:[%s425_s1 + $0x40] sm:$0xf]  ;;  %v282_v19 = vld [vmem:[%s425_s1 + $0x44] sm:$0xf0]  ;;  %v281_v20 = vld [vmem:[%s425_s1 + $0x44] sm:$0xf] }
   0x6   :  { %v244_v21 = vld [vmem:[%s425_s1 + $0x48] sm:$0xf0]  ;;  %v243_v22 = vor.u32 %v282_v19, %v242_v18  ;;  %v234_v24 = vld [vmem:[%s425_s1 + $0x30] sm:$0xf]  ;;  %v280_v25 = vld [vmem:[%s425_s1 + $0x34] sm:$0xf0] }
   0x7   :  { %v247_v23 = vor.u32 %v281_v20, %v244_v21  ;;  %v279_v26 = vld [vmem:[%s425_s1 + $0x34] sm:$0xf]  ;;  %v236_v27 = vld [vmem:[%s425_s1 + $0x38] sm:$0xf0]  ;;  %v235_v28 = vor.u32 %v280_v25, %v234_v24  ;;  %v226_v30 = vld [vmem:[%s425_s1 + $0x20] sm:$0xf] }
   0x8   :  { %134 = vmatpush.bf16.msra.mxu0 %v259_v10  ;;  %v239_v29 = vor.u32 %v279_v26, %v236_v27  ;;  %v278_v31 = vld [vmem:[%s425_s1 + $0x24] sm:$0xf0]  ;;  %v277_v32 = vld [vmem:[%s425_s1 + $0x24] sm:$0xf]  ;;  %v228_v33 = vld [vmem:[%s425_s1 + $0x28] sm:$0xf0] }
   0x9   :  { %148 = vmatpush.bf16.msra.mxu1 %v263_v11  ;;  %v227_v34 = vor.u32 %v278_v31, %v226_v30  ;;  %v231_v35 = vor.u32 %v277_v32, %v228_v33  ;;  %v218_v36 = vld [vmem:[%s425_s1 + $0x10] sm:$0xf]  ;;  %v276_v37 = vld [vmem:[%s425_s1 + $0x14] sm:$0xf0]  ;;  %v275_v38 = vld [vmem:[%s425_s1 + $0x14] sm:$0xf] }
   0xa   :  { %v220_v39 = vld [vmem:[%s425_s1 + $0x18] sm:$0xf0]  ;;  %v219_v40 = vor.u32 %v276_v37, %v218_v36  ;;  %v210_v42 = vld [vmem:[%s425_s1] sm:$0xf]  ;;  %v274_v43 = vld [vmem:[%s425_s1 + $0x4] sm:$0xf0] }
   0xb   :  { %v223_v41 = vor.u32 %v275_v38, %v220_v39  ;;  %v273_v44 = vld [vmem:[%s425_s1 + $0x4] sm:$0xf]  ;;  %v212_v45 = vld [vmem:[%s425_s1 + $0x8] sm:$0xf0]  ;;  %v211_v46 = vor.u32 %v274_v43, %v210_v42  ;;  %v176_v49 = vld [vmem:[%s427_s2] sm:$0x3] }
   0xc   :  { %135 = vmatpush.bf16.msra.mxu0 %v251_v16  ;;  %v215_v47 = vor.u32 %v273_v44, %v212_v45  ;;  %v272_v48 = vld [vmem:[%s426_s0] sm:$0xff]  ;;  %v178_v51 = vperm.slane %v176_v49, 0  ;;  %v179_v52 = vperm.slane %v176_v49, 1 }
   0xd   :  { %149 = vmatpush.bf16.msra.mxu1 %v255_v17  ;;  %v186_v50 = vld [vmem:[%s428_s3] sm:$0x3] }
   0xe   :  { %v188_v53 = vperm.slane %v186_v50, 0  ;;  %v189_v55 = vperm.slane %v186_v50, 1 }
  0x10   :  { %136 = vmatpush.bf16.msra.mxu0 %v243_v22 }
  0x11   :  { %150 = vmatpush.bf16.msra.mxu1 %v247_v23 }
  0x14   :  { %137 = vmatpush.bf16.msra.mxu0 %v235_v28 }
  0x15   :  { %151 = vmatpush.bf16.msra.mxu1 %v239_v29 }
  0x18   :  { %138 = vmatpush.bf16.msra.mxu0 %v227_v34 }
  0x19   :  { %152 = vmatpush.bf16.msra.mxu1 %v231_v35 }
  0x1c   :  { %139 = vmatpush.bf16.msra.mxu0 %v219_v40 }
  0x1d   :  { %153 = vmatpush.bf16.msra.mxu1 %v223_v41 }
  0x20   :  { %140 = vmatpush.bf16.msra.mxu0 %v211_v46 }
  0x21   :  { %154 = vmatpush.bf16.msra.mxu1 %v215_v47 }
  0x23   :  { %141 = vmatmul.bf16.vlgmr.msra.gmra.mxu0 %v272_v48 }
  0x24   :  { %155 = vmatmul.bf16.vlgmr.msra.gmra.mxu1 %v272_v48 }
  0xa0   :  { %v142_v54 = vpop.f32.mrf.mxu0 }
  0xa1   :  { %v182_v56 = vmul.f32 %v178_v51, %v142_v54  ;;  %v156_v57 = vpop.f32.mrf.mxu1 }
  0xa2   :  { %v183_v58 = vmul.f32 %v179_v52, %v156_v57 }
  0xa3   :  { %v192_v59 = vadd.f32 %v188_v53, %v182_v56 }
  0xa4   :  { %v193_v60 = vadd.f32 %v189_v55, %v183_v58 }
  0xa6   :  { %v196_v61 = vpack.c.bf16 %v193_v60, %v192_v59 }
  0xa8   :  { %198 = vst [vmem:[%s429_s4] sm:$0xff] %v196_v61  ;;  %v144_v62 = vpop.f32.mrf.mxu0 }
  0xa9   :  { %v184_v63 = vmul.f32 %v178_v51, %v144_v62  ;;  %v158_v0 = vpop.f32.mrf.mxu1 }
  0xaa   :  { %v185_v1 = vmul.f32 %v179_v52, %v158_v0 }
  0xab   :  { %v194_v2 = vadd.f32 %v188_v53, %v184_v63 }
  0xac   :  { %v195_v3 = vadd.f32 %v189_v55, %v185_v1 }
  0xae   :  { %v197_v4 = vpack.c.bf16 %v195_v3, %v194_v2 }
  0xb0   :  { %199 = vst [vmem:[%s429_s4 + $0x8] sm:$0xff] %v197_v4 }

// kernel: adv_resnet_forward.18
= control target key start
LH: loop header
LB: loop body
LE: loop exit
PB: predicated region body
PF: predicated region fallthrough
CT: control target
= control target key end

     0   :  { %s1325_s15 = smov 0   ;;  %s1327_s16 = smov 0   ;;  %s1518_s0 = inlined_call_operand.vmem [shape: bf16[16,1152], index: 0, kind: input, shape index: {}]   ;;  %s1519_s1 = inlined_call_operand.vmem [shape: bf16[1152,256], index: 1, kind: input, shape index: {}]   ;;  %s1520_s2 = inlined_call_operand.vmem [shape: f32[1,256], index: 2, kind: input, shape index: {}]   ;;  %s1521_s3 = inlined_call_operand.vmem [shape: f32[1,256], index: 3, kind: input, shape index: {}]   ;;  %s1522_s4 = inlined_call_operand.vmem [shape: bf16[16,256], index: 4, kind: output, shape index: {}]  }
   0x1   :  { %s1329_s17 = smov 0   ;;  %s1331_s18 = smov 0  }
   0x2   :  { %s1333_s19 = smov 0  }
   0x3 LB: > { %s26_s20 = sadd.s32 1, %s1293_s18  ;;  %p49_p1 = scmp.ne.s32.totalorder %s1285_s16, %s1281_s15  ;;  %s1297_s19 = sphi %s1333_s19, %s14_s19   ;;  %s1293_s18 = sphi %s1331_s18, %s1526_s18   ;;  %s1289_s17 = sphi %s1329_s17, %s1525_s17   ;;  %s1285_s16 = sphi %s1327_s16, %s1524_s16   ;;  %s1281_s15 = sphi %s1325_s15, %s1523_s15  }
   0x4   : > { %p27_p0 = scmp.ge.s32.totalorder %s26_s20, 3  ;;  %p50_p2 = scmp.eq.s32.totalorder %s1297_s19, 0 }
   0x5   : > { %s42_s22 = sadd.s32 1, %s1285_s16  ;;  %p944_p5 = scmp.ge.s32.totalorder %s1297_s19, 3 }
   0x6   : > { %s1528_s20 = smov (%p27_p0, %s26_s20), 0  ;;  %p51_p3 = por %p50_p2, %p49_p1 }
   0x7   : > { %s38_s21 = ssub.s32 %s1293_s18, %s1528_s20  ;;  %199 = sbr.rel (%p944_p5) target bundleno = 21 (0x15), region = 24 }
   0x8   : > { %p40_p4 = scmp.eq.s32.totalorder %s38_s21, 0 }
   0xa   : > { %s1360_s23 = scalar_select %p40_p4, %s1285_s16, %s42_s22  }
   0xc   : > { %202 = sbr.rel (!%p51_p3) target bundleno = 21 (0x15), region = 28  ;;  %s204_s24 = sand.u32 (%p51_p3), 1, %s1285_s16  }
   0xd   : > { %s1163_s25 = smul.u32 (%p51_p3), 12, %s1293_s18 }
   0xe   : > { %s1216_s26 = smul.u32 (%p51_p3), 24, %s204_s24 }
   0xf   : > { %s212_s29 = scalar_lea.vmem (%p51_p3), %s1518_s0, %s1163_s25 }
  0x10   : > { %v227_v0 = vld [vmem:[%s212_s29] sm:$0xff] (%p51_p3)  ;;  %v946_v2 = vld [vmem:[%s212_s29 + $0x8] sm:$0xf] (%p51_p3)  ;;  %s206_s30 = scalar_lea.vmem (%p51_p3), [#allocation3], %s1216_s26  ;;  %v948_v3 = vld [vmem:[%s212_s29 + $0x2c] sm:$0xf] (%p51_p3) }
  0x11   : > { %v229_v1 = vld [vmem:[%s212_s29 + $0x24] sm:$0xff]  ;;  %228 = vst [vmem:[%s206_s30] sm:$0xff] %v227_v0 }
  0x12   : > { %230 = vst [vmem:[%s206_s30 + $0xc] sm:$0xff] %v229_v1 }
  0x13   : > { %947 = vst [vmem:[%s206_s30 + $0x8] sm:$0xf] %v946_v2 }
  0x14   : > { %949 = vst [vmem:[%s206_s30 + $0x14] sm:$0xf] %v948_v3 }
  0x15 PF: > { %p950_p6 = scmp.ge.s32.totalorder %s1297_s19, 1  ;;  %p262_p7 = scmp.lt.s32.totalorder %s1297_s19, 4 }
  0x17   : > { %p263_p8 = pnand %p950_p6, %p262_p7 }
  0x18   : > { %s269_s5 = sand.u32 (!%p263_p8), 1, %s1281_s15   ;;  %s319_s6 = smul.u32 (!%p263_p8), 48, %s1289_s17 }
  0x19   : > { %266 = sbr.rel (%p263_p8) target bundleno = 263 (0x107), region = 58  ;;  %p953_p10 = scmp.ne.s32.totalorder (!%p263_p8), %s1289_s17, 0 }
  0x1a   : > { %s1217_s7 = smul.u32 (!%p263_p8), 24, %s269_s5  ;;  %p321_p9 = scmp.lt.s32.totalorder (!%p263_p8), %s319_s6, 143 }
  0x1c   : > { %s1377_s12 = scalar_lea.vmem (!%p263_p8), [#allocation3], %s1217_s7 }
  0x1e   : > { %s1530_s6 = smov (!%p321_p9, %s319_s6), 143  ;;  %356 = sbr.rel (%p953_p10) target bundleno = 40 (0x28), region = 66 }
  0x1f   : > { %s1164_s8 = sshll.u32 %s1530_s6, 3 }
  0x20   : > { %s1375_s11 = scalar_lea.vmem %s1519_s1, %s1164_s8 }
  0x23   : > { %v1299_v4 = vmov 0.0  }
  0x24   : > { %357 = vst [vmem:[#allocation2 + $0x10] sm:$0xff] %v1299_v4 }
  0x25   : > { %358 = vst [vmem:[#allocation2] sm:$0xff] %v1299_v4 }
  0x26   : > { %359 = vst [vmem:[#allocation2 + $0x18] sm:$0xff] %v1299_v4 }
  0x27   : > { %360 = vst [vmem:[#allocation2 + $0x8] sm:$0xff] %v1299_v4 }
  0x28 PF: > { %v1024_v5 = vld [vmem:[%s1375_s11 + $0x70] sm:$0xf]  ;;  %v1183_v6 = vld [vmem:[%s1375_s11 + $0x74] sm:$0xf0]  ;;  %v1016_v14 = vld [vmem:[%s1375_s11 + $0x60] sm:$0xf] }
  0x29   : > { %v1088_v7 = vld [vmem:[%s1375_s11 + $0xf0] sm:$0xf]  ;;  %v1025_v8 = vor.u32 %v1183_v6, %v1024_v5  ;;  %v1199_v9 = vld [vmem:[%s1375_s11 + $0xf4] sm:$0xf0]  ;;  %v1181_v15 = vld [vmem:[%s1375_s11 + $0x64] sm:$0xf0] }
  0x2a   : > { %v1152_v10 = vld [vmem:[%s1375_s11 + $0x170] sm:$0xf]  ;;  %v1215_v11 = vld [vmem:[%s1375_s11 + $0x174] sm:$0xf0]  ;;  %v1089_v12 = vor.u32 %v1199_v9, %v1088_v7  ;;  %v1080_v16 = vld [vmem:[%s1375_s11 + $0xe0] sm:$0xf]  ;;  %v1017_v17 = vor.u32 %v1181_v15, %v1016_v14 }
  0x2b   : > { %v1153_v13 = vor.u32 %v1215_v11, %v1152_v10  ;;  %673 = vmatpush.bf16.msra.mxu0 %v1025_v8  ;;  %v1197_v18 = vld [vmem:[%s1375_s11 + $0xe4] sm:$0xf0]  ;;  %v1144_v19 = vld [vmem:[%s1375_s11 + $0x160] sm:$0xf]  ;;  %v1008_v23 = vld [vmem:[%s1375_s11 + $0x50] sm:$0xf] }
  0x2c   : > { %v1213_v20 = vld [vmem:[%s1375_s11 + $0x164] sm:$0xf0]  ;;  %687 = vmatpush.bf16.msra.mxu1 %v1089_v12  ;;  %v1081_v21 = vor.u32 %v1197_v18, %v1080_v16  ;;  %v1179_v24 = vld [vmem:[%s1375_s11 + $0x54] sm:$0xf0]  ;;  %v1072_v25 = vld [vmem:[%s1375_s11 + $0xd0] sm:$0xf] }
  0x2d   : > { %701 = vmatpush.bf16.msra.mxu2 %v1153_v13  ;;  %v1145_v22 = vor.u32 %v1213_v20, %v1144_v19  ;;  %v1195_v26 = vld [vmem:[%s1375_s11 + $0xd4] sm:$0xf0]  ;;  %v1136_v27 = vld [vmem:[%s1375_s11 + $0x150] sm:$0xf]  ;;  %v1009_v29 = vor.u32 %v1179_v24, %v1008_v23  ;;  %v1000_v30 = vld [vmem:[%s1375_s11 + $0x40] sm:$0xf] }
  0x2e   : > { %v1211_v28 = vld [vmem:[%s1375_s11 + $0x154] sm:$0xf0]  ;;  %v1177_v31 = vld [vmem:[%s1375_s11 + $0x44] sm:$0xf0]  ;;  %v1073_v32 = vor.u32 %v1195_v26, %v1072_v25  ;;  %v1064_v34 = vld [vmem:[%s1375_s11 + $0xc0] sm:$0xf] }
  0x2f   : > { %674 = vmatpush.bf16.msra.mxu0 %v1017_v17  ;;  %v1137_v33 = vor.u32 %v1211_v28, %v1136_v27  ;;  %v1182_v35 = vld [vmem:[%s1375_s11 + $0x74] sm:$0xf]  ;;  %v1026_v36 = vld [vmem:[%s1375_s11 + $0x78] sm:$0xf0]  ;;  %v1193_v37 = vld [vmem:[%s1375_s11 + $0xc4] sm:$0xf0]  ;;  %v1001_v42 = vor.u32 %v1177_v31, %v1000_v30 }
  0x30   : > { %688 = vmatpush.bf16.msra.mxu1 %v1081_v21  ;;  %v1128_v38 = vld [vmem:[%s1375_s11 + $0x140] sm:$0xf]  ;;  %v1209_v39 = vld [vmem:[%s1375_s11 + $0x144] sm:$0xf0]  ;;  %v1029_v40 = vor.u32 %v1182_v35, %v1026_v36  ;;  %v1180_v41 = vld [vmem:[%s1375_s11 + $0x64] sm:$0xf]  ;;  %v1065_v46 = vor.u32 %v1193_v37, %v1064_v34 }
  0x31   : > { %702 = vmatpush.bf16.msra.mxu2 %v1145_v22  ;;  %v992_v43 = vld [vmem:[%s1375_s11 + $0x30] sm:$0xf]  ;;  %v1175_v44 = vld [vmem:[%s1375_s11 + $0x34] sm:$0xf0]  ;;  %v1018_v45 = vld [vmem:[%s1375_s11 + $0x68] sm:$0xf0]  ;;  %v1129_v47 = vor.u32 %v1209_v39, %v1128_v38 }
  0x32   : > { %715 = vmatpush.bf16.msra.mxu3 %v1029_v40  ;;  %v1056_v48 = vld [vmem:[%s1375_s11 + $0xb0] sm:$0xf]  ;;  %v1191_v49 = vld [vmem:[%s1375_s11 + $0xb4] sm:$0xf0]  ;;  %v1021_v51 = vor.u32 %v1180_v41, %v1018_v45  ;;  %v1178_v53 = vld [vmem:[%s1375_s11 + $0x54] sm:$0xf]  ;;  %v993_v55 = vor.u32 %v1175_v44, %v992_v43 }
  0x33   : > { %675 = vmatpush.bf16.msra.mxu0 %v1009_v29  ;;  %v1120_v50 = vld [vmem:[%s1375_s11 + $0x130] sm:$0xf]  ;;  %v1207_v52 = vld [vmem:[%s1375_s11 + $0x134] sm:$0xf0]  ;;  %v1010_v54 = vld [vmem:[%s1375_s11 + $0x58] sm:$0xf0]  ;;  %v1057_v59 = vor.u32 %v1191_v49, %v1056_v48 }
  0x34   : > { %689 = vmatpush.bf16.msra.mxu1 %v1073_v32  ;;  %v984_v56 = vld [vmem:[%s1375_s11 + $0x20] sm:$0xf]  ;;  %v1173_v57 = vld [vmem:[%s1375_s11 + $0x24] sm:$0xf0]  ;;  %v1013_v58 = vor.u32 %v1178_v53, %v1010_v54  ;;  %v1121_v60 = vor.u32 %v1207_v52, %v1120_v50  ;;  %v1176_v62 = vld [vmem:[%s1375_s11 + $0x44] sm:$0xf] }
  0x35   : > { %703 = vmatpush.bf16.msra.mxu2 %v1137_v33  ;;  %v1048_v61 = vld [vmem:[%s1375_s11 + $0xa0] sm:$0xf]  ;;  %v1002_v63 = vld [vmem:[%s1375_s11 + $0x48] sm:$0xf0]  ;;  %v1189_v0 = vld [vmem:[%s1375_s11 + $0xa4] sm:$0xf0]  ;;  %v985_v3 = vor.u32 %v1173_v57, %v984_v56 }
  0x36   : > { %716 = vmatpush.bf16.msra.mxu3 %v1021_v51  ;;  %v1112_v1 = vld [vmem:[%s1375_s11 + $0x120] sm:$0xf]  ;;  %v1205_v2 = vld [vmem:[%s1375_s11 + $0x124] sm:$0xf0]  ;;  %v976_v4 = vld [vmem:[%s1375_s11 + $0x10] sm:$0xf]  ;;  %v1005_v6 = vor.u32 %v1176_v62, %v1002_v63  ;;  %v1049_v7 = vor.u32 %v1189_v0, %v1048_v61 }
  0x37   : > { %676 = vmatpush.bf16.msra.mxu0 %v1001_v42  ;;  %v1171_v5 = vld [vmem:[%s1375_s11 + $0x14] sm:$0xf0]  ;;  %v1113_v8 = vor.u32 %v1205_v2, %v1112_v1  ;;  %v1040_v9 = vld [vmem:[%s1375_s11 + $0x90] sm:$0xf]  ;;  %v1174_v10 = vld [vmem:[%s1375_s11 + $0x34] sm:$0xf] }
  0x38   : > { %690 = vmatpush.bf16.msra.mxu1 %v1065_v46  ;;  %v994_v11 = vld [vmem:[%s1375_s11 + $0x38] sm:$0xf0]  ;;  %v1187_v12 = vld [vmem:[%s1375_s11 + $0x94] sm:$0xf0]  ;;  %v1104_v13 = vld [vmem:[%s1375_s11 + $0x110] sm:$0xf]  ;;  %v977_v15 = vor.u32 %v1171_v5, %v976_v4 }
  0x39   : > { %704 = vmatpush.bf16.msra.mxu2 %v1129_v47  ;;  %v1203_v14 = vld [vmem:[%s1375_s11 + $0x114] sm:$0xf0]  ;;  %v968_v16 = vld [vmem:[%s1375_s11] sm:$0xf]  ;;  %v1169_v17 = vld [vmem:[%s1375_s11 + $0x4] sm:$0xf0]  ;;  %v997_v19 = vor.u32 %v1174_v10, %v994_v11  ;;  %v1041_v20 = vor.u32 %v1187_v12, %v1040_v9 }
  0x3a   : > { %717 = vmatpush.bf16.msra.mxu3 %v1013_v58  ;;  %v1032_v18 = vld [vmem:[%s1375_s11 + $0x80] sm:$0xf]  ;;  %v1105_v21 = vor.u32 %v1203_v14, %v1104_v13  ;;  %v1185_v22 = vld [vmem:[%s1375_s11 + $0x84] sm:$0xf0]  ;;  %v1172_v23 = vld [vmem:[%s1375_s11 + $0x24] sm:$0xf]  ;;  %v969_v31 = vor.u32 %v1169_v17, %v968_v16 }
  0x3b   : > { %677 = vmatpush.bf16.msra.mxu0 %v993_v55  ;;  %v986_v24 = vld [vmem:[%s1375_s11 + $0x28] sm:$0xf0]  ;;  %v1096_v25 = vld [vmem:[%s1375_s11 + $0x100] sm:$0xf]  ;;  %v1201_v26 = vld [vmem:[%s1375_s11 + $0x104] sm:$0xf0]  ;;  %v1033_v36 = vor.u32 %v1185_v22, %v1032_v18 }
  0x3c   : > { %691 = vmatpush.bf16.msra.mxu1 %v1057_v59  ;;  %v1198_v27 = vld [vmem:[%s1375_s11 + $0xf4] sm:$0xf]  ;;  %v1090_v28 = vld [vmem:[%s1375_s11 + $0xf8] sm:$0xf0]  ;;  %v964_v32 = vld [vmem:[%s1377_s12 + $0x8] sm:$0xf]  ;;  %v989_v33 = vor.u32 %v1172_v23, %v986_v24  ;;  %v1097_v37 = vor.u32 %v1201_v26, %v1096_v25 }
  0x3d   : > { %705 = vmatpush.bf16.msra.mxu2 %v1121_v60  ;;  %v1214_v29 = vld [vmem:[%s1375_s11 + $0x174] sm:$0xf]  ;;  %v1154_v30 = vld [vmem:[%s1375_s11 + $0x178] sm:$0xf0]  ;;  %v956_v34 = vld [vmem:[%s1377_s12] sm:$0xf]  ;;  %v1093_v41 = vor.u32 %v1198_v27, %v1090_v28 }
  0x3e   : > { %718 = vmatpush.bf16.msra.mxu3 %v1005_v6  ;;  %v1166_v35 = vld [vmem:[%s1377_s12 + $0x8] sm:$0xf0]  ;;  %v1167_v38 = vld [vmem:[%s1377_s12 + $0x10] sm:$0xf0]  ;;  %v1165_v39 = vld [vmem:[%s1377_s12 + $0x4] sm:$0xf]  ;;  %v1157_v42 = vor.u32 %v1214_v29, %v1154_v30 }
  0x3f   : > { %678 = vmatpush.bf16.msra.mxu0 %v985_v3  ;;  %v958_v40 = vld [vmem:[%s1377_s12 + $0xc] sm:$0xf0]  ;;  %v1196_v43 = vld [vmem:[%s1375_s11 + $0xe4] sm:$0xf]  ;;  %v1170_v44 = vld [vmem:[%s1375_s11 + $0x14] sm:$0xf]  ;;  %v957_v49 = vor.u32 %v1166_v35, %v956_v34  ;;  %v1456_v50 = vor.u32 %v1167_v38, %v964_v32 }
  0x40   : > { %692 = vmatpush.bf16.msra.mxu1 %v1049_v7  ;;  %v978_v45 = vld [vmem:[%s1375_s11 + $0x18] sm:$0xf0]  ;;  %v1082_v46 = vld [vmem:[%s1375_s11 + $0xe8] sm:$0xf0]  ;;  %v1212_v47 = vld [vmem:[%s1375_s11 + $0x164] sm:$0xf]  ;;  %v1458_v51 = vor.u32 %v1165_v39, %v958_v40 }
  0x41   : > { %706 = vmatpush.bf16.msra.mxu2 %v1113_v8  ;;  %v1146_v48 = vld [vmem:[%s1375_s11 + $0x168] sm:$0xf0]  ;;  %v981_v52 = vor.u32 %v1170_v44, %v978_v45  ;;  %v1085_v53 = vor.u32 %v1196_v43, %v1082_v46  ;;  %v1194_v55 = vld [vmem:[%s1375_s11 + $0xd4] sm:$0xf]  ;;  %v1168_v56 = vld [vmem:[%s1375_s11 + $0x4] sm:$0xf] }
  0x42   : > { %719 = vmatpush.bf16.msra.mxu3 %v997_v19  ;;  %v1149_v54 = vor.u32 %v1212_v47, %v1146_v48  ;;  %v970_v57 = vld [vmem:[%s1375_s11 + $0x8] sm:$0xf0]  ;;  %v1074_v58 = vld [vmem:[%s1375_s11 + $0xd8] sm:$0xf0]  ;;  %v1210_v59 = vld [vmem:[%s1375_s11 + $0x154] sm:$0xf] }
  0x43   : > { %679 = vmatpush.bf16.msra.mxu0 %v977_v15  ;;  %v1138_v60 = vld [vmem:[%s1375_s11 + $0x158] sm:$0xf0]  ;;  %v973_v61 = vor.u32 %v1168_v56, %v970_v57  ;;  %v1077_v62 = vor.u32 %v1194_v55, %v1074_v58  ;;  %v1192_v0 = vld [vmem:[%s1375_s11 + $0xc4] sm:$0xf]  ;;  %v1066_v1 = vld [vmem:[%s1375_s11 + $0xc8] sm:$0xf0] }
  0x44   : > { %693 = vmatpush.bf16.msra.mxu1 %v1041_v20  ;;  %v1141_v63 = vor.u32 %v1210_v59, %v1138_v60  ;;  %v1208_v2 = vld [vmem:[%s1375_s11 + $0x144] sm:$0xf]  ;;  %v1130_v3 = vld [vmem:[%s1375_s11 + $0x148] sm:$0xf0]  ;;  %v1069_v4 = vor.u32 %v1192_v0, %v1066_v1  ;;  %v1190_v6 = vld [vmem:[%s1375_s11 + $0xb4] sm:$0xf] }
  0x45   : > { %707 = vmatpush.bf16.msra.mxu2 %v1105_v21  ;;  %v1133_v5 = vor.u32 %v1208_v2, %v1130_v3  ;;  %v1058_v7 = vld [vmem:[%s1375_s11 + $0xb8] sm:$0xf0]  ;;  %v1206_v8 = vld [vmem:[%s1375_s11 + $0x134] sm:$0xf]  ;;  %v1188_v12 = vld [vmem:[%s1375_s11 + $0xa4] sm:$0xf] }
  0x46   : > { %720 = vmatpush.bf16.msra.mxu3 %v989_v33  ;;  %v1122_v9 = vld [vmem:[%s1375_s11 + $0x138] sm:$0xf0]  ;;  %v1061_v10 = vor.u32 %v1190_v6, %v1058_v7  ;;  %v1050_v13 = vld [vmem:[%s1375_s11 + $0xa8] sm:$0xf0]  ;;  %v1204_v14 = vld [vmem:[%s1375_s11 + $0x124] sm:$0xf] }
  0x47   : > { %680 = vmatpush.bf16.msra.mxu0 %v969_v31  ;;  %v1125_v11 = vor.u32 %v1206_v8, %v1122_v9  ;;  %v1114_v15 = vld [vmem:[%s1375_s11 + $0x128] sm:$0xf0]  ;;  %v1053_v16 = vor.u32 %v1188_v12, %v1050_v13  ;;  %v1186_v18 = vld [vmem:[%s1375_s11 + $0x94] sm:$0xf]  ;;  %v1042_v19 = vld [vmem:[%s1375_s11 + $0x98] sm:$0xf0] }
  0x48   : > { %694 = vmatpush.bf16.msra.mxu1 %v1033_v36  ;;  %v1117_v17 = vor.u32 %v1204_v14, %v1114_v15  ;;  %v1202_v20 = vld [vmem:[%s1375_s11 + $0x114] sm:$0xf]  ;;  %v1106_v21 = vld [vmem:[%s1375_s11 + $0x118] sm:$0xf0]  ;;  %v1045_v22 = vor.u32 %v1186_v18, %v1042_v19  ;;  %v1184_v24 = vld [vmem:[%s1375_s11 + $0x84] sm:$0xf] }
  0x49   : > { %708 = vmatpush.bf16.msra.mxu2 %v1097_v37  ;;  %v1109_v23 = vor.u32 %v1202_v20, %v1106_v21  ;;  %v1034_v25 = vld [vmem:[%s1375_s11 + $0x88] sm:$0xf0]  ;;  %v1200_v26 = vld [vmem:[%s1375_s11 + $0x104] sm:$0xf]  ;;  %v361_v33 = vld [vmem:[#allocation2 + $0x10] sm:$0xff]  ;;  %p1158_p11 = scmp.ne.s32.totalorder %s1289_s17, 2 }
  0x4a   : > { %681 = vmatmul.bf16.vlgmr.msra.gmra.mxu0 %v957_v49  ;;  %721 = vmatpush.bf16.msra.mxu3 %v981_v52  ;;  %v1098_v27 = vld [vmem:[%s1375_s11 + $0x108] sm:$0xf0]  ;;  %v1037_v28 = vor.u32 %v1184_v24, %v1034_v25  ;;  %v363_v40 = vld [vmem:[#allocation2 + $0x18] sm:$0xff]  ;;  %v362_v48 = vld [vmem:[#allocation2] sm:$0xff] }
  0x4b   : > { %729 = vmatpush.bf16.msrb.mxu0 %v1093_v41  ;;  %695 = vmatmul.bf16.vlgmr.msra.gmra.mxu1 %v1458_v51  ;;  %v1101_v29 = vor.u32 %v1200_v26, %v1098_v27 }
  0x4c   : > { %743 = vmatpush.bf16.msrb.mxu1 %v1157_v42  ;;  %709 = vmatmul.bf16.vlgmr.msra.gmra.mxu2 %v1456_v50 }
  0x4e   : > { %722 = vmatpush.bf16.msra.mxu3 %v973_v61 }
  0x4f   : > { %730 = vmatpush.bf16.msrb.mxu0 %v1085_v53 }
  0x50   : > { %744 = vmatpush.bf16.msrb.mxu1 %v1149_v54  ;;  %v364_v54 = vld [vmem:[#allocation2 + $0x8] sm:$0xff] }
  0x51   : > { %723 = vmatmul.bf16.vlgmr.msra.gmra.mxu3 %v957_v49 }
  0x53   : > { %731 = vmatpush.bf16.msrb.mxu0 %v1077_v62 }
  0x54   : > { %745 = vmatpush.bf16.msrb.mxu1 %v1141_v63 }
  0x57   : > { %732 = vmatpush.bf16.msrb.mxu0 %v1069_v4 }
  0x58   : > { %746 = vmatpush.bf16.msrb.mxu1 %v1133_v5 }
  0x5b   : > { %733 = vmatpush.bf16.msrb.mxu0 %v1061_v10 }
  0x5c   : > { %747 = vmatpush.bf16.msrb.mxu1 %v1125_v11 }
  0x5f   : > { %734 = vmatpush.bf16.msrb.mxu0 %v1053_v16 }
  0x60   : > { %748 = vmatpush.bf16.msrb.mxu1 %v1117_v17 }
  0x63   : > { %735 = vmatpush.bf16.msrb.mxu0 %v1045_v22 }
  0x64   : > { %749 = vmatpush.bf16.msrb.mxu1 %v1109_v23 }
  0x67   : > { %736 = vmatpush.bf16.msrb.mxu0 %v1037_v28 }
  0x68   : > { %750 = vmatpush.bf16.msrb.mxu1 %v1101_v29 }
  0x6a   : > { %737 = vmatmul.bf16.vlgmr.msrb.gmra.mxu0 %v1458_v51 }
  0x6b   : > { %751 = vmatmul.bf16.vlgmr.msrb.gmra.mxu1 %v1456_v50 }
  0xc7   : > { %v682_v30 = vpop.f32.mrf.mxu0 }
  0xc8   : > { %v696_v31 = vpop.f32.mrf.mxu1 }
  0xc9   : > { %v697_v32 = vadd.f32 %v696_v31, %v682_v30 }
  0xcf   : > { %v710_v34 = vpop.f32.mrf.mxu2  ;;  %v684_v36 = vpop.f32.mrf.mxu0 }
  0xd0   : > { %v711_v35 = vadd.f32 %v710_v34, %v697_v32  ;;  %v698_v37 = vpop.f32.mrf.mxu1 }
  0xd1   : > { %v699_v39 = vadd.f32 %v698_v37, %v684_v36 }
  0xd2   : > { %v757_v38 = vadd.f32 %v711_v35, %v361_v33 }
  0xd4   : > { %761 = vst [vmem:[#allocation2 + $0x10] sm:$0xff] %v757_v38  ;;  %v724_v44 = vpop.f32.mrf.mxu3 }
  0xd7   : > { %v712_v41 = vpop.f32.mrf.mxu2 }
  0xd8   : > { %v713_v42 = vadd.f32 %v712_v41, %v699_v39 }
  0xda   : > { %v759_v43 = vadd.f32 %v713_v42, %v363_v40 }
  0xdc   : > { %763 = vst [vmem:[#allocation2 + $0x18] sm:$0xff] %v759_v43  ;;  %v726_v51 = vpop.f32.mrf.mxu3 }
  0xe7   : > { %v738_v45 = vpop.f32.mrf.mxu0 }
  0xe8   : > { %v752_v46 = vpop.f32.mrf.mxu1  ;;  %v739_v47 = vadd.f32 %v738_v45, %v724_v44 }
  0xea   : > { %v753_v49 = vadd.f32 %v752_v46, %v739_v47 }
  0xec   : > { %v758_v50 = vadd.f32 %v753_v49, %v362_v48 }
  0xee   : > { %762 = vst [vmem:[#allocation2] sm:$0xff] %v758_v50 }
  0xef   : > { %v740_v52 = vpop.f32.mrf.mxu0 }
  0xf0   : > { %v741_v53 = vadd.f32 %v740_v52, %v726_v51  ;;  %v754_v55 = vpop.f32.mrf.mxu1 }
  0xf2   : > { %v755_v56 = vadd.f32 %v754_v55, %v741_v53  ;;  %768 = sbr.rel (%p1158_p11) target bundleno = 263 (0x107), region = 70 }
  0xf4   : > { %v760_v57 = vadd.f32 %v755_v56, %v364_v54 }
  0xf6   : > { %764 = vst [vmem:[#allocation2 + $0x8] sm:$0xff] %v760_v57 }
  0xf7   : > { %v769_v58 = vld [vmem:[#allocation2 + $0x10] sm:$0xff]  ;;  %v770_v59 = vld [vmem:[#allocation2] sm:$0xff]  ;;  %v771_v0 = vld [vmem:[#allocation2 + $0x18] sm:$0xff] }
  0xf8   : > { %v773_v60 = vld [vmem:[%s1520_s2] sm:$0x3] }
  0xf9   : > { %v775_v61 = vperm.slane %v773_v60, 0  ;;  %v776_v62 = vperm.slane %v773_v60, 1  ;;  %v783_v63 = vld [vmem:[%s1521_s3] sm:$0x3] }
  0xfa   : > { %v785_v2 = vperm.slane %v783_v63, 0  ;;  %v786_v3 = vperm.slane %v783_v63, 1 }
  0xfb   : > { %v779_v4 = vmul.f32 %v775_v61, %v769_v58  ;;  %v780_v5 = vmul.f32 %v776_v62, %v770_v59  ;;  %v781_v6 = vmul.f32 %v775_v61, %v771_v0 }
  0xfd   : > { %v772_v1 = vld [vmem:[#allocation2 + $0x8] sm:$0xff]  ;;  %v789_v8 = vadd.f32 %v785_v2, %v779_v4  ;;  %v790_v9 = vadd.f32 %v786_v3, %v780_v5  ;;  %v791_v10 = vadd.f32 %v785_v2, %v781_v6 }
  0xfe   : > { %v782_v7 = vmul.f32 %v776_v62, %v772_v1 }
  0xff   : > { %v793_v12 = vmax.f32 %v789_v8, 0.0  ;;  %v794_v13 = vmax.f32 %v790_v9, 0.0  ;;  %v795_v14 = vmax.f32 %v791_v10, 0.0 }
 0x100   : > { %v792_v11 = vadd.f32 %v786_v3, %v782_v7 }
 0x101   : > { %v797_v16 = vpack.c.bf16 %v794_v13, %v793_v12 }
 0x102   : > { %v796_v15 = vmax.f32 %v792_v11, 0.0 }
 0x103   : > { %799 = vst [vmem:[%s1522_s4] sm:$0xff] %v797_v16 }
 0x104   : > { %v798_v17 = vpack.c.bf16 %v796_v15, %v795_v14 }
 0x106   : > { %800 = vst [vmem:[%s1522_s4 + $0x8] sm:$0xff] %v798_v17 }
 0x107 PF: > { %s14_s19 = sadd.s32 1, %s1297_s19   ;;  %s1523_s15 = smov %s1285_s16 }
 0x108   : > { %p11_p12 = scmp.ge.s32.totalorder %s14_s19, 5   ;;  %s1524_s16 = smov %s1360_s23 }
 0x109   : > { %s1525_s17 = smov %s1293_s18  ;;  %s1526_s18 = smov %s1528_s20 }
 0x10a   :  { %13 = sbr.rel (!%p11_p12) target bundleno = 3 (0x3), region = 120 }

// kernel: adv_resnet_forward.20
= control target key start
LH: loop header
LB: loop body
LE: loop exit
PB: predicated region body
PF: predicated region fallthrough
CT: control target
= control target key end

     0   :  { %s1430_s18 = smov 0   ;;  %s1432_s19 = smov 0   ;;  %s1629_s0 = inlined_call_operand.vmem [shape: bf16[16,2304], index: 0, kind: input, shape index: {}]   ;;  %s1630_s1 = inlined_call_operand.vmem [shape: bf16[2304,256], index: 1, kind: input, shape index: {}]   ;;  %s1631_s2 = inlined_call_operand.vmem [shape: f32[1,256], index: 2, kind: input, shape index: {}]   ;;  %s1632_s3 = inlined_call_operand.vmem [shape: f32[1,256], index: 3, kind: input, shape index: {}]   ;;  %s1633_s4 = inlined_call_operand.vmem [shape: bf16[16,256], index: 4, kind: input, shape index: {}]   ;;  %s1634_s5 = inlined_call_operand.vmem [shape: bf16[16,256], index: 5, kind: output, shape index: {}]  }
   0x1   :  { %s1434_s20 = smov 0   ;;  %s1436_s21 = smov 0  }
   0x2   :  { %s1438_s22 = smov 0  }
   0x3 LB: > { %s27_s23 = sadd.s32 1, %s1393_s21  ;;  %p50_p1 = scmp.ne.s32.totalorder %s1385_s19, %s1381_s18  ;;  %s1397_s22 = sphi %s1438_s22, %s15_s22   ;;  %s1393_s21 = sphi %s1436_s21, %s1638_s21   ;;  %s1389_s20 = sphi %s1434_s20, %s1637_s20   ;;  %s1385_s19 = sphi %s1432_s19, %s1636_s19   ;;  %s1381_s18 = sphi %s1430_s18, %s1635_s18  }
   0x4   : > { %p28_p0 = scmp.ge.s32.totalorder %s27_s23, 6  ;;  %p51_p2 = scmp.eq.s32.totalorder %s1397_s22, 0 }
   0x5   : > { %s43_s25 = sadd.s32 1, %s1385_s19  ;;  %p1044_p5 = scmp.ge.s32.totalorder %s1397_s22, 6 }
   0x6   : > { %s1640_s23 = smov (%p28_p0, %s27_s23), 0  ;;  %p52_p3 = por %p51_p2, %p50_p1 }
   0x7   : > { %s39_s24 = ssub.s32 %s1393_s21, %s1640_s23  ;;  %243 = sbr.rel (%p1044_p5) target bundleno = 21 (0x15), region = 28 }
   0x8   : > { %p41_p4 = scmp.eq.s32.totalorder %s39_s24, 0 }
   0xa   : > { %s1465_s26 = scalar_select %p41_p4, %s1385_s19, %s43_s25  }
   0xc   : > { %246 = sbr.rel (!%p52_p3) target bundleno = 21 (0x15), region = 32  ;;  %s248_s27 = sand.u32 (%p52_p3), 1, %s1385_s19  }
   0xd   : > { %s1263_s28 = smul.u32 (%p52_p3), 12, %s1393_s21 }
   0xe   : > { %s1316_s29 = smul.u32 (%p52_p3), 24, %s248_s27 }
   0xf   : > { %s256_s7 = scalar_lea.vmem (%p52_p3), %s1629_s0, %s1263_s28 }
  0x10   : > { %v271_v0 = vld [vmem:[%s256_s7] sm:$0xff] (%p52_p3)  ;;  %v273_v1 = vld [vmem:[%s256_s7 + $0x48] sm:$0xff] (%p52_p3)  ;;  %s250_s8 = scalar_lea.vmem (%p52_p3), [#allocation3], %s1316_s29  ;;  %v1048_v3 = vld [vmem:[%s256_s7 + $0x50] sm:$0xf] (%p52_p3) }
  0x11   : > { %v1046_v2 = vld [vmem:[%s256_s7 + $0x8] sm:$0xf]  ;;  %272 = vst [vmem:[%s250_s8] sm:$0xff] %v271_v0 }
  0x12   : > { %274 = vst [vmem:[%s250_s8 + $0xc] sm:$0xff] %v273_v1 }
  0x13   : > { %1047 = vst [vmem:[%s250_s8 + $0x8] sm:$0xf] %v1046_v2 }
  0x14   : > { %1049 = vst [vmem:[%s250_s8 + $0x14] sm:$0xf] %v1048_v3 }
  0x15 PF: > { %p1050_p6 = scmp.ge.s32.totalorder %s1397_s22, 1  ;;  %p306_p7 = scmp.lt.s32.totalorder %s1397_s22, 7 }
  0x17   : > { %p307_p8 = pnand %p1050_p6, %p306_p7 }
  0x18   : > { %s313_s9 = sand.u32 (!%p307_p8), 1, %s1381_s18   ;;  %s375_s10 = smul.u32 (!%p307_p8), 48, %s1389_s20 }
  0x19   : > { %310 = sbr.rel (%p307_p8) target bundleno = 265 (0x109), region = 62  ;;  %p1053_p10 = scmp.ne.s32.totalorder (!%p307_p8), %s1389_s20, 0 }
  0x1a   : > { %s1317_s11 = smul.u32 (!%p307_p8), 24, %s313_s9  ;;  %p377_p9 = scmp.lt.s32.totalorder (!%p307_p8), %s375_s10, 287 }
  0x1c   : > { %s1482_s16 = scalar_lea.vmem (!%p307_p8), [#allocation3], %s1317_s11 }
  0x1e   : > { %s1642_s10 = smov (!%p377_p9, %s375_s10), 287  ;;  %424 = sbr.rel (%p1053_p10) target bundleno = 40 (0x28), region = 70 }
  0x1f   : > { %s1264_s12 = sshll.u32 %s1642_s10, 3 }
  0x20   : > { %s1480_s15 = scalar_lea.vmem %s1630_s1, %s1264_s12 }
  0x23   : > { %v1399_v4 = vmov 0.0  }
  0x24   : > { %425 = vst [vmem:[#allocation2 + $0x10] sm:$0xff] %v1399_v4 }
  0x25   : > { %426 = vst [vmem:[#allocation2] sm:$0xff] %v1399_v4 }
  0x26   : > { %427 = vst [vmem:[#allocation2 + $0x18] sm:$0xff] %v1399_v4 }
  0x27   : > { %428 = vst [vmem:[#allocation2 + $0x8] sm:$0xff] %v1399_v4 }
  0x28 PF: > { %v1124_v5 = vld [vmem:[%s1480_s15 + $0x70] sm:$0xf]  ;;  %v1283_v6 = vld [vmem:[%s1480_s15 + $0x74] sm:$0xf0]  ;;  %v1116_v14 = vld [vmem:[%s1480_s15 + $0x60] sm:$0xf] }
  0x29   : > { %v1188_v7 = vld [vmem:[%s1480_s15 + $0xf0] sm:$0xf]  ;;  %v1125_v8 = vor.u32 %v1283_v6, %v1124_v5  ;;  %v1299_v9 = vld [vmem:[%s1480_s15 + $0xf4] sm:$0xf0]  ;;  %v1281_v15 = vld [vmem:[%s1480_s15 + $0x64] sm:$0xf0] }
  0x2a   : > { %v1252_v10 = vld [vmem:[%s1480_s15 + $0x170] sm:$0xf]  ;;  %v1315_v11 = vld [vmem:[%s1480_s15 + $0x174] sm:$0xf0]  ;;  %v1189_v12 = vor.u32 %v1299_v9, %v1188_v7  ;;  %v1180_v16 = vld [vmem:[%s1480_s15 + $0xe0] sm:$0xf]  ;;  %v1117_v17 = vor.u32 %v1281_v15, %v1116_v14 }
  0x2b   : > { %v1253_v13 = vor.u32 %v1315_v11, %v1252_v10  ;;  %741 = vmatpush.bf16.msra.mxu0 %v1125_v8  ;;  %v1297_v18 = vld [vmem:[%s1480_s15 + $0xe4] sm:$0xf0]  ;;  %v1244_v19 = vld [vmem:[%s1480_s15 + $0x160] sm:$0xf]  ;;  %v1108_v23 = vld [vmem:[%s1480_s15 + $0x50] sm:$0xf] }
  0x2c   : > { %v1313_v20 = vld [vmem:[%s1480_s15 + $0x164] sm:$0xf0]  ;;  %755 = vmatpush.bf16.msra.mxu1 %v1189_v12  ;;  %v1181_v21 = vor.u32 %v1297_v18, %v1180_v16  ;;  %v1279_v24 = vld [vmem:[%s1480_s15 + $0x54] sm:$0xf0]  ;;  %v1172_v25 = vld [vmem:[%s1480_s15 + $0xd0] sm:$0xf] }
  0x2d   : > { %769 = vmatpush.bf16.msra.mxu2 %v1253_v13  ;;  %v1245_v22 = vor.u32 %v1313_v20, %v1244_v19  ;;  %v1295_v26 = vld [vmem:[%s1480_s15 + $0xd4] sm:$0xf0]  ;;  %v1236_v27 = vld [vmem:[%s1480_s15 + $0x150] sm:$0xf]  ;;  %v1109_v29 = vor.u32 %v1279_v24, %v1108_v23  ;;  %v1100_v30 = vld [vmem:[%s1480_s15 + $0x40] sm:$0xf] }
  0x2e   : > { %v1311_v28 = vld [vmem:[%s1480_s15 + $0x154] sm:$0xf0]  ;;  %v1277_v31 = vld [vmem:[%s1480_s15 + $0x44] sm:$0xf0]  ;;  %v1173_v32 = vor.u32 %v1295_v26, %v1172_v25  ;;  %v1164_v34 = vld [vmem:[%s1480_s15 + $0xc0] sm:$0xf] }
  0x2f   : > { %742 = vmatpush.bf16.msra.mxu0 %v1117_v17  ;;  %v1237_v33 = vor.u32 %v1311_v28, %v1236_v27  ;;  %v1282_v35 = vld [vmem:[%s1480_s15 + $0x74] sm:$0xf]  ;;  %v1126_v36 = vld [vmem:[%s1480_s15 + $0x78] sm:$0xf0]  ;;  %v1293_v37 = vld [vmem:[%s1480_s15 + $0xc4] sm:$0xf0]  ;;  %v1101_v42 = vor.u32 %v1277_v31, %v1100_v30 }
  0x30   : > { %756 = vmatpush.bf16.msra.mxu1 %v1181_v21  ;;  %v1228_v38 = vld [vmem:[%s1480_s15 + $0x140] sm:$0xf]  ;;  %v1309_v39 = vld [vmem:[%s1480_s15 + $0x144] sm:$0xf0]  ;;  %v1129_v40 = vor.u32 %v1282_v35, %v1126_v36  ;;  %v1280_v41 = vld [vmem:[%s1480_s15 + $0x64] sm:$0xf]  ;;  %v1165_v46 = vor.u32 %v1293_v37, %v1164_v34 }
  0x31   : > { %770 = vmatpush.bf16.msra.mxu2 %v1245_v22  ;;  %v1092_v43 = vld [vmem:[%s1480_s15 + $0x30] sm:$0xf]  ;;  %v1275_v44 = vld [vmem:[%s1480_s15 + $0x34] sm:$0xf0]  ;;  %v1118_v45 = vld [vmem:[%s1480_s15 + $0x68] sm:$0xf0]  ;;  %v1229_v47 = vor.u32 %v1309_v39, %v1228_v38 }
  0x32   : > { %783 = vmatpush.bf16.msra.mxu3 %v1129_v40  ;;  %v1156_v48 = vld [vmem:[%s1480_s15 + $0xb0] sm:$0xf]  ;;  %v1291_v49 = vld [vmem:[%s1480_s15 + $0xb4] sm:$0xf0]  ;;  %v1121_v51 = vor.u32 %v1280_v41, %v1118_v45  ;;  %v1278_v53 = vld [vmem:[%s1480_s15 + $0x54] sm:$0xf]  ;;  %v1093_v55 = vor.u32 %v1275_v44, %v1092_v43 }
  0x33   : > { %743 = vmatpush.bf16.msra.mxu0 %v1109_v29  ;;  %v1220_v50 = vld [vmem:[%s1480_s15 + $0x130] sm:$0xf]  ;;  %v1307_v52 = vld [vmem:[%s1480_s15 + $0x134] sm:$0xf0]  ;;  %v1110_v54 = vld [vmem:[%s1480_s15 + $0x58] sm:$0xf0]  ;;  %v1157_v59 = vor.u32 %v1291_v49, %v1156_v48 }
  0x34   : > { %757 = vmatpush.bf16.msra.mxu1 %v1173_v32  ;;  %v1084_v56 = vld [vmem:[%s1480_s15 + $0x20] sm:$0xf]  ;;  %v1273_v57 = vld [vmem:[%s1480_s15 + $0x24] sm:$0xf0]  ;;  %v1113_v58 = vor.u32 %v1278_v53, %v1110_v54  ;;  %v1221_v60 = vor.u32 %v1307_v52, %v1220_v50  ;;  %v1276_v62 = vld [vmem:[%s1480_s15 + $0x44] sm:$0xf] }
  0x35   : > { %771 = vmatpush.bf16.msra.mxu2 %v1237_v33  ;;  %v1148_v61 = vld [vmem:[%s1480_s15 + $0xa0] sm:$0xf]  ;;  %v1102_v63 = vld [vmem:[%s1480_s15 + $0x48] sm:$0xf0]  ;;  %v1289_v0 = vld [vmem:[%s1480_s15 + $0xa4] sm:$0xf0]  ;;  %v1085_v3 = vor.u32 %v1273_v57, %v1084_v56 }
  0x36   : > { %784 = vmatpush.bf16.msra.mxu3 %v1121_v51  ;;  %v1212_v1 = vld [vmem:[%s1480_s15 + $0x120] sm:$0xf]  ;;  %v1305_v2 = vld [vmem:[%s1480_s15 + $0x124] sm:$0xf0]  ;;  %v1076_v4 = vld [vmem:[%s1480_s15 + $0x10] sm:$0xf]  ;;  %v1105_v6 = vor.u32 %v1276_v62, %v1102_v63  ;;  %v1149_v7 = vor.u32 %v1289_v0, %v1148_v61 }
  0x37   : > { %744 = vmatpush.bf16.msra.mxu0 %v1101_v42  ;;  %v1271_v5 = vld [vmem:[%s1480_s15 + $0x14] sm:$0xf0]  ;;  %v1213_v8 = vor.u32 %v1305_v2, %v1212_v1  ;;  %v1140_v9 = vld [vmem:[%s1480_s15 + $0x90] sm:$0xf]  ;;  %v1274_v10 = vld [vmem:[%s1480_s15 + $0x34] sm:$0xf] }
  0x38   : > { %758 = vmatpush.bf16.msra.mxu1 %v1165_v46  ;;  %v1094_v11 = vld [vmem:[%s1480_s15 + $0x38] sm:$0xf0]  ;;  %v1287_v12 = vld [vmem:[%s1480_s15 + $0x94] sm:$0xf0]  ;;  %v1204_v13 = vld [vmem:[%s1480_s15 + $0x110] sm:$0xf]  ;;  %v1077_v15 = vor.u32 %v1271_v5, %v1076_v4 }
  0x39   : > { %772 = vmatpush.bf16.msra.mxu2 %v1229_v47  ;;  %v1303_v14 = vld [vmem:[%s1480_s15 + $0x114] sm:$0xf0]  ;;  %v1068_v16 = vld [vmem:[%s1480_s15] sm:$0xf]  ;;  %v1269_v17 = vld [vmem:[%s1480_s15 + $0x4] sm:$0xf0]  ;;  %v1097_v19 = vor.u32 %v1274_v10, %v1094_v11  ;;  %v1141_v20 = vor.u32 %v1287_v12, %v1140_v9 }
  0x3a   : > { %785 = vmatpush.bf16.msra.mxu3 %v1113_v58  ;;  %v1132_v18 = vld [vmem:[%s1480_s15 + $0x80] sm:$0xf]  ;;  %v1205_v21 = vor.u32 %v1303_v14, %v1204_v13  ;;  %v1285_v22 = vld [vmem:[%s1480_s15 + $0x84] sm:$0xf0]  ;;  %v1272_v23 = vld [vmem:[%s1480_s15 + $0x24] sm:$0xf]  ;;  %v1069_v31 = vor.u32 %v1269_v17, %v1068_v16 }
  0x3b   : > { %745 = vmatpush.bf16.msra.mxu0 %v1093_v55  ;;  %v1086_v24 = vld [vmem:[%s1480_s15 + $0x28] sm:$0xf0]  ;;  %v1196_v25 = vld [vmem:[%s1480_s15 + $0x100] sm:$0xf]  ;;  %v1301_v26 = vld [vmem:[%s1480_s15 + $0x104] sm:$0xf0]  ;;  %v1133_v36 = vor.u32 %v1285_v22, %v1132_v18 }
  0x3c   : > { %759 = vmatpush.bf16.msra.mxu1 %v1157_v59  ;;  %v1298_v27 = vld [vmem:[%s1480_s15 + $0xf4] sm:$0xf]  ;;  %v1190_v28 = vld [vmem:[%s1480_s15 + $0xf8] sm:$0xf0]  ;;  %v1064_v32 = vld [vmem:[%s1482_s16 + $0x8] sm:$0xf]  ;;  %v1089_v33 = vor.u32 %v1272_v23, %v1086_v24  ;;  %v1197_v37 = vor.u32 %v1301_v26, %v1196_v25 }
  0x3d   : > { %773 = vmatpush.bf16.msra.mxu2 %v1221_v60  ;;  %v1314_v29 = vld [vmem:[%s1480_s15 + $0x174] sm:$0xf]  ;;  %v1254_v30 = vld [vmem:[%s1480_s15 + $0x178] sm:$0xf0]  ;;  %v1056_v34 = vld [vmem:[%s1482_s16] sm:$0xf]  ;;  %v1193_v41 = vor.u32 %v1298_v27, %v1190_v28 }
  0x3e   : > { %786 = vmatpush.bf16.msra.mxu3 %v1105_v6  ;;  %v1266_v35 = vld [vmem:[%s1482_s16 + $0x8] sm:$0xf0]  ;;  %v1267_v38 = vld [vmem:[%s1482_s16 + $0x10] sm:$0xf0]  ;;  %v1265_v39 = vld [vmem:[%s1482_s16 + $0x4] sm:$0xf]  ;;  %v1257_v42 = vor.u32 %v1314_v29, %v1254_v30 }
  0x3f   : > { %746 = vmatpush.bf16.msra.mxu0 %v1085_v3  ;;  %v1058_v40 = vld [vmem:[%s1482_s16 + $0xc] sm:$0xf0]  ;;  %v1296_v43 = vld [vmem:[%s1480_s15 + $0xe4] sm:$0xf]  ;;  %v1270_v44 = vld [vmem:[%s1480_s15 + $0x14] sm:$0xf]  ;;  %v1057_v49 = vor.u32 %v1266_v35, %v1056_v34  ;;  %v1561_v50 = vor.u32 %v1267_v38, %v1064_v32 }
  0x40   : > { %760 = vmatpush.bf16.msra.mxu1 %v1149_v7  ;;  %v1078_v45 = vld [vmem:[%s1480_s15 + $0x18] sm:$0xf0]  ;;  %v1182_v46 = vld [vmem:[%s1480_s15 + $0xe8] sm:$0xf0]  ;;  %v1312_v47 = vld [vmem:[%s1480_s15 + $0x164] sm:$0xf]  ;;  %v1563_v51 = vor.u32 %v1265_v39, %v1058_v40 }
  0x41   : > { %774 = vmatpush.bf16.msra.mxu2 %v1213_v8  ;;  %v1246_v48 = vld [vmem:[%s1480_s15 + $0x168] sm:$0xf0]  ;;  %v1081_v52 = vor.u32 %v1270_v44, %v1078_v45  ;;  %v1185_v53 = vor.u32 %v1296_v43, %v1182_v46  ;;  %v1294_v55 = vld [vmem:[%s1480_s15 + $0xd4] sm:$0xf]  ;;  %v1268_v56 = vld [vmem:[%s1480_s15 + $0x4] sm:$0xf] }
  0x42   : > { %787 = vmatpush.bf16.msra.mxu3 %v1097_v19  ;;  %v1249_v54 = vor.u32 %v1312_v47, %v1246_v48  ;;  %v1070_v57 = vld [vmem:[%s1480_s15 + $0x8] sm:$0xf0]  ;;  %v1174_v58 = vld [vmem:[%s1480_s15 + $0xd8] sm:$0xf0]  ;;  %v1310_v59 = vld [vmem:[%s1480_s15 + $0x154] sm:$0xf] }
  0x43   : > { %747 = vmatpush.bf16.msra.mxu0 %v1077_v15  ;;  %v1238_v60 = vld [vmem:[%s1480_s15 + $0x158] sm:$0xf0]  ;;  %v1073_v61 = vor.u32 %v1268_v56, %v1070_v57  ;;  %v1177_v62 = vor.u32 %v1294_v55, %v1174_v58  ;;  %v1292_v0 = vld [vmem:[%s1480_s15 + $0xc4] sm:$0xf]  ;;  %v1166_v1 = vld [vmem:[%s1480_s15 + $0xc8] sm:$0xf0] }
  0x44   : > { %761 = vmatpush.bf16.msra.mxu1 %v1141_v20  ;;  %v1241_v63 = vor.u32 %v1310_v59, %v1238_v60  ;;  %v1308_v2 = vld [vmem:[%s1480_s15 + $0x144] sm:$0xf]  ;;  %v1230_v3 = vld [vmem:[%s1480_s15 + $0x148] sm:$0xf0]  ;;  %v1169_v4 = vor.u32 %v1292_v0, %v1166_v1  ;;  %v1290_v6 = vld [vmem:[%s1480_s15 + $0xb4] sm:$0xf] }
  0x45   : > { %775 = vmatpush.bf16.msra.mxu2 %v1205_v21  ;;  %v1233_v5 = vor.u32 %v1308_v2, %v1230_v3  ;;  %v1158_v7 = vld [vmem:[%s1480_s15 + $0xb8] sm:$0xf0]  ;;  %v1306_v8 = vld [vmem:[%s1480_s15 + $0x134] sm:$0xf]  ;;  %v1288_v12 = vld [vmem:[%s1480_s15 + $0xa4] sm:$0xf] }
  0x46   : > { %788 = vmatpush.bf16.msra.mxu3 %v1089_v33  ;;  %v1222_v9 = vld [vmem:[%s1480_s15 + $0x138] sm:$0xf0]  ;;  %v1161_v10 = vor.u32 %v1290_v6, %v1158_v7  ;;  %v1150_v13 = vld [vmem:[%s1480_s15 + $0xa8] sm:$0xf0]  ;;  %v1304_v14 = vld [vmem:[%s1480_s15 + $0x124] sm:$0xf] }
  0x47   : > { %748 = vmatpush.bf16.msra.mxu0 %v1069_v31  ;;  %v1225_v11 = vor.u32 %v1306_v8, %v1222_v9  ;;  %v1214_v15 = vld [vmem:[%s1480_s15 + $0x128] sm:$0xf0]  ;;  %v1153_v16 = vor.u32 %v1288_v12, %v1150_v13  ;;  %v1286_v18 = vld [vmem:[%s1480_s15 + $0x94] sm:$0xf]  ;;  %v1142_v19 = vld [vmem:[%s1480_s15 + $0x98] sm:$0xf0] }
  0x48   : > { %762 = vmatpush.bf16.msra.mxu1 %v1133_v36  ;;  %v1217_v17 = vor.u32 %v1304_v14, %v1214_v15  ;;  %v1302_v20 = vld [vmem:[%s1480_s15 + $0x114] sm:$0xf]  ;;  %v1206_v21 = vld [vmem:[%s1480_s15 + $0x118] sm:$0xf0]  ;;  %v1145_v22 = vor.u32 %v1286_v18, %v1142_v19  ;;  %v1284_v24 = vld [vmem:[%s1480_s15 + $0x84] sm:$0xf] }
  0x49   : > { %776 = vmatpush.bf16.msra.mxu2 %v1197_v37  ;;  %v1209_v23 = vor.u32 %v1302_v20, %v1206_v21  ;;  %v1134_v25 = vld [vmem:[%s1480_s15 + $0x88] sm:$0xf0]  ;;  %v1300_v26 = vld [vmem:[%s1480_s15 + $0x104] sm:$0xf]  ;;  %v429_v33 = vld [vmem:[#allocation2 + $0x10] sm:$0xff]  ;;  %p1258_p11 = scmp.ne.s32.totalorder %s1389_s20, 5 }
  0x4a   : > { %749 = vmatmul.bf16.vlgmr.msra.gmra.mxu0 %v1057_v49  ;;  %789 = vmatpush.bf16.msra.mxu3 %v1081_v52  ;;  %v1198_v27 = vld [vmem:[%s1480_s15 + $0x108] sm:$0xf0]  ;;  %v1137_v28 = vor.u32 %v1284_v24, %v1134_v25  ;;  %v431_v40 = vld [vmem:[#allocation2 + $0x18] sm:$0xff]  ;;  %v430_v48 = vld [vmem:[#allocation2] sm:$0xff] }
  0x4b   : > { %797 = vmatpush.bf16.msrb.mxu0 %v1193_v41  ;;  %763 = vmatmul.bf16.vlgmr.msra.gmra.mxu1 %v1563_v51  ;;  %v1201_v29 = vor.u32 %v1300_v26, %v1198_v27 }
  0x4c   : > { %811 = vmatpush.bf16.msrb.mxu1 %v1257_v42  ;;  %777 = vmatmul.bf16.vlgmr.msra.gmra.mxu2 %v1561_v50 }
  0x4e   : > { %790 = vmatpush.bf16.msra.mxu3 %v1073_v61 }
  0x4f   : > { %798 = vmatpush.bf16.msrb.mxu0 %v1185_v53 }
  0x50   : > { %812 = vmatpush.bf16.msrb.mxu1 %v1249_v54  ;;  %v432_v54 = vld [vmem:[#allocation2 + $0x8] sm:$0xff] }
  0x51   : > { %791 = vmatmul.bf16.vlgmr.msra.gmra.mxu3 %v1057_v49 }
  0x53   : > { %799 = vmatpush.bf16.msrb.mxu0 %v1177_v62 }
  0x54   : > { %813 = vmatpush.bf16.msrb.mxu1 %v1241_v63 }
  0x57   : > { %800 = vmatpush.bf16.msrb.mxu0 %v1169_v4 }
  0x58   : > { %814 = vmatpush.bf16.msrb.mxu1 %v1233_v5 }
  0x5b   : > { %801 = vmatpush.bf16.msrb.mxu0 %v1161_v10 }
  0x5c   : > { %815 = vmatpush.bf16.msrb.mxu1 %v1225_v11 }
  0x5f   : > { %802 = vmatpush.bf16.msrb.mxu0 %v1153_v16 }
  0x60   : > { %816 = vmatpush.bf16.msrb.mxu1 %v1217_v17 }
  0x63   : > { %803 = vmatpush.bf16.msrb.mxu0 %v1145_v22 }
  0x64   : > { %817 = vmatpush.bf16.msrb.mxu1 %v1209_v23 }
  0x67   : > { %804 = vmatpush.bf16.msrb.mxu0 %v1137_v28 }
  0x68   : > { %818 = vmatpush.bf16.msrb.mxu1 %v1201_v29 }
  0x6a   : > { %805 = vmatmul.bf16.vlgmr.msrb.gmra.mxu0 %v1563_v51 }
  0x6b   : > { %819 = vmatmul.bf16.vlgmr.msrb.gmra.mxu1 %v1561_v50 }
  0xc7   : > { %v750_v30 = vpop.f32.mrf.mxu0 }
  0xc8   : > { %v764_v31 = vpop.f32.mrf.mxu1 }
  0xc9   : > { %v765_v32 = vadd.f32 %v764_v31, %v750_v30 }
  0xcf   : > { %v778_v34 = vpop.f32.mrf.mxu2  ;;  %v752_v36 = vpop.f32.mrf.mxu0 }
  0xd0   : > { %v779_v35 = vadd.f32 %v778_v34, %v765_v32  ;;  %v766_v37 = vpop.f32.mrf.mxu1 }
  0xd1   : > { %v767_v39 = vadd.f32 %v766_v37, %v752_v36 }
  0xd2   : > { %v825_v38 = vadd.f32 %v779_v35, %v429_v33 }
  0xd4   : > { %829 = vst [vmem:[#allocation2 + $0x10] sm:$0xff] %v825_v38  ;;  %v792_v44 = vpop.f32.mrf.mxu3 }
  0xd7   : > { %v780_v41 = vpop.f32.mrf.mxu2 }
  0xd8   : > { %v781_v42 = vadd.f32 %v780_v41, %v767_v39 }
  0xda   : > { %v827_v43 = vadd.f32 %v781_v42, %v431_v40 }
  0xdc   : > { %831 = vst [vmem:[#allocation2 + $0x18] sm:$0xff] %v827_v43  ;;  %v794_v51 = vpop.f32.mrf.mxu3 }
  0xe7   : > { %v806_v45 = vpop.f32.mrf.mxu0 }
  0xe8   : > { %v820_v46 = vpop.f32.mrf.mxu1  ;;  %v807_v47 = vadd.f32 %v806_v45, %v792_v44 }
  0xea   : > { %v821_v49 = vadd.f32 %v820_v46, %v807_v47 }
  0xec   : > { %v826_v50 = vadd.f32 %v821_v49, %v430_v48 }
  0xee   : > { %830 = vst [vmem:[#allocation2] sm:$0xff] %v826_v50 }
  0xef   : > { %v808_v52 = vpop.f32.mrf.mxu0 }
  0xf0   : > { %v809_v53 = vadd.f32 %v808_v52, %v794_v51  ;;  %v822_v55 = vpop.f32.mrf.mxu1 }
  0xf2   : > { %v823_v56 = vadd.f32 %v822_v55, %v809_v53  ;;  %836 = sbr.rel (%p1258_p11) target bundleno = 265 (0x109), region = 74 }
  0xf4   : > { %v828_v57 = vadd.f32 %v823_v56, %v432_v54 }
  0xf6   : > { %832 = vst [vmem:[#allocation2 + $0x8] sm:$0xff] %v828_v57 }
  0xf7   : > { %v837_v58 = vld [vmem:[#allocation2 + $0x10] sm:$0xff]  ;;  %v838_v59 = vld [vmem:[#allocation2] sm:$0xff]  ;;  %v839_v1 = vld [vmem:[#allocation2 + $0x18] sm:$0xff] }
  0xf8   : > { %v841_v60 = vld [vmem:[%s1631_s2] sm:$0x3]  ;;  %v862_v7 = vld [vmem:[%s1633_s4 + $0x8] sm:$0xff] }
  0xf9   : > { %v843_v61 = vperm.slane %v841_v60, 0  ;;  %v844_v62 = vperm.slane %v841_v60, 1  ;;  %v851_v63 = vld [vmem:[%s1632_s3] sm:$0x3]  ;;  %v865_v12 = vunpack.c.l.bf16 %v862_v7  ;;  %v866_v13 = vunpack.c.h.bf16 %v862_v7 }
  0xfa   : > { %v861_v0 = vld [vmem:[%s1633_s4] sm:$0xff]  ;;  %v853_v2 = vperm.slane %v851_v63, 0  ;;  %v854_v3 = vperm.slane %v851_v63, 1 }
  0xfb   : > { %v863_v4 = vunpack.c.l.bf16 %v861_v0  ;;  %v864_v5 = vunpack.c.h.bf16 %v861_v0  ;;  %v847_v8 = vmul.f32 %v843_v61, %v837_v58  ;;  %v848_v9 = vmul.f32 %v844_v62, %v838_v59 }
  0xfc   : > { %v849_v10 = vmul.f32 %v843_v61, %v839_v1 }
  0xfd   : > { %v840_v6 = vld [vmem:[#allocation2 + $0x8] sm:$0xff]  ;;  %v857_v14 = vadd.f32 %v853_v2, %v847_v8  ;;  %v858_v15 = vadd.f32 %v854_v3, %v848_v9 }
  0xfe   : > { %v850_v11 = vmul.f32 %v844_v62, %v840_v6  ;;  %v859_v16 = vadd.f32 %v853_v2, %v849_v10 }
  0xff   : > { %v867_v18 = vadd.f32 %v863_v4, %v857_v14  ;;  %v868_v19 = vadd.f32 %v864_v5, %v858_v15 }
 0x100   : > { %v860_v17 = vadd.f32 %v854_v3, %v850_v11  ;;  %v869_v20 = vadd.f32 %v865_v12, %v859_v16 }
 0x101   : > { %v871_v22 = vmax.f32 %v867_v18, 0.0  ;;  %v872_v23 = vmax.f32 %v868_v19, 0.0 }
 0x102   : > { %v870_v21 = vadd.f32 %v866_v13, %v860_v17  ;;  %v873_v24 = vmax.f32 %v869_v20, 0.0 }
 0x103   : > { %v875_v26 = vpack.c.bf16 %v872_v23, %v871_v22 }
 0x104   : > { %v874_v25 = vmax.f32 %v870_v21, 0.0 }
 0x105   : > { %877 = vst [vmem:[%s1634_s5] sm:$0xff] %v875_v26 }
 0x106   : > { %v876_v27 = vpack.c.bf16 %v874_v25, %v873_v24 }
 0x108   : > { %878 = vst [vmem:[%s1634_s5 + $0x8] sm:$0xff] %v876_v27 }
 0x109 PF: > { %s15_s22 = sadd.s32 1, %s1397_s22   ;;  %s1635_s18 = smov %s1385_s19 }
 0x10a   : > { %p12_p12 = scmp.ge.s32.totalorder %s15_s22, 8   ;;  %s1636_s19 = smov %s1465_s26 }
 0x10b   : > { %s1637_s20 = smov %s1393_s21  ;;  %s1638_s21 = smov %s1640_s23 }
 0x10c   :  { %14 = sbr.rel (!%p12_p12) target bundleno = 3 (0x3), region = 127 }

// kernel: adv_resnet_forward.21
= control target key start
LH: loop header
LB: loop body
LE: loop exit
PB: predicated region body
PF: predicated region fallthrough
CT: control target
= control target key end

     0   :  { %s2054_s0 = inlined_call_operand.vmem [shape: bf16[16,2304], index: 0, kind: input, shape index: {}]   ;;  %s2055_s1 = inlined_call_operand.vmem [shape: bf16[2304,512], index: 1, kind: input, shape index: {}]   ;;  %s2056_s2 = inlined_call_operand.vmem [shape: f32[1,512], index: 2, kind: input, shape index: {}]   ;;  %s2057_s3 = inlined_call_operand.vmem [shape: f32[1,512], index: 3, kind: input, shape index: {}]   ;;  %s2058_s4 = inlined_call_operand.vmem [shape: bf16[16,512], index: 4, kind: output, shape index: {}]  }
   0x1   :  { %2061 = sst [smem:[#allocation8_spill]] %s2054_s0 }
   0x2   :  { %2062 = sst [smem:[#allocation9_spill]] %s2055_s1 }
   0x3   :  { %s1653_s15 = smov 0   ;;  %s1655_s16 = smov 0  }
   0x4   :  { %s1657_s17 = smov 0   ;;  %s1659_s18 = smov 0  }
   0x5   :  { %s1661_s19 = smov 0   ;;  %s1663_s20 = smov 0  }
   0x6   :  { %s1665_s21 = smov 0   ;;  %s1667_s22 = smov 0  }
   0x7   :  { %s1669_s23 = smov 0   ;;  %s1671_s24 = smov 0  }
   0x8   :  { %s1673_s25 = smov 0  }
   0x9 LB: > { %s1165_s26 = sadd.s32 4294967295, %s1625_s25   ;;  %s26_s27 = sadd.s32 1, %s1617_s23  ;;  %s1625_s25 = sphi %s1673_s25, %s14_s25   ;;  %s1621_s24 = sphi %s1671_s24, %s2081_s24   ;;  %s1617_s23 = sphi %s1669_s23, %s2080_s23   ;;  %s1613_s22 = sphi %s1667_s22, %s2079_s22   ;;  %s1609_s21 = sphi %s1665_s21, %s2078_s21   ;;  %s1605_s20 = sphi %s1663_s20, %s2077_s20   ;;  %s1601_s19 = sphi %s1661_s19, %s2076_s19   ;;  %s1597_s18 = sphi %s1659_s18, %s2075_s18   ;;  %s1593_s17 = sphi %s1657_s17, %s2074_s17   ;;  %s1589_s16 = sphi %s1655_s16, %s2073_s16   ;;  %s1585_s15 = sphi %s1653_s15, %s2072_s15  }
   0xa   : > { %p27_p0 = scmp.ge.s32.totalorder %s26_s27, 6  ;;  %s29_s28 = sadd.s32 1, %s1621_s24 }
   0xb   : > { %s42_s29 = sadd.s32 1, %s1605_s20  ;;  %p49_p1 = scmp.ne.s32.totalorder %s1605_s20, %s1601_s19 }
   0xc   : > { %s2083_s27 = smov (%p27_p0, %s26_s27), 0  ;;  %s2085_s28 = smov (!%p27_p0, %s29_s28), %s1621_s24 }
   0xd   : > { %2063 = sst [smem:[#allocation6_spill]] %s2083_s27  ;;  %s38_s30 = ssub.s32 %s1617_s23, %s2083_s27 }
   0xe   : > { %p50_p2 = scmp.eq.s32.totalorder %s1625_s25, 0  ;;  %p31_p3 = scmp.ge.s32.totalorder %s2085_s28, 2 }
   0xf   : > { %p40_p4 = scmp.eq.s32.totalorder %s38_s30, 0  ;;  %s70_s6 = sadd.s32 1, %s1597_s18 }
  0x10   : > { %p1720_p5 = por %p50_p2, %p49_p1  ;;  %s2087_s28 = smov (%p31_p3, %s2085_s28), 0 }
  0x11   : > { %2065 = sst [smem:[#allocation7_spill]] %s2087_s28  ;;  %s66_s8 = ssub.s32 %s1621_s24, %s2087_s28 }
  0x12   : > { %s1728_s7 = scalar_select %p40_p4, %s1605_s20, %s42_s29  }
  0x13   : > { %p77_p6 = scmp.ne.s32.totalorder %s1597_s18, %s1593_s17  ;;  %s67_s9 = sor.u32 %s66_s8, %s38_s30 }
  0x14   : > { %p148_p7 = scmp.eq.s32.totalorder %s66_s8, 0  ;;  %p68_p8 = scmp.eq.s32.totalorder %s67_s9, 0 }
  0x15   : > { %p1734_p9 = por %p77_p6, %p50_p2  ;;  %s150_s11 = sadd.s32 1, %s1589_s16 }
  0x16   : > { %p160_p10 = scmp.ne.s32.totalorder %s1589_s16, %s1585_s15  ;;  %p161_p11 = scmp.eq.s32.totalorder %s1165_s26, 11 }
  0x17   : > { %s1742_s12 = scalar_select %p68_p8, %s1597_s18, %s70_s6  }
  0x18   : > { %s1745_s13 = scalar_select %p148_p7, %s1589_s16, %s150_s11  }
  0x19   : > { %p1747_p12 = por %p161_p11, %p160_p10  ;;  %p1168_p13 = scmp.ge.s32.totalorder %s1625_s25, 12 }
  0x1b   : > { %183 = sbr.rel (%p1168_p13) target bundleno = 103 (0x67), region = 16 }
  0x20   : > { %186 = sbr.rel (!%p1720_p5) target bundleno = 45 (0x2d), region = 20  ;;  %s188_s29 = sand.u32 (%p1720_p5), 1, %s1605_s20  }
  0x21   : > { %s1392_s30 = smul.u32 (%p1720_p5), 12, %s1617_s23  ;;  %s2068_s0 = sld [smem:[#allocation8_spill]] (%p1720_p5) }
  0x22   : > { %s1446_s8 = smul.u32 (%p1720_p5), 24, %s188_s29 }
  0x24   : > { %s190_s26 = scalar_lea.vmem (%p1720_p5), [#allocation3], %s1446_s8 }
  0x27   : > { %s196_s11 = scalar_lea.vmem %s2068_s0, %s1392_s30 }
  0x28   : > { %v211_v0 = vld [vmem:[%s196_s11] sm:$0xff]  ;;  %v213_v1 = vld [vmem:[%s196_s11 + $0x48] sm:$0xff]  ;;  %v1172_v3 = vld [vmem:[%s196_s11 + $0x50] sm:$0xf] }
  0x29   : > { %v1170_v2 = vld [vmem:[%s196_s11 + $0x8] sm:$0xf]  ;;  %212 = vst [vmem:[%s190_s26] sm:$0xff] %v211_v0 }
  0x2a   : > { %214 = vst [vmem:[%s190_s26 + $0xc] sm:$0xff] %v213_v1 }
  0x2b   : > { %1171 = vst [vmem:[%s190_s26 + $0x8] sm:$0xf] %v1170_v2 }
  0x2c   : > { %1173 = vst [vmem:[%s190_s26 + $0x14] sm:$0xf] %v1172_v3 }
  0x2d PF: > { %232 = sbr.rel (!%p1734_p9) target bundleno = 103 (0x67), region = 46  ;;  %s234_s5 = sand.u32 (%p1734_p9), 1, %s1597_s18  }
  0x2e   : > { %s1447_s29 = smul.u32 (%p1734_p9), 384, %s234_s5  ;;  %s1174_s6 = sshll.u32 (%p1734_p9), %s1621_s24, 1 }
  0x2f   : > { %s1393_s30 = smul.u32 (%p1734_p9), 192, %s1617_s23  ;;  %s2069_s1 = sld [smem:[#allocation9_spill]] (%p1734_p9) }
  0x30   : > { %s1772_s10 = scalar_lea.vmem (%p1734_p9), [#allocation4], %s1447_s29 }
  0x31   : > { %s240_s9 = sadd.s32 (%p1734_p9), %s1393_s30, %s1174_s6 }
  0x32   : > { %s1176_s0 = sshll.u32 %s240_s9, 2 }
  0x35   : > { %s1767_s11 = scalar_lea.vmem %s2069_s1, %s1176_s0 }
  0x36   : > { %v365_v4 = vld [vmem:[%s1767_s11] sm:$0xff]  ;;  %v367_v5 = vld [vmem:[%s1767_s11 + $0x10] sm:$0xff] }
  0x37   : > { %v369_v6 = vld [vmem:[%s1767_s11 + $0x20] sm:$0xff]  ;;  %366 = vst [vmem:[%s1772_s10] sm:$0xff] %v365_v4  ;;  %v371_v7 = vld [vmem:[%s1767_s11 + $0x30] sm:$0xff] }
  0x38   : > { %368 = vst [vmem:[%s1772_s10 + $0x8] sm:$0xff] %v367_v5  ;;  %v373_v8 = vld [vmem:[%s1767_s11 + $0x40] sm:$0xff]  ;;  %v375_v9 = vld [vmem:[%s1767_s11 + $0x50] sm:$0xff] }
  0x39   : > { %370 = vst [vmem:[%s1772_s10 + $0x10] sm:$0xff] %v369_v6  ;;  %v377_v10 = vld [vmem:[%s1767_s11 + $0x60] sm:$0xff]  ;;  %v379_v11 = vld [vmem:[%s1767_s11 + $0x70] sm:$0xff] }
  0x3a   : > { %372 = vst [vmem:[%s1772_s10 + $0x18] sm:$0xff] %v371_v7  ;;  %v381_v12 = vld [vmem:[%s1767_s11 + $0x80] sm:$0xff]  ;;  %v383_v13 = vld [vmem:[%s1767_s11 + $0x90] sm:$0xff] }
  0x3b   : > { %374 = vst [vmem:[%s1772_s10 + $0x20] sm:$0xff] %v373_v8  ;;  %v385_v14 = vld [vmem:[%s1767_s11 + $0xa0] sm:$0xff]  ;;  %v387_v15 = vld [vmem:[%s1767_s11 + $0xb0] sm:$0xff] }
  0x3c   : > { %376 = vst [vmem:[%s1772_s10 + $0x28] sm:$0xff] %v375_v9  ;;  %v389_v16 = vld [vmem:[%s1767_s11 + $0xc0] sm:$0xff]  ;;  %v391_v17 = vld [vmem:[%s1767_s11 + $0xd0] sm:$0xff] }
  0x3d   : > { %378 = vst [vmem:[%s1772_s10 + $0x30] sm:$0xff] %v377_v10  ;;  %v393_v18 = vld [vmem:[%s1767_s11 + $0xe0] sm:$0xff]  ;;  %v395_v19 = vld [vmem:[%s1767_s11 + $0xf0] sm:$0xff] }
  0x3e   : > { %380 = vst [vmem:[%s1772_s10 + $0x38] sm:$0xff] %v379_v11  ;;  %v397_v20 = vld [vmem:[%s1767_s11 + $0x100] sm:$0xff]  ;;  %v399_v21 = vld [vmem:[%s1767_s11 + $0x110] sm:$0xff] }
  0x3f   : > { %382 = vst [vmem:[%s1772_s10 + $0x40] sm:$0xff] %v381_v12  ;;  %v401_v22 = vld [vmem:[%s1767_s11 + $0x120] sm:$0xff]  ;;  %v403_v23 = vld [vmem:[%s1767_s11 + $0x130] sm:$0xff] }
  0x40   : > { %384 = vst [vmem:[%s1772_s10 + $0x48] sm:$0xff] %v383_v13  ;;  %v405_v24 = vld [vmem:[%s1767_s11 + $0x140] sm:$0xff]  ;;  %v407_v25 = vld [vmem:[%s1767_s11 + $0x150] sm:$0xff] }
  0x41   : > { %386 = vst [vmem:[%s1772_s10 + $0x50] sm:$0xff] %v385_v14  ;;  %v409_v26 = vld [vmem:[%s1767_s11 + $0x160] sm:$0xff]  ;;  %v411_v27 = vld [vmem:[%s1767_s11 + $0x170] sm:$0xff] }
  0x42   : > { %388 = vst [vmem:[%s1772_s10 + $0x58] sm:$0xff] %v387_v15  ;;  %v413_v28 = vld [vmem:[%s1767_s11 + $0x180] sm:$0xff]  ;;  %v415_v29 = vld [vmem:[%s1767_s11 + $0x190] sm:$0xff] }
  0x43   : > { %390 = vst [vmem:[%s1772_s10 + $0x60] sm:$0xff] %v389_v16  ;;  %v417_v30 = vld [vmem:[%s1767_s11 + $0x1a0] sm:$0xff]  ;;  %v419_v31 = vld [vmem:[%s1767_s11 + $0x1b0] sm:$0xff] }
  0x44   : > { %392 = vst [vmem:[%s1772_s10 + $0x68] sm:$0xff] %v391_v17  ;;  %v421_v32 = vld [vmem:[%s1767_s11 + $0x1c0] sm:$0xff]  ;;  %v423_v33 = vld [vmem:[%s1767_s11 + $0x1d0] sm:$0xff] }
  0x45   : > { %394 = vst [vmem:[%s1772_s10 + $0x70] sm:$0xff] %v393_v18  ;;  %v425_v34 = vld [vmem:[%s1767_s11 + $0x1e0] sm:$0xff]  ;;  %v427_v35 = vld [vmem:[%s1767_s11 + $0x1f0] sm:$0xff] }
  0x46   : > { %396 = vst [vmem:[%s1772_s10 + $0x78] sm:$0xff] %v395_v19  ;;  %v429_v36 = vld [vmem:[%s1767_s11 + $0x200] sm:$0xff]  ;;  %v431_v37 = vld [vmem:[%s1767_s11 + $0x210] sm:$0xff] }
  0x47   : > { %398 = vst [vmem:[%s1772_s10 + $0x80] sm:$0xff] %v397_v20  ;;  %v433_v38 = vld [vmem:[%s1767_s11 + $0x220] sm:$0xff]  ;;  %v435_v39 = vld [vmem:[%s1767_s11 + $0x230] sm:$0xff] }
  0x48   : > { %400 = vst [vmem:[%s1772_s10 + $0x88] sm:$0xff] %v399_v21  ;;  %v437_v40 = vld [vmem:[%s1767_s11 + $0x240] sm:$0xff]  ;;  %v439_v41 = vld [vmem:[%s1767_s11 + $0x250] sm:$0xff] }
  0x49   : > { %402 = vst [vmem:[%s1772_s10 + $0x90] sm:$0xff] %v401_v22  ;;  %v441_v42 = vld [vmem:[%s1767_s11 + $0x260] sm:$0xff]  ;;  %v443_v43 = vld [vmem:[%s1767_s11 + $0x270] sm:$0xff] }
  0x4a   : > { %404 = vst [vmem:[%s1772_s10 + $0x98] sm:$0xff] %v403_v23  ;;  %v445_v44 = vld [vmem:[%s1767_s11 + $0x280] sm:$0xff]  ;;  %v447_v45 = vld [vmem:[%s1767_s11 + $0x290] sm:$0xff] }
  0x4b   : > { %406 = vst [vmem:[%s1772_s10 + $0xa0] sm:$0xff] %v405_v24  ;;  %v449_v46 = vld [vmem:[%s1767_s11 + $0x2a0] sm:$0xff]  ;;  %v451_v47 = vld [vmem:[%s1767_s11 + $0x2b0] sm:$0xff] }
  0x4c   : > { %408 = vst [vmem:[%s1772_s10 + $0xa8] sm:$0xff] %v407_v25  ;;  %v453_v48 = vld [vmem:[%s1767_s11 + $0x2c0] sm:$0xff]  ;;  %v455_v49 = vld [vmem:[%s1767_s11 + $0x2d0] sm:$0xff] }
  0x4d   : > { %410 = vst [vmem:[%s1772_s10 + $0xb0] sm:$0xff] %v409_v26  ;;  %v457_v50 = vld [vmem:[%s1767_s11 + $0x2e0] sm:$0xff]  ;;  %v459_v51 = vld [vmem:[%s1767_s11 + $0x2f0] sm:$0xff] }
  0x4e   : > { %412 = vst [vmem:[%s1772_s10 + $0xb8] sm:$0xff] %v411_v27 }
  0x4f   : > { %414 = vst [vmem:[%s1772_s10 + $0xc0] sm:$0xff] %v413_v28 }
  0x50   : > { %416 = vst [vmem:[%s1772_s10 + $0xc8] sm:$0xff] %v415_v29 }
  0x51   : > { %418 = vst [vmem:[%s1772_s10 + $0xd0] sm:$0xff] %v417_v30 }
  0x52   : > { %420 = vst [vmem:[%s1772_s10 + $0xd8] sm:$0xff] %v419_v31 }
  0x53   : > { %422 = vst [vmem:[%s1772_s10 + $0xe0] sm:$0xff] %v421_v32 }
  0x54   : > { %424 = vst [vmem:[%s1772_s10 + $0xe8] sm:$0xff] %v423_v33 }
  0x55   : > { %426 = vst [vmem:[%s1772_s10 + $0xf0] sm:$0xff] %v425_v34 }
  0x56   : > { %428 = vst [vmem:[%s1772_s10 + $0xf8] sm:$0xff] %v427_v35 }
  0x57   : > { %430 = vst [vmem:[%s1772_s10 + $0x100] sm:$0xff] %v429_v36 }
  0x58   : > { %432 = vst [vmem:[%s1772_s10 + $0x108] sm:$0xff] %v431_v37 }
  0x59   : > { %434 = vst [vmem:[%s1772_s10 + $0x110] sm:$0xff] %v433_v38 }
  0x5a   : > { %436 = vst [vmem:[%s1772_s10 + $0x118] sm:$0xff] %v435_v39 }
  0x5b   : > { %438 = vst [vmem:[%s1772_s10 + $0x120] sm:$0xff] %v437_v40 }
  0x5c   : > { %440 = vst [vmem:[%s1772_s10 + $0x128] sm:$0xff] %v439_v41 }
  0x5d   : > { %442 = vst [vmem:[%s1772_s10 + $0x130] sm:$0xff] %v441_v42 }
  0x5e   : > { %444 = vst [vmem:[%s1772_s10 + $0x138] sm:$0xff] %v443_v43 }
  0x5f   : > { %446 = vst [vmem:[%s1772_s10 + $0x140] sm:$0xff] %v445_v44 }
  0x60   : > { %448 = vst [vmem:[%s1772_s10 + $0x148] sm:$0xff] %v447_v45 }
  0x61   : > { %450 = vst [vmem:[%s1772_s10 + $0x150] sm:$0xff] %v449_v46 }
  0x62   : > { %452 = vst [vmem:[%s1772_s10 + $0x158] sm:$0xff] %v451_v47 }
  0x63   : > { %454 = vst [vmem:[%s1772_s10 + $0x160] sm:$0xff] %v453_v48 }
  0x64   : > { %456 = vst [vmem:[%s1772_s10 + $0x168] sm:$0xff] %v455_v49 }
  0x65   : > { %458 = vst [vmem:[%s1772_s10 + $0x170] sm:$0xff] %v457_v50 }
  0x66   : > { %460 = vst [vmem:[%s1772_s10 + $0x178] sm:$0xff] %v459_v51 }
  0x67 PF: > { %p1177_p0 = scmp.ge.s32.totalorder %s1625_s25, 1  ;;  %p481_p1 = scmp.lt.s32.totalorder %s1625_s25, 13 }
  0x69   : > { %p482_p2 = pnand %p1177_p0, %p481_p1 }
  0x6a   : > { %s488_s0 = sand.u32 (!%p482_p2), 1, %s1601_s19   ;;  %s495_s28 = sand.u32 (!%p482_p2), 1, %s1593_s17  }
  0x6b   : > { %485 = sbr.rel (%p482_p2) target bundleno = 355 (0x163), region = 92  ;;  %s528_s5 = sand.u32 (!%p482_p2), 1, %s1585_s15  }
  0x6c   : > { %s1448_s26 = smul.u32 (!%p482_p2), 24, %s488_s0  ;;  %s1178_s6 = sshll.u32 (!%p482_p2), %s528_s5, 4 }
  0x6d   : > { %s1449_s29 = smul.u32 (!%p482_p2), 384, %s495_s28  ;;  %s1179_s30 = sshll.u32 (!%p482_p2), %s1613_s22, 1 }
  0x6e   : > { %p536_p3 = scmp.lt.s32.totalorder (!%p482_p2), %s1179_s30, 3  ;;  %s1883_s19 = scalar_lea.vmem (!%p482_p2), [#allocation3], %s1448_s26 }
  0x6f   : > { %s1885_s17 = scalar_lea.vmem (!%p482_p2), [#allocation4], %s1449_s29  ;;  %s1887_s15 = scalar_lea.vmem (!%p482_p2), [#allocation5], %s1178_s6 }
  0x70   : > { %s2089_s30 = smov (!%p536_p3, %s1179_s30), 3  ;;  %p1181_p4 = scmp.ne.s32.totalorder %s1609_s21, 0 }
  0x71   : > { %s538_s11 = scalar_lea.vmem %s2056_s2, %s2089_s30  ;;  %s543_s27 = scalar_lea.vmem %s2057_s3, %s2089_s30 }
  0x72   : > { %550 = sbr.rel (%p1181_p4) target bundleno = 124 (0x7c), region = 104 }
  0x77   : > { %v1627_v52 = vmov 0.0  }
  0x78   : > { %551 = vst [vmem:[#allocation2 + $0x10] sm:$0xff] %v1627_v52 }
  0x79   : > { %552 = vst [vmem:[#allocation2] sm:$0xff] %v1627_v52 }
  0x7a   : > { %553 = vst [vmem:[#allocation2 + $0x18] sm:$0xff] %v1627_v52 }
  0x7b   : > { %554 = vst [vmem:[#allocation2 + $0x8] sm:$0xff] %v1627_v52 }
  0x7c PF: > { %v1252_v53 = vld [vmem:[%s1885_s17 + $0x70] sm:$0xf]  ;;  %v1412_v54 = vld [vmem:[%s1885_s17 + $0x74] sm:$0xf0]  ;;  %v1244_v62 = vld [vmem:[%s1885_s17 + $0x60] sm:$0xf] }
  0x7d   : > { %v1316_v55 = vld [vmem:[%s1885_s17 + $0xf0] sm:$0xf]  ;;  %v1253_v56 = vor.u32 %v1412_v54, %v1252_v53  ;;  %v1428_v57 = vld [vmem:[%s1885_s17 + $0xf4] sm:$0xf0]  ;;  %v1410_v63 = vld [vmem:[%s1885_s17 + $0x64] sm:$0xf0] }
  0x7e   : > { %v1380_v58 = vld [vmem:[%s1885_s17 + $0x170] sm:$0xf]  ;;  %v1444_v59 = vld [vmem:[%s1885_s17 + $0x174] sm:$0xf0]  ;;  %v1317_v60 = vor.u32 %v1428_v57, %v1316_v55  ;;  %v1308_v0 = vld [vmem:[%s1885_s17 + $0xe0] sm:$0xf]  ;;  %v1245_v1 = vor.u32 %v1410_v63, %v1244_v62 }
  0x7f   : > { %v1381_v61 = vor.u32 %v1444_v59, %v1380_v58  ;;  %867 = vmatpush.bf16.msra.mxu0 %v1253_v56  ;;  %v1426_v2 = vld [vmem:[%s1885_s17 + $0xe4] sm:$0xf0]  ;;  %v1372_v3 = vld [vmem:[%s1885_s17 + $0x160] sm:$0xf]  ;;  %v1236_v7 = vld [vmem:[%s1885_s17 + $0x50] sm:$0xf] }
  0x80   : > { %v1442_v4 = vld [vmem:[%s1885_s17 + $0x164] sm:$0xf0]  ;;  %881 = vmatpush.bf16.msra.mxu1 %v1317_v60  ;;  %v1309_v5 = vor.u32 %v1426_v2, %v1308_v0  ;;  %v1408_v8 = vld [vmem:[%s1885_s17 + $0x54] sm:$0xf0]  ;;  %v1300_v9 = vld [vmem:[%s1885_s17 + $0xd0] sm:$0xf] }
  0x81   : > { %895 = vmatpush.bf16.msra.mxu2 %v1381_v61  ;;  %v1373_v6 = vor.u32 %v1442_v4, %v1372_v3  ;;  %v1424_v10 = vld [vmem:[%s1885_s17 + $0xd4] sm:$0xf0]  ;;  %v1364_v11 = vld [vmem:[%s1885_s17 + $0x150] sm:$0xf]  ;;  %v1237_v13 = vor.u32 %v1408_v8, %v1236_v7  ;;  %v1228_v14 = vld [vmem:[%s1885_s17 + $0x40] sm:$0xf] }
  0x82   : > { %v1440_v12 = vld [vmem:[%s1885_s17 + $0x154] sm:$0xf0]  ;;  %v1406_v15 = vld [vmem:[%s1885_s17 + $0x44] sm:$0xf0]  ;;  %v1301_v16 = vor.u32 %v1424_v10, %v1300_v9  ;;  %v1292_v18 = vld [vmem:[%s1885_s17 + $0xc0] sm:$0xf] }
  0x83   : > { %868 = vmatpush.bf16.msra.mxu0 %v1245_v1  ;;  %v1365_v17 = vor.u32 %v1440_v12, %v1364_v11  ;;  %v1411_v19 = vld [vmem:[%s1885_s17 + $0x74] sm:$0xf]  ;;  %v1254_v20 = vld [vmem:[%s1885_s17 + $0x78] sm:$0xf0]  ;;  %v1422_v21 = vld [vmem:[%s1885_s17 + $0xc4] sm:$0xf0]  ;;  %v1229_v26 = vor.u32 %v1406_v15, %v1228_v14 }
  0x84   : > { %882 = vmatpush.bf16.msra.mxu1 %v1309_v5  ;;  %v1356_v22 = vld [vmem:[%s1885_s17 + $0x140] sm:$0xf]  ;;  %v1438_v23 = vld [vmem:[%s1885_s17 + $0x144] sm:$0xf0]  ;;  %v1257_v24 = vor.u32 %v1411_v19, %v1254_v20  ;;  %v1409_v25 = vld [vmem:[%s1885_s17 + $0x64] sm:$0xf]  ;;  %v1293_v30 = vor.u32 %v1422_v21, %v1292_v18 }
  0x85   : > { %896 = vmatpush.bf16.msra.mxu2 %v1373_v6  ;;  %v1220_v27 = vld [vmem:[%s1885_s17 + $0x30] sm:$0xf]  ;;  %v1404_v28 = vld [vmem:[%s1885_s17 + $0x34] sm:$0xf0]  ;;  %v1246_v29 = vld [vmem:[%s1885_s17 + $0x68] sm:$0xf0]  ;;  %v1357_v31 = vor.u32 %v1438_v23, %v1356_v22 }
  0x86   : > { %909 = vmatpush.bf16.msra.mxu3 %v1257_v24  ;;  %v1284_v32 = vld [vmem:[%s1885_s17 + $0xb0] sm:$0xf]  ;;  %v1420_v33 = vld [vmem:[%s1885_s17 + $0xb4] sm:$0xf0]  ;;  %v1249_v35 = vor.u32 %v1409_v25, %v1246_v29  ;;  %v1407_v37 = vld [vmem:[%s1885_s17 + $0x54] sm:$0xf]  ;;  %v1221_v39 = vor.u32 %v1404_v28, %v1220_v27 }
  0x87   : > { %869 = vmatpush.bf16.msra.mxu0 %v1237_v13  ;;  %v1348_v34 = vld [vmem:[%s1885_s17 + $0x130] sm:$0xf]  ;;  %v1436_v36 = vld [vmem:[%s1885_s17 + $0x134] sm:$0xf0]  ;;  %v1238_v38 = vld [vmem:[%s1885_s17 + $0x58] sm:$0xf0]  ;;  %v1285_v43 = vor.u32 %v1420_v33, %v1284_v32 }
  0x88   : > { %883 = vmatpush.bf16.msra.mxu1 %v1301_v16  ;;  %v1212_v40 = vld [vmem:[%s1885_s17 + $0x20] sm:$0xf]  ;;  %v1402_v41 = vld [vmem:[%s1885_s17 + $0x24] sm:$0xf0]  ;;  %v1241_v42 = vor.u32 %v1407_v37, %v1238_v38  ;;  %v1349_v44 = vor.u32 %v1436_v36, %v1348_v34  ;;  %v1405_v46 = vld [vmem:[%s1885_s17 + $0x44] sm:$0xf] }
  0x89   : > { %897 = vmatpush.bf16.msra.mxu2 %v1365_v17  ;;  %v1276_v45 = vld [vmem:[%s1885_s17 + $0xa0] sm:$0xf]  ;;  %v1230_v47 = vld [vmem:[%s1885_s17 + $0x48] sm:$0xf0]  ;;  %v1418_v48 = vld [vmem:[%s1885_s17 + $0xa4] sm:$0xf0]  ;;  %v1213_v51 = vor.u32 %v1402_v41, %v1212_v40 }
  0x8a   : > { %910 = vmatpush.bf16.msra.mxu3 %v1249_v35  ;;  %v1340_v49 = vld [vmem:[%s1885_s17 + $0x120] sm:$0xf]  ;;  %v1434_v50 = vld [vmem:[%s1885_s17 + $0x124] sm:$0xf0]  ;;  %v1204_v52 = vld [vmem:[%s1885_s17 + $0x10] sm:$0xf]  ;;  %v1233_v54 = vor.u32 %v1405_v46, %v1230_v47  ;;  %v1277_v55 = vor.u32 %v1418_v48, %v1276_v45 }
  0x8b   : > { %870 = vmatpush.bf16.msra.mxu0 %v1229_v26  ;;  %v1400_v53 = vld [vmem:[%s1885_s17 + $0x14] sm:$0xf0]  ;;  %v1341_v56 = vor.u32 %v1434_v50, %v1340_v49  ;;  %v1268_v57 = vld [vmem:[%s1885_s17 + $0x90] sm:$0xf]  ;;  %v1403_v58 = vld [vmem:[%s1885_s17 + $0x34] sm:$0xf] }
  0x8c   : > { %884 = vmatpush.bf16.msra.mxu1 %v1293_v30  ;;  %v1222_v59 = vld [vmem:[%s1885_s17 + $0x38] sm:$0xf0]  ;;  %v1416_v60 = vld [vmem:[%s1885_s17 + $0x94] sm:$0xf0]  ;;  %v1332_v61 = vld [vmem:[%s1885_s17 + $0x110] sm:$0xf]  ;;  %v1205_v63 = vor.u32 %v1400_v53, %v1204_v52 }
  0x8d   : > { %898 = vmatpush.bf16.msra.mxu2 %v1357_v31  ;;  %v1432_v62 = vld [vmem:[%s1885_s17 + $0x114] sm:$0xf0]  ;;  %v1196_v0 = vld [vmem:[%s1885_s17] sm:$0xf]  ;;  %v1398_v1 = vld [vmem:[%s1885_s17 + $0x4] sm:$0xf0]  ;;  %v1225_v3 = vor.u32 %v1403_v58, %v1222_v59  ;;  %v1269_v4 = vor.u32 %v1416_v60, %v1268_v57 }
  0x8e   : > { %911 = vmatpush.bf16.msra.mxu3 %v1241_v42  ;;  %v1260_v2 = vld [vmem:[%s1885_s17 + $0x80] sm:$0xf]  ;;  %v1333_v5 = vor.u32 %v1432_v62, %v1332_v61  ;;  %v1414_v6 = vld [vmem:[%s1885_s17 + $0x84] sm:$0xf0]  ;;  %v1401_v7 = vld [vmem:[%s1885_s17 + $0x24] sm:$0xf]  ;;  %v1197_v15 = vor.u32 %v1398_v1, %v1196_v0 }
  0x8f   : > { %871 = vmatpush.bf16.msra.mxu0 %v1221_v39  ;;  %v1214_v8 = vld [vmem:[%s1885_s17 + $0x28] sm:$0xf0]  ;;  %v1324_v9 = vld [vmem:[%s1885_s17 + $0x100] sm:$0xf]  ;;  %v1430_v10 = vld [vmem:[%s1885_s17 + $0x104] sm:$0xf0]  ;;  %v1261_v20 = vor.u32 %v1414_v6, %v1260_v2 }
  0x90   : > { %885 = vmatpush.bf16.msra.mxu1 %v1285_v43  ;;  %v1427_v11 = vld [vmem:[%s1885_s17 + $0xf4] sm:$0xf]  ;;  %v1318_v12 = vld [vmem:[%s1885_s17 + $0xf8] sm:$0xf0]  ;;  %v1192_v16 = vld [vmem:[%s1883_s19 + $0x8] sm:$0xf]  ;;  %v1217_v17 = vor.u32 %v1401_v7, %v1214_v8  ;;  %v1325_v21 = vor.u32 %v1430_v10, %v1324_v9 }
  0x91   : > { %899 = vmatpush.bf16.msra.mxu2 %v1349_v44  ;;  %v1443_v13 = vld [vmem:[%s1885_s17 + $0x174] sm:$0xf]  ;;  %v1382_v14 = vld [vmem:[%s1885_s17 + $0x178] sm:$0xf0]  ;;  %v1184_v18 = vld [vmem:[%s1883_s19] sm:$0xf]  ;;  %v1321_v25 = vor.u32 %v1427_v11, %v1318_v12 }
  0x92   : > { %912 = vmatpush.bf16.msra.mxu3 %v1233_v54  ;;  %v1395_v19 = vld [vmem:[%s1883_s19 + $0x8] sm:$0xf0]  ;;  %v1396_v22 = vld [vmem:[%s1883_s19 + $0x10] sm:$0xf0]  ;;  %v1394_v23 = vld [vmem:[%s1883_s19 + $0x4] sm:$0xf]  ;;  %v1385_v26 = vor.u32 %v1443_v13, %v1382_v14 }
  0x93   : > { %872 = vmatpush.bf16.msra.mxu0 %v1213_v51  ;;  %v1186_v24 = vld [vmem:[%s1883_s19 + $0xc] sm:$0xf0]  ;;  %v1425_v27 = vld [vmem:[%s1885_s17 + $0xe4] sm:$0xf]  ;;  %v1399_v28 = vld [vmem:[%s1885_s17 + $0x14] sm:$0xf]  ;;  %v1185_v33 = vor.u32 %v1395_v19, %v1184_v18  ;;  %v1966_v34 = vor.u32 %v1396_v22, %v1192_v16 }
  0x94   : > { %886 = vmatpush.bf16.msra.mxu1 %v1277_v55  ;;  %v1206_v29 = vld [vmem:[%s1885_s17 + $0x18] sm:$0xf0]  ;;  %v1310_v30 = vld [vmem:[%s1885_s17 + $0xe8] sm:$0xf0]  ;;  %v1441_v31 = vld [vmem:[%s1885_s17 + $0x164] sm:$0xf]  ;;  %v1968_v35 = vor.u32 %v1394_v23, %v1186_v24 }
  0x95   : > { %900 = vmatpush.bf16.msra.mxu2 %v1341_v56  ;;  %v1374_v32 = vld [vmem:[%s1885_s17 + $0x168] sm:$0xf0]  ;;  %v1209_v36 = vor.u32 %v1399_v28, %v1206_v29  ;;  %v1313_v37 = vor.u32 %v1425_v27, %v1310_v30  ;;  %v1423_v39 = vld [vmem:[%s1885_s17 + $0xd4] sm:$0xf]  ;;  %v1397_v40 = vld [vmem:[%s1885_s17 + $0x4] sm:$0xf] }
  0x96   : > { %913 = vmatpush.bf16.msra.mxu3 %v1225_v3  ;;  %v1377_v38 = vor.u32 %v1441_v31, %v1374_v32  ;;  %v1198_v41 = vld [vmem:[%s1885_s17 + $0x8] sm:$0xf0]  ;;  %v1302_v42 = vld [vmem:[%s1885_s17 + $0xd8] sm:$0xf0]  ;;  %v1439_v43 = vld [vmem:[%s1885_s17 + $0x154] sm:$0xf] }
  0x97   : > { %873 = vmatpush.bf16.msra.mxu0 %v1205_v63  ;;  %v1366_v44 = vld [vmem:[%s1885_s17 + $0x158] sm:$0xf0]  ;;  %v1201_v45 = vor.u32 %v1397_v40, %v1198_v41  ;;  %v1305_v46 = vor.u32 %v1423_v39, %v1302_v42  ;;  %v1421_v48 = vld [vmem:[%s1885_s17 + $0xc4] sm:$0xf]  ;;  %v1294_v49 = vld [vmem:[%s1885_s17 + $0xc8] sm:$0xf0] }
  0x98   : > { %887 = vmatpush.bf16.msra.mxu1 %v1269_v4  ;;  %v1369_v47 = vor.u32 %v1439_v43, %v1366_v44  ;;  %v1437_v50 = vld [vmem:[%s1885_s17 + $0x144] sm:$0xf]  ;;  %v1358_v51 = vld [vmem:[%s1885_s17 + $0x148] sm:$0xf0]  ;;  %v1297_v52 = vor.u32 %v1421_v48, %v1294_v49  ;;  %v1419_v54 = vld [vmem:[%s1885_s17 + $0xb4] sm:$0xf] }
  0x99   : > { %901 = vmatpush.bf16.msra.mxu2 %v1333_v5  ;;  %v1361_v53 = vor.u32 %v1437_v50, %v1358_v51  ;;  %v1286_v55 = vld [vmem:[%s1885_s17 + $0xb8] sm:$0xf0]  ;;  %v1435_v56 = vld [vmem:[%s1885_s17 + $0x134] sm:$0xf]  ;;  %v1417_v60 = vld [vmem:[%s1885_s17 + $0xa4] sm:$0xf] }
  0x9a   : > { %914 = vmatpush.bf16.msra.mxu3 %v1217_v17  ;;  %v1350_v57 = vld [vmem:[%s1885_s17 + $0x138] sm:$0xf0]  ;;  %v1289_v58 = vor.u32 %v1419_v54, %v1286_v55  ;;  %v1278_v61 = vld [vmem:[%s1885_s17 + $0xa8] sm:$0xf0]  ;;  %v1433_v62 = vld [vmem:[%s1885_s17 + $0x124] sm:$0xf] }
  0x9b   : > { %874 = vmatpush.bf16.msra.mxu0 %v1197_v15  ;;  %v1353_v59 = vor.u32 %v1435_v56, %v1350_v57  ;;  %v1342_v63 = vld [vmem:[%s1885_s17 + $0x128] sm:$0xf0]  ;;  %v1281_v0 = vor.u32 %v1417_v60, %v1278_v61  ;;  %v1415_v2 = vld [vmem:[%s1885_s17 + $0x94] sm:$0xf]  ;;  %v1270_v3 = vld [vmem:[%s1885_s17 + $0x98] sm:$0xf0] }
  0x9c   : > { %888 = vmatpush.bf16.msra.mxu1 %v1261_v20  ;;  %v1345_v1 = vor.u32 %v1433_v62, %v1342_v63  ;;  %v1431_v4 = vld [vmem:[%s1885_s17 + $0x114] sm:$0xf]  ;;  %v1334_v5 = vld [vmem:[%s1885_s17 + $0x118] sm:$0xf0]  ;;  %v1273_v6 = vor.u32 %v1415_v2, %v1270_v3  ;;  %v1413_v8 = vld [vmem:[%s1885_s17 + $0x84] sm:$0xf] }
  0x9d   : > { %902 = vmatpush.bf16.msra.mxu2 %v1325_v21  ;;  %v1337_v7 = vor.u32 %v1431_v4, %v1334_v5  ;;  %v1262_v9 = vld [vmem:[%s1885_s17 + $0x88] sm:$0xf0]  ;;  %v1429_v10 = vld [vmem:[%s1885_s17 + $0x104] sm:$0xf]  ;;  %v556_v32 = vld [vmem:[#allocation2] sm:$0xff]  ;;  %p1386_p5 = scmp.ne.s32.totalorder %s1609_s21, 5 }
  0x9e   : > { %875 = vmatmul.bf16.vlgmr.msra.gmra.mxu0 %v1185_v33  ;;  %915 = vmatpush.bf16.msra.mxu3 %v1209_v36  ;;  %v1326_v11 = vld [vmem:[%s1885_s17 + $0x108] sm:$0xf0]  ;;  %v1265_v12 = vor.u32 %v1413_v8, %v1262_v9  ;;  %v555_v17 = vld [vmem:[#allocation2 + $0x10] sm:$0xff] }
  0x9f   : > { %923 = vmatpush.bf16.msrb.mxu0 %v1321_v25  ;;  %889 = vmatmul.bf16.vlgmr.msra.gmra.mxu1 %v1968_v35  ;;  %v1329_v13 = vor.u32 %v1429_v10, %v1326_v11  ;;  %v557_v24 = vld [vmem:[#allocation2 + $0x18] sm:$0xff] }
  0xa0   : > { %937 = vmatpush.bf16.msrb.mxu1 %v1385_v26  ;;  %903 = vmatmul.bf16.vlgmr.msra.gmra.mxu2 %v1966_v34 }
  0xa2   : > { %916 = vmatpush.bf16.msra.mxu3 %v1201_v45 }
  0xa3   : > { %924 = vmatpush.bf16.msrb.mxu0 %v1313_v37 }
  0xa4   : > { %938 = vmatpush.bf16.msrb.mxu1 %v1377_v38  ;;  %v558_v38 = vld [vmem:[#allocation2 + $0x8] sm:$0xff] }
  0xa5   : > { %917 = vmatmul.bf16.vlgmr.msra.gmra.mxu3 %v1185_v33 }
  0xa7   : > { %925 = vmatpush.bf16.msrb.mxu0 %v1305_v46 }
  0xa8   : > { %939 = vmatpush.bf16.msrb.mxu1 %v1369_v47 }
  0xab   : > { %926 = vmatpush.bf16.msrb.mxu0 %v1297_v52 }
  0xac   : > { %940 = vmatpush.bf16.msrb.mxu1 %v1361_v53 }
  0xaf   : > { %927 = vmatpush.bf16.msrb.mxu0 %v1289_v58 }
  0xb0   : > { %941 = vmatpush.bf16.msrb.mxu1 %v1353_v59 }
  0xb3   : > { %928 = vmatpush.bf16.msrb.mxu0 %v1281_v0 }
  0xb4   : > { %942 = vmatpush.bf16.msrb.mxu1 %v1345_v1 }
  0xb7   : > { %929 = vmatpush.bf16.msrb.mxu0 %v1273_v6 }
  0xb8   : > { %943 = vmatpush.bf16.msrb.mxu1 %v1337_v7 }
  0xbb   : > { %930 = vmatpush.bf16.msrb.mxu0 %v1265_v12 }
  0xbc   : > { %944 = vmatpush.bf16.msrb.mxu1 %v1329_v13 }
  0xbe   : > { %931 = vmatmul.bf16.vlgmr.msrb.gmra.mxu0 %v1968_v35 }
  0xbf   : > { %945 = vmatmul.bf16.vlgmr.msrb.gmra.mxu1 %v1966_v34 }
 0x11b   : > { %v876_v14 = vpop.f32.mrf.mxu0 }
 0x11c   : > { %v890_v15 = vpop.f32.mrf.mxu1 }
 0x11d   : > { %v891_v16 = vadd.f32 %v890_v15, %v876_v14 }
 0x123   : > { %v904_v18 = vpop.f32.mrf.mxu2  ;;  %v878_v20 = vpop.f32.mrf.mxu0 }
 0x124   : > { %v905_v19 = vadd.f32 %v904_v18, %v891_v16  ;;  %v892_v21 = vpop.f32.mrf.mxu1 }
 0x125   : > { %v893_v23 = vadd.f32 %v892_v21, %v878_v20 }
 0x126   : > { %v951_v22 = vadd.f32 %v905_v19, %v555_v17 }
 0x128   : > { %955 = vst [vmem:[#allocation2 + $0x10] sm:$0xff] %v951_v22  ;;  %v918_v28 = vpop.f32.mrf.mxu3 }
 0x12b   : > { %v906_v25 = vpop.f32.mrf.mxu2 }
 0x12c   : > { %v907_v26 = vadd.f32 %v906_v25, %v893_v23 }
 0x12e   : > { %v953_v27 = vadd.f32 %v907_v26, %v557_v24 }
 0x130   : > { %957 = vst [vmem:[#allocation2 + $0x18] sm:$0xff] %v953_v27  ;;  %v920_v35 = vpop.f32.mrf.mxu3 }
 0x13b   : > { %v932_v29 = vpop.f32.mrf.mxu0 }
 0x13c   : > { %v946_v30 = vpop.f32.mrf.mxu1  ;;  %v933_v31 = vadd.f32 %v932_v29, %v918_v28 }
 0x13e   : > { %v947_v33 = vadd.f32 %v946_v30, %v933_v31 }
 0x140   : > { %v952_v34 = vadd.f32 %v947_v33, %v556_v32 }
 0x142   : > { %956 = vst [vmem:[#allocation2] sm:$0xff] %v952_v34 }
 0x143   : > { %v934_v36 = vpop.f32.mrf.mxu0 }
 0x144   : > { %v935_v37 = vadd.f32 %v934_v36, %v920_v35  ;;  %v948_v39 = vpop.f32.mrf.mxu1 }
 0x146   : > { %v949_v40 = vadd.f32 %v948_v39, %v935_v37  ;;  %962 = sbr.rel (%p1386_p5) target bundleno = 347 (0x15b), region = 108 }
 0x148   : > { %v954_v41 = vadd.f32 %v949_v40, %v558_v38 }
 0x14a   : > { %958 = vst [vmem:[#allocation2 + $0x8] sm:$0xff] %v954_v41 }
 0x14b   : > { %v963_v42 = vld [vmem:[#allocation2 + $0x10] sm:$0xff]  ;;  %v964_v43 = vld [vmem:[#allocation2] sm:$0xff]  ;;  %v965_v48 = vld [vmem:[#allocation2 + $0x18] sm:$0xff] }
 0x14c   : > { %v967_v44 = vld [vmem:[%s538_s11] sm:$0x3] }
 0x14d   : > { %v969_v45 = vperm.slane %v967_v44, 0  ;;  %v970_v46 = vperm.slane %v967_v44, 1  ;;  %v977_v47 = vld [vmem:[%s543_s27] sm:$0x3] }
 0x14e   : > { %v979_v50 = vperm.slane %v977_v47, 0  ;;  %v980_v51 = vperm.slane %v977_v47, 1 }
 0x14f   : > { %v973_v52 = vmul.f32 %v969_v45, %v963_v42  ;;  %v974_v53 = vmul.f32 %v970_v46, %v964_v43  ;;  %v975_v54 = vmul.f32 %v969_v45, %v965_v48 }
 0x151   : > { %v966_v49 = vld [vmem:[#allocation2 + $0x8] sm:$0xff]  ;;  %v983_v56 = vadd.f32 %v979_v50, %v973_v52  ;;  %v984_v57 = vadd.f32 %v980_v51, %v974_v53  ;;  %v985_v58 = vadd.f32 %v979_v50, %v975_v54 }
 0x152   : > { %v976_v55 = vmul.f32 %v970_v46, %v966_v49 }
 0x153   : > { %v987_v60 = vmax.f32 %v983_v56, 0.0  ;;  %v988_v61 = vmax.f32 %v984_v57, 0.0  ;;  %v989_v62 = vmax.f32 %v985_v58, 0.0 }
 0x154   : > { %v986_v59 = vadd.f32 %v980_v51, %v976_v55 }
 0x155   : > { %v991_v0 = vpack.c.bf16 %v988_v61, %v987_v60 }
 0x156   : > { %v990_v63 = vmax.f32 %v986_v59, 0.0 }
 0x157   : > { %993 = vst [vmem:[%s1887_s15] sm:$0xff] %v991_v0 }
 0x158   : > { %v992_v1 = vpack.c.bf16 %v990_v63, %v989_v62 }
 0x15a   : > { %994 = vst [vmem:[%s1887_s15 + $0x8] sm:$0xff] %v992_v1 }
 0x15b PF: > { %1001 = sbr.rel (!%p1747_p12) target bundleno = 355 (0x163), region = 112  ;;  %s1445_s21 = sshll.u32 (%p1747_p12), %s1613_s22, 3 }
 0x15c   : > { %s1007_s29 = scalar_lea.vmem (%p1747_p12), %s2058_s4, %s1445_s21 }
 0x15e   : > { %v1038_v2 = vld [vmem:[%s1887_s15] sm:$0xff] (%p1747_p12) }
 0x15f   : > { %1039 = vst [vmem:[%s1007_s29] sm:$0xff] (%p1747_p12), %v1038_v2 }
 0x161   : > { %v1040_v3 = vld [vmem:[%s1887_s15 + $0x8] sm:$0xff] }
 0x162   : > { %1041 = vst [vmem:[%s1007_s29 + $0x10] sm:$0xff] %v1040_v3 }
 0x163 PF: > { %s14_s25 = sadd.s32 1, %s1625_s25   ;;  %s2070_s14 = sld [smem:[#allocation6_spill]] }
 0x164   : > { %p11_p6 = scmp.ge.s32.totalorder %s14_s25, 14   ;;  %s2071_s6 = sld [smem:[#allocation7_spill]] }
 0x165   : > { %s2072_s15 = smov %s1589_s16  ;;  %s2073_s16 = smov %s1745_s13 }
 0x166   : > { %s2074_s17 = smov %s1597_s18  ;;  %s2075_s18 = smov %s1742_s12 }
 0x167   : > { %s2076_s19 = smov %s1605_s20  ;;  %s2077_s20 = smov %s1728_s7 }
 0x168   : > { %s2078_s21 = smov %s1617_s23  ;;  %s2079_s22 = smov %s1621_s24 }
 0x169   : > { %s2080_s23 = smov %s2070_s14  ;;  %13 = sbr.rel (!%p11_p6) target bundleno = 9 (0x9), region = 201 }
 0x16a   : > { %s2081_s24 = smov %s2071_s6 }

// kernel: adv_resnet_forward.22
= control target key start
LH: loop header
LB: loop body
LE: loop exit
PB: predicated region body
PF: predicated region fallthrough
CT: control target
= control target key end

     0   :  { %s1230_s15 = smov 0   ;;  %s1232_s16 = smov 0   ;;  %s1459_s0 = inlined_call_operand.vmem [shape: bf16[16,256], index: 0, kind: input, shape index: {}]   ;;  %s1460_s1 = inlined_call_operand.vmem [shape: bf16[256,512], index: 1, kind: input, shape index: {}]   ;;  %s1461_s2 = inlined_call_operand.vmem [shape: f32[1,512], index: 2, kind: input, shape index: {}]   ;;  %s1462_s3 = inlined_call_operand.vmem [shape: f32[1,512], index: 3, kind: input, shape index: {}]   ;;  %s1463_s4 = inlined_call_operand.vmem [shape: bf16[16,512], index: 4, kind: output, shape index: {}]  }
   0x1   :  { %s1234_s17 = smov 0   ;;  %s1236_s18 = smov 0  }
   0x2   :  { %s1238_s19 = smov 0  }
   0x3 LB: > { %s29_s20 = sadd.s32 1, %s1199_s18  ;;  %s935_s21 = sadd.s32 4294967295, %s1203_s19   ;;  %s1203_s19 = sphi %s1238_s19, %s14_s19   ;;  %s1199_s18 = sphi %s1236_s18, %s1468_s18   ;;  %s1195_s17 = sphi %s1234_s17, %s1467_s17   ;;  %s1191_s16 = sphi %s1232_s16, %s1466_s16   ;;  %s1187_s15 = sphi %s1230_s15, %s1465_s15  }
   0x4   : > { %p31_p0 = scmp.ge.s32.totalorder %s29_s20, 2  ;;  %p77_p1 = scmp.ne.s32.totalorder %s1191_s16, %s1187_s15 }
   0x5   : > { %p78_p2 = scmp.eq.s32.totalorder %s1203_s19, 0  ;;  %p161_p4 = scmp.eq.s32.totalorder %s935_s21, 1 }
   0x6   : > { %s1470_s20 = smov (%p31_p0, %s29_s20), 0  ;;  %s70_s23 = sadd.s32 1, %s1191_s16 }
   0x7   : > { %p79_p3 = por %p78_p2, %p77_p1  ;;  %s66_s22 = ssub.s32 %s1199_s18, %s1470_s20 }
   0x8   : > { %p68_p5 = scmp.eq.s32.totalorder %s66_s22, 0  ;;  %p1265_p6 = por %p161_p4, %p77_p1 }
   0x9   : > { %p939_p7 = scmp.ge.s32.totalorder %s1203_s19, 2 }
   0xa   : > { %s1270_s25 = scalar_select %p68_p5, %s1191_s16, %s70_s23  }
   0xb   : > { %198 = sbr.rel (%p939_p7) target bundleno = 52 (0x34), region = 20 }
  0x10   : > { %201 = sbr.rel (!%p79_p3) target bundleno = 52 (0x34), region = 24  ;;  %s203_s26 = sand.u32 (%p79_p3), 1, %s1191_s16  }
  0x11   : > { %s1089_s27 = sshll.u32 (%p79_p3), %s1199_s18, 3  ;;  %s940_s28 = sshll.u32 (%p79_p3), %s203_s26, 8 }
  0x12   : > { %s1278_s5 = scalar_lea.vmem (%p79_p3), %s1460_s1, %s1089_s27  ;;  %s1283_s6 = scalar_lea.vmem (%p79_p3), [#allocation3], %s940_s28 }
  0x13   : > { %v302_v0 = vld [vmem:[%s1278_s5] sm:$0xff] (%p79_p3)  ;;  %v304_v1 = vld [vmem:[%s1278_s5 + $0x10] sm:$0xff] (%p79_p3) }
  0x14   : > { %v306_v2 = vld [vmem:[%s1278_s5 + $0x20] sm:$0xff] (%p79_p3)  ;;  %303 = vst [vmem:[%s1283_s6] sm:$0xff] (%p79_p3), %v302_v0  ;;  %v308_v3 = vld [vmem:[%s1278_s5 + $0x30] sm:$0xff] (%p79_p3) }
  0x15   : > { %305 = vst [vmem:[%s1283_s6 + $0x8] sm:$0xff] %v304_v1  ;;  %v310_v4 = vld [vmem:[%s1278_s5 + $0x40] sm:$0xff]  ;;  %v312_v5 = vld [vmem:[%s1278_s5 + $0x50] sm:$0xff] }
  0x16   : > { %307 = vst [vmem:[%s1283_s6 + $0x10] sm:$0xff] %v306_v2  ;;  %v314_v6 = vld [vmem:[%s1278_s5 + $0x60] sm:$0xff]  ;;  %v316_v7 = vld [vmem:[%s1278_s5 + $0x70] sm:$0xff] }
  0x17   : > { %309 = vst [vmem:[%s1283_s6 + $0x18] sm:$0xff] %v308_v3  ;;  %v318_v8 = vld [vmem:[%s1278_s5 + $0x80] sm:$0xff]  ;;  %v320_v9 = vld [vmem:[%s1278_s5 + $0x90] sm:$0xff] }
  0x18   : > { %311 = vst [vmem:[%s1283_s6 + $0x20] sm:$0xff] %v310_v4  ;;  %v322_v10 = vld [vmem:[%s1278_s5 + $0xa0] sm:$0xff]  ;;  %v324_v11 = vld [vmem:[%s1278_s5 + $0xb0] sm:$0xff] }
  0x19   : > { %313 = vst [vmem:[%s1283_s6 + $0x28] sm:$0xff] %v312_v5  ;;  %v326_v12 = vld [vmem:[%s1278_s5 + $0xc0] sm:$0xff]  ;;  %v328_v13 = vld [vmem:[%s1278_s5 + $0xd0] sm:$0xff] }
  0x1a   : > { %315 = vst [vmem:[%s1283_s6 + $0x30] sm:$0xff] %v314_v6  ;;  %v330_v14 = vld [vmem:[%s1278_s5 + $0xe0] sm:$0xff]  ;;  %v332_v15 = vld [vmem:[%s1278_s5 + $0xf0] sm:$0xff] }
  0x1b   : > { %317 = vst [vmem:[%s1283_s6 + $0x38] sm:$0xff] %v316_v7  ;;  %v334_v16 = vld [vmem:[%s1278_s5 + $0x100] sm:$0xff]  ;;  %v336_v17 = vld [vmem:[%s1278_s5 + $0x110] sm:$0xff] }
  0x1c   : > { %319 = vst [vmem:[%s1283_s6 + $0x40] sm:$0xff] %v318_v8  ;;  %v338_v18 = vld [vmem:[%s1278_s5 + $0x120] sm:$0xff]  ;;  %v340_v19 = vld [vmem:[%s1278_s5 + $0x130] sm:$0xff] }
  0x1d   : > { %321 = vst [vmem:[%s1283_s6 + $0x48] sm:$0xff] %v320_v9  ;;  %v342_v20 = vld [vmem:[%s1278_s5 + $0x140] sm:$0xff]  ;;  %v344_v21 = vld [vmem:[%s1278_s5 + $0x150] sm:$0xff] }
  0x1e   : > { %323 = vst [vmem:[%s1283_s6 + $0x50] sm:$0xff] %v322_v10  ;;  %v346_v22 = vld [vmem:[%s1278_s5 + $0x160] sm:$0xff]  ;;  %v348_v23 = vld [vmem:[%s1278_s5 + $0x170] sm:$0xff] }
  0x1f   : > { %325 = vst [vmem:[%s1283_s6 + $0x58] sm:$0xff] %v324_v11  ;;  %v350_v24 = vld [vmem:[%s1278_s5 + $0x180] sm:$0xff]  ;;  %v352_v25 = vld [vmem:[%s1278_s5 + $0x190] sm:$0xff] }
  0x20   : > { %327 = vst [vmem:[%s1283_s6 + $0x60] sm:$0xff] %v326_v12  ;;  %v354_v26 = vld [vmem:[%s1278_s5 + $0x1a0] sm:$0xff]  ;;  %v356_v27 = vld [vmem:[%s1278_s5 + $0x1b0] sm:$0xff] }
  0x21   : > { %329 = vst [vmem:[%s1283_s6 + $0x68] sm:$0xff] %v328_v13  ;;  %v358_v28 = vld [vmem:[%s1278_s5 + $0x1c0] sm:$0xff]  ;;  %v360_v29 = vld [vmem:[%s1278_s5 + $0x1d0] sm:$0xff] }
  0x22   : > { %331 = vst [vmem:[%s1283_s6 + $0x70] sm:$0xff] %v330_v14  ;;  %v362_v30 = vld [vmem:[%s1278_s5 + $0x1e0] sm:$0xff]  ;;  %v364_v31 = vld [vmem:[%s1278_s5 + $0x1f0] sm:$0xff] }
  0x23   : > { %333 = vst [vmem:[%s1283_s6 + $0x78] sm:$0xff] %v332_v15 }
  0x24   : > { %335 = vst [vmem:[%s1283_s6 + $0x80] sm:$0xff] %v334_v16 }
  0x25   : > { %337 = vst [vmem:[%s1283_s6 + $0x88] sm:$0xff] %v336_v17 }
  0x26   : > { %339 = vst [vmem:[%s1283_s6 + $0x90] sm:$0xff] %v338_v18 }
  0x27   : > { %341 = vst [vmem:[%s1283_s6 + $0x98] sm:$0xff] %v340_v19 }
  0x28   : > { %343 = vst [vmem:[%s1283_s6 + $0xa0] sm:$0xff] %v342_v20 }
  0x29   : > { %345 = vst [vmem:[%s1283_s6 + $0xa8] sm:$0xff] %v344_v21 }
  0x2a   : > { %347 = vst [vmem:[%s1283_s6 + $0xb0] sm:$0xff] %v346_v22 }
  0x2b   : > { %349 = vst [vmem:[%s1283_s6 + $0xb8] sm:$0xff] %v348_v23 }
  0x2c   : > { %351 = vst [vmem:[%s1283_s6 + $0xc0] sm:$0xff] %v350_v24 }
  0x2d   : > { %353 = vst [vmem:[%s1283_s6 + $0xc8] sm:$0xff] %v352_v25 }
  0x2e   : > { %355 = vst [vmem:[%s1283_s6 + $0xd0] sm:$0xff] %v354_v26 }
  0x2f   : > { %357 = vst [vmem:[%s1283_s6 + $0xd8] sm:$0xff] %v356_v27 }
  0x30   : > { %359 = vst [vmem:[%s1283_s6 + $0xe0] sm:$0xff] %v358_v28 }
  0x31   : > { %361 = vst [vmem:[%s1283_s6 + $0xe8] sm:$0xff] %v360_v29 }
  0x32   : > { %363 = vst [vmem:[%s1283_s6 + $0xf0] sm:$0xff] %v362_v30 }
  0x33   : > { %365 = vst [vmem:[%s1283_s6 + $0xf8] sm:$0xff] %v364_v31 }
  0x34 PF: > { %p943_p8 = scmp.ge.s32.totalorder %s1203_s19, 1  ;;  %p386_p9 = scmp.lt.s32.totalorder %s1203_s19, 3 }
  0x36   : > { %p387_p10 = pnand %p943_p8, %p386_p9 }
  0x37   : > { %s393_s7 = sand.u32 (!%p387_p10), 1, %s1187_s15   ;;  %s946_s26 = sshll.u32 (!%p387_p10), %s1195_s17, 1 }
  0x38   : > { %390 = sbr.rel (%p387_p10) target bundleno = 254 (0xfe), region = 70  ;;  %s944_s8 = sshll.u32 (!%p387_p10), %s393_s7, 8 }
  0x39   : > { %s1351_s9 = scalar_lea.vmem (!%p387_p10), [#allocation3], %s944_s8  ;;  %p450_p11 = scmp.lt.s32.totalorder (!%p387_p10), %s946_s26, 3 }
  0x3a   : > { %s945_s8 = sshll.u32 (!%p387_p10), %s393_s7, 4 }
  0x3d   : > { %v1014_v32 = vld [vmem:[%s1351_s9 + $0x70] sm:$0xf]  ;;  %v1107_v33 = vld [vmem:[%s1351_s9 + $0x74] sm:$0xf0]  ;;  %v1106_v37 = vld [vmem:[%s1351_s9 + $0x74] sm:$0xf] }
  0x3e   : > { %v1078_v34 = vld [vmem:[%s1351_s9 + $0xf0] sm:$0xf]  ;;  %v1015_v35 = vor.u32 %v1107_v33, %v1014_v32  ;;  %v1123_v36 = vld [vmem:[%s1351_s9 + $0xf4] sm:$0xf0]  ;;  %v1016_v38 = vld [vmem:[%s1351_s9 + $0x78] sm:$0xf0] }
  0x3f   : > { %v1079_v39 = vor.u32 %v1123_v36, %v1078_v34  ;;  %v1019_v40 = vor.u32 %v1106_v37, %v1016_v38  ;;  %v1122_v41 = vld [vmem:[%s1351_s9 + $0xf4] sm:$0xf]  ;;  %v1080_v42 = vld [vmem:[%s1351_s9 + $0xf8] sm:$0xf0]  ;;  %v1006_v43 = vld [vmem:[%s1351_s9 + $0x60] sm:$0xf] }
  0x40   : > { %677 = vmatpush.bf16.msra.mxu0 %v1015_v35  ;;  %v1083_v44 = vor.u32 %v1122_v41, %v1080_v42  ;;  %v1105_v45 = vld [vmem:[%s1351_s9 + $0x64] sm:$0xf0]  ;;  %v1070_v46 = vld [vmem:[%s1351_s9 + $0xe0] sm:$0xf]  ;;  %v1104_v50 = vld [vmem:[%s1351_s9 + $0x64] sm:$0xf] }
  0x41   : > { %v1121_v47 = vld [vmem:[%s1351_s9 + $0xe4] sm:$0xf0]  ;;  %691 = vmatpush.bf16.msra.mxu1 %v1079_v39  ;;  %705 = vmatpush.bf16.msra.mxu2 %v1019_v40  ;;  %v1007_v48 = vor.u32 %v1105_v45, %v1006_v43  ;;  %v1008_v51 = vld [vmem:[%s1351_s9 + $0x68] sm:$0xf0]  ;;  %v1120_v52 = vld [vmem:[%s1351_s9 + $0xe4] sm:$0xf] }
  0x42   : > { %v1071_v49 = vor.u32 %v1121_v47, %v1070_v46  ;;  %719 = vmatpush.bf16.msra.mxu3 %v1083_v44  ;;  %v1011_v53 = vor.u32 %v1104_v50, %v1008_v51  ;;  %v1072_v54 = vld [vmem:[%s1351_s9 + $0xe8] sm:$0xf0]  ;;  %v998_v55 = vld [vmem:[%s1351_s9 + $0x50] sm:$0xf]  ;;  %v1103_v56 = vld [vmem:[%s1351_s9 + $0x54] sm:$0xf0] }
  0x43   : > { %v1075_v57 = vor.u32 %v1120_v52, %v1072_v54  ;;  %v1062_v58 = vld [vmem:[%s1351_s9 + $0xd0] sm:$0xf]  ;;  %v1119_v59 = vld [vmem:[%s1351_s9 + $0xd4] sm:$0xf0]  ;;  %v1102_v60 = vld [vmem:[%s1351_s9 + $0x54] sm:$0xf]  ;;  %v999_v61 = vor.u32 %v1103_v56, %v998_v55 }
  0x44   : > { %678 = vmatpush.bf16.msra.mxu0 %v1007_v48  ;;  %v1000_v62 = vld [vmem:[%s1351_s9 + $0x58] sm:$0xf0]  ;;  %v1118_v63 = vld [vmem:[%s1351_s9 + $0xd4] sm:$0xf]  ;;  %v1063_v1 = vor.u32 %v1119_v59, %v1062_v58  ;;  %v990_v3 = vld [vmem:[%s1351_s9 + $0x40] sm:$0xf] }
  0x45   : > { %v1064_v0 = vld [vmem:[%s1351_s9 + $0xd8] sm:$0xf0]  ;;  %692 = vmatpush.bf16.msra.mxu1 %v1071_v49  ;;  %706 = vmatpush.bf16.msra.mxu2 %v1011_v53  ;;  %v1003_v2 = vor.u32 %v1102_v60, %v1000_v62  ;;  %v1101_v4 = vld [vmem:[%s1351_s9 + $0x44] sm:$0xf0]  ;;  %v1054_v5 = vld [vmem:[%s1351_s9 + $0xc0] sm:$0xf] }
  0x46   : > { %720 = vmatpush.bf16.msra.mxu3 %v1075_v57  ;;  %v1067_v6 = vor.u32 %v1118_v63, %v1064_v0  ;;  %v1117_v7 = vld [vmem:[%s1351_s9 + $0xc4] sm:$0xf0]  ;;  %v1100_v8 = vld [vmem:[%s1351_s9 + $0x44] sm:$0xf]  ;;  %v992_v9 = vld [vmem:[%s1351_s9 + $0x48] sm:$0xf0]  ;;  %v991_v12 = vor.u32 %v1101_v4, %v990_v3 }
  0x47   : > { %v1116_v10 = vld [vmem:[%s1351_s9 + $0xc4] sm:$0xf]  ;;  %v1056_v11 = vld [vmem:[%s1351_s9 + $0xc8] sm:$0xf0]  ;;  %v1055_v13 = vor.u32 %v1117_v7, %v1054_v5  ;;  %v995_v14 = vor.u32 %v1100_v8, %v992_v9  ;;  %v982_v15 = vld [vmem:[%s1351_s9 + $0x30] sm:$0xf] }
  0x48   : > { %679 = vmatpush.bf16.msra.mxu0 %v999_v61  ;;  %v1099_v16 = vld [vmem:[%s1351_s9 + $0x34] sm:$0xf0]  ;;  %v1046_v17 = vld [vmem:[%s1351_s9 + $0xb0] sm:$0xf]  ;;  %v1059_v18 = vor.u32 %v1116_v10, %v1056_v11  ;;  %v1098_v20 = vld [vmem:[%s1351_s9 + $0x34] sm:$0xf] }
  0x49   : > { %693 = vmatpush.bf16.msra.mxu1 %v1063_v1  ;;  %707 = vmatpush.bf16.msra.mxu2 %v1003_v2  ;;  %v1115_v19 = vld [vmem:[%s1351_s9 + $0xb4] sm:$0xf0]  ;;  %v984_v21 = vld [vmem:[%s1351_s9 + $0x38] sm:$0xf0]  ;;  %v1114_v22 = vld [vmem:[%s1351_s9 + $0xb4] sm:$0xf]  ;;  %v983_v24 = vor.u32 %v1099_v16, %v982_v15 }
  0x4a   : > { %721 = vmatpush.bf16.msra.mxu3 %v1067_v6  ;;  %v1048_v23 = vld [vmem:[%s1351_s9 + $0xb8] sm:$0xf0]  ;;  %v1047_v25 = vor.u32 %v1115_v19, %v1046_v17  ;;  %v987_v26 = vor.u32 %v1098_v20, %v984_v21  ;;  %v974_v27 = vld [vmem:[%s1351_s9 + $0x20] sm:$0xf]  ;;  %v1097_v28 = vld [vmem:[%s1351_s9 + $0x24] sm:$0xf0] }
  0x4b   : > { %v1038_v29 = vld [vmem:[%s1351_s9 + $0xa0] sm:$0xf]  ;;  %v1051_v30 = vor.u32 %v1114_v22, %v1048_v23  ;;  %v1113_v31 = vld [vmem:[%s1351_s9 + $0xa4] sm:$0xf0]  ;;  %v1096_v32 = vld [vmem:[%s1351_s9 + $0x24] sm:$0xf]  ;;  %v975_v36 = vor.u32 %v1097_v28, %v974_v27 }
  0x4c   : > { %680 = vmatpush.bf16.msra.mxu0 %v991_v12  ;;  %v976_v33 = vld [vmem:[%s1351_s9 + $0x28] sm:$0xf0]  ;;  %v1112_v34 = vld [vmem:[%s1351_s9 + $0xa4] sm:$0xf]  ;;  %v1039_v37 = vor.u32 %v1113_v31, %v1038_v29  ;;  %v966_v39 = vld [vmem:[%s1351_s9 + $0x10] sm:$0xf] }
  0x4d   : > { %694 = vmatpush.bf16.msra.mxu1 %v1055_v13  ;;  %708 = vmatpush.bf16.msra.mxu2 %v995_v14  ;;  %v1040_v35 = vld [vmem:[%s1351_s9 + $0xa8] sm:$0xf0]  ;;  %v979_v38 = vor.u32 %v1096_v32, %v976_v33  ;;  %v1095_v40 = vld [vmem:[%s1351_s9 + $0x14] sm:$0xf0]  ;;  %v1030_v41 = vld [vmem:[%s1351_s9 + $0x90] sm:$0xf] }
  0x4e   : > { %722 = vmatpush.bf16.msra.mxu3 %v1059_v18  ;;  %v1043_v42 = vor.u32 %v1112_v34, %v1040_v35  ;;  %v1111_v43 = vld [vmem:[%s1351_s9 + $0x94] sm:$0xf0]  ;;  %v1094_v44 = vld [vmem:[%s1351_s9 + $0x14] sm:$0xf]  ;;  %v968_v45 = vld [vmem:[%s1351_s9 + $0x18] sm:$0xf0]  ;;  %v967_v48 = vor.u32 %v1095_v40, %v966_v39 }
  0x4f   : > { %v1110_v46 = vld [vmem:[%s1351_s9 + $0x94] sm:$0xf]  ;;  %v1032_v47 = vld [vmem:[%s1351_s9 + $0x98] sm:$0xf0]  ;;  %v1031_v49 = vor.u32 %v1111_v43, %v1030_v41  ;;  %v971_v50 = vor.u32 %v1094_v44, %v968_v45  ;;  %v958_v51 = vld [vmem:[%s1351_s9] sm:$0xf] }
  0x50   : > { %681 = vmatpush.bf16.msra.mxu0 %v983_v24  ;;  %v1093_v52 = vld [vmem:[%s1351_s9 + $0x4] sm:$0xf0]  ;;  %v1022_v53 = vld [vmem:[%s1351_s9 + $0x80] sm:$0xf]  ;;  %v1035_v54 = vor.u32 %v1110_v46, %v1032_v47  ;;  %v1092_v56 = vld [vmem:[%s1351_s9 + $0x4] sm:$0xf] }
  0x51   : > { %695 = vmatpush.bf16.msra.mxu1 %v1047_v25  ;;  %709 = vmatpush.bf16.msra.mxu2 %v987_v26  ;;  %v1109_v55 = vld [vmem:[%s1351_s9 + $0x84] sm:$0xf0]  ;;  %v960_v57 = vld [vmem:[%s1351_s9 + $0x8] sm:$0xf0]  ;;  %v1108_v58 = vld [vmem:[%s1351_s9 + $0x84] sm:$0xf]  ;;  %v959_v60 = vor.u32 %v1093_v52, %v958_v51 }
  0x52   : > { %723 = vmatpush.bf16.msra.mxu3 %v1051_v30  ;;  %v1024_v59 = vld [vmem:[%s1351_s9 + $0x88] sm:$0xf0]  ;;  %v950_v61 = vld [vmem:[%s1459_s0] sm:$0xf]  ;;  %v1091_v62 = vld [vmem:[%s1459_s0 + $0x4] sm:$0xf0]  ;;  %v1023_v63 = vor.u32 %v1109_v55, %v1022_v53  ;;  %v963_v0 = vor.u32 %v1092_v56, %v960_v57 }
  0x53   : > { %v1090_v1 = vld [vmem:[%s1459_s0 + $0x4] sm:$0xf]  ;;  %v952_v2 = vld [vmem:[%s1459_s0 + $0x8] sm:$0xf0]  ;;  %v1027_v3 = vor.u32 %v1108_v58, %v1024_v59  ;;  %v951_v4 = vor.u32 %v1091_v62, %v950_v61  ;;  %s1472_s26 = smov (!%p450_p11, %s946_s26), 3  ;;  %s434_s9 = scalar_lea.vmem [#allocation4], %s945_s8 }
  0x54   : > { %682 = vmatpush.bf16.msra.mxu0 %v975_v36  ;;  %v955_v5 = vor.u32 %v1090_v1, %v952_v2  ;;  %s452_s29 = scalar_lea.vmem %s1461_s2, %s1472_s26  ;;  %s457_s6 = scalar_lea.vmem %s1462_s3, %s1472_s26 }
  0x55   : > { %696 = vmatpush.bf16.msra.mxu1 %v1039_v37  ;;  %710 = vmatpush.bf16.msra.mxu2 %v979_v38  ;;  %v748_v7 = vld [vmem:[%s452_s29] sm:$0x3]  ;;  %s1124_s15 = sshll.u32 (%p1265_p6), %s1195_s17, 3 }
  0x56   : > { %724 = vmatpush.bf16.msra.mxu3 %v1043_v42  ;;  %v750_v10 = vperm.slane %v748_v7, 0  ;;  %v758_v11 = vld [vmem:[%s457_s6] sm:$0x3]  ;;  %v751_v15 = vperm.slane %v748_v7, 1  ;;  %s784_s11 = scalar_lea.vmem (%p1265_p6), %s1463_s4, %s1124_s15 }
  0x57   : > { %v760_v13 = vperm.slane %v758_v11, 0  ;;  %v761_v18 = vperm.slane %v758_v11, 1 }
  0x58   : > { %683 = vmatpush.bf16.msra.mxu0 %v967_v48 }
  0x59   : > { %697 = vmatpush.bf16.msra.mxu1 %v1031_v49  ;;  %711 = vmatpush.bf16.msra.mxu2 %v971_v50 }
  0x5a   : > { %725 = vmatpush.bf16.msra.mxu3 %v1035_v54 }
  0x5c   : > { %684 = vmatpush.bf16.msra.mxu0 %v959_v60 }
  0x5d   : > { %698 = vmatpush.bf16.msra.mxu1 %v1023_v63  ;;  %712 = vmatpush.bf16.msra.mxu2 %v963_v0 }
  0x5e   : > { %726 = vmatpush.bf16.msra.mxu3 %v1027_v3 }
  0x5f   : > { %685 = vmatmul.bf16.vlgmr.msra.gmra.mxu0 %v951_v4 }
  0x60   : > { %699 = vmatmul.bf16.vlgmr.msra.gmra.mxu1 %v955_v5  ;;  %713 = vmatmul.bf16.vlgmr.msra.gmra.mxu2 %v951_v4 }
  0x61   : > { %727 = vmatmul.bf16.vlgmr.msra.gmra.mxu3 %v955_v5 }
  0xdc   : > { %v686_v6 = vpop.f32.mrf.mxu0 }
  0xdd   : > { %v700_v8 = vpop.f32.mrf.mxu1 }
  0xde   : > { %v701_v9 = vadd.f32 %v700_v8, %v686_v6 }
  0xe0   : > { %v754_v12 = vmul.f32 %v750_v10, %v701_v9 }
  0xe2   : > { %v764_v21 = vadd.f32 %v760_v13, %v754_v12 }
  0xe3   : > { %v714_v14 = vpop.f32.mrf.mxu2 }
  0xe4   : > { %v728_v16 = vpop.f32.mrf.mxu3  ;;  %v688_v19 = vpop.f32.mrf.mxu0 }
  0xe5   : > { %v729_v17 = vadd.f32 %v728_v16, %v714_v14  ;;  %v702_v20 = vpop.f32.mrf.mxu1 }
  0xe6   : > { %v703_v24 = vadd.f32 %v702_v20, %v688_v19 }
  0xe7   : > { %v755_v22 = vmul.f32 %v751_v15, %v729_v17 }
  0xe8   : > { %v756_v28 = vmul.f32 %v750_v10, %v703_v24 }
  0xe9   : > { %v765_v23 = vadd.f32 %v761_v18, %v755_v22 }
  0xea   : > { %v766_v31 = vadd.f32 %v760_v13, %v756_v28 }
  0xeb   : > { %v768_v25 = vpack.c.bf16 %v765_v23, %v764_v21  ;;  %v716_v26 = vpop.f32.mrf.mxu2 }
  0xec   : > { %v730_v27 = vpop.f32.mrf.mxu3 }
  0xed   : > { %770 = vst [vmem:[%s434_s9] sm:$0xff] %v768_v25  ;;  %v731_v29 = vadd.f32 %v730_v27, %v716_v26 }
  0xef   : > { %v757_v30 = vmul.f32 %v751_v15, %v731_v29 }
  0xf1   : > { %v767_v32 = vadd.f32 %v761_v18, %v757_v30  ;;  %778 = sbr.rel (!%p1265_p6) target bundleno = 254 (0xfe), region = 86 }
  0xf3   : > { %v769_v33 = vpack.c.bf16 %v767_v32, %v766_v31 }
  0xf4   : > { %v815_v34 = vld [vmem:[%s434_s9] sm:$0xff] (%p1265_p6) }
  0xf5   : > { %771 = vst [vmem:[%s434_s9 + $0x8] sm:$0xff] %v769_v33 }
  0xf6   : > { %816 = vst [vmem:[%s784_s11] sm:$0xff] %v815_v34 }
  0xfc   : > { %v817_v35 = vld [vmem:[%s434_s9 + $0x8] sm:$0xff] }
  0xfd   : > { %818 = vst [vmem:[%s784_s11 + $0x10] sm:$0xff] %v817_v35 }
  0xfe PF: > { %s14_s19 = sadd.s32 1, %s1203_s19   ;;  %s1465_s15 = smov %s1191_s16 }
  0xff   : > { %p11_p12 = scmp.ge.s32.totalorder %s14_s19, 4   ;;  %s1466_s16 = smov %s1270_s25 }
 0x100   : > { %s1467_s17 = smov %s1199_s18  ;;  %s1468_s18 = smov %s1470_s20 }
 0x101   :  { %13 = sbr.rel (!%p11_p12) target bundleno = 3 (0x3), region = 164 }

// kernel: adv_resnet_forward.23
= control target key start
LH: loop header
LB: loop body
LE: loop exit
PB: predicated region body
PF: predicated region fallthrough
CT: control target
= control target key end

     0   :  { %s2549_s0 = inlined_call_operand.vmem [shape: bf16[16,4608], index: 0, kind: input, shape index: {}]   ;;  %s2550_s1 = inlined_call_operand.vmem [shape: bf16[4608,512], index: 1, kind: input, shape index: {}]   ;;  %s2551_s2 = inlined_call_operand.vmem [shape: f32[1,512], index: 2, kind: input, shape index: {}]   ;;  %s2552_s3 = inlined_call_operand.vmem [shape: f32[1,512], index: 3, kind: input, shape index: {}]   ;;  %s2553_s4 = inlined_call_operand.vmem [shape: bf16[16,512], index: 4, kind: input, shape index: {}]   ;;  %s2554_s5 = inlined_call_operand.vmem [shape: bf16[16,512], index: 5, kind: output, shape index: {}]  }
   0x1   :  { %2557 = sst [smem:[#allocation10_spill]] %s2549_s0 }
   0x2   :  { %s2049_s18 = smov 0   ;;  %s2051_s19 = smov 0  }
   0x3   :  { %s2053_s20 = smov 0   ;;  %s2055_s21 = smov 0  }
   0x4   :  { %s2057_s22 = smov 0   ;;  %s2059_s23 = smov 0  }
   0x5   :  { %s2061_s24 = smov 0   ;;  %s2063_s25 = smov 0  }
   0x6   :  { %s2065_s26 = smov 0   ;;  %s2067_s27 = smov 0  }
   0x7   :  { %s2069_s28 = smov 0  }
   0x8 LB: > { %s1468_s29 = sadd.s32 4294967295, %s2016_s28   ;;  %s27_s30 = sadd.s32 1, %s2008_s26  ;;  %s2016_s28 = sphi %s2069_s28, %s15_s28   ;;  %s2012_s27 = sphi %s2067_s27, %s2578_s27   ;;  %s2008_s26 = sphi %s2065_s26, %s2577_s26   ;;  %s2004_s25 = sphi %s2063_s25, %s2576_s25   ;;  %s2000_s24 = sphi %s2061_s24, %s2575_s24   ;;  %s1996_s23 = sphi %s2059_s23, %s2574_s23   ;;  %s1992_s22 = sphi %s2057_s22, %s2573_s22   ;;  %s1988_s21 = sphi %s2055_s21, %s2572_s21   ;;  %s1984_s20 = sphi %s2053_s20, %s2571_s20   ;;  %s1980_s19 = sphi %s2051_s19, %s2570_s19   ;;  %s1976_s18 = sphi %s2049_s18, %s2569_s18  }
   0x9   : > { %p28_p0 = scmp.ge.s32.totalorder %s27_s30, 9  ;;  %s30_s6 = sadd.s32 1, %s2012_s27 }
   0xa   : > { %s43_s7 = sadd.s32 1, %s1996_s23  ;;  %p50_p1 = scmp.ne.s32.totalorder %s1996_s23, %s1992_s22 }
   0xb   : > { %s2580_s30 = smov (%p28_p0, %s27_s30), 0  ;;  %s2582_s6 = smov (!%p28_p0, %s30_s6), %s2012_s27 }
   0xc   : > { %2558 = sst [smem:[#allocation7_spill]] %s2580_s30  ;;  %s39_s8 = ssub.s32 %s2008_s26, %s2580_s30 }
   0xd   : > { %p51_p2 = scmp.eq.s32.totalorder %s2016_s28, 0  ;;  %p32_p3 = scmp.ge.s32.totalorder %s2582_s6, 2 }
   0xe   : > { %p41_p4 = scmp.eq.s32.totalorder %s39_s8, 0  ;;  %s71_s10 = sadd.s32 1, %s1988_s21 }
   0xf   : > { %p2118_p5 = por %p51_p2, %p50_p1  ;;  %s2584_s6 = smov (%p32_p3, %s2582_s6), 0 }
  0x10   : > { %2560 = sst [smem:[#allocation8_spill]] %s2584_s6  ;;  %s67_s12 = ssub.s32 %s2012_s27, %s2584_s6 }
  0x11   : > { %s2126_s11 = scalar_select %p41_p4, %s1996_s23, %s43_s7  }
  0x12   : > { %p78_p6 = scmp.ne.s32.totalorder %s1988_s21, %s1984_s20  ;;  %s68_s13 = sor.u32 %s67_s12, %s39_s8 }
  0x13   : > { %2561 = sst [smem:[#allocation9_spill]] %s2126_s11  ;;  %p149_p7 = scmp.eq.s32.totalorder %s67_s12, 0 }
  0x14   : > { %p69_p8 = scmp.eq.s32.totalorder %s68_s13, 0  ;;  %p2134_p9 = por %p78_p6, %p51_p2 }
  0x15   : > { %s151_s15 = sadd.s32 1, %s1980_s19  ;;  %p158_p10 = scmp.ne.s32.totalorder %s1980_s19, %s1976_s18 }
  0x16   : > { %s2142_s16 = scalar_select %p69_p8, %s1988_s21, %s71_s10  }
  0x17   : > { %s2145_s17 = scalar_select %p149_p7, %s1980_s19, %s151_s15  }
  0x18   : > { %p2149_p11 = por %p158_p10, %p51_p2  ;;  %p190_p12 = scmp.eq.s32.totalorder %s1468_s29, 17 }
  0x19   : > { %p1471_p0 = scmp.ge.s32.totalorder %s2016_s28, 18 }
  0x1a   : > { %p2153_p13 = por %p190_p12, %p158_p10 }
  0x1b   : > { %212 = sbr.rel (%p1471_p0) target bundleno = 123 (0x7b), region = 16 }
  0x20   : > { %215 = sbr.rel (!%p2118_p5) target bundleno = 46 (0x2e), region = 20  ;;  %s217_s10 = sand.u32 (%p2118_p5), 1, %s1996_s23  }
  0x21   : > { %s1769_s12 = sshll.u32 (%p2118_p5), %s2008_s26, 4  ;;  %s1472_s13 = sshll.u32 (%p2118_p5), %s217_s10, 5 }
  0x22   : > { %s2565_s0 = sld [smem:[#allocation10_spill]] (%p2118_p5)  ;;  %s219_s29 = scalar_lea.vmem (%p2118_p5), [#allocation3], %s1472_s13 }
  0x28   : > { %s225_s30 = scalar_lea.vmem %s2565_s0, %s1769_s12 }
  0x29   : > { %v238_v0 = vld [vmem:[%s225_s30] sm:$0xff]  ;;  %v240_v1 = vld [vmem:[%s225_s30 + $0x8] sm:$0xff]  ;;  %v242_v2 = vld [vmem:[%s225_s30 + $0x90] sm:$0xff] }
  0x2a   : > { %239 = vst [vmem:[%s219_s29] sm:$0xff] %v238_v0  ;;  %v244_v3 = vld [vmem:[%s225_s30 + $0x98] sm:$0xff] }
  0x2b   : > { %241 = vst [vmem:[%s219_s29 + $0x8] sm:$0xff] %v240_v1 }
  0x2c   : > { %243 = vst [vmem:[%s219_s29 + $0x10] sm:$0xff] %v242_v2 }
  0x2d   : > { %245 = vst [vmem:[%s219_s29 + $0x18] sm:$0xff] %v244_v3 }
  0x2e PF: > { %251 = sbr.rel (!%p2134_p9) target bundleno = 117 (0x75), region = 43  ;;  %s253_s9 = sand.u32 (%p2134_p9), 1, %s1988_s21  }
  0x2f   : > { %s1477_s10 = sshll.u32 (%p2134_p9), %s2012_s27, 1  ;;  %s1475_s6 = sshll.u32 (%p2134_p9), %s253_s9, 9 }
  0x30   : > { %s1770_s12 = sshll.u32 (%p2134_p9), %s2008_s26, 8  ;;  %s2178_s14 = scalar_lea.vmem (%p2134_p9), [#allocation4], %s1475_s6 }
  0x31   : > { %s259_s15 = sadd.s32 (%p2134_p9), %s1770_s12, %s1477_s10 }
  0x32   : > { %s1479_s0 = sshll.u32 (%p2134_p9), %s259_s15, 2 }
  0x33   : > { %s2173_s30 = scalar_lea.vmem %s2550_s1, %s1479_s0 }
  0x34   : > { %v416_v4 = vld [vmem:[%s2173_s30] sm:$0xff]  ;;  %v418_v5 = vld [vmem:[%s2173_s30 + $0x10] sm:$0xff] }
  0x35   : > { %v420_v6 = vld [vmem:[%s2173_s30 + $0x20] sm:$0xff]  ;;  %417 = vst [vmem:[%s2178_s14] sm:$0xff] %v416_v4  ;;  %v422_v7 = vld [vmem:[%s2173_s30 + $0x30] sm:$0xff] }
  0x36   : > { %419 = vst [vmem:[%s2178_s14 + $0x8] sm:$0xff] %v418_v5  ;;  %v424_v8 = vld [vmem:[%s2173_s30 + $0x40] sm:$0xff]  ;;  %v426_v9 = vld [vmem:[%s2173_s30 + $0x50] sm:$0xff] }
  0x37   : > { %421 = vst [vmem:[%s2178_s14 + $0x10] sm:$0xff] %v420_v6  ;;  %v428_v10 = vld [vmem:[%s2173_s30 + $0x60] sm:$0xff]  ;;  %v430_v11 = vld [vmem:[%s2173_s30 + $0x70] sm:$0xff] }
  0x38   : > { %423 = vst [vmem:[%s2178_s14 + $0x18] sm:$0xff] %v422_v7  ;;  %v432_v12 = vld [vmem:[%s2173_s30 + $0x80] sm:$0xff]  ;;  %v434_v13 = vld [vmem:[%s2173_s30 + $0x90] sm:$0xff] }
  0x39   : > { %425 = vst [vmem:[%s2178_s14 + $0x20] sm:$0xff] %v424_v8  ;;  %v436_v14 = vld [vmem:[%s2173_s30 + $0xa0] sm:$0xff]  ;;  %v438_v15 = vld [vmem:[%s2173_s30 + $0xb0] sm:$0xff] }
  0x3a   : > { %427 = vst [vmem:[%s2178_s14 + $0x28] sm:$0xff] %v426_v9  ;;  %v440_v16 = vld [vmem:[%s2173_s30 + $0xc0] sm:$0xff]  ;;  %v442_v17 = vld [vmem:[%s2173_s30 + $0xd0] sm:$0xff] }
  0x3b   : > { %429 = vst [vmem:[%s2178_s14 + $0x30] sm:$0xff] %v428_v10  ;;  %v444_v18 = vld [vmem:[%s2173_s30 + $0xe0] sm:$0xff]  ;;  %v446_v19 = vld [vmem:[%s2173_s30 + $0xf0] sm:$0xff] }
  0x3c   : > { %431 = vst [vmem:[%s2178_s14 + $0x38] sm:$0xff] %v430_v11  ;;  %v448_v20 = vld [vmem:[%s2173_s30 + $0x100] sm:$0xff]  ;;  %v450_v21 = vld [vmem:[%s2173_s30 + $0x110] sm:$0xff] }
  0x3d   : > { %433 = vst [vmem:[%s2178_s14 + $0x40] sm:$0xff] %v432_v12  ;;  %v452_v22 = vld [vmem:[%s2173_s30 + $0x120] sm:$0xff]  ;;  %v454_v23 = vld [vmem:[%s2173_s30 + $0x130] sm:$0xff] }
  0x3e   : > { %435 = vst [vmem:[%s2178_s14 + $0x48] sm:$0xff] %v434_v13  ;;  %v456_v24 = vld [vmem:[%s2173_s30 + $0x140] sm:$0xff]  ;;  %v458_v25 = vld [vmem:[%s2173_s30 + $0x150] sm:$0xff] }
  0x3f   : > { %437 = vst [vmem:[%s2178_s14 + $0x50] sm:$0xff] %v436_v14  ;;  %v460_v26 = vld [vmem:[%s2173_s30 + $0x160] sm:$0xff]  ;;  %v462_v27 = vld [vmem:[%s2173_s30 + $0x170] sm:$0xff] }
  0x40   : > { %439 = vst [vmem:[%s2178_s14 + $0x58] sm:$0xff] %v438_v15  ;;  %v464_v28 = vld [vmem:[%s2173_s30 + $0x180] sm:$0xff]  ;;  %v466_v29 = vld [vmem:[%s2173_s30 + $0x190] sm:$0xff] }
  0x41   : > { %441 = vst [vmem:[%s2178_s14 + $0x60] sm:$0xff] %v440_v16  ;;  %v468_v30 = vld [vmem:[%s2173_s30 + $0x1a0] sm:$0xff]  ;;  %v470_v31 = vld [vmem:[%s2173_s30 + $0x1b0] sm:$0xff] }
  0x42   : > { %443 = vst [vmem:[%s2178_s14 + $0x68] sm:$0xff] %v442_v17  ;;  %v472_v32 = vld [vmem:[%s2173_s30 + $0x1c0] sm:$0xff]  ;;  %v474_v33 = vld [vmem:[%s2173_s30 + $0x1d0] sm:$0xff] }
  0x43   : > { %445 = vst [vmem:[%s2178_s14 + $0x70] sm:$0xff] %v444_v18  ;;  %v476_v34 = vld [vmem:[%s2173_s30 + $0x1e0] sm:$0xff]  ;;  %v478_v35 = vld [vmem:[%s2173_s30 + $0x1f0] sm:$0xff] }
  0x44   : > { %447 = vst [vmem:[%s2178_s14 + $0x78] sm:$0xff] %v446_v19  ;;  %v480_v36 = vld [vmem:[%s2173_s30 + $0x200] sm:$0xff]  ;;  %v482_v37 = vld [vmem:[%s2173_s30 + $0x210] sm:$0xff] }
  0x45   : > { %449 = vst [vmem:[%s2178_s14 + $0x80] sm:$0xff] %v448_v20  ;;  %v484_v38 = vld [vmem:[%s2173_s30 + $0x220] sm:$0xff]  ;;  %v486_v39 = vld [vmem:[%s2173_s30 + $0x230] sm:$0xff] }
  0x46   : > { %451 = vst [vmem:[%s2178_s14 + $0x88] sm:$0xff] %v450_v21  ;;  %v488_v40 = vld [vmem:[%s2173_s30 + $0x240] sm:$0xff]  ;;  %v490_v41 = vld [vmem:[%s2173_s30 + $0x250] sm:$0xff] }
  0x47   : > { %453 = vst [vmem:[%s2178_s14 + $0x90] sm:$0xff] %v452_v22  ;;  %v492_v42 = vld [vmem:[%s2173_s30 + $0x260] sm:$0xff]  ;;  %v494_v43 = vld [vmem:[%s2173_s30 + $0x270] sm:$0xff] }
  0x48   : > { %455 = vst [vmem:[%s2178_s14 + $0x98] sm:$0xff] %v454_v23  ;;  %v496_v44 = vld [vmem:[%s2173_s30 + $0x280] sm:$0xff]  ;;  %v498_v45 = vld [vmem:[%s2173_s30 + $0x290] sm:$0xff] }
  0x49   : > { %457 = vst [vmem:[%s2178_s14 + $0xa0] sm:$0xff] %v456_v24  ;;  %v500_v46 = vld [vmem:[%s2173_s30 + $0x2a0] sm:$0xff]  ;;  %v502_v47 = vld [vmem:[%s2173_s30 + $0x2b0] sm:$0xff] }
  0x4a   : > { %459 = vst [vmem:[%s2178_s14 + $0xa8] sm:$0xff] %v458_v25  ;;  %v504_v48 = vld [vmem:[%s2173_s30 + $0x2c0] sm:$0xff]  ;;  %v506_v49 = vld [vmem:[%s2173_s30 + $0x2d0] sm:$0xff] }
  0x4b   : > { %461 = vst [vmem:[%s2178_s14 + $0xb0] sm:$0xff] %v460_v26  ;;  %v508_v50 = vld [vmem:[%s2173_s30 + $0x2e0] sm:$0xff]  ;;  %v510_v51 = vld [vmem:[%s2173_s30 + $0x2f0] sm:$0xff] }
  0x4c   : > { %463 = vst [vmem:[%s2178_s14 + $0xb8] sm:$0xff] %v462_v27  ;;  %v512_v52 = vld [vmem:[%s2173_s30 + $0x300] sm:$0xff]  ;;  %v514_v53 = vld [vmem:[%s2173_s30 + $0x310] sm:$0xff] }
  0x4d   : > { %465 = vst [vmem:[%s2178_s14 + $0xc0] sm:$0xff] %v464_v28  ;;  %v516_v54 = vld [vmem:[%s2173_s30 + $0x320] sm:$0xff]  ;;  %v518_v55 = vld [vmem:[%s2173_s30 + $0x330] sm:$0xff] }
  0x4e   : > { %467 = vst [vmem:[%s2178_s14 + $0xc8] sm:$0xff] %v466_v29  ;;  %v520_v56 = vld [vmem:[%s2173_s30 + $0x340] sm:$0xff]  ;;  %v522_v57 = vld [vmem:[%s2173_s30 + $0x350] sm:$0xff] }
  0x4f   : > { %469 = vst [vmem:[%s2178_s14 + $0xd0] sm:$0xff] %v468_v30  ;;  %v524_v58 = vld [vmem:[%s2173_s30 + $0x360] sm:$0xff]  ;;  %v526_v59 = vld [vmem:[%s2173_s30 + $0x370] sm:$0xff] }
  0x50   : > { %471 = vst [vmem:[%s2178_s14 + $0xd8] sm:$0xff] %v470_v31  ;;  %v528_v60 = vld [vmem:[%s2173_s30 + $0x380] sm:$0xff]  ;;  %v530_v61 = vld [vmem:[%s2173_s30 + $0x390] sm:$0xff] }
  0x51   : > { %473 = vst [vmem:[%s2178_s14 + $0xe0] sm:$0xff] %v472_v32  ;;  %v532_v62 = vld [vmem:[%s2173_s30 + $0x3a0] sm:$0xff]  ;;  %v534_v63 = vld [vmem:[%s2173_s30 + $0x3b0] sm:$0xff] }
  0x52   : > { %475 = vst [vmem:[%s2178_s14 + $0xe8] sm:$0xff] %v474_v33  ;;  %v536_v0 = vld [vmem:[%s2173_s30 + $0x3c0] sm:$0xff]  ;;  %v538_v1 = vld [vmem:[%s2173_s30 + $0x3d0] sm:$0xff] }
  0x53   : > { %477 = vst [vmem:[%s2178_s14 + $0xf0] sm:$0xff] %v476_v34  ;;  %v540_v2 = vld [vmem:[%s2173_s30 + $0x3e0] sm:$0xff]  ;;  %v542_v3 = vld [vmem:[%s2173_s30 + $0x3f0] sm:$0xff] }
  0x54   : > { %479 = vst [vmem:[%s2178_s14 + $0xf8] sm:$0xff] %v478_v35 }
  0x55   : > { %481 = vst [vmem:[%s2178_s14 + $0x100] sm:$0xff] %v480_v36 }
  0x56   : > { %483 = vst [vmem:[%s2178_s14 + $0x108] sm:$0xff] %v482_v37 }
  0x57   : > { %485 = vst [vmem:[%s2178_s14 + $0x110] sm:$0xff] %v484_v38 }
  0x58   : > { %487 = vst [vmem:[%s2178_s14 + $0x118] sm:$0xff] %v486_v39 }
  0x59   : > { %489 = vst [vmem:[%s2178_s14 + $0x120] sm:$0xff] %v488_v40 }
  0x5a   : > { %491 = vst [vmem:[%s2178_s14 + $0x128] sm:$0xff] %v490_v41 }
  0x5b   : > { %493 = vst [vmem:[%s2178_s14 + $0x130] sm:$0xff] %v492_v42 }
  0x5c   : > { %495 = vst [vmem:[%s2178_s14 + $0x138] sm:$0xff] %v494_v43 }
  0x5d   : > { %497 = vst [vmem:[%s2178_s14 + $0x140] sm:$0xff] %v496_v44 }
  0x5e   : > { %499 = vst [vmem:[%s2178_s14 + $0x148] sm:$0xff] %v498_v45 }
  0x5f   : > { %501 = vst [vmem:[%s2178_s14 + $0x150] sm:$0xff] %v500_v46 }
  0x60   : > { %503 = vst [vmem:[%s2178_s14 + $0x158] sm:$0xff] %v502_v47 }
  0x61   : > { %505 = vst [vmem:[%s2178_s14 + $0x160] sm:$0xff] %v504_v48 }
  0x62   : > { %507 = vst [vmem:[%s2178_s14 + $0x168] sm:$0xff] %v506_v49 }
  0x63   : > { %509 = vst [vmem:[%s2178_s14 + $0x170] sm:$0xff] %v508_v50 }
  0x64   : > { %511 = vst [vmem:[%s2178_s14 + $0x178] sm:$0xff] %v510_v51 }
  0x65   : > { %513 = vst [vmem:[%s2178_s14 + $0x180] sm:$0xff] %v512_v52 }
  0x66   : > { %515 = vst [vmem:[%s2178_s14 + $0x188] sm:$0xff] %v514_v53 }
  0x67   : > { %517 = vst [vmem:[%s2178_s14 + $0x190] sm:$0xff] %v516_v54 }
  0x68   : > { %519 = vst [vmem:[%s2178_s14 + $0x198] sm:$0xff] %v518_v55 }
  0x69   : > { %521 = vst [vmem:[%s2178_s14 + $0x1a0] sm:$0xff] %v520_v56 }
  0x6a   : > { %523 = vst [vmem:[%s2178_s14 + $0x1a8] sm:$0xff] %v522_v57 }
  0x6b   : > { %525 = vst [vmem:[%s2178_s14 + $0x1b0] sm:$0xff] %v524_v58 }
  0x6c   : > { %527 = vst [vmem:[%s2178_s14 + $0x1b8] sm:$0xff] %v526_v59 }
  0x6d   : > { %529 = vst [vmem:[%s2178_s14 + $0x1c0] sm:$0xff] %v528_v60 }
  0x6e   : > { %531 = vst [vmem:[%s2178_s14 + $0x1c8] sm:$0xff] %v530_v61 }
  0x6f   : > { %533 = vst [vmem:[%s2178_s14 + $0x1d0] sm:$0xff] %v532_v62 }
  0x70   : > { %535 = vst [vmem:[%s2178_s14 + $0x1d8] sm:$0xff] %v534_v63 }
  0x71   : > { %537 = vst [vmem:[%s2178_s14 + $0x1e0] sm:$0xff] %v536_v0 }
  0x72   : > { %539 = vst [vmem:[%s2178_s14 + $0x1e8] sm:$0xff] %v538_v1 }
  0x73   : > { %541 = vst [vmem:[%s2178_s14 + $0x1f0] sm:$0xff] %v540_v2 }
  0x74   : > { %543 = vst [vmem:[%s2178_s14 + $0x1f8] sm:$0xff] %v542_v3 }
  0x75 PF: > { %565 = sbr.rel (!%p2149_p11) target bundleno = 123 (0x7b), region = 89  ;;  %s567_s0 = sand.u32 (%p2149_p11), 1, %s1980_s19  }
  0x76   : > { %s1771_s11 = sshll.u32 (%p2149_p11), %s2012_s27, 3  ;;  %s1480_s29 = sshll.u32 (%p2149_p11), %s567_s0, 4 }
  0x77   : > { %s575_s6 = scalar_lea.vmem (%p2149_p11), %s2553_s4, %s1771_s11  ;;  %s569_s12 = scalar_lea.vmem (%p2149_p11), [#allocation5], %s1480_s29 }
  0x78   : > { %v606_v4 = vld [vmem:[%s575_s6] sm:$0xff] (%p2149_p11)  ;;  %v608_v5 = vld [vmem:[%s575_s6 + $0x10] sm:$0xff] (%p2149_p11) }
  0x79   : > { %607 = vst [vmem:[%s569_s12] sm:$0xff] (%p2149_p11), %v606_v4 }
  0x7a   : > { %609 = vst [vmem:[%s569_s12 + $0x8] sm:$0xff] %v608_v5 }
  0x7b PF: > { %p1483_p1 = scmp.ge.s32.totalorder %s2016_s28, 1  ;;  %p614_p2 = scmp.lt.s32.totalorder %s2016_s28, 19 }
  0x7d   : > { %p615_p3 = pnand %p1483_p1, %p614_p2 }
  0x7e   : > { %s621_s7 = sand.u32 (!%p615_p3), 1, %s1992_s22   ;;  %s628_s15 = sand.u32 (!%p615_p3), 1, %s1984_s20  }
  0x7f   : > { %618 = sbr.rel (%p615_p3) target bundleno = 387 (0x183), region = 127  ;;  %s1484_s13 = sshll.u32 (!%p615_p3), %s621_s7, 5 }
  0x80   : > { %s1485_s30 = sshll.u32 (!%p615_p3), %s628_s15, 9  ;;  %s635_s14 = sand.u32 (!%p615_p3), 1, %s1976_s18  }
  0x81   : > { %s1488_s0 = sshll.u32 (!%p615_p3), %s2004_s25, 1  ;;  %s2318_s11 = sshll.u32 (!%p615_p3), %s635_s14, 4 }
  0x82   : > { %p682_p4 = scmp.lt.s32.totalorder (!%p615_p3), %s1488_s0, 3  ;;  %s2330_s12 = scalar_lea.vmem (!%p615_p3), [#allocation3], %s1484_s13 }
  0x83   : > { %s2332_s18 = scalar_lea.vmem (!%p615_p3), [#allocation4], %s1485_s30  ;;  %s637_s7 = scalar_lea.vmem (!%p615_p3), [#allocation5], %s2318_s11 }
  0x84   : > { %s2586_s0 = smov (!%p682_p4, %s1488_s0), 3  ;;  %s2336_s15 = scalar_lea.vmem [#allocation6], %s2318_s11 }
  0x85   : > { %s684_s10 = scalar_lea.vmem %s2551_s2, %s2586_s0  ;;  %s689_s20 = scalar_lea.vmem %s2552_s3, %s2586_s0 }
  0x86   : > { %p1490_p5 = scmp.ne.s32.totalorder %s2000_s24, 0 }
  0x88   : > { %698 = sbr.rel (%p1490_p5) target bundleno = 146 (0x92), region = 143 }
  0x8d   : > { %v2018_v6 = vmov 0.0  }
  0x8e   : > { %699 = vst [vmem:[#allocation2 + $0x10] sm:$0xff] %v2018_v6 }
  0x8f   : > { %700 = vst [vmem:[#allocation2] sm:$0xff] %v2018_v6 }
  0x90   : > { %701 = vst [vmem:[#allocation2 + $0x18] sm:$0xff] %v2018_v6 }
  0x91   : > { %702 = vst [vmem:[#allocation2 + $0x8] sm:$0xff] %v2018_v6 }
  0x92 PF: > { %v1565_v7 = vld [vmem:[%s2332_s18 + $0x70] sm:$0xf]  ;;  %v1791_v8 = vld [vmem:[%s2332_s18 + $0x74] sm:$0xf0]  ;;  %v1557_v18 = vld [vmem:[%s2332_s18 + $0x60] sm:$0xf] }
  0x93   : > { %v1629_v9 = vld [vmem:[%s2332_s18 + $0xf0] sm:$0xf]  ;;  %v1566_v10 = vor.u32 %v1791_v8, %v1565_v7  ;;  %v1807_v11 = vld [vmem:[%s2332_s18 + $0xf4] sm:$0xf0]  ;;  %v1789_v20 = vld [vmem:[%s2332_s18 + $0x64] sm:$0xf0] }
  0x94   : > { %v1693_v12 = vld [vmem:[%s2332_s18 + $0x170] sm:$0xf]  ;;  %v1823_v13 = vld [vmem:[%s2332_s18 + $0x174] sm:$0xf0]  ;;  %v1630_v14 = vor.u32 %v1807_v11, %v1629_v9  ;;  %v1621_v21 = vld [vmem:[%s2332_s18 + $0xe0] sm:$0xf]  ;;  %v1558_v23 = vor.u32 %v1789_v20, %v1557_v18 }
  0x95   : > { %v1694_v15 = vor.u32 %v1823_v13, %v1693_v12  ;;  %v1757_v16 = vld [vmem:[%s2332_s18 + $0x1f0] sm:$0xf]  ;;  %v1839_v17 = vld [vmem:[%s2332_s18 + $0x1f4] sm:$0xf0]  ;;  %1115 = vmatpush.bf16.msra.mxu0 %v1566_v10  ;;  %v1805_v22 = vld [vmem:[%s2332_s18 + $0xe4] sm:$0xf0] }
  0x96   : > { %v1758_v19 = vor.u32 %v1839_v17, %v1757_v16  ;;  %1129 = vmatpush.bf16.msra.mxu1 %v1630_v14  ;;  %v1622_v24 = vor.u32 %v1805_v22, %v1621_v21  ;;  %v1685_v25 = vld [vmem:[%s2332_s18 + $0x160] sm:$0xf]  ;;  %v1821_v26 = vld [vmem:[%s2332_s18 + $0x164] sm:$0xf0]  ;;  %v1549_v30 = vld [vmem:[%s2332_s18 + $0x50] sm:$0xf] }
  0x97   : > { %1143 = vmatpush.bf16.msra.mxu2 %v1694_v15  ;;  %v1749_v27 = vld [vmem:[%s2332_s18 + $0x1e0] sm:$0xf]  ;;  %v1686_v28 = vor.u32 %v1821_v26, %v1685_v25  ;;  %v1837_v29 = vld [vmem:[%s2332_s18 + $0x1e4] sm:$0xf0]  ;;  %v1787_v31 = vld [vmem:[%s2332_s18 + $0x54] sm:$0xf0] }
  0x98   : > { %1157 = vmatpush.bf16.msra.mxu3 %v1758_v19  ;;  %v1750_v32 = vor.u32 %v1837_v29, %v1749_v27  ;;  %v1613_v33 = vld [vmem:[%s2332_s18 + $0xd0] sm:$0xf]  ;;  %v1803_v34 = vld [vmem:[%s2332_s18 + $0xd4] sm:$0xf0]  ;;  %v1550_v36 = vor.u32 %v1787_v31, %v1549_v30  ;;  %v1541_v42 = vld [vmem:[%s2332_s18 + $0x40] sm:$0xf] }
  0x99   : > { %v1677_v35 = vld [vmem:[%s2332_s18 + $0x150] sm:$0xf]  ;;  %1116 = vmatpush.bf16.msra.mxu0 %v1558_v23  ;;  %v1819_v37 = vld [vmem:[%s2332_s18 + $0x154] sm:$0xf0]  ;;  %v1614_v40 = vor.u32 %v1803_v34, %v1613_v33  ;;  %v1785_v43 = vld [vmem:[%s2332_s18 + $0x44] sm:$0xf0] }
  0x9a   : > { %v1741_v38 = vld [vmem:[%s2332_s18 + $0x1d0] sm:$0xf]  ;;  %v1835_v39 = vld [vmem:[%s2332_s18 + $0x1d4] sm:$0xf0]  ;;  %1130 = vmatpush.bf16.msra.mxu1 %v1622_v24  ;;  %v1678_v41 = vor.u32 %v1819_v37, %v1677_v35  ;;  %v1605_v44 = vld [vmem:[%s2332_s18 + $0xc0] sm:$0xf]  ;;  %v1542_v51 = vor.u32 %v1785_v43, %v1541_v42 }
  0x9b   : > { %1144 = vmatpush.bf16.msra.mxu2 %v1686_v28  ;;  %v1742_v45 = vor.u32 %v1835_v39, %v1741_v38  ;;  %v1801_v46 = vld [vmem:[%s2332_s18 + $0xc4] sm:$0xf0]  ;;  %v1669_v47 = vld [vmem:[%s2332_s18 + $0x140] sm:$0xf]  ;;  %v1533_v54 = vld [vmem:[%s2332_s18 + $0x30] sm:$0xf] }
  0x9c   : > { %1158 = vmatpush.bf16.msra.mxu3 %v1750_v32  ;;  %v1817_v48 = vld [vmem:[%s2332_s18 + $0x144] sm:$0xf0]  ;;  %v1733_v49 = vld [vmem:[%s2332_s18 + $0x1c0] sm:$0xf]  ;;  %v1606_v52 = vor.u32 %v1801_v46, %v1605_v44  ;;  %v1783_v55 = vld [vmem:[%s2332_s18 + $0x34] sm:$0xf0] }
  0x9d   : > { %v1833_v50 = vld [vmem:[%s2332_s18 + $0x1c4] sm:$0xf0]  ;;  %1117 = vmatpush.bf16.msra.mxu0 %v1550_v36  ;;  %v1670_v53 = vor.u32 %v1817_v48, %v1669_v47  ;;  %v1597_v56 = vld [vmem:[%s2332_s18 + $0xb0] sm:$0xf]  ;;  %v1799_v58 = vld [vmem:[%s2332_s18 + $0xb4] sm:$0xf0]  ;;  %v1534_v63 = vor.u32 %v1783_v55, %v1533_v54 }
  0x9e   : > { %1131 = vmatpush.bf16.msra.mxu1 %v1614_v40  ;;  %v1734_v57 = vor.u32 %v1833_v50, %v1733_v49  ;;  %v1661_v59 = vld [vmem:[%s2332_s18 + $0x130] sm:$0xf]  ;;  %v1815_v60 = vld [vmem:[%s2332_s18 + $0x134] sm:$0xf0]  ;;  %v1598_v0 = vor.u32 %v1799_v58, %v1597_v56  ;;  %v1525_v2 = vld [vmem:[%s2332_s18 + $0x20] sm:$0xf] }
  0x9f   : > { %1145 = vmatpush.bf16.msra.mxu2 %v1678_v41  ;;  %v1725_v61 = vld [vmem:[%s2332_s18 + $0x1b0] sm:$0xf]  ;;  %v1831_v62 = vld [vmem:[%s2332_s18 + $0x1b4] sm:$0xf0]  ;;  %v1662_v1 = vor.u32 %v1815_v60, %v1661_v59  ;;  %v1781_v3 = vld [vmem:[%s2332_s18 + $0x24] sm:$0xf0] }
  0xa0   : > { %1159 = vmatpush.bf16.msra.mxu3 %v1742_v45  ;;  %v1589_v4 = vld [vmem:[%s2332_s18 + $0xa0] sm:$0xf]  ;;  %v1726_v5 = vor.u32 %v1831_v62, %v1725_v61  ;;  %v1797_v6 = vld [vmem:[%s2332_s18 + $0xa4] sm:$0xf0]  ;;  %v1526_v11 = vor.u32 %v1781_v3, %v1525_v2  ;;  %v1517_v14 = vld [vmem:[%s2332_s18 + $0x10] sm:$0xf] }
  0xa1   : > { %1118 = vmatpush.bf16.msra.mxu0 %v1542_v51  ;;  %v1653_v7 = vld [vmem:[%s2332_s18 + $0x120] sm:$0xf]  ;;  %v1813_v8 = vld [vmem:[%s2332_s18 + $0x124] sm:$0xf0]  ;;  %v1590_v12 = vor.u32 %v1797_v6, %v1589_v4  ;;  %v1779_v15 = vld [vmem:[%s2332_s18 + $0x14] sm:$0xf0] }
  0xa2   : > { %1132 = vmatpush.bf16.msra.mxu1 %v1606_v52  ;;  %v1717_v9 = vld [vmem:[%s2332_s18 + $0x1a0] sm:$0xf]  ;;  %v1829_v10 = vld [vmem:[%s2332_s18 + $0x1a4] sm:$0xf0]  ;;  %v1654_v13 = vor.u32 %v1813_v8, %v1653_v7  ;;  %v1581_v16 = vld [vmem:[%s2332_s18 + $0x90] sm:$0xf]  ;;  %v1518_v24 = vor.u32 %v1779_v15, %v1517_v14 }
  0xa3   : > { %1146 = vmatpush.bf16.msra.mxu2 %v1670_v53  ;;  %v1718_v17 = vor.u32 %v1829_v10, %v1717_v9  ;;  %v1795_v18 = vld [vmem:[%s2332_s18 + $0x94] sm:$0xf0]  ;;  %v1645_v19 = vld [vmem:[%s2332_s18 + $0x110] sm:$0xf]  ;;  %v1509_v23 = vld [vmem:[%s2332_s18] sm:$0xf] }
  0xa4   : > { %1160 = vmatpush.bf16.msra.mxu3 %v1734_v57  ;;  %v1811_v20 = vld [vmem:[%s2332_s18 + $0x114] sm:$0xf0]  ;;  %v1709_v21 = vld [vmem:[%s2332_s18 + $0x190] sm:$0xf]  ;;  %v1777_v25 = vld [vmem:[%s2332_s18 + $0x4] sm:$0xf0]  ;;  %v1582_v28 = vor.u32 %v1795_v18, %v1581_v16 }
  0xa5   : > { %1119 = vmatpush.bf16.msra.mxu0 %v1534_v63  ;;  %v1827_v22 = vld [vmem:[%s2332_s18 + $0x194] sm:$0xf0]  ;;  %v1573_v26 = vld [vmem:[%s2332_s18 + $0x80] sm:$0xf]  ;;  %v1793_v27 = vld [vmem:[%s2332_s18 + $0x84] sm:$0xf0]  ;;  %v1646_v29 = vor.u32 %v1811_v20, %v1645_v19  ;;  %v1510_v40 = vor.u32 %v1777_v25, %v1509_v23 }
  0xa6   : > { %1133 = vmatpush.bf16.msra.mxu1 %v1598_v0  ;;  %v1637_v30 = vld [vmem:[%s2332_s18 + $0x100] sm:$0xf]  ;;  %v1809_v31 = vld [vmem:[%s2332_s18 + $0x104] sm:$0xf0]  ;;  %v1710_v33 = vor.u32 %v1827_v22, %v1709_v21  ;;  %v1790_v35 = vld [vmem:[%s2332_s18 + $0x74] sm:$0xf]  ;;  %v1574_v44 = vor.u32 %v1793_v27, %v1573_v26 }
  0xa7   : > { %1147 = vmatpush.bf16.msra.mxu2 %v1662_v1  ;;  %v1701_v32 = vld [vmem:[%s2332_s18 + $0x180] sm:$0xf]  ;;  %v1825_v34 = vld [vmem:[%s2332_s18 + $0x184] sm:$0xf0]  ;;  %v1567_v36 = vld [vmem:[%s2332_s18 + $0x78] sm:$0xf0]  ;;  %v1638_v45 = vor.u32 %v1809_v31, %v1637_v30 }
  0xa8   : > { %1161 = vmatpush.bf16.msra.mxu3 %v1726_v5  ;;  %v1806_v37 = vld [vmem:[%s2332_s18 + $0xf4] sm:$0xf]  ;;  %v1631_v38 = vld [vmem:[%s2332_s18 + $0xf8] sm:$0xf0]  ;;  %v1788_v46 = vld [vmem:[%s2332_s18 + $0x64] sm:$0xf]  ;;  %v1702_v50 = vor.u32 %v1825_v34, %v1701_v32  ;;  %v1570_v51 = vor.u32 %v1790_v35, %v1567_v36 }
  0xa9   : > { %1120 = vmatpush.bf16.msra.mxu0 %v1526_v11  ;;  %v1822_v39 = vld [vmem:[%s2332_s18 + $0x174] sm:$0xf]  ;;  %v1695_v41 = vld [vmem:[%s2332_s18 + $0x178] sm:$0xf0]  ;;  %v1559_v47 = vld [vmem:[%s2332_s18 + $0x68] sm:$0xf0]  ;;  %v1634_v56 = vor.u32 %v1806_v37, %v1631_v38 }
  0xaa   : > { %1134 = vmatpush.bf16.msra.mxu1 %v1590_v12  ;;  %v1838_v42 = vld [vmem:[%s2332_s18 + $0x1f4] sm:$0xf]  ;;  %v1759_v43 = vld [vmem:[%s2332_s18 + $0x1f8] sm:$0xf0]  ;;  %v1501_v48 = vld [vmem:[%s2330_s12 + $0x8] sm:$0xf]  ;;  %v1698_v57 = vor.u32 %v1822_v39, %v1695_v41  ;;  %v1562_v6 = vor.u32 %v1788_v46, %v1559_v47 }
  0xab   : > { %1148 = vmatpush.bf16.msra.mxu2 %v1654_v13  ;;  %v1775_v49 = vld [vmem:[%s2330_s12 + $0x14] sm:$0xf0]  ;;  %v1804_v52 = vld [vmem:[%s2332_s18 + $0xe4] sm:$0xf]  ;;  %v1623_v53 = vld [vmem:[%s2332_s18 + $0xe8] sm:$0xf0]  ;;  %v1762_v61 = vor.u32 %v1838_v42, %v1759_v43 }
  0xac   : > { %1162 = vmatpush.bf16.msra.mxu3 %v1718_v17  ;;  %v1820_v54 = vld [vmem:[%s2332_s18 + $0x164] sm:$0xf]  ;;  %v1687_v55 = vld [vmem:[%s2332_s18 + $0x168] sm:$0xf0]  ;;  %v1503_v59 = vld [vmem:[%s2330_s12 + $0x18] sm:$0xf0]  ;;  %v2422_v62 = vor.u32 %v1775_v49, %v1501_v48  ;;  %v1626_v8 = vor.u32 %v1804_v52, %v1623_v53 }
  0xad   : > { %1121 = vmatpush.bf16.msra.mxu0 %v1518_v24  ;;  %v1773_v58 = vld [vmem:[%s2330_s12 + $0xc] sm:$0xf]  ;;  %v1493_v60 = vld [vmem:[%s2330_s12] sm:$0xf]  ;;  %v1774_v63 = vld [vmem:[%s2330_s12 + $0xc] sm:$0xf0]  ;;  %v1690_v9 = vor.u32 %v1820_v54, %v1687_v55 }
  0xae   : > { %1135 = vmatpush.bf16.msra.mxu1 %v1582_v28  ;;  %v1772_v0 = vld [vmem:[%s2330_s12 + $0x4] sm:$0xf]  ;;  %v1495_v1 = vld [vmem:[%s2330_s12 + $0x10] sm:$0xf0]  ;;  %v1751_v3 = vld [vmem:[%s2332_s18 + $0x1e8] sm:$0xf0]  ;;  %v2429_v4 = vor.u32 %v1773_v58, %v1503_v59  ;;  %v2431_v5 = vor.u32 %v1774_v63, %v1493_v60 }
  0xaf   : > { %1149 = vmatpush.bf16.msra.mxu2 %v1646_v29  ;;  %v1836_v2 = vld [vmem:[%s2332_s18 + $0x1e4] sm:$0xf]  ;;  %v2433_v7 = vor.u32 %v1772_v0, %v1495_v1  ;;  %v1786_v10 = vld [vmem:[%s2332_s18 + $0x54] sm:$0xf]  ;;  %v1551_v11 = vld [vmem:[%s2332_s18 + $0x58] sm:$0xf0] }
  0xb0   : > { %1163 = vmatpush.bf16.msra.mxu3 %v1710_v33  ;;  %v1802_v12 = vld [vmem:[%s2332_s18 + $0xd4] sm:$0xf]  ;;  %v1754_v13 = vor.u32 %v1836_v2, %v1751_v3  ;;  %v1615_v14 = vld [vmem:[%s2332_s18 + $0xd8] sm:$0xf0]  ;;  %v1554_v19 = vor.u32 %v1786_v10, %v1551_v11  ;;  %v1784_v22 = vld [vmem:[%s2332_s18 + $0x44] sm:$0xf] }
  0xb1   : > { %1122 = vmatpush.bf16.msra.mxu0 %v1510_v40  ;;  %v1818_v15 = vld [vmem:[%s2332_s18 + $0x154] sm:$0xf]  ;;  %v1679_v16 = vld [vmem:[%s2332_s18 + $0x158] sm:$0xf0]  ;;  %v1618_v20 = vor.u32 %v1802_v12, %v1615_v14  ;;  %v1543_v23 = vld [vmem:[%s2332_s18 + $0x48] sm:$0xf0] }
  0xb2   : > { %1136 = vmatpush.bf16.msra.mxu1 %v1574_v44  ;;  %v1834_v17 = vld [vmem:[%s2332_s18 + $0x1d4] sm:$0xf]  ;;  %v1743_v18 = vld [vmem:[%s2332_s18 + $0x1d8] sm:$0xf0]  ;;  %v1682_v21 = vor.u32 %v1818_v15, %v1679_v16  ;;  %v1800_v24 = vld [vmem:[%s2332_s18 + $0xc4] sm:$0xf]  ;;  %v1546_v31 = vor.u32 %v1784_v22, %v1543_v23 }
  0xb3   : > { %1150 = vmatpush.bf16.msra.mxu2 %v1638_v45  ;;  %v1746_v25 = vor.u32 %v1834_v17, %v1743_v18  ;;  %v1607_v26 = vld [vmem:[%s2332_s18 + $0xc8] sm:$0xf0]  ;;  %v1816_v27 = vld [vmem:[%s2332_s18 + $0x144] sm:$0xf]  ;;  %v1782_v34 = vld [vmem:[%s2332_s18 + $0x34] sm:$0xf] }
  0xb4   : > { %1164 = vmatpush.bf16.msra.mxu3 %v1702_v50  ;;  %1123 = vmatmul.bf16.vlgmr.msra.gmra.mxu0 %v2431_v5  ;;  %v1671_v28 = vld [vmem:[%s2332_s18 + $0x148] sm:$0xf0]  ;;  %v1832_v29 = vld [vmem:[%s2332_s18 + $0x1c4] sm:$0xf]  ;;  %v1610_v32 = vor.u32 %v1800_v24, %v1607_v26  ;;  %v1535_v35 = vld [vmem:[%s2332_s18 + $0x38] sm:$0xf0] }
  0xb5   : > { %1171 = vmatpush.bf16.msrb.mxu0 %v1570_v51  ;;  %1137 = vmatmul.bf16.vlgmr.msra.gmra.mxu1 %v2433_v7  ;;  %v1735_v30 = vld [vmem:[%s2332_s18 + $0x1c8] sm:$0xf0]  ;;  %v1674_v33 = vor.u32 %v1816_v27, %v1671_v28  ;;  %v1798_v36 = vld [vmem:[%s2332_s18 + $0xb4] sm:$0xf]  ;;  %v1599_v38 = vld [vmem:[%s2332_s18 + $0xb8] sm:$0xf0]  ;;  %v1538_v43 = vor.u32 %v1782_v34, %v1535_v35 }
  0xb6   : > { %1185 = vmatpush.bf16.msrb.mxu1 %v1634_v56  ;;  %1151 = vmatmul.bf16.vlgmr.msra.gmra.mxu2 %v2422_v62  ;;  %v1738_v37 = vor.u32 %v1832_v29, %v1735_v30  ;;  %v1814_v39 = vld [vmem:[%s2332_s18 + $0x134] sm:$0xf]  ;;  %v1663_v40 = vld [vmem:[%s2332_s18 + $0x138] sm:$0xf0]  ;;  %v1602_v44 = vor.u32 %v1798_v36, %v1599_v38  ;;  %v1780_v46 = vld [vmem:[%s2332_s18 + $0x24] sm:$0xf] }
  0xb7   : > { %1199 = vmatpush.bf16.msrb.mxu2 %v1698_v57  ;;  %1165 = vmatmul.bf16.vlgmr.msra.gmra.mxu3 %v2429_v4  ;;  %v1830_v41 = vld [vmem:[%s2332_s18 + $0x1b4] sm:$0xf]  ;;  %v1727_v42 = vld [vmem:[%s2332_s18 + $0x1b8] sm:$0xf0]  ;;  %v1666_v45 = vor.u32 %v1814_v39, %v1663_v40  ;;  %v1527_v47 = vld [vmem:[%s2332_s18 + $0x28] sm:$0xf0] }
  0xb8   : > { %1213 = vmatpush.bf16.msrb.mxu3 %v1762_v61  ;;  %v1796_v48 = vld [vmem:[%s2332_s18 + $0xa4] sm:$0xf]  ;;  %v1730_v49 = vor.u32 %v1830_v41, %v1727_v42  ;;  %v1591_v50 = vld [vmem:[%s2332_s18 + $0xa8] sm:$0xf0]  ;;  %v1530_v55 = vor.u32 %v1780_v46, %v1527_v47  ;;  %v1778_v58 = vld [vmem:[%s2332_s18 + $0x14] sm:$0xf] }
  0xb9   : > { %1172 = vmatpush.bf16.msrb.mxu0 %v1562_v6  ;;  %v1812_v51 = vld [vmem:[%s2332_s18 + $0x124] sm:$0xf]  ;;  %v1655_v52 = vld [vmem:[%s2332_s18 + $0x128] sm:$0xf0]  ;;  %v1594_v56 = vor.u32 %v1796_v48, %v1591_v50  ;;  %v1519_v59 = vld [vmem:[%s2332_s18 + $0x18] sm:$0xf0] }
  0xba   : > { %1186 = vmatpush.bf16.msrb.mxu1 %v1626_v8  ;;  %v1828_v53 = vld [vmem:[%s2332_s18 + $0x1a4] sm:$0xf]  ;;  %v1719_v54 = vld [vmem:[%s2332_s18 + $0x1a8] sm:$0xf0]  ;;  %v1658_v57 = vor.u32 %v1812_v51, %v1655_v52  ;;  %v1794_v60 = vld [vmem:[%s2332_s18 + $0x94] sm:$0xf]  ;;  %v1522_v6 = vor.u32 %v1778_v58, %v1519_v59 }
  0xbb   : > { %1200 = vmatpush.bf16.msrb.mxu2 %v1690_v9  ;;  %v1722_v61 = vor.u32 %v1828_v53, %v1719_v54  ;;  %v1583_v63 = vld [vmem:[%s2332_s18 + $0x98] sm:$0xf0]  ;;  %v1810_v0 = vld [vmem:[%s2332_s18 + $0x114] sm:$0xf]  ;;  %v1776_v10 = vld [vmem:[%s2332_s18 + $0x4] sm:$0xf] }
  0xbc   : > { %1214 = vmatpush.bf16.msrb.mxu3 %v1754_v13  ;;  %v1647_v1 = vld [vmem:[%s2332_s18 + $0x118] sm:$0xf0]  ;;  %v1826_v2 = vld [vmem:[%s2332_s18 + $0x194] sm:$0xf]  ;;  %v1586_v8 = vor.u32 %v1794_v60, %v1583_v63  ;;  %v1511_v11 = vld [vmem:[%s2332_s18 + $0x8] sm:$0xf0] }
  0xbd   : > { %1173 = vmatpush.bf16.msrb.mxu0 %v1554_v19  ;;  %v1711_v3 = vld [vmem:[%s2332_s18 + $0x198] sm:$0xf0]  ;;  %v1650_v9 = vor.u32 %v1810_v0, %v1647_v1  ;;  %v1792_v12 = vld [vmem:[%s2332_s18 + $0x84] sm:$0xf]  ;;  %v1575_v14 = vld [vmem:[%s2332_s18 + $0x88] sm:$0xf0]  ;;  %v1514_v19 = vor.u32 %v1776_v10, %v1511_v11 }
  0xbe   : > { %1187 = vmatpush.bf16.msrb.mxu1 %v1618_v20  ;;  %v1714_v13 = vor.u32 %v1826_v2, %v1711_v3  ;;  %v1808_v15 = vld [vmem:[%s2332_s18 + $0x104] sm:$0xf]  ;;  %v1639_v16 = vld [vmem:[%s2332_s18 + $0x108] sm:$0xf0]  ;;  %v1578_v20 = vor.u32 %v1792_v12, %v1575_v14  ;;  %v703_v29 = vld [vmem:[#allocation2 + $0x10] sm:$0xff]  ;;  %p1763_p6 = scmp.ne.s32.totalorder %s2000_s24, 8 }
  0xbf   : > { %1201 = vmatpush.bf16.msrb.mxu2 %v1682_v21  ;;  %v1824_v17 = vld [vmem:[%s2332_s18 + $0x184] sm:$0xf]  ;;  %v1703_v18 = vld [vmem:[%s2332_s18 + $0x188] sm:$0xf0]  ;;  %v1642_v21 = vor.u32 %v1808_v15, %v1639_v16  ;;  %v705_v36 = vld [vmem:[#allocation2 + $0x18] sm:$0xff] }
  0xc0   : > { %1215 = vmatpush.bf16.msrb.mxu3 %v1746_v25  ;;  %v1706_v22 = vor.u32 %v1824_v17, %v1703_v18  ;;  %v706_v51 = vld [vmem:[#allocation2 + $0x8] sm:$0xff] }
  0xc1   : > { %1174 = vmatpush.bf16.msrb.mxu0 %v1546_v31 }
  0xc2   : > { %1188 = vmatpush.bf16.msrb.mxu1 %v1610_v32 }
  0xc3   : > { %1202 = vmatpush.bf16.msrb.mxu2 %v1674_v33 }
  0xc4   : > { %1216 = vmatpush.bf16.msrb.mxu3 %v1738_v37 }
  0xc5   : > { %1175 = vmatpush.bf16.msrb.mxu0 %v1538_v43  ;;  %v704_v43 = vld [vmem:[#allocation2] sm:$0xff] }
  0xc6   : > { %1189 = vmatpush.bf16.msrb.mxu1 %v1602_v44 }
  0xc7   : > { %1203 = vmatpush.bf16.msrb.mxu2 %v1666_v45 }
  0xc8   : > { %1217 = vmatpush.bf16.msrb.mxu3 %v1730_v49 }
  0xc9   : > { %1176 = vmatpush.bf16.msrb.mxu0 %v1530_v55 }
  0xca   : > { %1190 = vmatpush.bf16.msrb.mxu1 %v1594_v56 }
  0xcb   : > { %1204 = vmatpush.bf16.msrb.mxu2 %v1658_v57 }
  0xcc   : > { %1218 = vmatpush.bf16.msrb.mxu3 %v1722_v61 }
  0xcd   : > { %1177 = vmatpush.bf16.msrb.mxu0 %v1522_v6 }
  0xce   : > { %1191 = vmatpush.bf16.msrb.mxu1 %v1586_v8 }
  0xcf   : > { %1205 = vmatpush.bf16.msrb.mxu2 %v1650_v9 }
  0xd0   : > { %1219 = vmatpush.bf16.msrb.mxu3 %v1714_v13 }
  0xd1   : > { %1178 = vmatpush.bf16.msrb.mxu0 %v1514_v19 }
  0xd2   : > { %1192 = vmatpush.bf16.msrb.mxu1 %v1578_v20 }
  0xd3   : > { %1206 = vmatpush.bf16.msrb.mxu2 %v1642_v21 }
  0xd4   : > { %1220 = vmatpush.bf16.msrb.mxu3 %v1706_v22  ;;  %1179 = vmatmul.bf16.vlgmr.msrb.gmra.mxu0 %v2431_v5 }
  0xd5   : > { %1193 = vmatmul.bf16.vlgmr.msrb.gmra.mxu1 %v2433_v7 }
  0xd6   : > { %1207 = vmatmul.bf16.vlgmr.msrb.gmra.mxu2 %v2422_v62 }
  0xd7   : > { %1221 = vmatmul.bf16.vlgmr.msrb.gmra.mxu3 %v2429_v4 }
 0x131   : > { %v1124_v23 = vpop.f32.mrf.mxu0 }
 0x132   : > { %v1138_v24 = vpop.f32.mrf.mxu1 }
 0x133   : > { %v1139_v25 = vadd.f32 %v1138_v24, %v1124_v23 }
 0x139   : > { %v1152_v26 = vpop.f32.mrf.mxu2  ;;  %v1126_v31 = vpop.f32.mrf.mxu0 }
 0x13a   : > { %v1153_v27 = vadd.f32 %v1152_v26, %v1139_v25  ;;  %v1166_v28 = vpop.f32.mrf.mxu3  ;;  %v1140_v32 = vpop.f32.mrf.mxu1 }
 0x13b   : > { %v1141_v34 = vadd.f32 %v1140_v32, %v1126_v31 }
 0x13c   : > { %v1167_v30 = vadd.f32 %v1166_v28, %v1153_v27 }
 0x13e   : > { %v1227_v33 = vadd.f32 %v1167_v30, %v703_v29 }
 0x140   : > { %1231 = vst [vmem:[#allocation2 + $0x10] sm:$0xff] %v1227_v33 }
 0x141   : > { %v1154_v5 = vpop.f32.mrf.mxu2 }
 0x142   : > { %v1155_v35 = vadd.f32 %v1154_v5, %v1141_v34  ;;  %v1168_v7 = vpop.f32.mrf.mxu3 }
 0x144   : > { %v1169_v62 = vadd.f32 %v1168_v7, %v1155_v35 }
 0x146   : > { %v1229_v37 = vadd.f32 %v1169_v62, %v705_v36 }
 0x148   : > { %1233 = vst [vmem:[#allocation2 + $0x18] sm:$0xff] %v1229_v37 }
 0x151   : > { %v1180_v4 = vpop.f32.mrf.mxu0 }
 0x152   : > { %v1194_v38 = vpop.f32.mrf.mxu1 }
 0x153   : > { %v1195_v39 = vadd.f32 %v1194_v38, %v1180_v4 }
 0x159   : > { %v1208_v40 = vpop.f32.mrf.mxu2  ;;  %v1182_v45 = vpop.f32.mrf.mxu0 }
 0x15a   : > { %v1209_v41 = vadd.f32 %v1208_v40, %v1195_v39  ;;  %v1222_v42 = vpop.f32.mrf.mxu3  ;;  %v1196_v46 = vpop.f32.mrf.mxu1 }
 0x15b   : > { %v1197_v48 = vadd.f32 %v1196_v46, %v1182_v45 }
 0x15c   : > { %v1223_v44 = vadd.f32 %v1222_v42, %v1209_v41 }
 0x15e   : > { %v1228_v47 = vadd.f32 %v1223_v44, %v704_v43 }
 0x160   : > { %1232 = vst [vmem:[#allocation2] sm:$0xff] %v1228_v47 }
 0x161   : > { %v1210_v49 = vpop.f32.mrf.mxu2 }
 0x162   : > { %v1211_v50 = vadd.f32 %v1210_v49, %v1197_v48  ;;  %v1224_v52 = vpop.f32.mrf.mxu3 }
 0x164   : > { %v1225_v53 = vadd.f32 %v1224_v52, %v1211_v50  ;;  %1238 = sbr.rel (%p1763_p6) target bundleno = 379 (0x17b), region = 147 }
 0x166   : > { %v1230_v54 = vadd.f32 %v1225_v53, %v706_v51 }
 0x168   : > { %1234 = vst [vmem:[#allocation2 + $0x8] sm:$0xff] %v1230_v54 }
 0x169   : > { %v1239_v55 = vld [vmem:[#allocation2 + $0x10] sm:$0xff]  ;;  %v1240_v56 = vld [vmem:[#allocation2] sm:$0xff]  ;;  %v1241_v63 = vld [vmem:[#allocation2 + $0x18] sm:$0xff] }
 0x16a   : > { %v1243_v57 = vld [vmem:[%s684_s10] sm:$0x3]  ;;  %v1264_v8 = vld [vmem:[%s637_s7 + $0x8] sm:$0xff] }
 0x16b   : > { %v1245_v58 = vperm.slane %v1243_v57, 0  ;;  %v1246_v59 = vperm.slane %v1243_v57, 1  ;;  %v1253_v60 = vld [vmem:[%s689_s20] sm:$0x3]  ;;  %v1267_v13 = vunpack.c.l.bf16 %v1264_v8  ;;  %v1268_v14 = vunpack.c.h.bf16 %v1264_v8 }
 0x16c   : > { %v1263_v61 = vld [vmem:[%s637_s7] sm:$0xff]  ;;  %v1255_v0 = vperm.slane %v1253_v60, 0  ;;  %v1256_v1 = vperm.slane %v1253_v60, 1 }
 0x16d   : > { %v1265_v2 = vunpack.c.l.bf16 %v1263_v61  ;;  %v1266_v3 = vunpack.c.h.bf16 %v1263_v61  ;;  %v1249_v9 = vmul.f32 %v1245_v58, %v1239_v55  ;;  %v1250_v10 = vmul.f32 %v1246_v59, %v1240_v56 }
 0x16e   : > { %v1251_v11 = vmul.f32 %v1245_v58, %v1241_v63 }
 0x16f   : > { %v1242_v6 = vld [vmem:[#allocation2 + $0x8] sm:$0xff]  ;;  %v1259_v15 = vadd.f32 %v1255_v0, %v1249_v9  ;;  %v1260_v16 = vadd.f32 %v1256_v1, %v1250_v10 }
 0x170   : > { %v1252_v12 = vmul.f32 %v1246_v59, %v1242_v6  ;;  %v1261_v17 = vadd.f32 %v1255_v0, %v1251_v11 }
 0x171   : > { %v1269_v19 = vadd.f32 %v1265_v2, %v1259_v15  ;;  %v1270_v20 = vadd.f32 %v1266_v3, %v1260_v16 }
 0x172   : > { %v1262_v18 = vadd.f32 %v1256_v1, %v1252_v12  ;;  %v1271_v21 = vadd.f32 %v1267_v13, %v1261_v17 }
 0x173   : > { %v1273_v23 = vmax.f32 %v1269_v19, 0.0  ;;  %v1274_v24 = vmax.f32 %v1270_v20, 0.0 }
 0x174   : > { %v1272_v22 = vadd.f32 %v1268_v14, %v1262_v18  ;;  %v1275_v25 = vmax.f32 %v1271_v21, 0.0 }
 0x175   : > { %v1277_v27 = vpack.c.bf16 %v1274_v24, %v1273_v23 }
 0x176   : > { %v1276_v26 = vmax.f32 %v1272_v22, 0.0 }
 0x177   : > { %1279 = vst [vmem:[%s2336_s15] sm:$0xff] %v1277_v27 }
 0x178   : > { %v1278_v28 = vpack.c.bf16 %v1276_v26, %v1275_v25 }
 0x17a   : > { %1280 = vst [vmem:[%s2336_s15 + $0x8] sm:$0xff] %v1278_v28 }
 0x17b PF: > { %1287 = sbr.rel (!%p2153_p13) target bundleno = 387 (0x183), region = 151  ;;  %s1840_s24 = sshll.u32 (%p2153_p13), %s2004_s25, 3 }
 0x17c   : > { %s1293_s9 = scalar_lea.vmem (%p2153_p13), %s2554_s5, %s1840_s24 }
 0x17e   : > { %v1324_v29 = vld [vmem:[%s2336_s15] sm:$0xff] (%p2153_p13) }
 0x17f   : > { %1325 = vst [vmem:[%s1293_s9] sm:$0xff] (%p2153_p13), %v1324_v29 }
 0x181   : > { %v1326_v30 = vld [vmem:[%s2336_s15 + $0x8] sm:$0xff] }
 0x182   : > { %1327 = vst [vmem:[%s1293_s9 + $0x10] sm:$0xff] %v1326_v30 }
 0x183 PF: > { %s15_s28 = sadd.s32 1, %s2016_s28   ;;  %s2566_s8 = sld [smem:[#allocation9_spill]] }
 0x184   : > { %p12_p7 = scmp.ge.s32.totalorder %s15_s28, 20   ;;  %s2567_s10 = sld [smem:[#allocation7_spill]] }
 0x185   : > { %s2568_s6 = sld [smem:[#allocation8_spill]]  ;;  %s2569_s18 = smov %s1980_s19 }
 0x186   : > { %s2570_s19 = smov %s2145_s17  ;;  %s2571_s20 = smov %s1988_s21 }
 0x187   : > { %s2572_s21 = smov %s2142_s16  ;;  %s2573_s22 = smov %s1996_s23 }
 0x188   : > { %s2575_s24 = smov %s2008_s26  ;;  %s2576_s25 = smov %s2012_s27 }
 0x189   : > { %s2574_s23 = smov %s2566_s8  ;;  %14 = sbr.rel (!%p12_p7) target bundleno = 8 (0x8), region = 242 }
 0x18a   : > { %s2577_s26 = smov %s2567_s10 }
 0x18b   : > { %s2578_s27 = smov %s2568_s6 }

</bundles_post_ra>
